<compile_context>
chip_gen: v6e
topology: v6e:2x2x1
jax: 0.10.0
libtpu: 0.0.40
codegen_flags: <defaults>
</compile_context>

<pallas_src>
import math

import jax
import jax.numpy as jnp
from jax import lax
from jax.experimental import pallas as pl
from jax.experimental.pallas import tpu as pltpu

# ---------------- hyperparameters (small, consistent with make_model) ----------
D_MODEL = 32
D_FF = 64
N_HEAD = 4
D_K = D_MODEL // N_HEAD
N_LAYER = 2
SRC_VOCAB = 13
TRG_VOCAB = 11
MAX_LEN = 16
PAD_IDX = 0
EPS = 1e-6
NEG_INF = -1e9

N_ATTN = 3 * N_LAYER          # enc-self (N) + dec-self (N) + dec-cross (N)
N_FFN = 2 * N_LAYER
N_LN = 5 * N_LAYER + 2
VOCAB_PAD = ((max(SRC_VOCAB, TRG_VOCAB) + 7) // 8) * 8   # pad contraction dim to 8


# ============================ the single fused kernel ============================
# One grid step == one batch element (all math is 2-D inside the kernel).

def _transformer_kernel(src_col_ref, trg_col_ref, src_row_ref, trg_row_ref,
                        emb_ref, pe_ref,
                        qkv_w_ref, qkv_b_ref, o_w_ref, o_b_ref,
                        ff_w1_ref, ff_b1_ref, ff_w2_ref, ff_b2_ref,
                        ln_ref, out_ref):
    S = src_col_ref.shape[0]
    T = trg_col_ref.shape[0]
    vp = emb_ref.shape[1]

    # ---- building blocks: weights are loaded from VMEM refs at point of use ----
    def layer_norm(idx, x):
        ln = ln_ref[idx]                                   # (2, D): [gain; bias]
        mu = jnp.mean(x, axis=-1, keepdims=True)
        msq = jnp.mean(x * x, axis=-1, keepdims=True)      # independent reductions
        inv = lax.rsqrt(msq - mu * mu + EPS)
        return (x - mu) * inv * ln[0:1, :] + ln[1:2, :]

    def ffn(idx, x):
        h = jnp.dot(x, ff_w1_ref[idx],
                    preferred_element_type=jnp.float32) + ff_b1_ref[idx]
        h = jnp.maximum(h, 0.0)
        return jnp.dot(h, ff_w2_ref[idx],
                       preferred_element_type=jnp.float32) + ff_b2_ref[idx]

    def attention(att, x_q, x_kv, mask):
        # Per-head weights were pre-split at init: no runtime lane slicing, no
        # lane-axis concat.  1/sqrt(d_k) is folded into W_q.  Fully-masked rows
        # softmax to uniform attention (matches masked_fill(-1e9) semantics).
        tq = x_q.shape[0]
        acc = jnp.zeros((tq, D_MODEL), jnp.float32)
        for h in range(N_HEAD):                           # static unroll, H = 4
            qi = (att * 3 + 0) * N_HEAD + h
            ki = (att * 3 + 1) * N_HEAD + h
            vi = (att * 3 + 2) * N_HEAD + h
            q_h = jnp.dot(x_q, qkv_w_ref[qi],
                          preferred_element_type=jnp.float32) + qkv_b_ref[qi]
            k_h = jnp.dot(x_kv, qkv_w_ref[ki],
                          preferred_element_type=jnp.float32) + qkv_b_ref[ki]
            v_h = jnp.dot(x_kv, qkv_w_ref[vi],
                          preferred_element_type=jnp.float32) + qkv_b_ref[vi]
            s = jnp.einsum("qd,kd->qk", q_h, k_h,
                           preferred_element_type=jnp.float32)
            s = jnp.where(mask, s, NEG_INF)
            s = s - jnp.max(s, axis=-1, keepdims=True)
            p = jnp.exp(s)
            p = p * pl.reciprocal(jnp.sum(p, axis=-1, keepdims=True), approx=True)
            ctx = jnp.dot(p, v_h, preferred_element_type=jnp.float32)   # (tq, dk)
            acc = acc + jnp.dot(ctx, o_w_ref[att * N_HEAD + h],
                                preferred_element_type=jnp.float32)
        return acc + o_b_ref[att]

    # ---- masks built in-kernel (no host prep, no (B,T,T) HBM traffic) ----
    src_valid = src_row_ref[0] != PAD_IDX                  # (1, S) key validity
    trg_valid = trg_row_ref[0] != PAD_IDX                  # (1, T)
    enc_mask = jnp.broadcast_to(src_valid, (S, S))
    cross_mask = jnp.broadcast_to(src_valid, (T, S))
    rows = lax.broadcasted_iota(jnp.int32, (T, T), 0)
    cols = lax.broadcasted_iota(jnp.int32, (T, T), 1)
    dec_mask = jnp.logical_and(cols <= rows, jnp.broadcast_to(trg_valid, (T, T)))

    # ---- embeddings: one-hot matmul; sqrt(d_model) is folded into the table ----
    src_oh = (src_col_ref[...] ==
              lax.broadcasted_iota(jnp.int32, (S, vp), 1)).astype(jnp.float32)
    x = jnp.dot(src_oh, emb_ref[0],
                preferred_element_type=jnp.float32) + pe_ref[0:S, :]
    trg_oh = (trg_col_ref[...] ==
              lax.broadcasted_iota(jnp.int32, (T, vp), 1)).astype(jnp.float32)
    y = jnp.dot(trg_oh, emb_ref[1],
                preferred_element_type=jnp.float32) + pe_ref[0:T, :]

    # ---- encoder (pre-norm) ----
    for l in range(N_LAYER):
        xn = layer_norm(2 * l, x)
        x = x + attention(l, xn, xn, enc_mask)
        xn = layer_norm(2 * l + 1, x)
        x = x + ffn(l, xn)
    memory = layer_norm(2 * N_LAYER, x)

    # ---- decoder (pre-norm) ----
    ln_base = 2 * N_LAYER + 1
    for l in range(N_LAYER):
        yn = layer_norm(ln_base + 3 * l, y)
        y = y + attention(N_LAYER + 2 * l, yn, yn, dec_mask)
        yn = layer_norm(ln_base + 3 * l + 1, y)
        y = y + attention(N_LAYER + 2 * l + 1, yn, memory, cross_mask)
        yn = layer_norm(ln_base + 3 * l + 2, y)
        y = y + ffn(N_LAYER + l, yn)

    out_ref[0, :, :] = layer_norm(ln_base + 3 * N_LAYER, y)


# ================================ host-side wrapper ==============================

@jax.jit
def transformer_forward(params, src, trg):
    B, S = src.shape
    T = trg.shape[1]

    # Token ids in the two layouts the kernel needs (tiny int32 operands).
    src_col = src.reshape(B * S, 1).astype(jnp.int32)      # sublane layout (one-hot)
    trg_col = trg.reshape(B * T, 1).astype(jnp.int32)
    src_row = src.reshape(B, 1, S).astype(jnp.int32)       # lane layout (key masks)
    trg_row = trg.reshape(B, 1, T).astype(jnp.int32)

    def rep(a):                                            # weights: one block, reused
        nd = a.ndim
        return pl.BlockSpec(a.shape, lambda b, nd=nd: (0,) * nd)

    weight_names = ("emb", "pe", "attn_qkv_w", "attn_qkv_b", "attn_o_w", "attn_o_b",
                    "ffn_w1", "ffn_b1", "ffn_w2", "ffn_b2", "ln")
    weights = [params[k] for k in weight_names]

    in_specs = ([pl.BlockSpec((S, 1), lambda b: (b, 0)),
                 pl.BlockSpec((T, 1), lambda b: (b, 0)),
                 pl.BlockSpec((1, 1, S), lambda b: (b, 0, 0)),
                 pl.BlockSpec((1, 1, T), lambda b: (b, 0, 0))]
                + [rep(w) for w in weights])

    return pl.pallas_call(
        _transformer_kernel,
        grid=(B,),
        out_shape=jax.ShapeDtypeStruct((B, T, D_MODEL), jnp.float32),
        in_specs=in_specs,
        out_specs=pl.BlockSpec((1, T, D_MODEL), lambda b: (b, 0, 0)),
        compiler_params=pltpu.CompilerParams(
            dimension_semantics=("parallel",)),        # v7x: one TC per batch element
    )(src_col, trg_col, src_row, trg_row, *weights)


# ============================ deterministic parameters ==========================

def _xavier(key, shape):
    fan_in, fan_out = shape
    bound = math.sqrt(6.0 / (fan_in + fan_out))
    return jax.random.uniform(key, shape, jnp.float32, -bound, bound)


def make_pe(max_len, d_model):
    pos = jnp.arange(max_len, dtype=jnp.float32)[:, None]
    i = jnp.arange(0, d_model, 2, dtype=jnp.float32)
    div = jnp.exp(-math.log(10000.0) * i / d_model)
    pe = jnp.zeros((max_len, d_model), jnp.float32)
    pe = pe.at[:, 0::2].set(jnp.sin(pos * div))
    pe = pe.at[:, 1::2].set(jnp.cos(pos * div))
    return pe


def _padded_embedding(key, vocab, d_model):
    # sqrt(d_model) of Embedding.forward is folded into the table here.
    emb = _xavier(key, (vocab, d_model)) * math.sqrt(d_model)
    return jnp.zeros((VOCAB_PAD, d_model), jnp.float32).at[:vocab].set(emb)


def init_params(key):
    keys = iter(jax.random.split(key, 64))
    q_scale = 1.0 / math.sqrt(D_K)

    # Attention module order: [enc0, enc1, dec0_self, dec0_cross, dec1_self, dec1_cross]
    qkv_w, qkv_b, o_w, o_b = [], [], [], []
    for _ in range(N_ATTN):
        wq = _xavier(next(keys), (D_MODEL, D_MODEL)) * q_scale   # fold 1/sqrt(d_k)
        wk = _xavier(next(keys), (D_MODEL, D_MODEL))
        wv = _xavier(next(keys), (D_MODEL, D_MODEL))
        wo = _xavier(next(keys), (D_MODEL, D_MODEL))
        for w in (wq, wk, wv):                                   # pre-split per head
            for h in range(N_HEAD):
                qkv_w.append(w[:, h * D_K:(h + 1) * D_K])        # (D, d_k)
                qkv_b.append(jnp.zeros((1, D_K), jnp.float32))
        for h in range(N_HEAD):
            o_w.append(wo[h * D_K:(h + 1) * D_K, :])             # (d_k, D)
        o_b.append(jnp.zeros((1, D_MODEL), jnp.float32))

    # FFN module order: [enc0, enc1, dec0, dec1]
    ffn_w1 = [_xavier(next(keys), (D_MODEL, D_FF)) for _ in range(N_FFN)]
    ffn_w2 = [_xavier(next(keys), (D_FF, D_MODEL)) for _ in range(N_FFN)]

    ln_unit = jnp.stack([jnp.ones((D_MODEL,), jnp.float32),
                         jnp.zeros((D_MODEL,), jnp.float32)])

    return {
        "emb": jnp.stack([_padded_embedding(next(keys), SRC_VOCAB, D_MODEL),
                          _padded_embedding(next(keys), TRG_VOCAB, D_MODEL)]),
        "pe": make_pe(MAX_LEN, D_MODEL),
        "attn_qkv_w": jnp.stack(qkv_w),                  # (N_ATTN*3*H, D, d_k)
        "attn_qkv_b": jnp.stack(qkv_b),                  # (N_ATTN*3*H, 1, d_k)
        "attn_o_w": jnp.stack(o_w),                      # (N_ATTN*H, d_k, D)
        "attn_o_b": jnp.stack(o_b),                      # (N_ATTN, 1, D)
        "ffn_w1": jnp.stack(ffn_w1),                     # (N_FFN, D, D_FF)
        "ffn_b1": jnp.zeros((N_FFN, 1, D_FF), jnp.float32),
        "ffn_w2": jnp.stack(ffn_w2),                     # (N_FFN, D_FF, D)
        "ffn_b2": jnp.zeros((N_FFN, 1, D_MODEL), jnp.float32),
        "ln": jnp.tile(ln_unit[None], (N_LN, 1, 1)),     # (N_LN, 2, D)
    }


# ====================================== main ====================================

if __name__ == "__main__":
    key = jax.random.PRNGKey(0)
    pkey, skey, tkey = jax.random.split(key, 3)
    params = init_params(pkey)

    B, S, T = 2, 8, 8
    src = jax.random.randint(skey, (B, S), 1, SRC_VOCAB).astype(jnp.int32)
    trg = jax.random.randint(tkey, (B, T), 1, TRG_VOCAB).astype(jnp.int32)
    # introduce pad tokens to exercise the padding / causal masks
    src = src.at[0, -2:].set(PAD_IDX)
    trg = trg.at[1, -3:].set(PAD_IDX)

    out = transformer_forward(params, src, trg)
    out = jax.block_until_ready(out)
    assert out.shape == (B, T, D_MODEL) and out.dtype == jnp.float32
    assert bool(jnp.all(jnp.isfinite(out)))
    print("KERNEL_OK")
</pallas_src>

<mosaic_0001>
module attributes {stable_mosaic.version = 11 : i64} {
  func.func @_transformer_kernel(%arg0: i32, %arg1: memref<8x1xi32, #tpu.memory_space<vmem>>, %arg2: memref<8x1xi32, #tpu.memory_space<vmem>>, %arg3: memref<1x1x8xi32, #tpu.memory_space<vmem>>, %arg4: memref<1x1x8xi32, #tpu.memory_space<vmem>>, %arg5: memref<2x16x32xf32, #tpu.memory_space<vmem>>, %arg6: memref<16x32xf32, #tpu.memory_space<vmem>>, %arg7: memref<72x32x8xf32, #tpu.memory_space<vmem>>, %arg8: memref<72x1x8xf32, #tpu.memory_space<vmem>>, %arg9: memref<24x8x32xf32, #tpu.memory_space<vmem>>, %arg10: memref<6x1x32xf32, #tpu.memory_space<vmem>>, %arg11: memref<4x32x64xf32, #tpu.memory_space<vmem>>, %arg12: memref<4x1x64xf32, #tpu.memory_space<vmem>>, %arg13: memref<4x64x32xf32, #tpu.memory_space<vmem>>, %arg14: memref<4x1x32xf32, #tpu.memory_space<vmem>>, %arg15: memref<12x2x32xf32, #tpu.memory_space<vmem>>, %arg16: memref<1x8x32xf32, #tpu.memory_space<vmem>>) attributes {dimension_semantics = [#tpu.dimension_semantics<parallel>], iteration_bounds = array<i64: 2>, scalar_prefetch = 0 : i64, scratch_operands = 0 : i64, tpu.core_type = #tpu.core_type<tc>, window_params = [{transform_indices = @transform_0, window_bounds = array<i64: 8, 1>}, {transform_indices = @transform_1, window_bounds = array<i64: 8, 1>}, {transform_indices = @transform_2, window_bounds = array<i64: 1, 1, 8>}, {transform_indices = @transform_3, window_bounds = array<i64: 1, 1, 8>}, {pipeline_mode = #tpu.pipeline_mode<synchronous>, transform_indices = @transform_4, window_bounds = array<i64: 2, 16, 32>}, {pipeline_mode = #tpu.pipeline_mode<synchronous>, transform_indices = @transform_5, window_bounds = array<i64: 16, 32>}, {pipeline_mode = #tpu.pipeline_mode<synchronous>, transform_indices = @transform_6, window_bounds = array<i64: 72, 32, 8>}, {pipeline_mode = #tpu.pipeline_mode<synchronous>, transform_indices = @transform_7, window_bounds = array<i64: 72, 1, 8>}, {pipeline_mode = #tpu.pipeline_mode<synchronous>, transform_indices = @transform_8, window_bounds = array<i64: 24, 8, 32>}, {pipeline_mode = #tpu.pipeline_mode<synchronous>, transform_indices = @transform_9, window_bounds = array<i64: 6, 1, 32>}, {pipeline_mode = #tpu.pipeline_mode<synchronous>, transform_indices = @transform_10, window_bounds = array<i64: 4, 32, 64>}, {pipeline_mode = #tpu.pipeline_mode<synchronous>, transform_indices = @transform_11, window_bounds = array<i64: 4, 1, 64>}, {pipeline_mode = #tpu.pipeline_mode<synchronous>, transform_indices = @transform_12, window_bounds = array<i64: 4, 64, 32>}, {pipeline_mode = #tpu.pipeline_mode<synchronous>, transform_indices = @transform_13, window_bounds = array<i64: 4, 1, 32>}, {pipeline_mode = #tpu.pipeline_mode<synchronous>, transform_indices = @transform_14, window_bounds = array<i64: 12, 2, 32>}, {transform_indices = @transform_15, window_bounds = array<i64: 1, 8, 32>}]} {
    %c0 = arith.constant 0 : index
    %c0_0 = arith.constant 0 : index
    %c0_1 = arith.constant 0 : index
    %0 = vector.load %arg3[%c0, %c0_0, %c0_1] : memref<1x1x8xi32, #tpu.memory_space<vmem>>, vector<1x1x8xi32>
    %1 = vector.shape_cast %0 : vector<1x1x8xi32> to vector<1x8xi32>
    %c0_i32 = arith.constant 0 : i32
    %2 = vector.broadcast %c0_i32 : i32 to vector<1x8xi32>
    %3 = arith.cmpi ne, %1, %2 : vector<1x8xi32>
    %c0_2 = arith.constant 0 : index
    %c0_3 = arith.constant 0 : index
    %c0_4 = arith.constant 0 : index
    %4 = vector.load %arg4[%c0_2, %c0_3, %c0_4] : memref<1x1x8xi32, #tpu.memory_space<vmem>>, vector<1x1x8xi32>
    %5 = vector.shape_cast %4 : vector<1x1x8xi32> to vector<1x8xi32>
    %c0_i32_5 = arith.constant 0 : i32
    %6 = vector.broadcast %c0_i32_5 : i32 to vector<1x8xi32>
    %7 = arith.cmpi ne, %5, %6 : vector<1x8xi32>
    %8 = vector.shape_cast %3 : vector<1x8xi1> to vector<1x8xi1>
    %9 = vector.broadcast %8 : vector<1x8xi1> to vector<8x8xi1>
    %10 = vector.shape_cast %3 : vector<1x8xi1> to vector<1x8xi1>
    %11 = vector.broadcast %10 : vector<1x8xi1> to vector<8x8xi1>
    %12 = tpu.iota {dimensions = array<i32: 0>} : vector<8x8xi32>
    %13 = tpu.iota {dimensions = array<i32: 1>} : vector<8x8xi32>
    %14 = arith.cmpi sle, %13, %12 : vector<8x8xi32>
    %15 = vector.shape_cast %7 : vector<1x8xi1> to vector<1x8xi1>
    %16 = vector.broadcast %15 : vector<1x8xi1> to vector<8x8xi1>
    %17 = arith.andi %14, %16 : vector<8x8xi1>
    %c0_6 = arith.constant 0 : index
    %c0_7 = arith.constant 0 : index
    %18 = vector.load %arg1[%c0_6, %c0_7] : memref<8x1xi32, #tpu.memory_space<vmem>>, vector<8x1xi32>
    %19 = tpu.iota {dimensions = array<i32: 1>} : vector<8x16xi32>
    %20 = vector.broadcast %18 : vector<8x1xi32> to vector<8x16xi32>
    %21 = arith.cmpi eq, %20, %19 : vector<8x16xi32>
    %22 = arith.extui %21 : vector<8x16xi1> to vector<8x16xi32>
    %23 = arith.sitofp %22 : vector<8x16xi32> to vector<8x16xf32>
    %c0_8 = arith.constant 0 : index
    %c0_9 = arith.constant 0 : index
    %c0_10 = arith.constant 0 : index
    %24 = vector.load %arg5[%c0_8, %c0_9, %c0_10] : memref<2x16x32xf32, #tpu.memory_space<vmem>>, vector<1x16x32xf32>
    %25 = vector.shape_cast %24 : vector<1x16x32xf32> to vector<16x32xf32>
    %cst = arith.constant dense<0.000000e+00> : vector<8x32xf32>
    %26 = tpu.matmul %23, %25, %cst {dimension_numbers = #tpu.dot_dimension_numbers<[1], [0], [0], [1], [0, 0, 1, 1], [], []>} : vector<8x16xf32>, vector<16x32xf32>, vector<8x32xf32> -> vector<8x32xf32>
    %c0_11 = arith.constant 0 : index
    %c0_12 = arith.constant 0 : index
    %27 = vector.load %arg6[%c0_11, %c0_12] : memref<16x32xf32, #tpu.memory_space<vmem>>, vector<8x32xf32>
    %28 = arith.addf %26, %27 : vector<8x32xf32>
    %c0_13 = arith.constant 0 : index
    %c0_14 = arith.constant 0 : index
    %29 = vector.load %arg2[%c0_13, %c0_14] : memref<8x1xi32, #tpu.memory_space<vmem>>, vector<8x1xi32>
    %30 = tpu.iota {dimensions = array<i32: 1>} : vector<8x16xi32>
    %31 = vector.broadcast %29 : vector<8x1xi32> to vector<8x16xi32>
    %32 = arith.cmpi eq, %31, %30 : vector<8x16xi32>
    %33 = arith.extui %32 : vector<8x16xi1> to vector<8x16xi32>
    %34 = arith.sitofp %33 : vector<8x16xi32> to vector<8x16xf32>
    %c1 = arith.constant 1 : index
    %c0_15 = arith.constant 0 : index
    %c0_16 = arith.constant 0 : index
    %35 = vector.load %arg5[%c1, %c0_15, %c0_16] : memref<2x16x32xf32, #tpu.memory_space<vmem>>, vector<1x16x32xf32>
    %36 = vector.shape_cast %35 : vector<1x16x32xf32> to vector<16x32xf32>
    %cst_17 = arith.constant dense<0.000000e+00> : vector<8x32xf32>
    %37 = tpu.matmul %34, %36, %cst_17 {dimension_numbers = #tpu.dot_dimension_numbers<[1], [0], [0], [1], [0, 0, 1, 1], [], []>} : vector<8x16xf32>, vector<16x32xf32>, vector<8x32xf32> -> vector<8x32xf32>
    %c0_18 = arith.constant 0 : index
    %c0_19 = arith.constant 0 : index
    %38 = vector.load %arg6[%c0_18, %c0_19] : memref<16x32xf32, #tpu.memory_space<vmem>>, vector<8x32xf32>
    %39 = arith.addf %37, %38 : vector<8x32xf32>
    %c0_20 = arith.constant 0 : index
    %c0_21 = arith.constant 0 : index
    %c0_22 = arith.constant 0 : index
    %40 = vector.load %arg15[%c0_20, %c0_21, %c0_22] : memref<12x2x32xf32, #tpu.memory_space<vmem>>, vector<1x2x32xf32>
    %41 = vector.shape_cast %40 : vector<1x2x32xf32> to vector<2x32xf32>
    %cst_23 = arith.constant dense<0.000000e+00> : vector<8xf32>
    %42 = vector.multi_reduction <add>, %28, %cst_23 [1] : vector<8x32xf32> to vector<8xf32>
    %43 = vector.shape_cast %42 : vector<8xf32> to vector<8x1xf32>
    %cst_24 = arith.constant 3.200000e+01 : f32
    %44 = vector.broadcast %cst_24 : f32 to vector<8x1xf32>
    %45 = arith.divf %43, %44 : vector<8x1xf32>
    %46 = arith.mulf %28, %28 : vector<8x32xf32>
    %cst_25 = arith.constant dense<0.000000e+00> : vector<8xf32>
    %47 = vector.multi_reduction <add>, %46, %cst_25 [1] : vector<8x32xf32> to vector<8xf32>
    %48 = vector.shape_cast %47 : vector<8xf32> to vector<8x1xf32>
    %cst_26 = arith.constant 3.200000e+01 : f32
    %49 = vector.broadcast %cst_26 : f32 to vector<8x1xf32>
    %50 = arith.divf %48, %49 : vector<8x1xf32>
    %51 = arith.mulf %45, %45 : vector<8x1xf32>
    %52 = arith.subf %50, %51 : vector<8x1xf32>
    %cst_27 = arith.constant 9.99999997E-7 : f32
    %53 = vector.broadcast %cst_27 : f32 to vector<8x1xf32>
    %54 = arith.addf %52, %53 : vector<8x1xf32>
    %55 = math.rsqrt %54 : vector<8x1xf32>
    %56 = vector.broadcast %45 : vector<8x1xf32> to vector<8x32xf32>
    %57 = arith.subf %28, %56 : vector<8x32xf32>
    %58 = vector.broadcast %55 : vector<8x1xf32> to vector<8x32xf32>
    %59 = arith.mulf %57, %58 : vector<8x32xf32>
    %60 = vector.extract_strided_slice %41 {offsets = [0, 0], sizes = [1, 32], strides = [1, 1]} : vector<2x32xf32> to vector<1x32xf32>
    %61 = vector.broadcast %60 : vector<1x32xf32> to vector<8x32xf32>
    %62 = arith.mulf %59, %61 : vector<8x32xf32>
    %63 = vector.extract_strided_slice %41 {offsets = [1, 0], sizes = [1, 32], strides = [1, 1]} : vector<2x32xf32> to vector<1x32xf32>
    %64 = vector.broadcast %63 : vector<1x32xf32> to vector<8x32xf32>
    %65 = arith.addf %62, %64 : vector<8x32xf32>
    %cst_28 = arith.constant 0.000000e+00 : f32
    %66 = vector.broadcast %cst_28 : f32 to vector<8x32xf32>
    %c0_29 = arith.constant 0 : index
    %c0_30 = arith.constant 0 : index
    %c0_31 = arith.constant 0 : index
    %67 = vector.load %arg7[%c0_29, %c0_30, %c0_31] : memref<72x32x8xf32, #tpu.memory_space<vmem>>, vector<1x32x8xf32>
    %68 = vector.shape_cast %67 : vector<1x32x8xf32> to vector<32x8xf32>
    %cst_32 = arith.constant dense<0.000000e+00> : vector<8x8xf32>
    %69 = tpu.matmul %65, %68, %cst_32 {dimension_numbers = #tpu.dot_dimension_numbers<[1], [0], [0], [1], [0, 0, 1, 1], [], []>} : vector<8x32xf32>, vector<32x8xf32>, vector<8x8xf32> -> vector<8x8xf32>
    %c0_33 = arith.constant 0 : index
    %c0_34 = arith.constant 0 : index
    %c0_35 = arith.constant 0 : index
    %70 = vector.load %arg8[%c0_33, %c0_34, %c0_35] : memref<72x1x8xf32, #tpu.memory_space<vmem>>, vector<1x1x8xf32>
    %71 = vector.shape_cast %70 : vector<1x1x8xf32> to vector<1x8xf32>
    %72 = vector.broadcast %71 : vector<1x8xf32> to vector<8x8xf32>
    %73 = arith.addf %69, %72 : vector<8x8xf32>
    %c4 = arith.constant 4 : index
    %c0_36 = arith.constant 0 : index
    %c0_37 = arith.constant 0 : index
    %74 = vector.load %arg7[%c4, %c0_36, %c0_37] : memref<72x32x8xf32, #tpu.memory_space<vmem>>, vector<1x32x8xf32>
    %75 = vector.shape_cast %74 : vector<1x32x8xf32> to vector<32x8xf32>
    %cst_38 = arith.constant dense<0.000000e+00> : vector<8x8xf32>
    %76 = tpu.matmul %65, %75, %cst_38 {dimension_numbers = #tpu.dot_dimension_numbers<[1], [0], [0], [1], [0, 0, 1, 1], [], []>} : vector<8x32xf32>, vector<32x8xf32>, vector<8x8xf32> -> vector<8x8xf32>
    %c4_39 = arith.constant 4 : index
    %c0_40 = arith.constant 0 : index
    %c0_41 = arith.constant 0 : index
    %77 = vector.load %arg8[%c4_39, %c0_40, %c0_41] : memref<72x1x8xf32, #tpu.memory_space<vmem>>, vector<1x1x8xf32>
    %78 = vector.shape_cast %77 : vector<1x1x8xf32> to vector<1x8xf32>
    %79 = vector.broadcast %78 : vector<1x8xf32> to vector<8x8xf32>
    %80 = arith.addf %76, %79 : vector<8x8xf32>
    %c8 = arith.constant 8 : index
    %c0_42 = arith.constant 0 : index
    %c0_43 = arith.constant 0 : index
    %81 = vector.load %arg7[%c8, %c0_42, %c0_43] : memref<72x32x8xf32, #tpu.memory_space<vmem>>, vector<1x32x8xf32>
    %82 = vector.shape_cast %81 : vector<1x32x8xf32> to vector<32x8xf32>
    %cst_44 = arith.constant dense<0.000000e+00> : vector<8x8xf32>
    %83 = tpu.matmul %65, %82, %cst_44 {dimension_numbers = #tpu.dot_dimension_numbers<[1], [0], [0], [1], [0, 0, 1, 1], [], []>} : vector<8x32xf32>, vector<32x8xf32>, vector<8x8xf32> -> vector<8x8xf32>
    %c8_45 = arith.constant 8 : index
    %c0_46 = arith.constant 0 : index
    %c0_47 = arith.constant 0 : index
    %84 = vector.load %arg8[%c8_45, %c0_46, %c0_47] : memref<72x1x8xf32, #tpu.memory_space<vmem>>, vector<1x1x8xf32>
    %85 = vector.shape_cast %84 : vector<1x1x8xf32> to vector<1x8xf32>
    %86 = vector.broadcast %85 : vector<1x8xf32> to vector<8x8xf32>
    %87 = arith.addf %83, %86 : vector<8x8xf32>
    "tpu.trace_start"() <{level = 10 : i32, message = "qd,kd->qk"}> : () -> ()
    %cst_48 = arith.constant dense<0.000000e+00> : vector<8x8xf32>
    %88 = tpu.matmul %73, %80, %cst_48 {dimension_numbers = #tpu.dot_dimension_numbers<[1], [1], [0], [0], [0, 0, 1, 0], [], []>} : vector<8x8xf32>, vector<8x8xf32>, vector<8x8xf32> -> vector<8x8xf32>
    %cst_49 = arith.constant -1.000000e+09 : f32
    "tpu.trace_stop"() : () -> ()
    %89 = vector.broadcast %cst_49 : f32 to vector<8x8xf32>
    %90 = arith.select %9, %88, %89 : vector<8x8xi1>, vector<8x8xf32>
    %cst_50 = arith.constant dense<0xFF800000> : vector<8xf32>
    %91 = vector.multi_reduction <maximumf>, %90, %cst_50 [1] : vector<8x8xf32> to vector<8xf32>
    %92 = vector.shape_cast %91 : vector<8xf32> to vector<8x1xf32>
    %93 = vector.broadcast %92 : vector<8x1xf32> to vector<8x8xf32>
    %94 = arith.subf %90, %93 : vector<8x8xf32>
    %95 = math.exp %94 : vector<8x8xf32>
    %cst_51 = arith.constant dense<0.000000e+00> : vector<8xf32>
    %96 = vector.multi_reduction <add>, %95, %cst_51 [1] : vector<8x8xf32> to vector<8xf32>
    %97 = vector.shape_cast %96 : vector<8xf32> to vector<8x1xf32>
    %98 = tpu.reciprocal %97 {approx = true} : vector<8x1xf32> -> vector<8x1xf32>
    %99 = vector.broadcast %98 : vector<8x1xf32> to vector<8x8xf32>
    %100 = arith.mulf %95, %99 : vector<8x8xf32>
    %cst_52 = arith.constant dense<0.000000e+00> : vector<8x8xf32>
    %101 = tpu.matmul %100, %87, %cst_52 {dimension_numbers = #tpu.dot_dimension_numbers<[1], [0], [0], [1], [0, 0, 1, 1], [], []>} : vector<8x8xf32>, vector<8x8xf32>, vector<8x8xf32> -> vector<8x8xf32>
    %c0_53 = arith.constant 0 : index
    %c0_54 = arith.constant 0 : index
    %c0_55 = arith.constant 0 : index
    %102 = vector.load %arg9[%c0_53, %c0_54, %c0_55] : memref<24x8x32xf32, #tpu.memory_space<vmem>>, vector<1x8x32xf32>
    %103 = vector.shape_cast %102 : vector<1x8x32xf32> to vector<8x32xf32>
    %cst_56 = arith.constant dense<0.000000e+00> : vector<8x32xf32>
    %104 = tpu.matmul %101, %103, %cst_56 {dimension_numbers = #tpu.dot_dimension_numbers<[1], [0], [0], [1], [0, 0, 1, 1], [], []>} : vector<8x8xf32>, vector<8x32xf32>, vector<8x32xf32> -> vector<8x32xf32>
    %105 = arith.addf %66, %104 : vector<8x32xf32>
    %c1_57 = arith.constant 1 : index
    %c0_58 = arith.constant 0 : index
    %c0_59 = arith.constant 0 : index
    %106 = vector.load %arg7[%c1_57, %c0_58, %c0_59] : memref<72x32x8xf32, #tpu.memory_space<vmem>>, vector<1x32x8xf32>
    %107 = vector.shape_cast %106 : vector<1x32x8xf32> to vector<32x8xf32>
    %cst_60 = arith.constant dense<0.000000e+00> : vector<8x8xf32>
    %108 = tpu.matmul %65, %107, %cst_60 {dimension_numbers = #tpu.dot_dimension_numbers<[1], [0], [0], [1], [0, 0, 1, 1], [], []>} : vector<8x32xf32>, vector<32x8xf32>, vector<8x8xf32> -> vector<8x8xf32>
    %c1_61 = arith.constant 1 : index
    %c0_62 = arith.constant 0 : index
    %c0_63 = arith.constant 0 : index
    %109 = vector.load %arg8[%c1_61, %c0_62, %c0_63] : memref<72x1x8xf32, #tpu.memory_space<vmem>>, vector<1x1x8xf32>
    %110 = vector.shape_cast %109 : vector<1x1x8xf32> to vector<1x8xf32>
    %111 = vector.broadcast %110 : vector<1x8xf32> to vector<8x8xf32>
    %112 = arith.addf %108, %111 : vector<8x8xf32>
    %c5 = arith.constant 5 : index
    %c0_64 = arith.constant 0 : index
    %c0_65 = arith.constant 0 : index
    %113 = vector.load %arg7[%c5, %c0_64, %c0_65] : memref<72x32x8xf32, #tpu.memory_space<vmem>>, vector<1x32x8xf32>
    %114 = vector.shape_cast %113 : vector<1x32x8xf32> to vector<32x8xf32>
    %cst_66 = arith.constant dense<0.000000e+00> : vector<8x8xf32>
    %115 = tpu.matmul %65, %114, %cst_66 {dimension_numbers = #tpu.dot_dimension_numbers<[1], [0], [0], [1], [0, 0, 1, 1], [], []>} : vector<8x32xf32>, vector<32x8xf32>, vector<8x8xf32> -> vector<8x8xf32>
    %c5_67 = arith.constant 5 : index
    %c0_68 = arith.constant 0 : index
    %c0_69 = arith.constant 0 : index
    %116 = vector.load %arg8[%c5_67, %c0_68, %c0_69] : memref<72x1x8xf32, #tpu.memory_space<vmem>>, vector<1x1x8xf32>
    %117 = vector.shape_cast %116 : vector<1x1x8xf32> to vector<1x8xf32>
    %118 = vector.broadcast %117 : vector<1x8xf32> to vector<8x8xf32>
    %119 = arith.addf %115, %118 : vector<8x8xf32>
    %c9 = arith.constant 9 : index
    %c0_70 = arith.constant 0 : index
    %c0_71 = arith.constant 0 : index
    %120 = vector.load %arg7[%c9, %c0_70, %c0_71] : memref<72x32x8xf32, #tpu.memory_space<vmem>>, vector<1x32x8xf32>
    %121 = vector.shape_cast %120 : vector<1x32x8xf32> to vector<32x8xf32>
    %cst_72 = arith.constant dense<0.000000e+00> : vector<8x8xf32>
    %122 = tpu.matmul %65, %121, %cst_72 {dimension_numbers = #tpu.dot_dimension_numbers<[1], [0], [0], [1], [0, 0, 1, 1], [], []>} : vector<8x32xf32>, vector<32x8xf32>, vector<8x8xf32> -> vector<8x8xf32>
    %c9_73 = arith.constant 9 : index
    %c0_74 = arith.constant 0 : index
    %c0_75 = arith.constant 0 : index
    %123 = vector.load %arg8[%c9_73, %c0_74, %c0_75] : memref<72x1x8xf32, #tpu.memory_space<vmem>>, vector<1x1x8xf32>
    %124 = vector.shape_cast %123 : vector<1x1x8xf32> to vector<1x8xf32>
    %125 = vector.broadcast %124 : vector<1x8xf32> to vector<8x8xf32>
    %126 = arith.addf %122, %125 : vector<8x8xf32>
    "tpu.trace_start"() <{level = 10 : i32, message = "qd,kd->qk"}> : () -> ()
    %cst_76 = arith.constant dense<0.000000e+00> : vector<8x8xf32>
    %127 = tpu.matmul %112, %119, %cst_76 {dimension_numbers = #tpu.dot_dimension_numbers<[1], [1], [0], [0], [0, 0, 1, 0], [], []>} : vector<8x8xf32>, vector<8x8xf32>, vector<8x8xf32> -> vector<8x8xf32>
    %cst_77 = arith.constant -1.000000e+09 : f32
    "tpu.trace_stop"() : () -> ()
    %128 = vector.broadcast %cst_77 : f32 to vector<8x8xf32>
    %129 = arith.select %9, %127, %128 : vector<8x8xi1>, vector<8x8xf32>
    %cst_78 = arith.constant dense<0xFF800000> : vector<8xf32>
    %130 = vector.multi_reduction <maximumf>, %129, %cst_78 [1] : vector<8x8xf32> to vector<8xf32>
    %131 = vector.shape_cast %130 : vector<8xf32> to vector<8x1xf32>
    %132 = vector.broadcast %131 : vector<8x1xf32> to vector<8x8xf32>
    %133 = arith.subf %129, %132 : vector<8x8xf32>
    %134 = math.exp %133 : vector<8x8xf32>
    %cst_79 = arith.constant dense<0.000000e+00> : vector<8xf32>
    %135 = vector.multi_reduction <add>, %134, %cst_79 [1] : vector<8x8xf32> to vector<8xf32>
    %136 = vector.shape_cast %135 : vector<8xf32> to vector<8x1xf32>
    %137 = tpu.reciprocal %136 {approx = true} : vector<8x1xf32> -> vector<8x1xf32>
    %138 = vector.broadcast %137 : vector<8x1xf32> to vector<8x8xf32>
    %139 = arith.mulf %134, %138 : vector<8x8xf32>
    %cst_80 = arith.constant dense<0.000000e+00> : vector<8x8xf32>
    %140 = tpu.matmul %139, %126, %cst_80 {dimension_numbers = #tpu.dot_dimension_numbers<[1], [0], [0], [1], [0, 0, 1, 1], [], []>} : vector<8x8xf32>, vector<8x8xf32>, vector<8x8xf32> -> vector<8x8xf32>
    %c1_81 = arith.constant 1 : index
    %c0_82 = arith.constant 0 : index
    %c0_83 = arith.constant 0 : index
    %141 = vector.load %arg9[%c1_81, %c0_82, %c0_83] : memref<24x8x32xf32, #tpu.memory_space<vmem>>, vector<1x8x32xf32>
    %142 = vector.shape_cast %141 : vector<1x8x32xf32> to vector<8x32xf32>
    %cst_84 = arith.constant dense<0.000000e+00> : vector<8x32xf32>
    %143 = tpu.matmul %140, %142, %cst_84 {dimension_numbers = #tpu.dot_dimension_numbers<[1], [0], [0], [1], [0, 0, 1, 1], [], []>} : vector<8x8xf32>, vector<8x32xf32>, vector<8x32xf32> -> vector<8x32xf32>
    %144 = arith.addf %105, %143 : vector<8x32xf32>
    %c2 = arith.constant 2 : index
    %c0_85 = arith.constant 0 : index
    %c0_86 = arith.constant 0 : index
    %145 = vector.load %arg7[%c2, %c0_85, %c0_86] : memref<72x32x8xf32, #tpu.memory_space<vmem>>, vector<1x32x8xf32>
    %146 = vector.shape_cast %145 : vector<1x32x8xf32> to vector<32x8xf32>
    %cst_87 = arith.constant dense<0.000000e+00> : vector<8x8xf32>
    %147 = tpu.matmul %65, %146, %cst_87 {dimension_numbers = #tpu.dot_dimension_numbers<[1], [0], [0], [1], [0, 0, 1, 1], [], []>} : vector<8x32xf32>, vector<32x8xf32>, vector<8x8xf32> -> vector<8x8xf32>
    %c2_88 = arith.constant 2 : index
    %c0_89 = arith.constant 0 : index
    %c0_90 = arith.constant 0 : index
    %148 = vector.load %arg8[%c2_88, %c0_89, %c0_90] : memref<72x1x8xf32, #tpu.memory_space<vmem>>, vector<1x1x8xf32>
    %149 = vector.shape_cast %148 : vector<1x1x8xf32> to vector<1x8xf32>
    %150 = vector.broadcast %149 : vector<1x8xf32> to vector<8x8xf32>
    %151 = arith.addf %147, %150 : vector<8x8xf32>
    %c6 = arith.constant 6 : index
    %c0_91 = arith.constant 0 : index
    %c0_92 = arith.constant 0 : index
    %152 = vector.load %arg7[%c6, %c0_91, %c0_92] : memref<72x32x8xf32, #tpu.memory_space<vmem>>, vector<1x32x8xf32>
    %153 = vector.shape_cast %152 : vector<1x32x8xf32> to vector<32x8xf32>
    %cst_93 = arith.constant dense<0.000000e+00> : vector<8x8xf32>
    %154 = tpu.matmul %65, %153, %cst_93 {dimension_numbers = #tpu.dot_dimension_numbers<[1], [0], [0], [1], [0, 0, 1, 1], [], []>} : vector<8x32xf32>, vector<32x8xf32>, vector<8x8xf32> -> vector<8x8xf32>
    %c6_94 = arith.constant 6 : index
    %c0_95 = arith.constant 0 : index
    %c0_96 = arith.constant 0 : index
    %155 = vector.load %arg8[%c6_94, %c0_95, %c0_96] : memref<72x1x8xf32, #tpu.memory_space<vmem>>, vector<1x1x8xf32>
    %156 = vector.shape_cast %155 : vector<1x1x8xf32> to vector<1x8xf32>
    %157 = vector.broadcast %156 : vector<1x8xf32> to vector<8x8xf32>
    %158 = arith.addf %154, %157 : vector<8x8xf32>
    %c10 = arith.constant 10 : index
    %c0_97 = arith.constant 0 : index
    %c0_98 = arith.constant 0 : index
    %159 = vector.load %arg7[%c10, %c0_97, %c0_98] : memref<72x32x8xf32, #tpu.memory_space<vmem>>, vector<1x32x8xf32>
    %160 = vector.shape_cast %159 : vector<1x32x8xf32> to vector<32x8xf32>
    %cst_99 = arith.constant dense<0.000000e+00> : vector<8x8xf32>
    %161 = tpu.matmul %65, %160, %cst_99 {dimension_numbers = #tpu.dot_dimension_numbers<[1], [0], [0], [1], [0, 0, 1, 1], [], []>} : vector<8x32xf32>, vector<32x8xf32>, vector<8x8xf32> -> vector<8x8xf32>
    %c10_100 = arith.constant 10 : index
    %c0_101 = arith.constant 0 : index
    %c0_102 = arith.constant 0 : index
    %162 = vector.load %arg8[%c10_100, %c0_101, %c0_102] : memref<72x1x8xf32, #tpu.memory_space<vmem>>, vector<1x1x8xf32>
    %163 = vector.shape_cast %162 : vector<1x1x8xf32> to vector<1x8xf32>
    %164 = vector.broadcast %163 : vector<1x8xf32> to vector<8x8xf32>
    %165 = arith.addf %161, %164 : vector<8x8xf32>
    "tpu.trace_start"() <{level = 10 : i32, message = "qd,kd->qk"}> : () -> ()
    %cst_103 = arith.constant dense<0.000000e+00> : vector<8x8xf32>
    %166 = tpu.matmul %151, %158, %cst_103 {dimension_numbers = #tpu.dot_dimension_numbers<[1], [1], [0], [0], [0, 0, 1, 0], [], []>} : vector<8x8xf32>, vector<8x8xf32>, vector<8x8xf32> -> vector<8x8xf32>
    %cst_104 = arith.constant -1.000000e+09 : f32
    "tpu.trace_stop"() : () -> ()
    %167 = vector.broadcast %cst_104 : f32 to vector<8x8xf32>
    %168 = arith.select %9, %166, %167 : vector<8x8xi1>, vector<8x8xf32>
    %cst_105 = arith.constant dense<0xFF800000> : vector<8xf32>
    %169 = vector.multi_reduction <maximumf>, %168, %cst_105 [1] : vector<8x8xf32> to vector<8xf32>
    %170 = vector.shape_cast %169 : vector<8xf32> to vector<8x1xf32>
    %171 = vector.broadcast %170 : vector<8x1xf32> to vector<8x8xf32>
    %172 = arith.subf %168, %171 : vector<8x8xf32>
    %173 = math.exp %172 : vector<8x8xf32>
    %cst_106 = arith.constant dense<0.000000e+00> : vector<8xf32>
    %174 = vector.multi_reduction <add>, %173, %cst_106 [1] : vector<8x8xf32> to vector<8xf32>
    %175 = vector.shape_cast %174 : vector<8xf32> to vector<8x1xf32>
    %176 = tpu.reciprocal %175 {approx = true} : vector<8x1xf32> -> vector<8x1xf32>
    %177 = vector.broadcast %176 : vector<8x1xf32> to vector<8x8xf32>
    %178 = arith.mulf %173, %177 : vector<8x8xf32>
    %cst_107 = arith.constant dense<0.000000e+00> : vector<8x8xf32>
    %179 = tpu.matmul %178, %165, %cst_107 {dimension_numbers = #tpu.dot_dimension_numbers<[1], [0], [0], [1], [0, 0, 1, 1], [], []>} : vector<8x8xf32>, vector<8x8xf32>, vector<8x8xf32> -> vector<8x8xf32>
    %c2_108 = arith.constant 2 : index
    %c0_109 = arith.constant 0 : index
    %c0_110 = arith.constant 0 : index
    %180 = vector.load %arg9[%c2_108, %c0_109, %c0_110] : memref<24x8x32xf32, #tpu.memory_space<vmem>>, vector<1x8x32xf32>
    %181 = vector.shape_cast %180 : vector<1x8x32xf32> to vector<8x32xf32>
    %cst_111 = arith.constant dense<0.000000e+00> : vector<8x32xf32>
    %182 = tpu.matmul %179, %181, %cst_111 {dimension_numbers = #tpu.dot_dimension_numbers<[1], [0], [0], [1], [0, 0, 1, 1], [], []>} : vector<8x8xf32>, vector<8x32xf32>, vector<8x32xf32> -> vector<8x32xf32>
    %183 = arith.addf %144, %182 : vector<8x32xf32>
    %c3 = arith.constant 3 : index
    %c0_112 = arith.constant 0 : index
    %c0_113 = arith.constant 0 : index
    %184 = vector.load %arg7[%c3, %c0_112, %c0_113] : memref<72x32x8xf32, #tpu.memory_space<vmem>>, vector<1x32x8xf32>
    %185 = vector.shape_cast %184 : vector<1x32x8xf32> to vector<32x8xf32>
    %cst_114 = arith.constant dense<0.000000e+00> : vector<8x8xf32>
    %186 = tpu.matmul %65, %185, %cst_114 {dimension_numbers = #tpu.dot_dimension_numbers<[1], [0], [0], [1], [0, 0, 1, 1], [], []>} : vector<8x32xf32>, vector<32x8xf32>, vector<8x8xf32> -> vector<8x8xf32>
    %c3_115 = arith.constant 3 : index
    %c0_116 = arith.constant 0 : index
    %c0_117 = arith.constant 0 : index
    %187 = vector.load %arg8[%c3_115, %c0_116, %c0_117] : memref<72x1x8xf32, #tpu.memory_space<vmem>>, vector<1x1x8xf32>
    %188 = vector.shape_cast %187 : vector<1x1x8xf32> to vector<1x8xf32>
    %189 = vector.broadcast %188 : vector<1x8xf32> to vector<8x8xf32>
    %190 = arith.addf %186, %189 : vector<8x8xf32>
    %c7 = arith.constant 7 : index
    %c0_118 = arith.constant 0 : index
    %c0_119 = arith.constant 0 : index
    %191 = vector.load %arg7[%c7, %c0_118, %c0_119] : memref<72x32x8xf32, #tpu.memory_space<vmem>>, vector<1x32x8xf32>
    %192 = vector.shape_cast %191 : vector<1x32x8xf32> to vector<32x8xf32>
    %cst_120 = arith.constant dense<0.000000e+00> : vector<8x8xf32>
    %193 = tpu.matmul %65, %192, %cst_120 {dimension_numbers = #tpu.dot_dimension_numbers<[1], [0], [0], [1], [0, 0, 1, 1], [], []>} : vector<8x32xf32>, vector<32x8xf32>, vector<8x8xf32> -> vector<8x8xf32>
    %c7_121 = arith.constant 7 : index
    %c0_122 = arith.constant 0 : index
    %c0_123 = arith.constant 0 : index
    %194 = vector.load %arg8[%c7_121, %c0_122, %c0_123] : memref<72x1x8xf32, #tpu.memory_space<vmem>>, vector<1x1x8xf32>
    %195 = vector.shape_cast %194 : vector<1x1x8xf32> to vector<1x8xf32>
    %196 = vector.broadcast %195 : vector<1x8xf32> to vector<8x8xf32>
    %197 = arith.addf %193, %196 : vector<8x8xf32>
    %c11 = arith.constant 11 : index
    %c0_124 = arith.constant 0 : index
    %c0_125 = arith.constant 0 : index
    %198 = vector.load %arg7[%c11, %c0_124, %c0_125] : memref<72x32x8xf32, #tpu.memory_space<vmem>>, vector<1x32x8xf32>
    %199 = vector.shape_cast %198 : vector<1x32x8xf32> to vector<32x8xf32>
    %cst_126 = arith.constant dense<0.000000e+00> : vector<8x8xf32>
    %200 = tpu.matmul %65, %199, %cst_126 {dimension_numbers = #tpu.dot_dimension_numbers<[1], [0], [0], [1], [0, 0, 1, 1], [], []>} : vector<8x32xf32>, vector<32x8xf32>, vector<8x8xf32> -> vector<8x8xf32>
    %c11_127 = arith.constant 11 : index
    %c0_128 = arith.constant 0 : index
    %c0_129 = arith.constant 0 : index
    %201 = vector.load %arg8[%c11_127, %c0_128, %c0_129] : memref<72x1x8xf32, #tpu.memory_space<vmem>>, vector<1x1x8xf32>
    %202 = vector.shape_cast %201 : vector<1x1x8xf32> to vector<1x8xf32>
    %203 = vector.broadcast %202 : vector<1x8xf32> to vector<8x8xf32>
    %204 = arith.addf %200, %203 : vector<8x8xf32>
    "tpu.trace_start"() <{level = 10 : i32, message = "qd,kd->qk"}> : () -> ()
    %cst_130 = arith.constant dense<0.000000e+00> : vector<8x8xf32>
    %205 = tpu.matmul %190, %197, %cst_130 {dimension_numbers = #tpu.dot_dimension_numbers<[1], [1], [0], [0], [0, 0, 1, 0], [], []>} : vector<8x8xf32>, vector<8x8xf32>, vector<8x8xf32> -> vector<8x8xf32>
    %cst_131 = arith.constant -1.000000e+09 : f32
    "tpu.trace_stop"() : () -> ()
    %206 = vector.broadcast %cst_131 : f32 to vector<8x8xf32>
    %207 = arith.select %9, %205, %206 : vector<8x8xi1>, vector<8x8xf32>
    %cst_132 = arith.constant dense<0xFF800000> : vector<8xf32>
    %208 = vector.multi_reduction <maximumf>, %207, %cst_132 [1] : vector<8x8xf32> to vector<8xf32>
    %209 = vector.shape_cast %208 : vector<8xf32> to vector<8x1xf32>
    %210 = vector.broadcast %209 : vector<8x1xf32> to vector<8x8xf32>
    %211 = arith.subf %207, %210 : vector<8x8xf32>
    %212 = math.exp %211 : vector<8x8xf32>
    %cst_133 = arith.constant dense<0.000000e+00> : vector<8xf32>
    %213 = vector.multi_reduction <add>, %212, %cst_133 [1] : vector<8x8xf32> to vector<8xf32>
    %214 = vector.shape_cast %213 : vector<8xf32> to vector<8x1xf32>
    %215 = tpu.reciprocal %214 {approx = true} : vector<8x1xf32> -> vector<8x1xf32>
    %216 = vector.broadcast %215 : vector<8x1xf32> to vector<8x8xf32>
    %217 = arith.mulf %212, %216 : vector<8x8xf32>
    %cst_134 = arith.constant dense<0.000000e+00> : vector<8x8xf32>
    %218 = tpu.matmul %217, %204, %cst_134 {dimension_numbers = #tpu.dot_dimension_numbers<[1], [0], [0], [1], [0, 0, 1, 1], [], []>} : vector<8x8xf32>, vector<8x8xf32>, vector<8x8xf32> -> vector<8x8xf32>
    %c3_135 = arith.constant 3 : index
    %c0_136 = arith.constant 0 : index
    %c0_137 = arith.constant 0 : index
    %219 = vector.load %arg9[%c3_135, %c0_136, %c0_137] : memref<24x8x32xf32, #tpu.memory_space<vmem>>, vector<1x8x32xf32>
    %220 = vector.shape_cast %219 : vector<1x8x32xf32> to vector<8x32xf32>
    %cst_138 = arith.constant dense<0.000000e+00> : vector<8x32xf32>
    %221 = tpu.matmul %218, %220, %cst_138 {dimension_numbers = #tpu.dot_dimension_numbers<[1], [0], [0], [1], [0, 0, 1, 1], [], []>} : vector<8x8xf32>, vector<8x32xf32>, vector<8x32xf32> -> vector<8x32xf32>
    %222 = arith.addf %183, %221 : vector<8x32xf32>
    %c0_139 = arith.constant 0 : index
    %c0_140 = arith.constant 0 : index
    %c0_141 = arith.constant 0 : index
    %223 = vector.load %arg10[%c0_139, %c0_140, %c0_141] : memref<6x1x32xf32, #tpu.memory_space<vmem>>, vector<1x1x32xf32>
    %224 = vector.shape_cast %223 : vector<1x1x32xf32> to vector<1x32xf32>
    %225 = vector.broadcast %224 : vector<1x32xf32> to vector<8x32xf32>
    %226 = arith.addf %222, %225 : vector<8x32xf32>
    %227 = arith.addf %28, %226 : vector<8x32xf32>
    %c1_142 = arith.constant 1 : index
    %c0_143 = arith.constant 0 : index
    %c0_144 = arith.constant 0 : index
    %228 = vector.load %arg15[%c1_142, %c0_143, %c0_144] : memref<12x2x32xf32, #tpu.memory_space<vmem>>, vector<1x2x32xf32>
    %229 = vector.shape_cast %228 : vector<1x2x32xf32> to vector<2x32xf32>
    %cst_145 = arith.constant dense<0.000000e+00> : vector<8xf32>
    %230 = vector.multi_reduction <add>, %227, %cst_145 [1] : vector<8x32xf32> to vector<8xf32>
    %231 = vector.shape_cast %230 : vector<8xf32> to vector<8x1xf32>
    %cst_146 = arith.constant 3.200000e+01 : f32
    %232 = vector.broadcast %cst_146 : f32 to vector<8x1xf32>
    %233 = arith.divf %231, %232 : vector<8x1xf32>
    %234 = arith.mulf %227, %227 : vector<8x32xf32>
    %cst_147 = arith.constant dense<0.000000e+00> : vector<8xf32>
    %235 = vector.multi_reduction <add>, %234, %cst_147 [1] : vector<8x32xf32> to vector<8xf32>
    %236 = vector.shape_cast %235 : vector<8xf32> to vector<8x1xf32>
    %cst_148 = arith.constant 3.200000e+01 : f32
    %237 = vector.broadcast %cst_148 : f32 to vector<8x1xf32>
    %238 = arith.divf %236, %237 : vector<8x1xf32>
    %239 = arith.mulf %233, %233 : vector<8x1xf32>
    %240 = arith.subf %238, %239 : vector<8x1xf32>
    %cst_149 = arith.constant 9.99999997E-7 : f32
    %241 = vector.broadcast %cst_149 : f32 to vector<8x1xf32>
    %242 = arith.addf %240, %241 : vector<8x1xf32>
    %243 = math.rsqrt %242 : vector<8x1xf32>
    %244 = vector.broadcast %233 : vector<8x1xf32> to vector<8x32xf32>
    %245 = arith.subf %227, %244 : vector<8x32xf32>
    %246 = vector.broadcast %243 : vector<8x1xf32> to vector<8x32xf32>
    %247 = arith.mulf %245, %246 : vector<8x32xf32>
    %248 = vector.extract_strided_slice %229 {offsets = [0, 0], sizes = [1, 32], strides = [1, 1]} : vector<2x32xf32> to vector<1x32xf32>
    %249 = vector.broadcast %248 : vector<1x32xf32> to vector<8x32xf32>
    %250 = arith.mulf %247, %249 : vector<8x32xf32>
    %251 = vector.extract_strided_slice %229 {offsets = [1, 0], sizes = [1, 32], strides = [1, 1]} : vector<2x32xf32> to vector<1x32xf32>
    %252 = vector.broadcast %251 : vector<1x32xf32> to vector<8x32xf32>
    %253 = arith.addf %250, %252 : vector<8x32xf32>
    %c0_150 = arith.constant 0 : index
    %c0_151 = arith.constant 0 : index
    %c0_152 = arith.constant 0 : index
    %254 = vector.load %arg11[%c0_150, %c0_151, %c0_152] : memref<4x32x64xf32, #tpu.memory_space<vmem>>, vector<1x32x64xf32>
    %255 = vector.shape_cast %254 : vector<1x32x64xf32> to vector<32x64xf32>
    %cst_153 = arith.constant dense<0.000000e+00> : vector<8x64xf32>
    %256 = tpu.matmul %253, %255, %cst_153 {dimension_numbers = #tpu.dot_dimension_numbers<[1], [0], [0], [1], [0, 0, 1, 1], [], []>} : vector<8x32xf32>, vector<32x64xf32>, vector<8x64xf32> -> vector<8x64xf32>
    %c0_154 = arith.constant 0 : index
    %c0_155 = arith.constant 0 : index
    %c0_156 = arith.constant 0 : index
    %257 = vector.load %arg12[%c0_154, %c0_155, %c0_156] : memref<4x1x64xf32, #tpu.memory_space<vmem>>, vector<1x1x64xf32>
    %258 = vector.shape_cast %257 : vector<1x1x64xf32> to vector<1x64xf32>
    %259 = vector.broadcast %258 : vector<1x64xf32> to vector<8x64xf32>
    %260 = arith.addf %256, %259 : vector<8x64xf32>
    %cst_157 = arith.constant 0.000000e+00 : f32
    %261 = vector.broadcast %cst_157 : f32 to vector<8x64xf32>
    %262 = arith.maximumf %260, %261 : vector<8x64xf32>
    %c0_158 = arith.constant 0 : index
    %c0_159 = arith.constant 0 : index
    %c0_160 = arith.constant 0 : index
    %263 = vector.load %arg13[%c0_158, %c0_159, %c0_160] : memref<4x64x32xf32, #tpu.memory_space<vmem>>, vector<1x64x32xf32>
    %264 = vector.shape_cast %263 : vector<1x64x32xf32> to vector<64x32xf32>
    %cst_161 = arith.constant dense<0.000000e+00> : vector<8x32xf32>
    %265 = tpu.matmul %262, %264, %cst_161 {dimension_numbers = #tpu.dot_dimension_numbers<[1], [0], [0], [1], [0, 0, 1, 1], [], []>} : vector<8x64xf32>, vector<64x32xf32>, vector<8x32xf32> -> vector<8x32xf32>
    %c0_162 = arith.constant 0 : index
    %c0_163 = arith.constant 0 : index
    %c0_164 = arith.constant 0 : index
    %266 = vector.load %arg14[%c0_162, %c0_163, %c0_164] : memref<4x1x32xf32, #tpu.memory_space<vmem>>, vector<1x1x32xf32>
    %267 = vector.shape_cast %266 : vector<1x1x32xf32> to vector<1x32xf32>
    %268 = vector.broadcast %267 : vector<1x32xf32> to vector<8x32xf32>
    %269 = arith.addf %265, %268 : vector<8x32xf32>
    %270 = arith.addf %227, %269 : vector<8x32xf32>
    %c2_165 = arith.constant 2 : index
    %c0_166 = arith.constant 0 : index
    %c0_167 = arith.constant 0 : index
    %271 = vector.load %arg15[%c2_165, %c0_166, %c0_167] : memref<12x2x32xf32, #tpu.memory_space<vmem>>, vector<1x2x32xf32>
    %272 = vector.shape_cast %271 : vector<1x2x32xf32> to vector<2x32xf32>
    %cst_168 = arith.constant dense<0.000000e+00> : vector<8xf32>
    %273 = vector.multi_reduction <add>, %270, %cst_168 [1] : vector<8x32xf32> to vector<8xf32>
    %274 = vector.shape_cast %273 : vector<8xf32> to vector<8x1xf32>
    %cst_169 = arith.constant 3.200000e+01 : f32
    %275 = vector.broadcast %cst_169 : f32 to vector<8x1xf32>
    %276 = arith.divf %274, %275 : vector<8x1xf32>
    %277 = arith.mulf %270, %270 : vector<8x32xf32>
    %cst_170 = arith.constant dense<0.000000e+00> : vector<8xf32>
    %278 = vector.multi_reduction <add>, %277, %cst_170 [1] : vector<8x32xf32> to vector<8xf32>
    %279 = vector.shape_cast %278 : vector<8xf32> to vector<8x1xf32>
    %cst_171 = arith.constant 3.200000e+01 : f32
    %280 = vector.broadcast %cst_171 : f32 to vector<8x1xf32>
    %281 = arith.divf %279, %280 : vector<8x1xf32>
    %282 = arith.mulf %276, %276 : vector<8x1xf32>
    %283 = arith.subf %281, %282 : vector<8x1xf32>
    %cst_172 = arith.constant 9.99999997E-7 : f32
    %284 = vector.broadcast %cst_172 : f32 to vector<8x1xf32>
    %285 = arith.addf %283, %284 : vector<8x1xf32>
    %286 = math.rsqrt %285 : vector<8x1xf32>
    %287 = vector.broadcast %276 : vector<8x1xf32> to vector<8x32xf32>
    %288 = arith.subf %270, %287 : vector<8x32xf32>
    %289 = vector.broadcast %286 : vector<8x1xf32> to vector<8x32xf32>
    %290 = arith.mulf %288, %289 : vector<8x32xf32>
    %291 = vector.extract_strided_slice %272 {offsets = [0, 0], sizes = [1, 32], strides = [1, 1]} : vector<2x32xf32> to vector<1x32xf32>
    %292 = vector.broadcast %291 : vector<1x32xf32> to vector<8x32xf32>
    %293 = arith.mulf %290, %292 : vector<8x32xf32>
    %294 = vector.extract_strided_slice %272 {offsets = [1, 0], sizes = [1, 32], strides = [1, 1]} : vector<2x32xf32> to vector<1x32xf32>
    %295 = vector.broadcast %294 : vector<1x32xf32> to vector<8x32xf32>
    %296 = arith.addf %293, %295 : vector<8x32xf32>
    %cst_173 = arith.constant 0.000000e+00 : f32
    %297 = vector.broadcast %cst_173 : f32 to vector<8x32xf32>
    %c12 = arith.constant 12 : index
    %c0_174 = arith.constant 0 : index
    %c0_175 = arith.constant 0 : index
    %298 = vector.load %arg7[%c12, %c0_174, %c0_175] : memref<72x32x8xf32, #tpu.memory_space<vmem>>, vector<1x32x8xf32>
    %299 = vector.shape_cast %298 : vector<1x32x8xf32> to vector<32x8xf32>
    %cst_176 = arith.constant dense<0.000000e+00> : vector<8x8xf32>
    %300 = tpu.matmul %296, %299, %cst_176 {dimension_numbers = #tpu.dot_dimension_numbers<[1], [0], [0], [1], [0, 0, 1, 1], [], []>} : vector<8x32xf32>, vector<32x8xf32>, vector<8x8xf32> -> vector<8x8xf32>
    %c12_177 = arith.constant 12 : index
    %c0_178 = arith.constant 0 : index
    %c0_179 = arith.constant 0 : index
    %301 = vector.load %arg8[%c12_177, %c0_178, %c0_179] : memref<72x1x8xf32, #tpu.memory_space<vmem>>, vector<1x1x8xf32>
    %302 = vector.shape_cast %301 : vector<1x1x8xf32> to vector<1x8xf32>
    %303 = vector.broadcast %302 : vector<1x8xf32> to vector<8x8xf32>
    %304 = arith.addf %300, %303 : vector<8x8xf32>
    %c16 = arith.constant 16 : index
    %c0_180 = arith.constant 0 : index
    %c0_181 = arith.constant 0 : index
    %305 = vector.load %arg7[%c16, %c0_180, %c0_181] : memref<72x32x8xf32, #tpu.memory_space<vmem>>, vector<1x32x8xf32>
    %306 = vector.shape_cast %305 : vector<1x32x8xf32> to vector<32x8xf32>
    %cst_182 = arith.constant dense<0.000000e+00> : vector<8x8xf32>
    %307 = tpu.matmul %296, %306, %cst_182 {dimension_numbers = #tpu.dot_dimension_numbers<[1], [0], [0], [1], [0, 0, 1, 1], [], []>} : vector<8x32xf32>, vector<32x8xf32>, vector<8x8xf32> -> vector<8x8xf32>
    %c16_183 = arith.constant 16 : index
    %c0_184 = arith.constant 0 : index
    %c0_185 = arith.constant 0 : index
    %308 = vector.load %arg8[%c16_183, %c0_184, %c0_185] : memref<72x1x8xf32, #tpu.memory_space<vmem>>, vector<1x1x8xf32>
    %309 = vector.shape_cast %308 : vector<1x1x8xf32> to vector<1x8xf32>
    %310 = vector.broadcast %309 : vector<1x8xf32> to vector<8x8xf32>
    %311 = arith.addf %307, %310 : vector<8x8xf32>
    %c20 = arith.constant 20 : index
    %c0_186 = arith.constant 0 : index
    %c0_187 = arith.constant 0 : index
    %312 = vector.load %arg7[%c20, %c0_186, %c0_187] : memref<72x32x8xf32, #tpu.memory_space<vmem>>, vector<1x32x8xf32>
    %313 = vector.shape_cast %312 : vector<1x32x8xf32> to vector<32x8xf32>
    %cst_188 = arith.constant dense<0.000000e+00> : vector<8x8xf32>
    %314 = tpu.matmul %296, %313, %cst_188 {dimension_numbers = #tpu.dot_dimension_numbers<[1], [0], [0], [1], [0, 0, 1, 1], [], []>} : vector<8x32xf32>, vector<32x8xf32>, vector<8x8xf32> -> vector<8x8xf32>
    %c20_189 = arith.constant 20 : index
    %c0_190 = arith.constant 0 : index
    %c0_191 = arith.constant 0 : index
    %315 = vector.load %arg8[%c20_189, %c0_190, %c0_191] : memref<72x1x8xf32, #tpu.memory_space<vmem>>, vector<1x1x8xf32>
    %316 = vector.shape_cast %315 : vector<1x1x8xf32> to vector<1x8xf32>
    %317 = vector.broadcast %316 : vector<1x8xf32> to vector<8x8xf32>
    %318 = arith.addf %314, %317 : vector<8x8xf32>
    "tpu.trace_start"() <{level = 10 : i32, message = "qd,kd->qk"}> : () -> ()
    %cst_192 = arith.constant dense<0.000000e+00> : vector<8x8xf32>
    %319 = tpu.matmul %304, %311, %cst_192 {dimension_numbers = #tpu.dot_dimension_numbers<[1], [1], [0], [0], [0, 0, 1, 0], [], []>} : vector<8x8xf32>, vector<8x8xf32>, vector<8x8xf32> -> vector<8x8xf32>
    %cst_193 = arith.constant -1.000000e+09 : f32
    "tpu.trace_stop"() : () -> ()
    %320 = vector.broadcast %cst_193 : f32 to vector<8x8xf32>
    %321 = arith.select %9, %319, %320 : vector<8x8xi1>, vector<8x8xf32>
    %cst_194 = arith.constant dense<0xFF800000> : vector<8xf32>
    %322 = vector.multi_reduction <maximumf>, %321, %cst_194 [1] : vector<8x8xf32> to vector<8xf32>
    %323 = vector.shape_cast %322 : vector<8xf32> to vector<8x1xf32>
    %324 = vector.broadcast %323 : vector<8x1xf32> to vector<8x8xf32>
    %325 = arith.subf %321, %324 : vector<8x8xf32>
    %326 = math.exp %325 : vector<8x8xf32>
    %cst_195 = arith.constant dense<0.000000e+00> : vector<8xf32>
    %327 = vector.multi_reduction <add>, %326, %cst_195 [1] : vector<8x8xf32> to vector<8xf32>
    %328 = vector.shape_cast %327 : vector<8xf32> to vector<8x1xf32>
    %329 = tpu.reciprocal %328 {approx = true} : vector<8x1xf32> -> vector<8x1xf32>
    %330 = vector.broadcast %329 : vector<8x1xf32> to vector<8x8xf32>
    %331 = arith.mulf %326, %330 : vector<8x8xf32>
    %cst_196 = arith.constant dense<0.000000e+00> : vector<8x8xf32>
    %332 = tpu.matmul %331, %318, %cst_196 {dimension_numbers = #tpu.dot_dimension_numbers<[1], [0], [0], [1], [0, 0, 1, 1], [], []>} : vector<8x8xf32>, vector<8x8xf32>, vector<8x8xf32> -> vector<8x8xf32>
    %c4_197 = arith.constant 4 : index
    %c0_198 = arith.constant 0 : index
    %c0_199 = arith.constant 0 : index
    %333 = vector.load %arg9[%c4_197, %c0_198, %c0_199] : memref<24x8x32xf32, #tpu.memory_space<vmem>>, vector<1x8x32xf32>
    %334 = vector.shape_cast %333 : vector<1x8x32xf32> to vector<8x32xf32>
    %cst_200 = arith.constant dense<0.000000e+00> : vector<8x32xf32>
    %335 = tpu.matmul %332, %334, %cst_200 {dimension_numbers = #tpu.dot_dimension_numbers<[1], [0], [0], [1], [0, 0, 1, 1], [], []>} : vector<8x8xf32>, vector<8x32xf32>, vector<8x32xf32> -> vector<8x32xf32>
    %336 = arith.addf %297, %335 : vector<8x32xf32>
    %c13 = arith.constant 13 : index
    %c0_201 = arith.constant 0 : index
    %c0_202 = arith.constant 0 : index
    %337 = vector.load %arg7[%c13, %c0_201, %c0_202] : memref<72x32x8xf32, #tpu.memory_space<vmem>>, vector<1x32x8xf32>
    %338 = vector.shape_cast %337 : vector<1x32x8xf32> to vector<32x8xf32>
    %cst_203 = arith.constant dense<0.000000e+00> : vector<8x8xf32>
    %339 = tpu.matmul %296, %338, %cst_203 {dimension_numbers = #tpu.dot_dimension_numbers<[1], [0], [0], [1], [0, 0, 1, 1], [], []>} : vector<8x32xf32>, vector<32x8xf32>, vector<8x8xf32> -> vector<8x8xf32>
    %c13_204 = arith.constant 13 : index
    %c0_205 = arith.constant 0 : index
    %c0_206 = arith.constant 0 : index
    %340 = vector.load %arg8[%c13_204, %c0_205, %c0_206] : memref<72x1x8xf32, #tpu.memory_space<vmem>>, vector<1x1x8xf32>
    %341 = vector.shape_cast %340 : vector<1x1x8xf32> to vector<1x8xf32>
    %342 = vector.broadcast %341 : vector<1x8xf32> to vector<8x8xf32>
    %343 = arith.addf %339, %342 : vector<8x8xf32>
    %c17 = arith.constant 17 : index
    %c0_207 = arith.constant 0 : index
    %c0_208 = arith.constant 0 : index
    %344 = vector.load %arg7[%c17, %c0_207, %c0_208] : memref<72x32x8xf32, #tpu.memory_space<vmem>>, vector<1x32x8xf32>
    %345 = vector.shape_cast %344 : vector<1x32x8xf32> to vector<32x8xf32>
    %cst_209 = arith.constant dense<0.000000e+00> : vector<8x8xf32>
    %346 = tpu.matmul %296, %345, %cst_209 {dimension_numbers = #tpu.dot_dimension_numbers<[1], [0], [0], [1], [0, 0, 1, 1], [], []>} : vector<8x32xf32>, vector<32x8xf32>, vector<8x8xf32> -> vector<8x8xf32>
    %c17_210 = arith.constant 17 : index
    %c0_211 = arith.constant 0 : index
    %c0_212 = arith.constant 0 : index
    %347 = vector.load %arg8[%c17_210, %c0_211, %c0_212] : memref<72x1x8xf32, #tpu.memory_space<vmem>>, vector<1x1x8xf32>
    %348 = vector.shape_cast %347 : vector<1x1x8xf32> to vector<1x8xf32>
    %349 = vector.broadcast %348 : vector<1x8xf32> to vector<8x8xf32>
    %350 = arith.addf %346, %349 : vector<8x8xf32>
    %c21 = arith.constant 21 : index
    %c0_213 = arith.constant 0 : index
    %c0_214 = arith.constant 0 : index
    %351 = vector.load %arg7[%c21, %c0_213, %c0_214] : memref<72x32x8xf32, #tpu.memory_space<vmem>>, vector<1x32x8xf32>
    %352 = vector.shape_cast %351 : vector<1x32x8xf32> to vector<32x8xf32>
    %cst_215 = arith.constant dense<0.000000e+00> : vector<8x8xf32>
    %353 = tpu.matmul %296, %352, %cst_215 {dimension_numbers = #tpu.dot_dimension_numbers<[1], [0], [0], [1], [0, 0, 1, 1], [], []>} : vector<8x32xf32>, vector<32x8xf32>, vector<8x8xf32> -> vector<8x8xf32>
    %c21_216 = arith.constant 21 : index
    %c0_217 = arith.constant 0 : index
    %c0_218 = arith.constant 0 : index
    %354 = vector.load %arg8[%c21_216, %c0_217, %c0_218] : memref<72x1x8xf32, #tpu.memory_space<vmem>>, vector<1x1x8xf32>
    %355 = vector.shape_cast %354 : vector<1x1x8xf32> to vector<1x8xf32>
    %356 = vector.broadcast %355 : vector<1x8xf32> to vector<8x8xf32>
    %357 = arith.addf %353, %356 : vector<8x8xf32>
    "tpu.trace_start"() <{level = 10 : i32, message = "qd,kd->qk"}> : () -> ()
    %cst_219 = arith.constant dense<0.000000e+00> : vector<8x8xf32>
    %358 = tpu.matmul %343, %350, %cst_219 {dimension_numbers = #tpu.dot_dimension_numbers<[1], [1], [0], [0], [0, 0, 1, 0], [], []>} : vector<8x8xf32>, vector<8x8xf32>, vector<8x8xf32> -> vector<8x8xf32>
    %cst_220 = arith.constant -1.000000e+09 : f32
    "tpu.trace_stop"() : () -> ()
    %359 = vector.broadcast %cst_220 : f32 to vector<8x8xf32>
    %360 = arith.select %9, %358, %359 : vector<8x8xi1>, vector<8x8xf32>
    %cst_221 = arith.constant dense<0xFF800000> : vector<8xf32>
    %361 = vector.multi_reduction <maximumf>, %360, %cst_221 [1] : vector<8x8xf32> to vector<8xf32>
    %362 = vector.shape_cast %361 : vector<8xf32> to vector<8x1xf32>
    %363 = vector.broadcast %362 : vector<8x1xf32> to vector<8x8xf32>
    %364 = arith.subf %360, %363 : vector<8x8xf32>
    %365 = math.exp %364 : vector<8x8xf32>
    %cst_222 = arith.constant dense<0.000000e+00> : vector<8xf32>
    %366 = vector.multi_reduction <add>, %365, %cst_222 [1] : vector<8x8xf32> to vector<8xf32>
    %367 = vector.shape_cast %366 : vector<8xf32> to vector<8x1xf32>
    %368 = tpu.reciprocal %367 {approx = true} : vector<8x1xf32> -> vector<8x1xf32>
    %369 = vector.broadcast %368 : vector<8x1xf32> to vector<8x8xf32>
    %370 = arith.mulf %365, %369 : vector<8x8xf32>
    %cst_223 = arith.constant dense<0.000000e+00> : vector<8x8xf32>
    %371 = tpu.matmul %370, %357, %cst_223 {dimension_numbers = #tpu.dot_dimension_numbers<[1], [0], [0], [1], [0, 0, 1, 1], [], []>} : vector<8x8xf32>, vector<8x8xf32>, vector<8x8xf32> -> vector<8x8xf32>
    %c5_224 = arith.constant 5 : index
    %c0_225 = arith.constant 0 : index
    %c0_226 = arith.constant 0 : index
    %372 = vector.load %arg9[%c5_224, %c0_225, %c0_226] : memref<24x8x32xf32, #tpu.memory_space<vmem>>, vector<1x8x32xf32>
    %373 = vector.shape_cast %372 : vector<1x8x32xf32> to vector<8x32xf32>
    %cst_227 = arith.constant dense<0.000000e+00> : vector<8x32xf32>
    %374 = tpu.matmul %371, %373, %cst_227 {dimension_numbers = #tpu.dot_dimension_numbers<[1], [0], [0], [1], [0, 0, 1, 1], [], []>} : vector<8x8xf32>, vector<8x32xf32>, vector<8x32xf32> -> vector<8x32xf32>
    %375 = arith.addf %336, %374 : vector<8x32xf32>
    %c14 = arith.constant 14 : index
    %c0_228 = arith.constant 0 : index
    %c0_229 = arith.constant 0 : index
    %376 = vector.load %arg7[%c14, %c0_228, %c0_229] : memref<72x32x8xf32, #tpu.memory_space<vmem>>, vector<1x32x8xf32>
    %377 = vector.shape_cast %376 : vector<1x32x8xf32> to vector<32x8xf32>
    %cst_230 = arith.constant dense<0.000000e+00> : vector<8x8xf32>
    %378 = tpu.matmul %296, %377, %cst_230 {dimension_numbers = #tpu.dot_dimension_numbers<[1], [0], [0], [1], [0, 0, 1, 1], [], []>} : vector<8x32xf32>, vector<32x8xf32>, vector<8x8xf32> -> vector<8x8xf32>
    %c14_231 = arith.constant 14 : index
    %c0_232 = arith.constant 0 : index
    %c0_233 = arith.constant 0 : index
    %379 = vector.load %arg8[%c14_231, %c0_232, %c0_233] : memref<72x1x8xf32, #tpu.memory_space<vmem>>, vector<1x1x8xf32>
    %380 = vector.shape_cast %379 : vector<1x1x8xf32> to vector<1x8xf32>
    %381 = vector.broadcast %380 : vector<1x8xf32> to vector<8x8xf32>
    %382 = arith.addf %378, %381 : vector<8x8xf32>
    %c18 = arith.constant 18 : index
    %c0_234 = arith.constant 0 : index
    %c0_235 = arith.constant 0 : index
    %383 = vector.load %arg7[%c18, %c0_234, %c0_235] : memref<72x32x8xf32, #tpu.memory_space<vmem>>, vector<1x32x8xf32>
    %384 = vector.shape_cast %383 : vector<1x32x8xf32> to vector<32x8xf32>
    %cst_236 = arith.constant dense<0.000000e+00> : vector<8x8xf32>
    %385 = tpu.matmul %296, %384, %cst_236 {dimension_numbers = #tpu.dot_dimension_numbers<[1], [0], [0], [1], [0, 0, 1, 1], [], []>} : vector<8x32xf32>, vector<32x8xf32>, vector<8x8xf32> -> vector<8x8xf32>
    %c18_237 = arith.constant 18 : index
    %c0_238 = arith.constant 0 : index
    %c0_239 = arith.constant 0 : index
    %386 = vector.load %arg8[%c18_237, %c0_238, %c0_239] : memref<72x1x8xf32, #tpu.memory_space<vmem>>, vector<1x1x8xf32>
    %387 = vector.shape_cast %386 : vector<1x1x8xf32> to vector<1x8xf32>
    %388 = vector.broadcast %387 : vector<1x8xf32> to vector<8x8xf32>
    %389 = arith.addf %385, %388 : vector<8x8xf32>
    %c22 = arith.constant 22 : index
    %c0_240 = arith.constant 0 : index
    %c0_241 = arith.constant 0 : index
    %390 = vector.load %arg7[%c22, %c0_240, %c0_241] : memref<72x32x8xf32, #tpu.memory_space<vmem>>, vector<1x32x8xf32>
    %391 = vector.shape_cast %390 : vector<1x32x8xf32> to vector<32x8xf32>
    %cst_242 = arith.constant dense<0.000000e+00> : vector<8x8xf32>
    %392 = tpu.matmul %296, %391, %cst_242 {dimension_numbers = #tpu.dot_dimension_numbers<[1], [0], [0], [1], [0, 0, 1, 1], [], []>} : vector<8x32xf32>, vector<32x8xf32>, vector<8x8xf32> -> vector<8x8xf32>
    %c22_243 = arith.constant 22 : index
    %c0_244 = arith.constant 0 : index
    %c0_245 = arith.constant 0 : index
    %393 = vector.load %arg8[%c22_243, %c0_244, %c0_245] : memref<72x1x8xf32, #tpu.memory_space<vmem>>, vector<1x1x8xf32>
    %394 = vector.shape_cast %393 : vector<1x1x8xf32> to vector<1x8xf32>
    %395 = vector.broadcast %394 : vector<1x8xf32> to vector<8x8xf32>
    %396 = arith.addf %392, %395 : vector<8x8xf32>
    "tpu.trace_start"() <{level = 10 : i32, message = "qd,kd->qk"}> : () -> ()
    %cst_246 = arith.constant dense<0.000000e+00> : vector<8x8xf32>
    %397 = tpu.matmul %382, %389, %cst_246 {dimension_numbers = #tpu.dot_dimension_numbers<[1], [1], [0], [0], [0, 0, 1, 0], [], []>} : vector<8x8xf32>, vector<8x8xf32>, vector<8x8xf32> -> vector<8x8xf32>
    %cst_247 = arith.constant -1.000000e+09 : f32
    "tpu.trace_stop"() : () -> ()
    %398 = vector.broadcast %cst_247 : f32 to vector<8x8xf32>
    %399 = arith.select %9, %397, %398 : vector<8x8xi1>, vector<8x8xf32>
    %cst_248 = arith.constant dense<0xFF800000> : vector<8xf32>
    %400 = vector.multi_reduction <maximumf>, %399, %cst_248 [1] : vector<8x8xf32> to vector<8xf32>
    %401 = vector.shape_cast %400 : vector<8xf32> to vector<8x1xf32>
    %402 = vector.broadcast %401 : vector<8x1xf32> to vector<8x8xf32>
    %403 = arith.subf %399, %402 : vector<8x8xf32>
    %404 = math.exp %403 : vector<8x8xf32>
    %cst_249 = arith.constant dense<0.000000e+00> : vector<8xf32>
    %405 = vector.multi_reduction <add>, %404, %cst_249 [1] : vector<8x8xf32> to vector<8xf32>
    %406 = vector.shape_cast %405 : vector<8xf32> to vector<8x1xf32>
    %407 = tpu.reciprocal %406 {approx = true} : vector<8x1xf32> -> vector<8x1xf32>
    %408 = vector.broadcast %407 : vector<8x1xf32> to vector<8x8xf32>
    %409 = arith.mulf %404, %408 : vector<8x8xf32>
    %cst_250 = arith.constant dense<0.000000e+00> : vector<8x8xf32>
    %410 = tpu.matmul %409, %396, %cst_250 {dimension_numbers = #tpu.dot_dimension_numbers<[1], [0], [0], [1], [0, 0, 1, 1], [], []>} : vector<8x8xf32>, vector<8x8xf32>, vector<8x8xf32> -> vector<8x8xf32>
    %c6_251 = arith.constant 6 : index
    %c0_252 = arith.constant 0 : index
    %c0_253 = arith.constant 0 : index
    %411 = vector.load %arg9[%c6_251, %c0_252, %c0_253] : memref<24x8x32xf32, #tpu.memory_space<vmem>>, vector<1x8x32xf32>
    %412 = vector.shape_cast %411 : vector<1x8x32xf32> to vector<8x32xf32>
    %cst_254 = arith.constant dense<0.000000e+00> : vector<8x32xf32>
    %413 = tpu.matmul %410, %412, %cst_254 {dimension_numbers = #tpu.dot_dimension_numbers<[1], [0], [0], [1], [0, 0, 1, 1], [], []>} : vector<8x8xf32>, vector<8x32xf32>, vector<8x32xf32> -> vector<8x32xf32>
    %414 = arith.addf %375, %413 : vector<8x32xf32>
    %c15 = arith.constant 15 : index
    %c0_255 = arith.constant 0 : index
    %c0_256 = arith.constant 0 : index
    %415 = vector.load %arg7[%c15, %c0_255, %c0_256] : memref<72x32x8xf32, #tpu.memory_space<vmem>>, vector<1x32x8xf32>
    %416 = vector.shape_cast %415 : vector<1x32x8xf32> to vector<32x8xf32>
    %cst_257 = arith.constant dense<0.000000e+00> : vector<8x8xf32>
    %417 = tpu.matmul %296, %416, %cst_257 {dimension_numbers = #tpu.dot_dimension_numbers<[1], [0], [0], [1], [0, 0, 1, 1], [], []>} : vector<8x32xf32>, vector<32x8xf32>, vector<8x8xf32> -> vector<8x8xf32>
    %c15_258 = arith.constant 15 : index
    %c0_259 = arith.constant 0 : index
    %c0_260 = arith.constant 0 : index
    %418 = vector.load %arg8[%c15_258, %c0_259, %c0_260] : memref<72x1x8xf32, #tpu.memory_space<vmem>>, vector<1x1x8xf32>
    %419 = vector.shape_cast %418 : vector<1x1x8xf32> to vector<1x8xf32>
    %420 = vector.broadcast %419 : vector<1x8xf32> to vector<8x8xf32>
    %421 = arith.addf %417, %420 : vector<8x8xf32>
    %c19 = arith.constant 19 : index
    %c0_261 = arith.constant 0 : index
    %c0_262 = arith.constant 0 : index
    %422 = vector.load %arg7[%c19, %c0_261, %c0_262] : memref<72x32x8xf32, #tpu.memory_space<vmem>>, vector<1x32x8xf32>
    %423 = vector.shape_cast %422 : vector<1x32x8xf32> to vector<32x8xf32>
    %cst_263 = arith.constant dense<0.000000e+00> : vector<8x8xf32>
    %424 = tpu.matmul %296, %423, %cst_263 {dimension_numbers = #tpu.dot_dimension_numbers<[1], [0], [0], [1], [0, 0, 1, 1], [], []>} : vector<8x32xf32>, vector<32x8xf32>, vector<8x8xf32> -> vector<8x8xf32>
    %c19_264 = arith.constant 19 : index
    %c0_265 = arith.constant 0 : index
    %c0_266 = arith.constant 0 : index
    %425 = vector.load %arg8[%c19_264, %c0_265, %c0_266] : memref<72x1x8xf32, #tpu.memory_space<vmem>>, vector<1x1x8xf32>
    %426 = vector.shape_cast %425 : vector<1x1x8xf32> to vector<1x8xf32>
    %427 = vector.broadcast %426 : vector<1x8xf32> to vector<8x8xf32>
    %428 = arith.addf %424, %427 : vector<8x8xf32>
    %c23 = arith.constant 23 : index
    %c0_267 = arith.constant 0 : index
    %c0_268 = arith.constant 0 : index
    %429 = vector.load %arg7[%c23, %c0_267, %c0_268] : memref<72x32x8xf32, #tpu.memory_space<vmem>>, vector<1x32x8xf32>
    %430 = vector.shape_cast %429 : vector<1x32x8xf32> to vector<32x8xf32>
    %cst_269 = arith.constant dense<0.000000e+00> : vector<8x8xf32>
    %431 = tpu.matmul %296, %430, %cst_269 {dimension_numbers = #tpu.dot_dimension_numbers<[1], [0], [0], [1], [0, 0, 1, 1], [], []>} : vector<8x32xf32>, vector<32x8xf32>, vector<8x8xf32> -> vector<8x8xf32>
    %c23_270 = arith.constant 23 : index
    %c0_271 = arith.constant 0 : index
    %c0_272 = arith.constant 0 : index
    %432 = vector.load %arg8[%c23_270, %c0_271, %c0_272] : memref<72x1x8xf32, #tpu.memory_space<vmem>>, vector<1x1x8xf32>
    %433 = vector.shape_cast %432 : vector<1x1x8xf32> to vector<1x8xf32>
    %434 = vector.broadcast %433 : vector<1x8xf32> to vector<8x8xf32>
    %435 = arith.addf %431, %434 : vector<8x8xf32>
    "tpu.trace_start"() <{level = 10 : i32, message = "qd,kd->qk"}> : () -> ()
    %cst_273 = arith.constant dense<0.000000e+00> : vector<8x8xf32>
    %436 = tpu.matmul %421, %428, %cst_273 {dimension_numbers = #tpu.dot_dimension_numbers<[1], [1], [0], [0], [0, 0, 1, 0], [], []>} : vector<8x8xf32>, vector<8x8xf32>, vector<8x8xf32> -> vector<8x8xf32>
    %cst_274 = arith.constant -1.000000e+09 : f32
    "tpu.trace_stop"() : () -> ()
    %437 = vector.broadcast %cst_274 : f32 to vector<8x8xf32>
    %438 = arith.select %9, %436, %437 : vector<8x8xi1>, vector<8x8xf32>
    %cst_275 = arith.constant dense<0xFF800000> : vector<8xf32>
    %439 = vector.multi_reduction <maximumf>, %438, %cst_275 [1] : vector<8x8xf32> to vector<8xf32>
    %440 = vector.shape_cast %439 : vector<8xf32> to vector<8x1xf32>
    %441 = vector.broadcast %440 : vector<8x1xf32> to vector<8x8xf32>
    %442 = arith.subf %438, %441 : vector<8x8xf32>
    %443 = math.exp %442 : vector<8x8xf32>
    %cst_276 = arith.constant dense<0.000000e+00> : vector<8xf32>
    %444 = vector.multi_reduction <add>, %443, %cst_276 [1] : vector<8x8xf32> to vector<8xf32>
    %445 = vector.shape_cast %444 : vector<8xf32> to vector<8x1xf32>
    %446 = tpu.reciprocal %445 {approx = true} : vector<8x1xf32> -> vector<8x1xf32>
    %447 = vector.broadcast %446 : vector<8x1xf32> to vector<8x8xf32>
    %448 = arith.mulf %443, %447 : vector<8x8xf32>
    %cst_277 = arith.constant dense<0.000000e+00> : vector<8x8xf32>
    %449 = tpu.matmul %448, %435, %cst_277 {dimension_numbers = #tpu.dot_dimension_numbers<[1], [0], [0], [1], [0, 0, 1, 1], [], []>} : vector<8x8xf32>, vector<8x8xf32>, vector<8x8xf32> -> vector<8x8xf32>
    %c7_278 = arith.constant 7 : index
    %c0_279 = arith.constant 0 : index
    %c0_280 = arith.constant 0 : index
    %450 = vector.load %arg9[%c7_278, %c0_279, %c0_280] : memref<24x8x32xf32, #tpu.memory_space<vmem>>, vector<1x8x32xf32>
    %451 = vector.shape_cast %450 : vector<1x8x32xf32> to vector<8x32xf32>
    %cst_281 = arith.constant dense<0.000000e+00> : vector<8x32xf32>
    %452 = tpu.matmul %449, %451, %cst_281 {dimension_numbers = #tpu.dot_dimension_numbers<[1], [0], [0], [1], [0, 0, 1, 1], [], []>} : vector<8x8xf32>, vector<8x32xf32>, vector<8x32xf32> -> vector<8x32xf32>
    %453 = arith.addf %414, %452 : vector<8x32xf32>
    %c1_282 = arith.constant 1 : index
    %c0_283 = arith.constant 0 : index
    %c0_284 = arith.constant 0 : index
    %454 = vector.load %arg10[%c1_282, %c0_283, %c0_284] : memref<6x1x32xf32, #tpu.memory_space<vmem>>, vector<1x1x32xf32>
    %455 = vector.shape_cast %454 : vector<1x1x32xf32> to vector<1x32xf32>
    %456 = vector.broadcast %455 : vector<1x32xf32> to vector<8x32xf32>
    %457 = arith.addf %453, %456 : vector<8x32xf32>
    %458 = arith.addf %270, %457 : vector<8x32xf32>
    %c3_285 = arith.constant 3 : index
    %c0_286 = arith.constant 0 : index
    %c0_287 = arith.constant 0 : index
    %459 = vector.load %arg15[%c3_285, %c0_286, %c0_287] : memref<12x2x32xf32, #tpu.memory_space<vmem>>, vector<1x2x32xf32>
    %460 = vector.shape_cast %459 : vector<1x2x32xf32> to vector<2x32xf32>
    %cst_288 = arith.constant dense<0.000000e+00> : vector<8xf32>
    %461 = vector.multi_reduction <add>, %458, %cst_288 [1] : vector<8x32xf32> to vector<8xf32>
    %462 = vector.shape_cast %461 : vector<8xf32> to vector<8x1xf32>
    %cst_289 = arith.constant 3.200000e+01 : f32
    %463 = vector.broadcast %cst_289 : f32 to vector<8x1xf32>
    %464 = arith.divf %462, %463 : vector<8x1xf32>
    %465 = arith.mulf %458, %458 : vector<8x32xf32>
    %cst_290 = arith.constant dense<0.000000e+00> : vector<8xf32>
    %466 = vector.multi_reduction <add>, %465, %cst_290 [1] : vector<8x32xf32> to vector<8xf32>
    %467 = vector.shape_cast %466 : vector<8xf32> to vector<8x1xf32>
    %cst_291 = arith.constant 3.200000e+01 : f32
    %468 = vector.broadcast %cst_291 : f32 to vector<8x1xf32>
    %469 = arith.divf %467, %468 : vector<8x1xf32>
    %470 = arith.mulf %464, %464 : vector<8x1xf32>
    %471 = arith.subf %469, %470 : vector<8x1xf32>
    %cst_292 = arith.constant 9.99999997E-7 : f32
    %472 = vector.broadcast %cst_292 : f32 to vector<8x1xf32>
    %473 = arith.addf %471, %472 : vector<8x1xf32>
    %474 = math.rsqrt %473 : vector<8x1xf32>
    %475 = vector.broadcast %464 : vector<8x1xf32> to vector<8x32xf32>
    %476 = arith.subf %458, %475 : vector<8x32xf32>
    %477 = vector.broadcast %474 : vector<8x1xf32> to vector<8x32xf32>
    %478 = arith.mulf %476, %477 : vector<8x32xf32>
    %479 = vector.extract_strided_slice %460 {offsets = [0, 0], sizes = [1, 32], strides = [1, 1]} : vector<2x32xf32> to vector<1x32xf32>
    %480 = vector.broadcast %479 : vector<1x32xf32> to vector<8x32xf32>
    %481 = arith.mulf %478, %480 : vector<8x32xf32>
    %482 = vector.extract_strided_slice %460 {offsets = [1, 0], sizes = [1, 32], strides = [1, 1]} : vector<2x32xf32> to vector<1x32xf32>
    %483 = vector.broadcast %482 : vector<1x32xf32> to vector<8x32xf32>
    %484 = arith.addf %481, %483 : vector<8x32xf32>
    %c1_293 = arith.constant 1 : index
    %c0_294 = arith.constant 0 : index
    %c0_295 = arith.constant 0 : index
    %485 = vector.load %arg11[%c1_293, %c0_294, %c0_295] : memref<4x32x64xf32, #tpu.memory_space<vmem>>, vector<1x32x64xf32>
    %486 = vector.shape_cast %485 : vector<1x32x64xf32> to vector<32x64xf32>
    %cst_296 = arith.constant dense<0.000000e+00> : vector<8x64xf32>
    %487 = tpu.matmul %484, %486, %cst_296 {dimension_numbers = #tpu.dot_dimension_numbers<[1], [0], [0], [1], [0, 0, 1, 1], [], []>} : vector<8x32xf32>, vector<32x64xf32>, vector<8x64xf32> -> vector<8x64xf32>
    %c1_297 = arith.constant 1 : index
    %c0_298 = arith.constant 0 : index
    %c0_299 = arith.constant 0 : index
    %488 = vector.load %arg12[%c1_297, %c0_298, %c0_299] : memref<4x1x64xf32, #tpu.memory_space<vmem>>, vector<1x1x64xf32>
    %489 = vector.shape_cast %488 : vector<1x1x64xf32> to vector<1x64xf32>
    %490 = vector.broadcast %489 : vector<1x64xf32> to vector<8x64xf32>
    %491 = arith.addf %487, %490 : vector<8x64xf32>
    %cst_300 = arith.constant 0.000000e+00 : f32
    %492 = vector.broadcast %cst_300 : f32 to vector<8x64xf32>
    %493 = arith.maximumf %491, %492 : vector<8x64xf32>
    %c1_301 = arith.constant 1 : index
    %c0_302 = arith.constant 0 : index
    %c0_303 = arith.constant 0 : index
    %494 = vector.load %arg13[%c1_301, %c0_302, %c0_303] : memref<4x64x32xf32, #tpu.memory_space<vmem>>, vector<1x64x32xf32>
    %495 = vector.shape_cast %494 : vector<1x64x32xf32> to vector<64x32xf32>
    %cst_304 = arith.constant dense<0.000000e+00> : vector<8x32xf32>
    %496 = tpu.matmul %493, %495, %cst_304 {dimension_numbers = #tpu.dot_dimension_numbers<[1], [0], [0], [1], [0, 0, 1, 1], [], []>} : vector<8x64xf32>, vector<64x32xf32>, vector<8x32xf32> -> vector<8x32xf32>
    %c1_305 = arith.constant 1 : index
    %c0_306 = arith.constant 0 : index
    %c0_307 = arith.constant 0 : index
    %497 = vector.load %arg14[%c1_305, %c0_306, %c0_307] : memref<4x1x32xf32, #tpu.memory_space<vmem>>, vector<1x1x32xf32>
    %498 = vector.shape_cast %497 : vector<1x1x32xf32> to vector<1x32xf32>
    %499 = vector.broadcast %498 : vector<1x32xf32> to vector<8x32xf32>
    %500 = arith.addf %496, %499 : vector<8x32xf32>
    %501 = arith.addf %458, %500 : vector<8x32xf32>
    %c4_308 = arith.constant 4 : index
    %c0_309 = arith.constant 0 : index
    %c0_310 = arith.constant 0 : index
    %502 = vector.load %arg15[%c4_308, %c0_309, %c0_310] : memref<12x2x32xf32, #tpu.memory_space<vmem>>, vector<1x2x32xf32>
    %503 = vector.shape_cast %502 : vector<1x2x32xf32> to vector<2x32xf32>
    %cst_311 = arith.constant dense<0.000000e+00> : vector<8xf32>
    %504 = vector.multi_reduction <add>, %501, %cst_311 [1] : vector<8x32xf32> to vector<8xf32>
    %505 = vector.shape_cast %504 : vector<8xf32> to vector<8x1xf32>
    %cst_312 = arith.constant 3.200000e+01 : f32
    %506 = vector.broadcast %cst_312 : f32 to vector<8x1xf32>
    %507 = arith.divf %505, %506 : vector<8x1xf32>
    %508 = arith.mulf %501, %501 : vector<8x32xf32>
    %cst_313 = arith.constant dense<0.000000e+00> : vector<8xf32>
    %509 = vector.multi_reduction <add>, %508, %cst_313 [1] : vector<8x32xf32> to vector<8xf32>
    %510 = vector.shape_cast %509 : vector<8xf32> to vector<8x1xf32>
    %cst_314 = arith.constant 3.200000e+01 : f32
    %511 = vector.broadcast %cst_314 : f32 to vector<8x1xf32>
    %512 = arith.divf %510, %511 : vector<8x1xf32>
    %513 = arith.mulf %507, %507 : vector<8x1xf32>
    %514 = arith.subf %512, %513 : vector<8x1xf32>
    %cst_315 = arith.constant 9.99999997E-7 : f32
    %515 = vector.broadcast %cst_315 : f32 to vector<8x1xf32>
    %516 = arith.addf %514, %515 : vector<8x1xf32>
    %517 = math.rsqrt %516 : vector<8x1xf32>
    %518 = vector.broadcast %507 : vector<8x1xf32> to vector<8x32xf32>
    %519 = arith.subf %501, %518 : vector<8x32xf32>
    %520 = vector.broadcast %517 : vector<8x1xf32> to vector<8x32xf32>
    %521 = arith.mulf %519, %520 : vector<8x32xf32>
    %522 = vector.extract_strided_slice %503 {offsets = [0, 0], sizes = [1, 32], strides = [1, 1]} : vector<2x32xf32> to vector<1x32xf32>
    %523 = vector.broadcast %522 : vector<1x32xf32> to vector<8x32xf32>
    %524 = arith.mulf %521, %523 : vector<8x32xf32>
    %525 = vector.extract_strided_slice %503 {offsets = [1, 0], sizes = [1, 32], strides = [1, 1]} : vector<2x32xf32> to vector<1x32xf32>
    %526 = vector.broadcast %525 : vector<1x32xf32> to vector<8x32xf32>
    %527 = arith.addf %524, %526 : vector<8x32xf32>
    %c5_316 = arith.constant 5 : index
    %c0_317 = arith.constant 0 : index
    %c0_318 = arith.constant 0 : index
    %528 = vector.load %arg15[%c5_316, %c0_317, %c0_318] : memref<12x2x32xf32, #tpu.memory_space<vmem>>, vector<1x2x32xf32>
    %529 = vector.shape_cast %528 : vector<1x2x32xf32> to vector<2x32xf32>
    %cst_319 = arith.constant dense<0.000000e+00> : vector<8xf32>
    %530 = vector.multi_reduction <add>, %39, %cst_319 [1] : vector<8x32xf32> to vector<8xf32>
    %531 = vector.shape_cast %530 : vector<8xf32> to vector<8x1xf32>
    %cst_320 = arith.constant 3.200000e+01 : f32
    %532 = vector.broadcast %cst_320 : f32 to vector<8x1xf32>
    %533 = arith.divf %531, %532 : vector<8x1xf32>
    %534 = arith.mulf %39, %39 : vector<8x32xf32>
    %cst_321 = arith.constant dense<0.000000e+00> : vector<8xf32>
    %535 = vector.multi_reduction <add>, %534, %cst_321 [1] : vector<8x32xf32> to vector<8xf32>
    %536 = vector.shape_cast %535 : vector<8xf32> to vector<8x1xf32>
    %cst_322 = arith.constant 3.200000e+01 : f32
    %537 = vector.broadcast %cst_322 : f32 to vector<8x1xf32>
    %538 = arith.divf %536, %537 : vector<8x1xf32>
    %539 = arith.mulf %533, %533 : vector<8x1xf32>
    %540 = arith.subf %538, %539 : vector<8x1xf32>
    %cst_323 = arith.constant 9.99999997E-7 : f32
    %541 = vector.broadcast %cst_323 : f32 to vector<8x1xf32>
    %542 = arith.addf %540, %541 : vector<8x1xf32>
    %543 = math.rsqrt %542 : vector<8x1xf32>
    %544 = vector.broadcast %533 : vector<8x1xf32> to vector<8x32xf32>
    %545 = arith.subf %39, %544 : vector<8x32xf32>
    %546 = vector.broadcast %543 : vector<8x1xf32> to vector<8x32xf32>
    %547 = arith.mulf %545, %546 : vector<8x32xf32>
    %548 = vector.extract_strided_slice %529 {offsets = [0, 0], sizes = [1, 32], strides = [1, 1]} : vector<2x32xf32> to vector<1x32xf32>
    %549 = vector.broadcast %548 : vector<1x32xf32> to vector<8x32xf32>
    %550 = arith.mulf %547, %549 : vector<8x32xf32>
    %551 = vector.extract_strided_slice %529 {offsets = [1, 0], sizes = [1, 32], strides = [1, 1]} : vector<2x32xf32> to vector<1x32xf32>
    %552 = vector.broadcast %551 : vector<1x32xf32> to vector<8x32xf32>
    %553 = arith.addf %550, %552 : vector<8x32xf32>
    %cst_324 = arith.constant 0.000000e+00 : f32
    %554 = vector.broadcast %cst_324 : f32 to vector<8x32xf32>
    %c24 = arith.constant 24 : index
    %c0_325 = arith.constant 0 : index
    %c0_326 = arith.constant 0 : index
    %555 = vector.load %arg7[%c24, %c0_325, %c0_326] : memref<72x32x8xf32, #tpu.memory_space<vmem>>, vector<1x32x8xf32>
    %556 = vector.shape_cast %555 : vector<1x32x8xf32> to vector<32x8xf32>
    %cst_327 = arith.constant dense<0.000000e+00> : vector<8x8xf32>
    %557 = tpu.matmul %553, %556, %cst_327 {dimension_numbers = #tpu.dot_dimension_numbers<[1], [0], [0], [1], [0, 0, 1, 1], [], []>} : vector<8x32xf32>, vector<32x8xf32>, vector<8x8xf32> -> vector<8x8xf32>
    %c24_328 = arith.constant 24 : index
    %c0_329 = arith.constant 0 : index
    %c0_330 = arith.constant 0 : index
    %558 = vector.load %arg8[%c24_328, %c0_329, %c0_330] : memref<72x1x8xf32, #tpu.memory_space<vmem>>, vector<1x1x8xf32>
    %559 = vector.shape_cast %558 : vector<1x1x8xf32> to vector<1x8xf32>
    %560 = vector.broadcast %559 : vector<1x8xf32> to vector<8x8xf32>
    %561 = arith.addf %557, %560 : vector<8x8xf32>
    %c28 = arith.constant 28 : index
    %c0_331 = arith.constant 0 : index
    %c0_332 = arith.constant 0 : index
    %562 = vector.load %arg7[%c28, %c0_331, %c0_332] : memref<72x32x8xf32, #tpu.memory_space<vmem>>, vector<1x32x8xf32>
    %563 = vector.shape_cast %562 : vector<1x32x8xf32> to vector<32x8xf32>
    %cst_333 = arith.constant dense<0.000000e+00> : vector<8x8xf32>
    %564 = tpu.matmul %553, %563, %cst_333 {dimension_numbers = #tpu.dot_dimension_numbers<[1], [0], [0], [1], [0, 0, 1, 1], [], []>} : vector<8x32xf32>, vector<32x8xf32>, vector<8x8xf32> -> vector<8x8xf32>
    %c28_334 = arith.constant 28 : index
    %c0_335 = arith.constant 0 : index
    %c0_336 = arith.constant 0 : index
    %565 = vector.load %arg8[%c28_334, %c0_335, %c0_336] : memref<72x1x8xf32, #tpu.memory_space<vmem>>, vector<1x1x8xf32>
    %566 = vector.shape_cast %565 : vector<1x1x8xf32> to vector<1x8xf32>
    %567 = vector.broadcast %566 : vector<1x8xf32> to vector<8x8xf32>
    %568 = arith.addf %564, %567 : vector<8x8xf32>
    %c32 = arith.constant 32 : index
    %c0_337 = arith.constant 0 : index
    %c0_338 = arith.constant 0 : index
    %569 = vector.load %arg7[%c32, %c0_337, %c0_338] : memref<72x32x8xf32, #tpu.memory_space<vmem>>, vector<1x32x8xf32>
    %570 = vector.shape_cast %569 : vector<1x32x8xf32> to vector<32x8xf32>
    %cst_339 = arith.constant dense<0.000000e+00> : vector<8x8xf32>
    %571 = tpu.matmul %553, %570, %cst_339 {dimension_numbers = #tpu.dot_dimension_numbers<[1], [0], [0], [1], [0, 0, 1, 1], [], []>} : vector<8x32xf32>, vector<32x8xf32>, vector<8x8xf32> -> vector<8x8xf32>
    %c32_340 = arith.constant 32 : index
    %c0_341 = arith.constant 0 : index
    %c0_342 = arith.constant 0 : index
    %572 = vector.load %arg8[%c32_340, %c0_341, %c0_342] : memref<72x1x8xf32, #tpu.memory_space<vmem>>, vector<1x1x8xf32>
    %573 = vector.shape_cast %572 : vector<1x1x8xf32> to vector<1x8xf32>
    %574 = vector.broadcast %573 : vector<1x8xf32> to vector<8x8xf32>
    %575 = arith.addf %571, %574 : vector<8x8xf32>
    "tpu.trace_start"() <{level = 10 : i32, message = "qd,kd->qk"}> : () -> ()
    %cst_343 = arith.constant dense<0.000000e+00> : vector<8x8xf32>
    %576 = tpu.matmul %561, %568, %cst_343 {dimension_numbers = #tpu.dot_dimension_numbers<[1], [1], [0], [0], [0, 0, 1, 0], [], []>} : vector<8x8xf32>, vector<8x8xf32>, vector<8x8xf32> -> vector<8x8xf32>
    %cst_344 = arith.constant -1.000000e+09 : f32
    "tpu.trace_stop"() : () -> ()
    %577 = vector.broadcast %cst_344 : f32 to vector<8x8xf32>
    %578 = arith.select %17, %576, %577 : vector<8x8xi1>, vector<8x8xf32>
    %cst_345 = arith.constant dense<0xFF800000> : vector<8xf32>
    %579 = vector.multi_reduction <maximumf>, %578, %cst_345 [1] : vector<8x8xf32> to vector<8xf32>
    %580 = vector.shape_cast %579 : vector<8xf32> to vector<8x1xf32>
    %581 = vector.broadcast %580 : vector<8x1xf32> to vector<8x8xf32>
    %582 = arith.subf %578, %581 : vector<8x8xf32>
    %583 = math.exp %582 : vector<8x8xf32>
    %cst_346 = arith.constant dense<0.000000e+00> : vector<8xf32>
    %584 = vector.multi_reduction <add>, %583, %cst_346 [1] : vector<8x8xf32> to vector<8xf32>
    %585 = vector.shape_cast %584 : vector<8xf32> to vector<8x1xf32>
    %586 = tpu.reciprocal %585 {approx = true} : vector<8x1xf32> -> vector<8x1xf32>
    %587 = vector.broadcast %586 : vector<8x1xf32> to vector<8x8xf32>
    %588 = arith.mulf %583, %587 : vector<8x8xf32>
    %cst_347 = arith.constant dense<0.000000e+00> : vector<8x8xf32>
    %589 = tpu.matmul %588, %575, %cst_347 {dimension_numbers = #tpu.dot_dimension_numbers<[1], [0], [0], [1], [0, 0, 1, 1], [], []>} : vector<8x8xf32>, vector<8x8xf32>, vector<8x8xf32> -> vector<8x8xf32>
    %c8_348 = arith.constant 8 : index
    %c0_349 = arith.constant 0 : index
    %c0_350 = arith.constant 0 : index
    %590 = vector.load %arg9[%c8_348, %c0_349, %c0_350] : memref<24x8x32xf32, #tpu.memory_space<vmem>>, vector<1x8x32xf32>
    %591 = vector.shape_cast %590 : vector<1x8x32xf32> to vector<8x32xf32>
    %cst_351 = arith.constant dense<0.000000e+00> : vector<8x32xf32>
    %592 = tpu.matmul %589, %591, %cst_351 {dimension_numbers = #tpu.dot_dimension_numbers<[1], [0], [0], [1], [0, 0, 1, 1], [], []>} : vector<8x8xf32>, vector<8x32xf32>, vector<8x32xf32> -> vector<8x32xf32>
    %593 = arith.addf %554, %592 : vector<8x32xf32>
    %c25 = arith.constant 25 : index
    %c0_352 = arith.constant 0 : index
    %c0_353 = arith.constant 0 : index
    %594 = vector.load %arg7[%c25, %c0_352, %c0_353] : memref<72x32x8xf32, #tpu.memory_space<vmem>>, vector<1x32x8xf32>
    %595 = vector.shape_cast %594 : vector<1x32x8xf32> to vector<32x8xf32>
    %cst_354 = arith.constant dense<0.000000e+00> : vector<8x8xf32>
    %596 = tpu.matmul %553, %595, %cst_354 {dimension_numbers = #tpu.dot_dimension_numbers<[1], [0], [0], [1], [0, 0, 1, 1], [], []>} : vector<8x32xf32>, vector<32x8xf32>, vector<8x8xf32> -> vector<8x8xf32>
    %c25_355 = arith.constant 25 : index
    %c0_356 = arith.constant 0 : index
    %c0_357 = arith.constant 0 : index
    %597 = vector.load %arg8[%c25_355, %c0_356, %c0_357] : memref<72x1x8xf32, #tpu.memory_space<vmem>>, vector<1x1x8xf32>
    %598 = vector.shape_cast %597 : vector<1x1x8xf32> to vector<1x8xf32>
    %599 = vector.broadcast %598 : vector<1x8xf32> to vector<8x8xf32>
    %600 = arith.addf %596, %599 : vector<8x8xf32>
    %c29 = arith.constant 29 : index
    %c0_358 = arith.constant 0 : index
    %c0_359 = arith.constant 0 : index
    %601 = vector.load %arg7[%c29, %c0_358, %c0_359] : memref<72x32x8xf32, #tpu.memory_space<vmem>>, vector<1x32x8xf32>
    %602 = vector.shape_cast %601 : vector<1x32x8xf32> to vector<32x8xf32>
    %cst_360 = arith.constant dense<0.000000e+00> : vector<8x8xf32>
    %603 = tpu.matmul %553, %602, %cst_360 {dimension_numbers = #tpu.dot_dimension_numbers<[1], [0], [0], [1], [0, 0, 1, 1], [], []>} : vector<8x32xf32>, vector<32x8xf32>, vector<8x8xf32> -> vector<8x8xf32>
    %c29_361 = arith.constant 29 : index
    %c0_362 = arith.constant 0 : index
    %c0_363 = arith.constant 0 : index
    %604 = vector.load %arg8[%c29_361, %c0_362, %c0_363] : memref<72x1x8xf32, #tpu.memory_space<vmem>>, vector<1x1x8xf32>
    %605 = vector.shape_cast %604 : vector<1x1x8xf32> to vector<1x8xf32>
    %606 = vector.broadcast %605 : vector<1x8xf32> to vector<8x8xf32>
    %607 = arith.addf %603, %606 : vector<8x8xf32>
    %c33 = arith.constant 33 : index
    %c0_364 = arith.constant 0 : index
    %c0_365 = arith.constant 0 : index
    %608 = vector.load %arg7[%c33, %c0_364, %c0_365] : memref<72x32x8xf32, #tpu.memory_space<vmem>>, vector<1x32x8xf32>
    %609 = vector.shape_cast %608 : vector<1x32x8xf32> to vector<32x8xf32>
    %cst_366 = arith.constant dense<0.000000e+00> : vector<8x8xf32>
    %610 = tpu.matmul %553, %609, %cst_366 {dimension_numbers = #tpu.dot_dimension_numbers<[1], [0], [0], [1], [0, 0, 1, 1], [], []>} : vector<8x32xf32>, vector<32x8xf32>, vector<8x8xf32> -> vector<8x8xf32>
    %c33_367 = arith.constant 33 : index
    %c0_368 = arith.constant 0 : index
    %c0_369 = arith.constant 0 : index
    %611 = vector.load %arg8[%c33_367, %c0_368, %c0_369] : memref<72x1x8xf32, #tpu.memory_space<vmem>>, vector<1x1x8xf32>
    %612 = vector.shape_cast %611 : vector<1x1x8xf32> to vector<1x8xf32>
    %613 = vector.broadcast %612 : vector<1x8xf32> to vector<8x8xf32>
    %614 = arith.addf %610, %613 : vector<8x8xf32>
    "tpu.trace_start"() <{level = 10 : i32, message = "qd,kd->qk"}> : () -> ()
    %cst_370 = arith.constant dense<0.000000e+00> : vector<8x8xf32>
    %615 = tpu.matmul %600, %607, %cst_370 {dimension_numbers = #tpu.dot_dimension_numbers<[1], [1], [0], [0], [0, 0, 1, 0], [], []>} : vector<8x8xf32>, vector<8x8xf32>, vector<8x8xf32> -> vector<8x8xf32>
    %cst_371 = arith.constant -1.000000e+09 : f32
    "tpu.trace_stop"() : () -> ()
    %616 = vector.broadcast %cst_371 : f32 to vector<8x8xf32>
    %617 = arith.select %17, %615, %616 : vector<8x8xi1>, vector<8x8xf32>
    %cst_372 = arith.constant dense<0xFF800000> : vector<8xf32>
    %618 = vector.multi_reduction <maximumf>, %617, %cst_372 [1] : vector<8x8xf32> to vector<8xf32>
    %619 = vector.shape_cast %618 : vector<8xf32> to vector<8x1xf32>
    %620 = vector.broadcast %619 : vector<8x1xf32> to vector<8x8xf32>
    %621 = arith.subf %617, %620 : vector<8x8xf32>
    %622 = math.exp %621 : vector<8x8xf32>
    %cst_373 = arith.constant dense<0.000000e+00> : vector<8xf32>
    %623 = vector.multi_reduction <add>, %622, %cst_373 [1] : vector<8x8xf32> to vector<8xf32>
    %624 = vector.shape_cast %623 : vector<8xf32> to vector<8x1xf32>
    %625 = tpu.reciprocal %624 {approx = true} : vector<8x1xf32> -> vector<8x1xf32>
    %626 = vector.broadcast %625 : vector<8x1xf32> to vector<8x8xf32>
    %627 = arith.mulf %622, %626 : vector<8x8xf32>
    %cst_374 = arith.constant dense<0.000000e+00> : vector<8x8xf32>
    %628 = tpu.matmul %627, %614, %cst_374 {dimension_numbers = #tpu.dot_dimension_numbers<[1], [0], [0], [1], [0, 0, 1, 1], [], []>} : vector<8x8xf32>, vector<8x8xf32>, vector<8x8xf32> -> vector<8x8xf32>
    %c9_375 = arith.constant 9 : index
    %c0_376 = arith.constant 0 : index
    %c0_377 = arith.constant 0 : index
    %629 = vector.load %arg9[%c9_375, %c0_376, %c0_377] : memref<24x8x32xf32, #tpu.memory_space<vmem>>, vector<1x8x32xf32>
    %630 = vector.shape_cast %629 : vector<1x8x32xf32> to vector<8x32xf32>
    %cst_378 = arith.constant dense<0.000000e+00> : vector<8x32xf32>
    %631 = tpu.matmul %628, %630, %cst_378 {dimension_numbers = #tpu.dot_dimension_numbers<[1], [0], [0], [1], [0, 0, 1, 1], [], []>} : vector<8x8xf32>, vector<8x32xf32>, vector<8x32xf32> -> vector<8x32xf32>
    %632 = arith.addf %593, %631 : vector<8x32xf32>
    %c26 = arith.constant 26 : index
    %c0_379 = arith.constant 0 : index
    %c0_380 = arith.constant 0 : index
    %633 = vector.load %arg7[%c26, %c0_379, %c0_380] : memref<72x32x8xf32, #tpu.memory_space<vmem>>, vector<1x32x8xf32>
    %634 = vector.shape_cast %633 : vector<1x32x8xf32> to vector<32x8xf32>
    %cst_381 = arith.constant dense<0.000000e+00> : vector<8x8xf32>
    %635 = tpu.matmul %553, %634, %cst_381 {dimension_numbers = #tpu.dot_dimension_numbers<[1], [0], [0], [1], [0, 0, 1, 1], [], []>} : vector<8x32xf32>, vector<32x8xf32>, vector<8x8xf32> -> vector<8x8xf32>
    %c26_382 = arith.constant 26 : index
    %c0_383 = arith.constant 0 : index
    %c0_384 = arith.constant 0 : index
    %636 = vector.load %arg8[%c26_382, %c0_383, %c0_384] : memref<72x1x8xf32, #tpu.memory_space<vmem>>, vector<1x1x8xf32>
    %637 = vector.shape_cast %636 : vector<1x1x8xf32> to vector<1x8xf32>
    %638 = vector.broadcast %637 : vector<1x8xf32> to vector<8x8xf32>
    %639 = arith.addf %635, %638 : vector<8x8xf32>
    %c30 = arith.constant 30 : index
    %c0_385 = arith.constant 0 : index
    %c0_386 = arith.constant 0 : index
    %640 = vector.load %arg7[%c30, %c0_385, %c0_386] : memref<72x32x8xf32, #tpu.memory_space<vmem>>, vector<1x32x8xf32>
    %641 = vector.shape_cast %640 : vector<1x32x8xf32> to vector<32x8xf32>
    %cst_387 = arith.constant dense<0.000000e+00> : vector<8x8xf32>
    %642 = tpu.matmul %553, %641, %cst_387 {dimension_numbers = #tpu.dot_dimension_numbers<[1], [0], [0], [1], [0, 0, 1, 1], [], []>} : vector<8x32xf32>, vector<32x8xf32>, vector<8x8xf32> -> vector<8x8xf32>
    %c30_388 = arith.constant 30 : index
    %c0_389 = arith.constant 0 : index
    %c0_390 = arith.constant 0 : index
    %643 = vector.load %arg8[%c30_388, %c0_389, %c0_390] : memref<72x1x8xf32, #tpu.memory_space<vmem>>, vector<1x1x8xf32>
    %644 = vector.shape_cast %643 : vector<1x1x8xf32> to vector<1x8xf32>
    %645 = vector.broadcast %644 : vector<1x8xf32> to vector<8x8xf32>
    %646 = arith.addf %642, %645 : vector<8x8xf32>
    %c34 = arith.constant 34 : index
    %c0_391 = arith.constant 0 : index
    %c0_392 = arith.constant 0 : index
    %647 = vector.load %arg7[%c34, %c0_391, %c0_392] : memref<72x32x8xf32, #tpu.memory_space<vmem>>, vector<1x32x8xf32>
    %648 = vector.shape_cast %647 : vector<1x32x8xf32> to vector<32x8xf32>
    %cst_393 = arith.constant dense<0.000000e+00> : vector<8x8xf32>
    %649 = tpu.matmul %553, %648, %cst_393 {dimension_numbers = #tpu.dot_dimension_numbers<[1], [0], [0], [1], [0, 0, 1, 1], [], []>} : vector<8x32xf32>, vector<32x8xf32>, vector<8x8xf32> -> vector<8x8xf32>
    %c34_394 = arith.constant 34 : index
    %c0_395 = arith.constant 0 : index
    %c0_396 = arith.constant 0 : index
    %650 = vector.load %arg8[%c34_394, %c0_395, %c0_396] : memref<72x1x8xf32, #tpu.memory_space<vmem>>, vector<1x1x8xf32>
    %651 = vector.shape_cast %650 : vector<1x1x8xf32> to vector<1x8xf32>
    %652 = vector.broadcast %651 : vector<1x8xf32> to vector<8x8xf32>
    %653 = arith.addf %649, %652 : vector<8x8xf32>
    "tpu.trace_start"() <{level = 10 : i32, message = "qd,kd->qk"}> : () -> ()
    %cst_397 = arith.constant dense<0.000000e+00> : vector<8x8xf32>
    %654 = tpu.matmul %639, %646, %cst_397 {dimension_numbers = #tpu.dot_dimension_numbers<[1], [1], [0], [0], [0, 0, 1, 0], [], []>} : vector<8x8xf32>, vector<8x8xf32>, vector<8x8xf32> -> vector<8x8xf32>
    %cst_398 = arith.constant -1.000000e+09 : f32
    "tpu.trace_stop"() : () -> ()
    %655 = vector.broadcast %cst_398 : f32 to vector<8x8xf32>
    %656 = arith.select %17, %654, %655 : vector<8x8xi1>, vector<8x8xf32>
    %cst_399 = arith.constant dense<0xFF800000> : vector<8xf32>
    %657 = vector.multi_reduction <maximumf>, %656, %cst_399 [1] : vector<8x8xf32> to vector<8xf32>
    %658 = vector.shape_cast %657 : vector<8xf32> to vector<8x1xf32>
    %659 = vector.broadcast %658 : vector<8x1xf32> to vector<8x8xf32>
    %660 = arith.subf %656, %659 : vector<8x8xf32>
    %661 = math.exp %660 : vector<8x8xf32>
    %cst_400 = arith.constant dense<0.000000e+00> : vector<8xf32>
    %662 = vector.multi_reduction <add>, %661, %cst_400 [1] : vector<8x8xf32> to vector<8xf32>
    %663 = vector.shape_cast %662 : vector<8xf32> to vector<8x1xf32>
    %664 = tpu.reciprocal %663 {approx = true} : vector<8x1xf32> -> vector<8x1xf32>
    %665 = vector.broadcast %664 : vector<8x1xf32> to vector<8x8xf32>
    %666 = arith.mulf %661, %665 : vector<8x8xf32>
    %cst_401 = arith.constant dense<0.000000e+00> : vector<8x8xf32>
    %667 = tpu.matmul %666, %653, %cst_401 {dimension_numbers = #tpu.dot_dimension_numbers<[1], [0], [0], [1], [0, 0, 1, 1], [], []>} : vector<8x8xf32>, vector<8x8xf32>, vector<8x8xf32> -> vector<8x8xf32>
    %c10_402 = arith.constant 10 : index
    %c0_403 = arith.constant 0 : index
    %c0_404 = arith.constant 0 : index
    %668 = vector.load %arg9[%c10_402, %c0_403, %c0_404] : memref<24x8x32xf32, #tpu.memory_space<vmem>>, vector<1x8x32xf32>
    %669 = vector.shape_cast %668 : vector<1x8x32xf32> to vector<8x32xf32>
    %cst_405 = arith.constant dense<0.000000e+00> : vector<8x32xf32>
    %670 = tpu.matmul %667, %669, %cst_405 {dimension_numbers = #tpu.dot_dimension_numbers<[1], [0], [0], [1], [0, 0, 1, 1], [], []>} : vector<8x8xf32>, vector<8x32xf32>, vector<8x32xf32> -> vector<8x32xf32>
    %671 = arith.addf %632, %670 : vector<8x32xf32>
    %c27 = arith.constant 27 : index
    %c0_406 = arith.constant 0 : index
    %c0_407 = arith.constant 0 : index
    %672 = vector.load %arg7[%c27, %c0_406, %c0_407] : memref<72x32x8xf32, #tpu.memory_space<vmem>>, vector<1x32x8xf32>
    %673 = vector.shape_cast %672 : vector<1x32x8xf32> to vector<32x8xf32>
    %cst_408 = arith.constant dense<0.000000e+00> : vector<8x8xf32>
    %674 = tpu.matmul %553, %673, %cst_408 {dimension_numbers = #tpu.dot_dimension_numbers<[1], [0], [0], [1], [0, 0, 1, 1], [], []>} : vector<8x32xf32>, vector<32x8xf32>, vector<8x8xf32> -> vector<8x8xf32>
    %c27_409 = arith.constant 27 : index
    %c0_410 = arith.constant 0 : index
    %c0_411 = arith.constant 0 : index
    %675 = vector.load %arg8[%c27_409, %c0_410, %c0_411] : memref<72x1x8xf32, #tpu.memory_space<vmem>>, vector<1x1x8xf32>
    %676 = vector.shape_cast %675 : vector<1x1x8xf32> to vector<1x8xf32>
    %677 = vector.broadcast %676 : vector<1x8xf32> to vector<8x8xf32>
    %678 = arith.addf %674, %677 : vector<8x8xf32>
    %c31 = arith.constant 31 : index
    %c0_412 = arith.constant 0 : index
    %c0_413 = arith.constant 0 : index
    %679 = vector.load %arg7[%c31, %c0_412, %c0_413] : memref<72x32x8xf32, #tpu.memory_space<vmem>>, vector<1x32x8xf32>
    %680 = vector.shape_cast %679 : vector<1x32x8xf32> to vector<32x8xf32>
    %cst_414 = arith.constant dense<0.000000e+00> : vector<8x8xf32>
    %681 = tpu.matmul %553, %680, %cst_414 {dimension_numbers = #tpu.dot_dimension_numbers<[1], [0], [0], [1], [0, 0, 1, 1], [], []>} : vector<8x32xf32>, vector<32x8xf32>, vector<8x8xf32> -> vector<8x8xf32>
    %c31_415 = arith.constant 31 : index
    %c0_416 = arith.constant 0 : index
    %c0_417 = arith.constant 0 : index
    %682 = vector.load %arg8[%c31_415, %c0_416, %c0_417] : memref<72x1x8xf32, #tpu.memory_space<vmem>>, vector<1x1x8xf32>
    %683 = vector.shape_cast %682 : vector<1x1x8xf32> to vector<1x8xf32>
    %684 = vector.broadcast %683 : vector<1x8xf32> to vector<8x8xf32>
    %685 = arith.addf %681, %684 : vector<8x8xf32>
    %c35 = arith.constant 35 : index
    %c0_418 = arith.constant 0 : index
    %c0_419 = arith.constant 0 : index
    %686 = vector.load %arg7[%c35, %c0_418, %c0_419] : memref<72x32x8xf32, #tpu.memory_space<vmem>>, vector<1x32x8xf32>
    %687 = vector.shape_cast %686 : vector<1x32x8xf32> to vector<32x8xf32>
    %cst_420 = arith.constant dense<0.000000e+00> : vector<8x8xf32>
    %688 = tpu.matmul %553, %687, %cst_420 {dimension_numbers = #tpu.dot_dimension_numbers<[1], [0], [0], [1], [0, 0, 1, 1], [], []>} : vector<8x32xf32>, vector<32x8xf32>, vector<8x8xf32> -> vector<8x8xf32>
    %c35_421 = arith.constant 35 : index
    %c0_422 = arith.constant 0 : index
    %c0_423 = arith.constant 0 : index
    %689 = vector.load %arg8[%c35_421, %c0_422, %c0_423] : memref<72x1x8xf32, #tpu.memory_space<vmem>>, vector<1x1x8xf32>
    %690 = vector.shape_cast %689 : vector<1x1x8xf32> to vector<1x8xf32>
    %691 = vector.broadcast %690 : vector<1x8xf32> to vector<8x8xf32>
    %692 = arith.addf %688, %691 : vector<8x8xf32>
    "tpu.trace_start"() <{level = 10 : i32, message = "qd,kd->qk"}> : () -> ()
    %cst_424 = arith.constant dense<0.000000e+00> : vector<8x8xf32>
    %693 = tpu.matmul %678, %685, %cst_424 {dimension_numbers = #tpu.dot_dimension_numbers<[1], [1], [0], [0], [0, 0, 1, 0], [], []>} : vector<8x8xf32>, vector<8x8xf32>, vector<8x8xf32> -> vector<8x8xf32>
    %cst_425 = arith.constant -1.000000e+09 : f32
    "tpu.trace_stop"() : () -> ()
    %694 = vector.broadcast %cst_425 : f32 to vector<8x8xf32>
    %695 = arith.select %17, %693, %694 : vector<8x8xi1>, vector<8x8xf32>
    %cst_426 = arith.constant dense<0xFF800000> : vector<8xf32>
    %696 = vector.multi_reduction <maximumf>, %695, %cst_426 [1] : vector<8x8xf32> to vector<8xf32>
    %697 = vector.shape_cast %696 : vector<8xf32> to vector<8x1xf32>
    %698 = vector.broadcast %697 : vector<8x1xf32> to vector<8x8xf32>
    %699 = arith.subf %695, %698 : vector<8x8xf32>
    %700 = math.exp %699 : vector<8x8xf32>
    %cst_427 = arith.constant dense<0.000000e+00> : vector<8xf32>
    %701 = vector.multi_reduction <add>, %700, %cst_427 [1] : vector<8x8xf32> to vector<8xf32>
    %702 = vector.shape_cast %701 : vector<8xf32> to vector<8x1xf32>
    %703 = tpu.reciprocal %702 {approx = true} : vector<8x1xf32> -> vector<8x1xf32>
    %704 = vector.broadcast %703 : vector<8x1xf32> to vector<8x8xf32>
    %705 = arith.mulf %700, %704 : vector<8x8xf32>
    %cst_428 = arith.constant dense<0.000000e+00> : vector<8x8xf32>
    %706 = tpu.matmul %705, %692, %cst_428 {dimension_numbers = #tpu.dot_dimension_numbers<[1], [0], [0], [1], [0, 0, 1, 1], [], []>} : vector<8x8xf32>, vector<8x8xf32>, vector<8x8xf32> -> vector<8x8xf32>
    %c11_429 = arith.constant 11 : index
    %c0_430 = arith.constant 0 : index
    %c0_431 = arith.constant 0 : index
    %707 = vector.load %arg9[%c11_429, %c0_430, %c0_431] : memref<24x8x32xf32, #tpu.memory_space<vmem>>, vector<1x8x32xf32>
    %708 = vector.shape_cast %707 : vector<1x8x32xf32> to vector<8x32xf32>
    %cst_432 = arith.constant dense<0.000000e+00> : vector<8x32xf32>
    %709 = tpu.matmul %706, %708, %cst_432 {dimension_numbers = #tpu.dot_dimension_numbers<[1], [0], [0], [1], [0, 0, 1, 1], [], []>} : vector<8x8xf32>, vector<8x32xf32>, vector<8x32xf32> -> vector<8x32xf32>
    %710 = arith.addf %671, %709 : vector<8x32xf32>
    %c2_433 = arith.constant 2 : index
    %c0_434 = arith.constant 0 : index
    %c0_435 = arith.constant 0 : index
    %711 = vector.load %arg10[%c2_433, %c0_434, %c0_435] : memref<6x1x32xf32, #tpu.memory_space<vmem>>, vector<1x1x32xf32>
    %712 = vector.shape_cast %711 : vector<1x1x32xf32> to vector<1x32xf32>
    %713 = vector.broadcast %712 : vector<1x32xf32> to vector<8x32xf32>
    %714 = arith.addf %710, %713 : vector<8x32xf32>
    %715 = arith.addf %39, %714 : vector<8x32xf32>
    %c6_436 = arith.constant 6 : index
    %c0_437 = arith.constant 0 : index
    %c0_438 = arith.constant 0 : index
    %716 = vector.load %arg15[%c6_436, %c0_437, %c0_438] : memref<12x2x32xf32, #tpu.memory_space<vmem>>, vector<1x2x32xf32>
    %717 = vector.shape_cast %716 : vector<1x2x32xf32> to vector<2x32xf32>
    %cst_439 = arith.constant dense<0.000000e+00> : vector<8xf32>
    %718 = vector.multi_reduction <add>, %715, %cst_439 [1] : vector<8x32xf32> to vector<8xf32>
    %719 = vector.shape_cast %718 : vector<8xf32> to vector<8x1xf32>
    %cst_440 = arith.constant 3.200000e+01 : f32
    %720 = vector.broadcast %cst_440 : f32 to vector<8x1xf32>
    %721 = arith.divf %719, %720 : vector<8x1xf32>
    %722 = arith.mulf %715, %715 : vector<8x32xf32>
    %cst_441 = arith.constant dense<0.000000e+00> : vector<8xf32>
    %723 = vector.multi_reduction <add>, %722, %cst_441 [1] : vector<8x32xf32> to vector<8xf32>
    %724 = vector.shape_cast %723 : vector<8xf32> to vector<8x1xf32>
    %cst_442 = arith.constant 3.200000e+01 : f32
    %725 = vector.broadcast %cst_442 : f32 to vector<8x1xf32>
    %726 = arith.divf %724, %725 : vector<8x1xf32>
    %727 = arith.mulf %721, %721 : vector<8x1xf32>
    %728 = arith.subf %726, %727 : vector<8x1xf32>
    %cst_443 = arith.constant 9.99999997E-7 : f32
    %729 = vector.broadcast %cst_443 : f32 to vector<8x1xf32>
    %730 = arith.addf %728, %729 : vector<8x1xf32>
    %731 = math.rsqrt %730 : vector<8x1xf32>
    %732 = vector.broadcast %721 : vector<8x1xf32> to vector<8x32xf32>
    %733 = arith.subf %715, %732 : vector<8x32xf32>
    %734 = vector.broadcast %731 : vector<8x1xf32> to vector<8x32xf32>
    %735 = arith.mulf %733, %734 : vector<8x32xf32>
    %736 = vector.extract_strided_slice %717 {offsets = [0, 0], sizes = [1, 32], strides = [1, 1]} : vector<2x32xf32> to vector<1x32xf32>
    %737 = vector.broadcast %736 : vector<1x32xf32> to vector<8x32xf32>
    %738 = arith.mulf %735, %737 : vector<8x32xf32>
    %739 = vector.extract_strided_slice %717 {offsets = [1, 0], sizes = [1, 32], strides = [1, 1]} : vector<2x32xf32> to vector<1x32xf32>
    %740 = vector.broadcast %739 : vector<1x32xf32> to vector<8x32xf32>
    %741 = arith.addf %738, %740 : vector<8x32xf32>
    %cst_444 = arith.constant 0.000000e+00 : f32
    %742 = vector.broadcast %cst_444 : f32 to vector<8x32xf32>
    %c36 = arith.constant 36 : index
    %c0_445 = arith.constant 0 : index
    %c0_446 = arith.constant 0 : index
    %743 = vector.load %arg7[%c36, %c0_445, %c0_446] : memref<72x32x8xf32, #tpu.memory_space<vmem>>, vector<1x32x8xf32>
    %744 = vector.shape_cast %743 : vector<1x32x8xf32> to vector<32x8xf32>
    %cst_447 = arith.constant dense<0.000000e+00> : vector<8x8xf32>
    %745 = tpu.matmul %741, %744, %cst_447 {dimension_numbers = #tpu.dot_dimension_numbers<[1], [0], [0], [1], [0, 0, 1, 1], [], []>} : vector<8x32xf32>, vector<32x8xf32>, vector<8x8xf32> -> vector<8x8xf32>
    %c36_448 = arith.constant 36 : index
    %c0_449 = arith.constant 0 : index
    %c0_450 = arith.constant 0 : index
    %746 = vector.load %arg8[%c36_448, %c0_449, %c0_450] : memref<72x1x8xf32, #tpu.memory_space<vmem>>, vector<1x1x8xf32>
    %747 = vector.shape_cast %746 : vector<1x1x8xf32> to vector<1x8xf32>
    %748 = vector.broadcast %747 : vector<1x8xf32> to vector<8x8xf32>
    %749 = arith.addf %745, %748 : vector<8x8xf32>
    %c40 = arith.constant 40 : index
    %c0_451 = arith.constant 0 : index
    %c0_452 = arith.constant 0 : index
    %750 = vector.load %arg7[%c40, %c0_451, %c0_452] : memref<72x32x8xf32, #tpu.memory_space<vmem>>, vector<1x32x8xf32>
    %751 = vector.shape_cast %750 : vector<1x32x8xf32> to vector<32x8xf32>
    %cst_453 = arith.constant dense<0.000000e+00> : vector<8x8xf32>
    %752 = tpu.matmul %527, %751, %cst_453 {dimension_numbers = #tpu.dot_dimension_numbers<[1], [0], [0], [1], [0, 0, 1, 1], [], []>} : vector<8x32xf32>, vector<32x8xf32>, vector<8x8xf32> -> vector<8x8xf32>
    %c40_454 = arith.constant 40 : index
    %c0_455 = arith.constant 0 : index
    %c0_456 = arith.constant 0 : index
    %753 = vector.load %arg8[%c40_454, %c0_455, %c0_456] : memref<72x1x8xf32, #tpu.memory_space<vmem>>, vector<1x1x8xf32>
    %754 = vector.shape_cast %753 : vector<1x1x8xf32> to vector<1x8xf32>
    %755 = vector.broadcast %754 : vector<1x8xf32> to vector<8x8xf32>
    %756 = arith.addf %752, %755 : vector<8x8xf32>
    %c44 = arith.constant 44 : index
    %c0_457 = arith.constant 0 : index
    %c0_458 = arith.constant 0 : index
    %757 = vector.load %arg7[%c44, %c0_457, %c0_458] : memref<72x32x8xf32, #tpu.memory_space<vmem>>, vector<1x32x8xf32>
    %758 = vector.shape_cast %757 : vector<1x32x8xf32> to vector<32x8xf32>
    %cst_459 = arith.constant dense<0.000000e+00> : vector<8x8xf32>
    %759 = tpu.matmul %527, %758, %cst_459 {dimension_numbers = #tpu.dot_dimension_numbers<[1], [0], [0], [1], [0, 0, 1, 1], [], []>} : vector<8x32xf32>, vector<32x8xf32>, vector<8x8xf32> -> vector<8x8xf32>
    %c44_460 = arith.constant 44 : index
    %c0_461 = arith.constant 0 : index
    %c0_462 = arith.constant 0 : index
    %760 = vector.load %arg8[%c44_460, %c0_461, %c0_462] : memref<72x1x8xf32, #tpu.memory_space<vmem>>, vector<1x1x8xf32>
    %761 = vector.shape_cast %760 : vector<1x1x8xf32> to vector<1x8xf32>
    %762 = vector.broadcast %761 : vector<1x8xf32> to vector<8x8xf32>
    %763 = arith.addf %759, %762 : vector<8x8xf32>
    "tpu.trace_start"() <{level = 10 : i32, message = "qd,kd->qk"}> : () -> ()
    %cst_463 = arith.constant dense<0.000000e+00> : vector<8x8xf32>
    %764 = tpu.matmul %749, %756, %cst_463 {dimension_numbers = #tpu.dot_dimension_numbers<[1], [1], [0], [0], [0, 0, 1, 0], [], []>} : vector<8x8xf32>, vector<8x8xf32>, vector<8x8xf32> -> vector<8x8xf32>
    %cst_464 = arith.constant -1.000000e+09 : f32
    "tpu.trace_stop"() : () -> ()
    %765 = vector.broadcast %cst_464 : f32 to vector<8x8xf32>
    %766 = arith.select %11, %764, %765 : vector<8x8xi1>, vector<8x8xf32>
    %cst_465 = arith.constant dense<0xFF800000> : vector<8xf32>
    %767 = vector.multi_reduction <maximumf>, %766, %cst_465 [1] : vector<8x8xf32> to vector<8xf32>
    %768 = vector.shape_cast %767 : vector<8xf32> to vector<8x1xf32>
    %769 = vector.broadcast %768 : vector<8x1xf32> to vector<8x8xf32>
    %770 = arith.subf %766, %769 : vector<8x8xf32>
    %771 = math.exp %770 : vector<8x8xf32>
    %cst_466 = arith.constant dense<0.000000e+00> : vector<8xf32>
    %772 = vector.multi_reduction <add>, %771, %cst_466 [1] : vector<8x8xf32> to vector<8xf32>
    %773 = vector.shape_cast %772 : vector<8xf32> to vector<8x1xf32>
    %774 = tpu.reciprocal %773 {approx = true} : vector<8x1xf32> -> vector<8x1xf32>
    %775 = vector.broadcast %774 : vector<8x1xf32> to vector<8x8xf32>
    %776 = arith.mulf %771, %775 : vector<8x8xf32>
    %cst_467 = arith.constant dense<0.000000e+00> : vector<8x8xf32>
    %777 = tpu.matmul %776, %763, %cst_467 {dimension_numbers = #tpu.dot_dimension_numbers<[1], [0], [0], [1], [0, 0, 1, 1], [], []>} : vector<8x8xf32>, vector<8x8xf32>, vector<8x8xf32> -> vector<8x8xf32>
    %c12_468 = arith.constant 12 : index
    %c0_469 = arith.constant 0 : index
    %c0_470 = arith.constant 0 : index
    %778 = vector.load %arg9[%c12_468, %c0_469, %c0_470] : memref<24x8x32xf32, #tpu.memory_space<vmem>>, vector<1x8x32xf32>
    %779 = vector.shape_cast %778 : vector<1x8x32xf32> to vector<8x32xf32>
    %cst_471 = arith.constant dense<0.000000e+00> : vector<8x32xf32>
    %780 = tpu.matmul %777, %779, %cst_471 {dimension_numbers = #tpu.dot_dimension_numbers<[1], [0], [0], [1], [0, 0, 1, 1], [], []>} : vector<8x8xf32>, vector<8x32xf32>, vector<8x32xf32> -> vector<8x32xf32>
    %781 = arith.addf %742, %780 : vector<8x32xf32>
    %c37 = arith.constant 37 : index
    %c0_472 = arith.constant 0 : index
    %c0_473 = arith.constant 0 : index
    %782 = vector.load %arg7[%c37, %c0_472, %c0_473] : memref<72x32x8xf32, #tpu.memory_space<vmem>>, vector<1x32x8xf32>
    %783 = vector.shape_cast %782 : vector<1x32x8xf32> to vector<32x8xf32>
    %cst_474 = arith.constant dense<0.000000e+00> : vector<8x8xf32>
    %784 = tpu.matmul %741, %783, %cst_474 {dimension_numbers = #tpu.dot_dimension_numbers<[1], [0], [0], [1], [0, 0, 1, 1], [], []>} : vector<8x32xf32>, vector<32x8xf32>, vector<8x8xf32> -> vector<8x8xf32>
    %c37_475 = arith.constant 37 : index
    %c0_476 = arith.constant 0 : index
    %c0_477 = arith.constant 0 : index
    %785 = vector.load %arg8[%c37_475, %c0_476, %c0_477] : memref<72x1x8xf32, #tpu.memory_space<vmem>>, vector<1x1x8xf32>
    %786 = vector.shape_cast %785 : vector<1x1x8xf32> to vector<1x8xf32>
    %787 = vector.broadcast %786 : vector<1x8xf32> to vector<8x8xf32>
    %788 = arith.addf %784, %787 : vector<8x8xf32>
    %c41 = arith.constant 41 : index
    %c0_478 = arith.constant 0 : index
    %c0_479 = arith.constant 0 : index
    %789 = vector.load %arg7[%c41, %c0_478, %c0_479] : memref<72x32x8xf32, #tpu.memory_space<vmem>>, vector<1x32x8xf32>
    %790 = vector.shape_cast %789 : vector<1x32x8xf32> to vector<32x8xf32>
    %cst_480 = arith.constant dense<0.000000e+00> : vector<8x8xf32>
    %791 = tpu.matmul %527, %790, %cst_480 {dimension_numbers = #tpu.dot_dimension_numbers<[1], [0], [0], [1], [0, 0, 1, 1], [], []>} : vector<8x32xf32>, vector<32x8xf32>, vector<8x8xf32> -> vector<8x8xf32>
    %c41_481 = arith.constant 41 : index
    %c0_482 = arith.constant 0 : index
    %c0_483 = arith.constant 0 : index
    %792 = vector.load %arg8[%c41_481, %c0_482, %c0_483] : memref<72x1x8xf32, #tpu.memory_space<vmem>>, vector<1x1x8xf32>
    %793 = vector.shape_cast %792 : vector<1x1x8xf32> to vector<1x8xf32>
    %794 = vector.broadcast %793 : vector<1x8xf32> to vector<8x8xf32>
    %795 = arith.addf %791, %794 : vector<8x8xf32>
    %c45 = arith.constant 45 : index
    %c0_484 = arith.constant 0 : index
    %c0_485 = arith.constant 0 : index
    %796 = vector.load %arg7[%c45, %c0_484, %c0_485] : memref<72x32x8xf32, #tpu.memory_space<vmem>>, vector<1x32x8xf32>
    %797 = vector.shape_cast %796 : vector<1x32x8xf32> to vector<32x8xf32>
    %cst_486 = arith.constant dense<0.000000e+00> : vector<8x8xf32>
    %798 = tpu.matmul %527, %797, %cst_486 {dimension_numbers = #tpu.dot_dimension_numbers<[1], [0], [0], [1], [0, 0, 1, 1], [], []>} : vector<8x32xf32>, vector<32x8xf32>, vector<8x8xf32> -> vector<8x8xf32>
    %c45_487 = arith.constant 45 : index
    %c0_488 = arith.constant 0 : index
    %c0_489 = arith.constant 0 : index
    %799 = vector.load %arg8[%c45_487, %c0_488, %c0_489] : memref<72x1x8xf32, #tpu.memory_space<vmem>>, vector<1x1x8xf32>
    %800 = vector.shape_cast %799 : vector<1x1x8xf32> to vector<1x8xf32>
    %801 = vector.broadcast %800 : vector<1x8xf32> to vector<8x8xf32>
    %802 = arith.addf %798, %801 : vector<8x8xf32>
    "tpu.trace_start"() <{level = 10 : i32, message = "qd,kd->qk"}> : () -> ()
    %cst_490 = arith.constant dense<0.000000e+00> : vector<8x8xf32>
    %803 = tpu.matmul %788, %795, %cst_490 {dimension_numbers = #tpu.dot_dimension_numbers<[1], [1], [0], [0], [0, 0, 1, 0], [], []>} : vector<8x8xf32>, vector<8x8xf32>, vector<8x8xf32> -> vector<8x8xf32>
    %cst_491 = arith.constant -1.000000e+09 : f32
    "tpu.trace_stop"() : () -> ()
    %804 = vector.broadcast %cst_491 : f32 to vector<8x8xf32>
    %805 = arith.select %11, %803, %804 : vector<8x8xi1>, vector<8x8xf32>
    %cst_492 = arith.constant dense<0xFF800000> : vector<8xf32>
    %806 = vector.multi_reduction <maximumf>, %805, %cst_492 [1] : vector<8x8xf32> to vector<8xf32>
    %807 = vector.shape_cast %806 : vector<8xf32> to vector<8x1xf32>
    %808 = vector.broadcast %807 : vector<8x1xf32> to vector<8x8xf32>
    %809 = arith.subf %805, %808 : vector<8x8xf32>
    %810 = math.exp %809 : vector<8x8xf32>
    %cst_493 = arith.constant dense<0.000000e+00> : vector<8xf32>
    %811 = vector.multi_reduction <add>, %810, %cst_493 [1] : vector<8x8xf32> to vector<8xf32>
    %812 = vector.shape_cast %811 : vector<8xf32> to vector<8x1xf32>
    %813 = tpu.reciprocal %812 {approx = true} : vector<8x1xf32> -> vector<8x1xf32>
    %814 = vector.broadcast %813 : vector<8x1xf32> to vector<8x8xf32>
    %815 = arith.mulf %810, %814 : vector<8x8xf32>
    %cst_494 = arith.constant dense<0.000000e+00> : vector<8x8xf32>
    %816 = tpu.matmul %815, %802, %cst_494 {dimension_numbers = #tpu.dot_dimension_numbers<[1], [0], [0], [1], [0, 0, 1, 1], [], []>} : vector<8x8xf32>, vector<8x8xf32>, vector<8x8xf32> -> vector<8x8xf32>
    %c13_495 = arith.constant 13 : index
    %c0_496 = arith.constant 0 : index
    %c0_497 = arith.constant 0 : index
    %817 = vector.load %arg9[%c13_495, %c0_496, %c0_497] : memref<24x8x32xf32, #tpu.memory_space<vmem>>, vector<1x8x32xf32>
    %818 = vector.shape_cast %817 : vector<1x8x32xf32> to vector<8x32xf32>
    %cst_498 = arith.constant dense<0.000000e+00> : vector<8x32xf32>
    %819 = tpu.matmul %816, %818, %cst_498 {dimension_numbers = #tpu.dot_dimension_numbers<[1], [0], [0], [1], [0, 0, 1, 1], [], []>} : vector<8x8xf32>, vector<8x32xf32>, vector<8x32xf32> -> vector<8x32xf32>
    %820 = arith.addf %781, %819 : vector<8x32xf32>
    %c38 = arith.constant 38 : index
    %c0_499 = arith.constant 0 : index
    %c0_500 = arith.constant 0 : index
    %821 = vector.load %arg7[%c38, %c0_499, %c0_500] : memref<72x32x8xf32, #tpu.memory_space<vmem>>, vector<1x32x8xf32>
    %822 = vector.shape_cast %821 : vector<1x32x8xf32> to vector<32x8xf32>
    %cst_501 = arith.constant dense<0.000000e+00> : vector<8x8xf32>
    %823 = tpu.matmul %741, %822, %cst_501 {dimension_numbers = #tpu.dot_dimension_numbers<[1], [0], [0], [1], [0, 0, 1, 1], [], []>} : vector<8x32xf32>, vector<32x8xf32>, vector<8x8xf32> -> vector<8x8xf32>
    %c38_502 = arith.constant 38 : index
    %c0_503 = arith.constant 0 : index
    %c0_504 = arith.constant 0 : index
    %824 = vector.load %arg8[%c38_502, %c0_503, %c0_504] : memref<72x1x8xf32, #tpu.memory_space<vmem>>, vector<1x1x8xf32>
    %825 = vector.shape_cast %824 : vector<1x1x8xf32> to vector<1x8xf32>
    %826 = vector.broadcast %825 : vector<1x8xf32> to vector<8x8xf32>
    %827 = arith.addf %823, %826 : vector<8x8xf32>
    %c42 = arith.constant 42 : index
    %c0_505 = arith.constant 0 : index
    %c0_506 = arith.constant 0 : index
    %828 = vector.load %arg7[%c42, %c0_505, %c0_506] : memref<72x32x8xf32, #tpu.memory_space<vmem>>, vector<1x32x8xf32>
    %829 = vector.shape_cast %828 : vector<1x32x8xf32> to vector<32x8xf32>
    %cst_507 = arith.constant dense<0.000000e+00> : vector<8x8xf32>
    %830 = tpu.matmul %527, %829, %cst_507 {dimension_numbers = #tpu.dot_dimension_numbers<[1], [0], [0], [1], [0, 0, 1, 1], [], []>} : vector<8x32xf32>, vector<32x8xf32>, vector<8x8xf32> -> vector<8x8xf32>
    %c42_508 = arith.constant 42 : index
    %c0_509 = arith.constant 0 : index
    %c0_510 = arith.constant 0 : index
    %831 = vector.load %arg8[%c42_508, %c0_509, %c0_510] : memref<72x1x8xf32, #tpu.memory_space<vmem>>, vector<1x1x8xf32>
    %832 = vector.shape_cast %831 : vector<1x1x8xf32> to vector<1x8xf32>
    %833 = vector.broadcast %832 : vector<1x8xf32> to vector<8x8xf32>
    %834 = arith.addf %830, %833 : vector<8x8xf32>
    %c46 = arith.constant 46 : index
    %c0_511 = arith.constant 0 : index
    %c0_512 = arith.constant 0 : index
    %835 = vector.load %arg7[%c46, %c0_511, %c0_512] : memref<72x32x8xf32, #tpu.memory_space<vmem>>, vector<1x32x8xf32>
    %836 = vector.shape_cast %835 : vector<1x32x8xf32> to vector<32x8xf32>
    %cst_513 = arith.constant dense<0.000000e+00> : vector<8x8xf32>
    %837 = tpu.matmul %527, %836, %cst_513 {dimension_numbers = #tpu.dot_dimension_numbers<[1], [0], [0], [1], [0, 0, 1, 1], [], []>} : vector<8x32xf32>, vector<32x8xf32>, vector<8x8xf32> -> vector<8x8xf32>
    %c46_514 = arith.constant 46 : index
    %c0_515 = arith.constant 0 : index
    %c0_516 = arith.constant 0 : index
    %838 = vector.load %arg8[%c46_514, %c0_515, %c0_516] : memref<72x1x8xf32, #tpu.memory_space<vmem>>, vector<1x1x8xf32>
    %839 = vector.shape_cast %838 : vector<1x1x8xf32> to vector<1x8xf32>
    %840 = vector.broadcast %839 : vector<1x8xf32> to vector<8x8xf32>
    %841 = arith.addf %837, %840 : vector<8x8xf32>
    "tpu.trace_start"() <{level = 10 : i32, message = "qd,kd->qk"}> : () -> ()
    %cst_517 = arith.constant dense<0.000000e+00> : vector<8x8xf32>
    %842 = tpu.matmul %827, %834, %cst_517 {dimension_numbers = #tpu.dot_dimension_numbers<[1], [1], [0], [0], [0, 0, 1, 0], [], []>} : vector<8x8xf32>, vector<8x8xf32>, vector<8x8xf32> -> vector<8x8xf32>
    %cst_518 = arith.constant -1.000000e+09 : f32
    "tpu.trace_stop"() : () -> ()
    %843 = vector.broadcast %cst_518 : f32 to vector<8x8xf32>
    %844 = arith.select %11, %842, %843 : vector<8x8xi1>, vector<8x8xf32>
    %cst_519 = arith.constant dense<0xFF800000> : vector<8xf32>
    %845 = vector.multi_reduction <maximumf>, %844, %cst_519 [1] : vector<8x8xf32> to vector<8xf32>
    %846 = vector.shape_cast %845 : vector<8xf32> to vector<8x1xf32>
    %847 = vector.broadcast %846 : vector<8x1xf32> to vector<8x8xf32>
    %848 = arith.subf %844, %847 : vector<8x8xf32>
    %849 = math.exp %848 : vector<8x8xf32>
    %cst_520 = arith.constant dense<0.000000e+00> : vector<8xf32>
    %850 = vector.multi_reduction <add>, %849, %cst_520 [1] : vector<8x8xf32> to vector<8xf32>
    %851 = vector.shape_cast %850 : vector<8xf32> to vector<8x1xf32>
    %852 = tpu.reciprocal %851 {approx = true} : vector<8x1xf32> -> vector<8x1xf32>
    %853 = vector.broadcast %852 : vector<8x1xf32> to vector<8x8xf32>
    %854 = arith.mulf %849, %853 : vector<8x8xf32>
    %cst_521 = arith.constant dense<0.000000e+00> : vector<8x8xf32>
    %855 = tpu.matmul %854, %841, %cst_521 {dimension_numbers = #tpu.dot_dimension_numbers<[1], [0], [0], [1], [0, 0, 1, 1], [], []>} : vector<8x8xf32>, vector<8x8xf32>, vector<8x8xf32> -> vector<8x8xf32>
    %c14_522 = arith.constant 14 : index
    %c0_523 = arith.constant 0 : index
    %c0_524 = arith.constant 0 : index
    %856 = vector.load %arg9[%c14_522, %c0_523, %c0_524] : memref<24x8x32xf32, #tpu.memory_space<vmem>>, vector<1x8x32xf32>
    %857 = vector.shape_cast %856 : vector<1x8x32xf32> to vector<8x32xf32>
    %cst_525 = arith.constant dense<0.000000e+00> : vector<8x32xf32>
    %858 = tpu.matmul %855, %857, %cst_525 {dimension_numbers = #tpu.dot_dimension_numbers<[1], [0], [0], [1], [0, 0, 1, 1], [], []>} : vector<8x8xf32>, vector<8x32xf32>, vector<8x32xf32> -> vector<8x32xf32>
    %859 = arith.addf %820, %858 : vector<8x32xf32>
    %c39 = arith.constant 39 : index
    %c0_526 = arith.constant 0 : index
    %c0_527 = arith.constant 0 : index
    %860 = vector.load %arg7[%c39, %c0_526, %c0_527] : memref<72x32x8xf32, #tpu.memory_space<vmem>>, vector<1x32x8xf32>
    %861 = vector.shape_cast %860 : vector<1x32x8xf32> to vector<32x8xf32>
    %cst_528 = arith.constant dense<0.000000e+00> : vector<8x8xf32>
    %862 = tpu.matmul %741, %861, %cst_528 {dimension_numbers = #tpu.dot_dimension_numbers<[1], [0], [0], [1], [0, 0, 1, 1], [], []>} : vector<8x32xf32>, vector<32x8xf32>, vector<8x8xf32> -> vector<8x8xf32>
    %c39_529 = arith.constant 39 : index
    %c0_530 = arith.constant 0 : index
    %c0_531 = arith.constant 0 : index
    %863 = vector.load %arg8[%c39_529, %c0_530, %c0_531] : memref<72x1x8xf32, #tpu.memory_space<vmem>>, vector<1x1x8xf32>
    %864 = vector.shape_cast %863 : vector<1x1x8xf32> to vector<1x8xf32>
    %865 = vector.broadcast %864 : vector<1x8xf32> to vector<8x8xf32>
    %866 = arith.addf %862, %865 : vector<8x8xf32>
    %c43 = arith.constant 43 : index
    %c0_532 = arith.constant 0 : index
    %c0_533 = arith.constant 0 : index
    %867 = vector.load %arg7[%c43, %c0_532, %c0_533] : memref<72x32x8xf32, #tpu.memory_space<vmem>>, vector<1x32x8xf32>
    %868 = vector.shape_cast %867 : vector<1x32x8xf32> to vector<32x8xf32>
    %cst_534 = arith.constant dense<0.000000e+00> : vector<8x8xf32>
    %869 = tpu.matmul %527, %868, %cst_534 {dimension_numbers = #tpu.dot_dimension_numbers<[1], [0], [0], [1], [0, 0, 1, 1], [], []>} : vector<8x32xf32>, vector<32x8xf32>, vector<8x8xf32> -> vector<8x8xf32>
    %c43_535 = arith.constant 43 : index
    %c0_536 = arith.constant 0 : index
    %c0_537 = arith.constant 0 : index
    %870 = vector.load %arg8[%c43_535, %c0_536, %c0_537] : memref<72x1x8xf32, #tpu.memory_space<vmem>>, vector<1x1x8xf32>
    %871 = vector.shape_cast %870 : vector<1x1x8xf32> to vector<1x8xf32>
    %872 = vector.broadcast %871 : vector<1x8xf32> to vector<8x8xf32>
    %873 = arith.addf %869, %872 : vector<8x8xf32>
    %c47 = arith.constant 47 : index
    %c0_538 = arith.constant 0 : index
    %c0_539 = arith.constant 0 : index
    %874 = vector.load %arg7[%c47, %c0_538, %c0_539] : memref<72x32x8xf32, #tpu.memory_space<vmem>>, vector<1x32x8xf32>
    %875 = vector.shape_cast %874 : vector<1x32x8xf32> to vector<32x8xf32>
    %cst_540 = arith.constant dense<0.000000e+00> : vector<8x8xf32>
    %876 = tpu.matmul %527, %875, %cst_540 {dimension_numbers = #tpu.dot_dimension_numbers<[1], [0], [0], [1], [0, 0, 1, 1], [], []>} : vector<8x32xf32>, vector<32x8xf32>, vector<8x8xf32> -> vector<8x8xf32>
    %c47_541 = arith.constant 47 : index
    %c0_542 = arith.constant 0 : index
    %c0_543 = arith.constant 0 : index
    %877 = vector.load %arg8[%c47_541, %c0_542, %c0_543] : memref<72x1x8xf32, #tpu.memory_space<vmem>>, vector<1x1x8xf32>
    %878 = vector.shape_cast %877 : vector<1x1x8xf32> to vector<1x8xf32>
    %879 = vector.broadcast %878 : vector<1x8xf32> to vector<8x8xf32>
    %880 = arith.addf %876, %879 : vector<8x8xf32>
    "tpu.trace_start"() <{level = 10 : i32, message = "qd,kd->qk"}> : () -> ()
    %cst_544 = arith.constant dense<0.000000e+00> : vector<8x8xf32>
    %881 = tpu.matmul %866, %873, %cst_544 {dimension_numbers = #tpu.dot_dimension_numbers<[1], [1], [0], [0], [0, 0, 1, 0], [], []>} : vector<8x8xf32>, vector<8x8xf32>, vector<8x8xf32> -> vector<8x8xf32>
    %cst_545 = arith.constant -1.000000e+09 : f32
    "tpu.trace_stop"() : () -> ()
    %882 = vector.broadcast %cst_545 : f32 to vector<8x8xf32>
    %883 = arith.select %11, %881, %882 : vector<8x8xi1>, vector<8x8xf32>
    %cst_546 = arith.constant dense<0xFF800000> : vector<8xf32>
    %884 = vector.multi_reduction <maximumf>, %883, %cst_546 [1] : vector<8x8xf32> to vector<8xf32>
    %885 = vector.shape_cast %884 : vector<8xf32> to vector<8x1xf32>
    %886 = vector.broadcast %885 : vector<8x1xf32> to vector<8x8xf32>
    %887 = arith.subf %883, %886 : vector<8x8xf32>
    %888 = math.exp %887 : vector<8x8xf32>
    %cst_547 = arith.constant dense<0.000000e+00> : vector<8xf32>
    %889 = vector.multi_reduction <add>, %888, %cst_547 [1] : vector<8x8xf32> to vector<8xf32>
    %890 = vector.shape_cast %889 : vector<8xf32> to vector<8x1xf32>
    %891 = tpu.reciprocal %890 {approx = true} : vector<8x1xf32> -> vector<8x1xf32>
    %892 = vector.broadcast %891 : vector<8x1xf32> to vector<8x8xf32>
    %893 = arith.mulf %888, %892 : vector<8x8xf32>
    %cst_548 = arith.constant dense<0.000000e+00> : vector<8x8xf32>
    %894 = tpu.matmul %893, %880, %cst_548 {dimension_numbers = #tpu.dot_dimension_numbers<[1], [0], [0], [1], [0, 0, 1, 1], [], []>} : vector<8x8xf32>, vector<8x8xf32>, vector<8x8xf32> -> vector<8x8xf32>
    %c15_549 = arith.constant 15 : index
    %c0_550 = arith.constant 0 : index
    %c0_551 = arith.constant 0 : index
    %895 = vector.load %arg9[%c15_549, %c0_550, %c0_551] : memref<24x8x32xf32, #tpu.memory_space<vmem>>, vector<1x8x32xf32>
    %896 = vector.shape_cast %895 : vector<1x8x32xf32> to vector<8x32xf32>
    %cst_552 = arith.constant dense<0.000000e+00> : vector<8x32xf32>
    %897 = tpu.matmul %894, %896, %cst_552 {dimension_numbers = #tpu.dot_dimension_numbers<[1], [0], [0], [1], [0, 0, 1, 1], [], []>} : vector<8x8xf32>, vector<8x32xf32>, vector<8x32xf32> -> vector<8x32xf32>
    %898 = arith.addf %859, %897 : vector<8x32xf32>
    %c3_553 = arith.constant 3 : index
    %c0_554 = arith.constant 0 : index
    %c0_555 = arith.constant 0 : index
    %899 = vector.load %arg10[%c3_553, %c0_554, %c0_555] : memref<6x1x32xf32, #tpu.memory_space<vmem>>, vector<1x1x32xf32>
    %900 = vector.shape_cast %899 : vector<1x1x32xf32> to vector<1x32xf32>
    %901 = vector.broadcast %900 : vector<1x32xf32> to vector<8x32xf32>
    %902 = arith.addf %898, %901 : vector<8x32xf32>
    %903 = arith.addf %715, %902 : vector<8x32xf32>
    %c7_556 = arith.constant 7 : index
    %c0_557 = arith.constant 0 : index
    %c0_558 = arith.constant 0 : index
    %904 = vector.load %arg15[%c7_556, %c0_557, %c0_558] : memref<12x2x32xf32, #tpu.memory_space<vmem>>, vector<1x2x32xf32>
    %905 = vector.shape_cast %904 : vector<1x2x32xf32> to vector<2x32xf32>
    %cst_559 = arith.constant dense<0.000000e+00> : vector<8xf32>
    %906 = vector.multi_reduction <add>, %903, %cst_559 [1] : vector<8x32xf32> to vector<8xf32>
    %907 = vector.shape_cast %906 : vector<8xf32> to vector<8x1xf32>
    %cst_560 = arith.constant 3.200000e+01 : f32
    %908 = vector.broadcast %cst_560 : f32 to vector<8x1xf32>
    %909 = arith.divf %907, %908 : vector<8x1xf32>
    %910 = arith.mulf %903, %903 : vector<8x32xf32>
    %cst_561 = arith.constant dense<0.000000e+00> : vector<8xf32>
    %911 = vector.multi_reduction <add>, %910, %cst_561 [1] : vector<8x32xf32> to vector<8xf32>
    %912 = vector.shape_cast %911 : vector<8xf32> to vector<8x1xf32>
    %cst_562 = arith.constant 3.200000e+01 : f32
    %913 = vector.broadcast %cst_562 : f32 to vector<8x1xf32>
    %914 = arith.divf %912, %913 : vector<8x1xf32>
    %915 = arith.mulf %909, %909 : vector<8x1xf32>
    %916 = arith.subf %914, %915 : vector<8x1xf32>
    %cst_563 = arith.constant 9.99999997E-7 : f32
    %917 = vector.broadcast %cst_563 : f32 to vector<8x1xf32>
    %918 = arith.addf %916, %917 : vector<8x1xf32>
    %919 = math.rsqrt %918 : vector<8x1xf32>
    %920 = vector.broadcast %909 : vector<8x1xf32> to vector<8x32xf32>
    %921 = arith.subf %903, %920 : vector<8x32xf32>
    %922 = vector.broadcast %919 : vector<8x1xf32> to vector<8x32xf32>
    %923 = arith.mulf %921, %922 : vector<8x32xf32>
    %924 = vector.extract_strided_slice %905 {offsets = [0, 0], sizes = [1, 32], strides = [1, 1]} : vector<2x32xf32> to vector<1x32xf32>
    %925 = vector.broadcast %924 : vector<1x32xf32> to vector<8x32xf32>
    %926 = arith.mulf %923, %925 : vector<8x32xf32>
    %927 = vector.extract_strided_slice %905 {offsets = [1, 0], sizes = [1, 32], strides = [1, 1]} : vector<2x32xf32> to vector<1x32xf32>
    %928 = vector.broadcast %927 : vector<1x32xf32> to vector<8x32xf32>
    %929 = arith.addf %926, %928 : vector<8x32xf32>
    %c2_564 = arith.constant 2 : index
    %c0_565 = arith.constant 0 : index
    %c0_566 = arith.constant 0 : index
    %930 = vector.load %arg11[%c2_564, %c0_565, %c0_566] : memref<4x32x64xf32, #tpu.memory_space<vmem>>, vector<1x32x64xf32>
    %931 = vector.shape_cast %930 : vector<1x32x64xf32> to vector<32x64xf32>
    %cst_567 = arith.constant dense<0.000000e+00> : vector<8x64xf32>
    %932 = tpu.matmul %929, %931, %cst_567 {dimension_numbers = #tpu.dot_dimension_numbers<[1], [0], [0], [1], [0, 0, 1, 1], [], []>} : vector<8x32xf32>, vector<32x64xf32>, vector<8x64xf32> -> vector<8x64xf32>
    %c2_568 = arith.constant 2 : index
    %c0_569 = arith.constant 0 : index
    %c0_570 = arith.constant 0 : index
    %933 = vector.load %arg12[%c2_568, %c0_569, %c0_570] : memref<4x1x64xf32, #tpu.memory_space<vmem>>, vector<1x1x64xf32>
    %934 = vector.shape_cast %933 : vector<1x1x64xf32> to vector<1x64xf32>
    %935 = vector.broadcast %934 : vector<1x64xf32> to vector<8x64xf32>
    %936 = arith.addf %932, %935 : vector<8x64xf32>
    %cst_571 = arith.constant 0.000000e+00 : f32
    %937 = vector.broadcast %cst_571 : f32 to vector<8x64xf32>
    %938 = arith.maximumf %936, %937 : vector<8x64xf32>
    %c2_572 = arith.constant 2 : index
    %c0_573 = arith.constant 0 : index
    %c0_574 = arith.constant 0 : index
    %939 = vector.load %arg13[%c2_572, %c0_573, %c0_574] : memref<4x64x32xf32, #tpu.memory_space<vmem>>, vector<1x64x32xf32>
    %940 = vector.shape_cast %939 : vector<1x64x32xf32> to vector<64x32xf32>
    %cst_575 = arith.constant dense<0.000000e+00> : vector<8x32xf32>
    %941 = tpu.matmul %938, %940, %cst_575 {dimension_numbers = #tpu.dot_dimension_numbers<[1], [0], [0], [1], [0, 0, 1, 1], [], []>} : vector<8x64xf32>, vector<64x32xf32>, vector<8x32xf32> -> vector<8x32xf32>
    %c2_576 = arith.constant 2 : index
    %c0_577 = arith.constant 0 : index
    %c0_578 = arith.constant 0 : index
    %942 = vector.load %arg14[%c2_576, %c0_577, %c0_578] : memref<4x1x32xf32, #tpu.memory_space<vmem>>, vector<1x1x32xf32>
    %943 = vector.shape_cast %942 : vector<1x1x32xf32> to vector<1x32xf32>
    %944 = vector.broadcast %943 : vector<1x32xf32> to vector<8x32xf32>
    %945 = arith.addf %941, %944 : vector<8x32xf32>
    %946 = arith.addf %903, %945 : vector<8x32xf32>
    %c8_579 = arith.constant 8 : index
    %c0_580 = arith.constant 0 : index
    %c0_581 = arith.constant 0 : index
    %947 = vector.load %arg15[%c8_579, %c0_580, %c0_581] : memref<12x2x32xf32, #tpu.memory_space<vmem>>, vector<1x2x32xf32>
    %948 = vector.shape_cast %947 : vector<1x2x32xf32> to vector<2x32xf32>
    %cst_582 = arith.constant dense<0.000000e+00> : vector<8xf32>
    %949 = vector.multi_reduction <add>, %946, %cst_582 [1] : vector<8x32xf32> to vector<8xf32>
    %950 = vector.shape_cast %949 : vector<8xf32> to vector<8x1xf32>
    %cst_583 = arith.constant 3.200000e+01 : f32
    %951 = vector.broadcast %cst_583 : f32 to vector<8x1xf32>
    %952 = arith.divf %950, %951 : vector<8x1xf32>
    %953 = arith.mulf %946, %946 : vector<8x32xf32>
    %cst_584 = arith.constant dense<0.000000e+00> : vector<8xf32>
    %954 = vector.multi_reduction <add>, %953, %cst_584 [1] : vector<8x32xf32> to vector<8xf32>
    %955 = vector.shape_cast %954 : vector<8xf32> to vector<8x1xf32>
    %cst_585 = arith.constant 3.200000e+01 : f32
    %956 = vector.broadcast %cst_585 : f32 to vector<8x1xf32>
    %957 = arith.divf %955, %956 : vector<8x1xf32>
    %958 = arith.mulf %952, %952 : vector<8x1xf32>
    %959 = arith.subf %957, %958 : vector<8x1xf32>
    %cst_586 = arith.constant 9.99999997E-7 : f32
    %960 = vector.broadcast %cst_586 : f32 to vector<8x1xf32>
    %961 = arith.addf %959, %960 : vector<8x1xf32>
    %962 = math.rsqrt %961 : vector<8x1xf32>
    %963 = vector.broadcast %952 : vector<8x1xf32> to vector<8x32xf32>
    %964 = arith.subf %946, %963 : vector<8x32xf32>
    %965 = vector.broadcast %962 : vector<8x1xf32> to vector<8x32xf32>
    %966 = arith.mulf %964, %965 : vector<8x32xf32>
    %967 = vector.extract_strided_slice %948 {offsets = [0, 0], sizes = [1, 32], strides = [1, 1]} : vector<2x32xf32> to vector<1x32xf32>
    %968 = vector.broadcast %967 : vector<1x32xf32> to vector<8x32xf32>
    %969 = arith.mulf %966, %968 : vector<8x32xf32>
    %970 = vector.extract_strided_slice %948 {offsets = [1, 0], sizes = [1, 32], strides = [1, 1]} : vector<2x32xf32> to vector<1x32xf32>
    %971 = vector.broadcast %970 : vector<1x32xf32> to vector<8x32xf32>
    %972 = arith.addf %969, %971 : vector<8x32xf32>
    %cst_587 = arith.constant 0.000000e+00 : f32
    %973 = vector.broadcast %cst_587 : f32 to vector<8x32xf32>
    %c48 = arith.constant 48 : index
    %c0_588 = arith.constant 0 : index
    %c0_589 = arith.constant 0 : index
    %974 = vector.load %arg7[%c48, %c0_588, %c0_589] : memref<72x32x8xf32, #tpu.memory_space<vmem>>, vector<1x32x8xf32>
    %975 = vector.shape_cast %974 : vector<1x32x8xf32> to vector<32x8xf32>
    %cst_590 = arith.constant dense<0.000000e+00> : vector<8x8xf32>
    %976 = tpu.matmul %972, %975, %cst_590 {dimension_numbers = #tpu.dot_dimension_numbers<[1], [0], [0], [1], [0, 0, 1, 1], [], []>} : vector<8x32xf32>, vector<32x8xf32>, vector<8x8xf32> -> vector<8x8xf32>
    %c48_591 = arith.constant 48 : index
    %c0_592 = arith.constant 0 : index
    %c0_593 = arith.constant 0 : index
    %977 = vector.load %arg8[%c48_591, %c0_592, %c0_593] : memref<72x1x8xf32, #tpu.memory_space<vmem>>, vector<1x1x8xf32>
    %978 = vector.shape_cast %977 : vector<1x1x8xf32> to vector<1x8xf32>
    %979 = vector.broadcast %978 : vector<1x8xf32> to vector<8x8xf32>
    %980 = arith.addf %976, %979 : vector<8x8xf32>
    %c52 = arith.constant 52 : index
    %c0_594 = arith.constant 0 : index
    %c0_595 = arith.constant 0 : index
    %981 = vector.load %arg7[%c52, %c0_594, %c0_595] : memref<72x32x8xf32, #tpu.memory_space<vmem>>, vector<1x32x8xf32>
    %982 = vector.shape_cast %981 : vector<1x32x8xf32> to vector<32x8xf32>
    %cst_596 = arith.constant dense<0.000000e+00> : vector<8x8xf32>
    %983 = tpu.matmul %972, %982, %cst_596 {dimension_numbers = #tpu.dot_dimension_numbers<[1], [0], [0], [1], [0, 0, 1, 1], [], []>} : vector<8x32xf32>, vector<32x8xf32>, vector<8x8xf32> -> vector<8x8xf32>
    %c52_597 = arith.constant 52 : index
    %c0_598 = arith.constant 0 : index
    %c0_599 = arith.constant 0 : index
    %984 = vector.load %arg8[%c52_597, %c0_598, %c0_599] : memref<72x1x8xf32, #tpu.memory_space<vmem>>, vector<1x1x8xf32>
    %985 = vector.shape_cast %984 : vector<1x1x8xf32> to vector<1x8xf32>
    %986 = vector.broadcast %985 : vector<1x8xf32> to vector<8x8xf32>
    %987 = arith.addf %983, %986 : vector<8x8xf32>
    %c56 = arith.constant 56 : index
    %c0_600 = arith.constant 0 : index
    %c0_601 = arith.constant 0 : index
    %988 = vector.load %arg7[%c56, %c0_600, %c0_601] : memref<72x32x8xf32, #tpu.memory_space<vmem>>, vector<1x32x8xf32>
    %989 = vector.shape_cast %988 : vector<1x32x8xf32> to vector<32x8xf32>
    %cst_602 = arith.constant dense<0.000000e+00> : vector<8x8xf32>
    %990 = tpu.matmul %972, %989, %cst_602 {dimension_numbers = #tpu.dot_dimension_numbers<[1], [0], [0], [1], [0, 0, 1, 1], [], []>} : vector<8x32xf32>, vector<32x8xf32>, vector<8x8xf32> -> vector<8x8xf32>
    %c56_603 = arith.constant 56 : index
    %c0_604 = arith.constant 0 : index
    %c0_605 = arith.constant 0 : index
    %991 = vector.load %arg8[%c56_603, %c0_604, %c0_605] : memref<72x1x8xf32, #tpu.memory_space<vmem>>, vector<1x1x8xf32>
    %992 = vector.shape_cast %991 : vector<1x1x8xf32> to vector<1x8xf32>
    %993 = vector.broadcast %992 : vector<1x8xf32> to vector<8x8xf32>
    %994 = arith.addf %990, %993 : vector<8x8xf32>
    "tpu.trace_start"() <{level = 10 : i32, message = "qd,kd->qk"}> : () -> ()
    %cst_606 = arith.constant dense<0.000000e+00> : vector<8x8xf32>
    %995 = tpu.matmul %980, %987, %cst_606 {dimension_numbers = #tpu.dot_dimension_numbers<[1], [1], [0], [0], [0, 0, 1, 0], [], []>} : vector<8x8xf32>, vector<8x8xf32>, vector<8x8xf32> -> vector<8x8xf32>
    %cst_607 = arith.constant -1.000000e+09 : f32
    "tpu.trace_stop"() : () -> ()
    %996 = vector.broadcast %cst_607 : f32 to vector<8x8xf32>
    %997 = arith.select %17, %995, %996 : vector<8x8xi1>, vector<8x8xf32>
    %cst_608 = arith.constant dense<0xFF800000> : vector<8xf32>
    %998 = vector.multi_reduction <maximumf>, %997, %cst_608 [1] : vector<8x8xf32> to vector<8xf32>
    %999 = vector.shape_cast %998 : vector<8xf32> to vector<8x1xf32>
    %1000 = vector.broadcast %999 : vector<8x1xf32> to vector<8x8xf32>
    %1001 = arith.subf %997, %1000 : vector<8x8xf32>
    %1002 = math.exp %1001 : vector<8x8xf32>
    %cst_609 = arith.constant dense<0.000000e+00> : vector<8xf32>
    %1003 = vector.multi_reduction <add>, %1002, %cst_609 [1] : vector<8x8xf32> to vector<8xf32>
    %1004 = vector.shape_cast %1003 : vector<8xf32> to vector<8x1xf32>
    %1005 = tpu.reciprocal %1004 {approx = true} : vector<8x1xf32> -> vector<8x1xf32>
    %1006 = vector.broadcast %1005 : vector<8x1xf32> to vector<8x8xf32>
    %1007 = arith.mulf %1002, %1006 : vector<8x8xf32>
    %cst_610 = arith.constant dense<0.000000e+00> : vector<8x8xf32>
    %1008 = tpu.matmul %1007, %994, %cst_610 {dimension_numbers = #tpu.dot_dimension_numbers<[1], [0], [0], [1], [0, 0, 1, 1], [], []>} : vector<8x8xf32>, vector<8x8xf32>, vector<8x8xf32> -> vector<8x8xf32>
    %c16_611 = arith.constant 16 : index
    %c0_612 = arith.constant 0 : index
    %c0_613 = arith.constant 0 : index
    %1009 = vector.load %arg9[%c16_611, %c0_612, %c0_613] : memref<24x8x32xf32, #tpu.memory_space<vmem>>, vector<1x8x32xf32>
    %1010 = vector.shape_cast %1009 : vector<1x8x32xf32> to vector<8x32xf32>
    %cst_614 = arith.constant dense<0.000000e+00> : vector<8x32xf32>
    %1011 = tpu.matmul %1008, %1010, %cst_614 {dimension_numbers = #tpu.dot_dimension_numbers<[1], [0], [0], [1], [0, 0, 1, 1], [], []>} : vector<8x8xf32>, vector<8x32xf32>, vector<8x32xf32> -> vector<8x32xf32>
    %1012 = arith.addf %973, %1011 : vector<8x32xf32>
    %c49 = arith.constant 49 : index
    %c0_615 = arith.constant 0 : index
    %c0_616 = arith.constant 0 : index
    %1013 = vector.load %arg7[%c49, %c0_615, %c0_616] : memref<72x32x8xf32, #tpu.memory_space<vmem>>, vector<1x32x8xf32>
    %1014 = vector.shape_cast %1013 : vector<1x32x8xf32> to vector<32x8xf32>
    %cst_617 = arith.constant dense<0.000000e+00> : vector<8x8xf32>
    %1015 = tpu.matmul %972, %1014, %cst_617 {dimension_numbers = #tpu.dot_dimension_numbers<[1], [0], [0], [1], [0, 0, 1, 1], [], []>} : vector<8x32xf32>, vector<32x8xf32>, vector<8x8xf32> -> vector<8x8xf32>
    %c49_618 = arith.constant 49 : index
    %c0_619 = arith.constant 0 : index
    %c0_620 = arith.constant 0 : index
    %1016 = vector.load %arg8[%c49_618, %c0_619, %c0_620] : memref<72x1x8xf32, #tpu.memory_space<vmem>>, vector<1x1x8xf32>
    %1017 = vector.shape_cast %1016 : vector<1x1x8xf32> to vector<1x8xf32>
    %1018 = vector.broadcast %1017 : vector<1x8xf32> to vector<8x8xf32>
    %1019 = arith.addf %1015, %1018 : vector<8x8xf32>
    %c53 = arith.constant 53 : index
    %c0_621 = arith.constant 0 : index
    %c0_622 = arith.constant 0 : index
    %1020 = vector.load %arg7[%c53, %c0_621, %c0_622] : memref<72x32x8xf32, #tpu.memory_space<vmem>>, vector<1x32x8xf32>
    %1021 = vector.shape_cast %1020 : vector<1x32x8xf32> to vector<32x8xf32>
    %cst_623 = arith.constant dense<0.000000e+00> : vector<8x8xf32>
    %1022 = tpu.matmul %972, %1021, %cst_623 {dimension_numbers = #tpu.dot_dimension_numbers<[1], [0], [0], [1], [0, 0, 1, 1], [], []>} : vector<8x32xf32>, vector<32x8xf32>, vector<8x8xf32> -> vector<8x8xf32>
    %c53_624 = arith.constant 53 : index
    %c0_625 = arith.constant 0 : index
    %c0_626 = arith.constant 0 : index
    %1023 = vector.load %arg8[%c53_624, %c0_625, %c0_626] : memref<72x1x8xf32, #tpu.memory_space<vmem>>, vector<1x1x8xf32>
    %1024 = vector.shape_cast %1023 : vector<1x1x8xf32> to vector<1x8xf32>
    %1025 = vector.broadcast %1024 : vector<1x8xf32> to vector<8x8xf32>
    %1026 = arith.addf %1022, %1025 : vector<8x8xf32>
    %c57 = arith.constant 57 : index
    %c0_627 = arith.constant 0 : index
    %c0_628 = arith.constant 0 : index
    %1027 = vector.load %arg7[%c57, %c0_627, %c0_628] : memref<72x32x8xf32, #tpu.memory_space<vmem>>, vector<1x32x8xf32>
    %1028 = vector.shape_cast %1027 : vector<1x32x8xf32> to vector<32x8xf32>
    %cst_629 = arith.constant dense<0.000000e+00> : vector<8x8xf32>
    %1029 = tpu.matmul %972, %1028, %cst_629 {dimension_numbers = #tpu.dot_dimension_numbers<[1], [0], [0], [1], [0, 0, 1, 1], [], []>} : vector<8x32xf32>, vector<32x8xf32>, vector<8x8xf32> -> vector<8x8xf32>
    %c57_630 = arith.constant 57 : index
    %c0_631 = arith.constant 0 : index
    %c0_632 = arith.constant 0 : index
    %1030 = vector.load %arg8[%c57_630, %c0_631, %c0_632] : memref<72x1x8xf32, #tpu.memory_space<vmem>>, vector<1x1x8xf32>
    %1031 = vector.shape_cast %1030 : vector<1x1x8xf32> to vector<1x8xf32>
    %1032 = vector.broadcast %1031 : vector<1x8xf32> to vector<8x8xf32>
    %1033 = arith.addf %1029, %1032 : vector<8x8xf32>
    "tpu.trace_start"() <{level = 10 : i32, message = "qd,kd->qk"}> : () -> ()
    %cst_633 = arith.constant dense<0.000000e+00> : vector<8x8xf32>
    %1034 = tpu.matmul %1019, %1026, %cst_633 {dimension_numbers = #tpu.dot_dimension_numbers<[1], [1], [0], [0], [0, 0, 1, 0], [], []>} : vector<8x8xf32>, vector<8x8xf32>, vector<8x8xf32> -> vector<8x8xf32>
    %cst_634 = arith.constant -1.000000e+09 : f32
    "tpu.trace_stop"() : () -> ()
    %1035 = vector.broadcast %cst_634 : f32 to vector<8x8xf32>
    %1036 = arith.select %17, %1034, %1035 : vector<8x8xi1>, vector<8x8xf32>
    %cst_635 = arith.constant dense<0xFF800000> : vector<8xf32>
    %1037 = vector.multi_reduction <maximumf>, %1036, %cst_635 [1] : vector<8x8xf32> to vector<8xf32>
    %1038 = vector.shape_cast %1037 : vector<8xf32> to vector<8x1xf32>
    %1039 = vector.broadcast %1038 : vector<8x1xf32> to vector<8x8xf32>
    %1040 = arith.subf %1036, %1039 : vector<8x8xf32>
    %1041 = math.exp %1040 : vector<8x8xf32>
    %cst_636 = arith.constant dense<0.000000e+00> : vector<8xf32>
    %1042 = vector.multi_reduction <add>, %1041, %cst_636 [1] : vector<8x8xf32> to vector<8xf32>
    %1043 = vector.shape_cast %1042 : vector<8xf32> to vector<8x1xf32>
    %1044 = tpu.reciprocal %1043 {approx = true} : vector<8x1xf32> -> vector<8x1xf32>
    %1045 = vector.broadcast %1044 : vector<8x1xf32> to vector<8x8xf32>
    %1046 = arith.mulf %1041, %1045 : vector<8x8xf32>
    %cst_637 = arith.constant dense<0.000000e+00> : vector<8x8xf32>
    %1047 = tpu.matmul %1046, %1033, %cst_637 {dimension_numbers = #tpu.dot_dimension_numbers<[1], [0], [0], [1], [0, 0, 1, 1], [], []>} : vector<8x8xf32>, vector<8x8xf32>, vector<8x8xf32> -> vector<8x8xf32>
    %c17_638 = arith.constant 17 : index
    %c0_639 = arith.constant 0 : index
    %c0_640 = arith.constant 0 : index
    %1048 = vector.load %arg9[%c17_638, %c0_639, %c0_640] : memref<24x8x32xf32, #tpu.memory_space<vmem>>, vector<1x8x32xf32>
    %1049 = vector.shape_cast %1048 : vector<1x8x32xf32> to vector<8x32xf32>
    %cst_641 = arith.constant dense<0.000000e+00> : vector<8x32xf32>
    %1050 = tpu.matmul %1047, %1049, %cst_641 {dimension_numbers = #tpu.dot_dimension_numbers<[1], [0], [0], [1], [0, 0, 1, 1], [], []>} : vector<8x8xf32>, vector<8x32xf32>, vector<8x32xf32> -> vector<8x32xf32>
    %1051 = arith.addf %1012, %1050 : vector<8x32xf32>
    %c50 = arith.constant 50 : index
    %c0_642 = arith.constant 0 : index
    %c0_643 = arith.constant 0 : index
    %1052 = vector.load %arg7[%c50, %c0_642, %c0_643] : memref<72x32x8xf32, #tpu.memory_space<vmem>>, vector<1x32x8xf32>
    %1053 = vector.shape_cast %1052 : vector<1x32x8xf32> to vector<32x8xf32>
    %cst_644 = arith.constant dense<0.000000e+00> : vector<8x8xf32>
    %1054 = tpu.matmul %972, %1053, %cst_644 {dimension_numbers = #tpu.dot_dimension_numbers<[1], [0], [0], [1], [0, 0, 1, 1], [], []>} : vector<8x32xf32>, vector<32x8xf32>, vector<8x8xf32> -> vector<8x8xf32>
    %c50_645 = arith.constant 50 : index
    %c0_646 = arith.constant 0 : index
    %c0_647 = arith.constant 0 : index
    %1055 = vector.load %arg8[%c50_645, %c0_646, %c0_647] : memref<72x1x8xf32, #tpu.memory_space<vmem>>, vector<1x1x8xf32>
    %1056 = vector.shape_cast %1055 : vector<1x1x8xf32> to vector<1x8xf32>
    %1057 = vector.broadcast %1056 : vector<1x8xf32> to vector<8x8xf32>
    %1058 = arith.addf %1054, %1057 : vector<8x8xf32>
    %c54 = arith.constant 54 : index
    %c0_648 = arith.constant 0 : index
    %c0_649 = arith.constant 0 : index
    %1059 = vector.load %arg7[%c54, %c0_648, %c0_649] : memref<72x32x8xf32, #tpu.memory_space<vmem>>, vector<1x32x8xf32>
    %1060 = vector.shape_cast %1059 : vector<1x32x8xf32> to vector<32x8xf32>
    %cst_650 = arith.constant dense<0.000000e+00> : vector<8x8xf32>
    %1061 = tpu.matmul %972, %1060, %cst_650 {dimension_numbers = #tpu.dot_dimension_numbers<[1], [0], [0], [1], [0, 0, 1, 1], [], []>} : vector<8x32xf32>, vector<32x8xf32>, vector<8x8xf32> -> vector<8x8xf32>
    %c54_651 = arith.constant 54 : index
    %c0_652 = arith.constant 0 : index
    %c0_653 = arith.constant 0 : index
    %1062 = vector.load %arg8[%c54_651, %c0_652, %c0_653] : memref<72x1x8xf32, #tpu.memory_space<vmem>>, vector<1x1x8xf32>
    %1063 = vector.shape_cast %1062 : vector<1x1x8xf32> to vector<1x8xf32>
    %1064 = vector.broadcast %1063 : vector<1x8xf32> to vector<8x8xf32>
    %1065 = arith.addf %1061, %1064 : vector<8x8xf32>
    %c58 = arith.constant 58 : index
    %c0_654 = arith.constant 0 : index
    %c0_655 = arith.constant 0 : index
    %1066 = vector.load %arg7[%c58, %c0_654, %c0_655] : memref<72x32x8xf32, #tpu.memory_space<vmem>>, vector<1x32x8xf32>
    %1067 = vector.shape_cast %1066 : vector<1x32x8xf32> to vector<32x8xf32>
    %cst_656 = arith.constant dense<0.000000e+00> : vector<8x8xf32>
    %1068 = tpu.matmul %972, %1067, %cst_656 {dimension_numbers = #tpu.dot_dimension_numbers<[1], [0], [0], [1], [0, 0, 1, 1], [], []>} : vector<8x32xf32>, vector<32x8xf32>, vector<8x8xf32> -> vector<8x8xf32>
    %c58_657 = arith.constant 58 : index
    %c0_658 = arith.constant 0 : index
    %c0_659 = arith.constant 0 : index
    %1069 = vector.load %arg8[%c58_657, %c0_658, %c0_659] : memref<72x1x8xf32, #tpu.memory_space<vmem>>, vector<1x1x8xf32>
    %1070 = vector.shape_cast %1069 : vector<1x1x8xf32> to vector<1x8xf32>
    %1071 = vector.broadcast %1070 : vector<1x8xf32> to vector<8x8xf32>
    %1072 = arith.addf %1068, %1071 : vector<8x8xf32>
    "tpu.trace_start"() <{level = 10 : i32, message = "qd,kd->qk"}> : () -> ()
    %cst_660 = arith.constant dense<0.000000e+00> : vector<8x8xf32>
    %1073 = tpu.matmul %1058, %1065, %cst_660 {dimension_numbers = #tpu.dot_dimension_numbers<[1], [1], [0], [0], [0, 0, 1, 0], [], []>} : vector<8x8xf32>, vector<8x8xf32>, vector<8x8xf32> -> vector<8x8xf32>
    %cst_661 = arith.constant -1.000000e+09 : f32
    "tpu.trace_stop"() : () -> ()
    %1074 = vector.broadcast %cst_661 : f32 to vector<8x8xf32>
    %1075 = arith.select %17, %1073, %1074 : vector<8x8xi1>, vector<8x8xf32>
    %cst_662 = arith.constant dense<0xFF800000> : vector<8xf32>
    %1076 = vector.multi_reduction <maximumf>, %1075, %cst_662 [1] : vector<8x8xf32> to vector<8xf32>
    %1077 = vector.shape_cast %1076 : vector<8xf32> to vector<8x1xf32>
    %1078 = vector.broadcast %1077 : vector<8x1xf32> to vector<8x8xf32>
    %1079 = arith.subf %1075, %1078 : vector<8x8xf32>
    %1080 = math.exp %1079 : vector<8x8xf32>
    %cst_663 = arith.constant dense<0.000000e+00> : vector<8xf32>
    %1081 = vector.multi_reduction <add>, %1080, %cst_663 [1] : vector<8x8xf32> to vector<8xf32>
    %1082 = vector.shape_cast %1081 : vector<8xf32> to vector<8x1xf32>
    %1083 = tpu.reciprocal %1082 {approx = true} : vector<8x1xf32> -> vector<8x1xf32>
    %1084 = vector.broadcast %1083 : vector<8x1xf32> to vector<8x8xf32>
    %1085 = arith.mulf %1080, %1084 : vector<8x8xf32>
    %cst_664 = arith.constant dense<0.000000e+00> : vector<8x8xf32>
    %1086 = tpu.matmul %1085, %1072, %cst_664 {dimension_numbers = #tpu.dot_dimension_numbers<[1], [0], [0], [1], [0, 0, 1, 1], [], []>} : vector<8x8xf32>, vector<8x8xf32>, vector<8x8xf32> -> vector<8x8xf32>
    %c18_665 = arith.constant 18 : index
    %c0_666 = arith.constant 0 : index
    %c0_667 = arith.constant 0 : index
    %1087 = vector.load %arg9[%c18_665, %c0_666, %c0_667] : memref<24x8x32xf32, #tpu.memory_space<vmem>>, vector<1x8x32xf32>
    %1088 = vector.shape_cast %1087 : vector<1x8x32xf32> to vector<8x32xf32>
    %cst_668 = arith.constant dense<0.000000e+00> : vector<8x32xf32>
    %1089 = tpu.matmul %1086, %1088, %cst_668 {dimension_numbers = #tpu.dot_dimension_numbers<[1], [0], [0], [1], [0, 0, 1, 1], [], []>} : vector<8x8xf32>, vector<8x32xf32>, vector<8x32xf32> -> vector<8x32xf32>
    %1090 = arith.addf %1051, %1089 : vector<8x32xf32>
    %c51 = arith.constant 51 : index
    %c0_669 = arith.constant 0 : index
    %c0_670 = arith.constant 0 : index
    %1091 = vector.load %arg7[%c51, %c0_669, %c0_670] : memref<72x32x8xf32, #tpu.memory_space<vmem>>, vector<1x32x8xf32>
    %1092 = vector.shape_cast %1091 : vector<1x32x8xf32> to vector<32x8xf32>
    %cst_671 = arith.constant dense<0.000000e+00> : vector<8x8xf32>
    %1093 = tpu.matmul %972, %1092, %cst_671 {dimension_numbers = #tpu.dot_dimension_numbers<[1], [0], [0], [1], [0, 0, 1, 1], [], []>} : vector<8x32xf32>, vector<32x8xf32>, vector<8x8xf32> -> vector<8x8xf32>
    %c51_672 = arith.constant 51 : index
    %c0_673 = arith.constant 0 : index
    %c0_674 = arith.constant 0 : index
    %1094 = vector.load %arg8[%c51_672, %c0_673, %c0_674] : memref<72x1x8xf32, #tpu.memory_space<vmem>>, vector<1x1x8xf32>
    %1095 = vector.shape_cast %1094 : vector<1x1x8xf32> to vector<1x8xf32>
    %1096 = vector.broadcast %1095 : vector<1x8xf32> to vector<8x8xf32>
    %1097 = arith.addf %1093, %1096 : vector<8x8xf32>
    %c55 = arith.constant 55 : index
    %c0_675 = arith.constant 0 : index
    %c0_676 = arith.constant 0 : index
    %1098 = vector.load %arg7[%c55, %c0_675, %c0_676] : memref<72x32x8xf32, #tpu.memory_space<vmem>>, vector<1x32x8xf32>
    %1099 = vector.shape_cast %1098 : vector<1x32x8xf32> to vector<32x8xf32>
    %cst_677 = arith.constant dense<0.000000e+00> : vector<8x8xf32>
    %1100 = tpu.matmul %972, %1099, %cst_677 {dimension_numbers = #tpu.dot_dimension_numbers<[1], [0], [0], [1], [0, 0, 1, 1], [], []>} : vector<8x32xf32>, vector<32x8xf32>, vector<8x8xf32> -> vector<8x8xf32>
    %c55_678 = arith.constant 55 : index
    %c0_679 = arith.constant 0 : index
    %c0_680 = arith.constant 0 : index
    %1101 = vector.load %arg8[%c55_678, %c0_679, %c0_680] : memref<72x1x8xf32, #tpu.memory_space<vmem>>, vector<1x1x8xf32>
    %1102 = vector.shape_cast %1101 : vector<1x1x8xf32> to vector<1x8xf32>
    %1103 = vector.broadcast %1102 : vector<1x8xf32> to vector<8x8xf32>
    %1104 = arith.addf %1100, %1103 : vector<8x8xf32>
    %c59 = arith.constant 59 : index
    %c0_681 = arith.constant 0 : index
    %c0_682 = arith.constant 0 : index
    %1105 = vector.load %arg7[%c59, %c0_681, %c0_682] : memref<72x32x8xf32, #tpu.memory_space<vmem>>, vector<1x32x8xf32>
    %1106 = vector.shape_cast %1105 : vector<1x32x8xf32> to vector<32x8xf32>
    %cst_683 = arith.constant dense<0.000000e+00> : vector<8x8xf32>
    %1107 = tpu.matmul %972, %1106, %cst_683 {dimension_numbers = #tpu.dot_dimension_numbers<[1], [0], [0], [1], [0, 0, 1, 1], [], []>} : vector<8x32xf32>, vector<32x8xf32>, vector<8x8xf32> -> vector<8x8xf32>
    %c59_684 = arith.constant 59 : index
    %c0_685 = arith.constant 0 : index
    %c0_686 = arith.constant 0 : index
    %1108 = vector.load %arg8[%c59_684, %c0_685, %c0_686] : memref<72x1x8xf32, #tpu.memory_space<vmem>>, vector<1x1x8xf32>
    %1109 = vector.shape_cast %1108 : vector<1x1x8xf32> to vector<1x8xf32>
    %1110 = vector.broadcast %1109 : vector<1x8xf32> to vector<8x8xf32>
    %1111 = arith.addf %1107, %1110 : vector<8x8xf32>
    "tpu.trace_start"() <{level = 10 : i32, message = "qd,kd->qk"}> : () -> ()
    %cst_687 = arith.constant dense<0.000000e+00> : vector<8x8xf32>
    %1112 = tpu.matmul %1097, %1104, %cst_687 {dimension_numbers = #tpu.dot_dimension_numbers<[1], [1], [0], [0], [0, 0, 1, 0], [], []>} : vector<8x8xf32>, vector<8x8xf32>, vector<8x8xf32> -> vector<8x8xf32>
    %cst_688 = arith.constant -1.000000e+09 : f32
    "tpu.trace_stop"() : () -> ()
    %1113 = vector.broadcast %cst_688 : f32 to vector<8x8xf32>
    %1114 = arith.select %17, %1112, %1113 : vector<8x8xi1>, vector<8x8xf32>
    %cst_689 = arith.constant dense<0xFF800000> : vector<8xf32>
    %1115 = vector.multi_reduction <maximumf>, %1114, %cst_689 [1] : vector<8x8xf32> to vector<8xf32>
    %1116 = vector.shape_cast %1115 : vector<8xf32> to vector<8x1xf32>
    %1117 = vector.broadcast %1116 : vector<8x1xf32> to vector<8x8xf32>
    %1118 = arith.subf %1114, %1117 : vector<8x8xf32>
    %1119 = math.exp %1118 : vector<8x8xf32>
    %cst_690 = arith.constant dense<0.000000e+00> : vector<8xf32>
    %1120 = vector.multi_reduction <add>, %1119, %cst_690 [1] : vector<8x8xf32> to vector<8xf32>
    %1121 = vector.shape_cast %1120 : vector<8xf32> to vector<8x1xf32>
    %1122 = tpu.reciprocal %1121 {approx = true} : vector<8x1xf32> -> vector<8x1xf32>
    %1123 = vector.broadcast %1122 : vector<8x1xf32> to vector<8x8xf32>
    %1124 = arith.mulf %1119, %1123 : vector<8x8xf32>
    %cst_691 = arith.constant dense<0.000000e+00> : vector<8x8xf32>
    %1125 = tpu.matmul %1124, %1111, %cst_691 {dimension_numbers = #tpu.dot_dimension_numbers<[1], [0], [0], [1], [0, 0, 1, 1], [], []>} : vector<8x8xf32>, vector<8x8xf32>, vector<8x8xf32> -> vector<8x8xf32>
    %c19_692 = arith.constant 19 : index
    %c0_693 = arith.constant 0 : index
    %c0_694 = arith.constant 0 : index
    %1126 = vector.load %arg9[%c19_692, %c0_693, %c0_694] : memref<24x8x32xf32, #tpu.memory_space<vmem>>, vector<1x8x32xf32>
    %1127 = vector.shape_cast %1126 : vector<1x8x32xf32> to vector<8x32xf32>
    %cst_695 = arith.constant dense<0.000000e+00> : vector<8x32xf32>
    %1128 = tpu.matmul %1125, %1127, %cst_695 {dimension_numbers = #tpu.dot_dimension_numbers<[1], [0], [0], [1], [0, 0, 1, 1], [], []>} : vector<8x8xf32>, vector<8x32xf32>, vector<8x32xf32> -> vector<8x32xf32>
    %1129 = arith.addf %1090, %1128 : vector<8x32xf32>
    %c4_696 = arith.constant 4 : index
    %c0_697 = arith.constant 0 : index
    %c0_698 = arith.constant 0 : index
    %1130 = vector.load %arg10[%c4_696, %c0_697, %c0_698] : memref<6x1x32xf32, #tpu.memory_space<vmem>>, vector<1x1x32xf32>
    %1131 = vector.shape_cast %1130 : vector<1x1x32xf32> to vector<1x32xf32>
    %1132 = vector.broadcast %1131 : vector<1x32xf32> to vector<8x32xf32>
    %1133 = arith.addf %1129, %1132 : vector<8x32xf32>
    %1134 = arith.addf %946, %1133 : vector<8x32xf32>
    %c9_699 = arith.constant 9 : index
    %c0_700 = arith.constant 0 : index
    %c0_701 = arith.constant 0 : index
    %1135 = vector.load %arg15[%c9_699, %c0_700, %c0_701] : memref<12x2x32xf32, #tpu.memory_space<vmem>>, vector<1x2x32xf32>
    %1136 = vector.shape_cast %1135 : vector<1x2x32xf32> to vector<2x32xf32>
    %cst_702 = arith.constant dense<0.000000e+00> : vector<8xf32>
    %1137 = vector.multi_reduction <add>, %1134, %cst_702 [1] : vector<8x32xf32> to vector<8xf32>
    %1138 = vector.shape_cast %1137 : vector<8xf32> to vector<8x1xf32>
    %cst_703 = arith.constant 3.200000e+01 : f32
    %1139 = vector.broadcast %cst_703 : f32 to vector<8x1xf32>
    %1140 = arith.divf %1138, %1139 : vector<8x1xf32>
    %1141 = arith.mulf %1134, %1134 : vector<8x32xf32>
    %cst_704 = arith.constant dense<0.000000e+00> : vector<8xf32>
    %1142 = vector.multi_reduction <add>, %1141, %cst_704 [1] : vector<8x32xf32> to vector<8xf32>
    %1143 = vector.shape_cast %1142 : vector<8xf32> to vector<8x1xf32>
    %cst_705 = arith.constant 3.200000e+01 : f32
    %1144 = vector.broadcast %cst_705 : f32 to vector<8x1xf32>
    %1145 = arith.divf %1143, %1144 : vector<8x1xf32>
    %1146 = arith.mulf %1140, %1140 : vector<8x1xf32>
    %1147 = arith.subf %1145, %1146 : vector<8x1xf32>
    %cst_706 = arith.constant 9.99999997E-7 : f32
    %1148 = vector.broadcast %cst_706 : f32 to vector<8x1xf32>
    %1149 = arith.addf %1147, %1148 : vector<8x1xf32>
    %1150 = math.rsqrt %1149 : vector<8x1xf32>
    %1151 = vector.broadcast %1140 : vector<8x1xf32> to vector<8x32xf32>
    %1152 = arith.subf %1134, %1151 : vector<8x32xf32>
    %1153 = vector.broadcast %1150 : vector<8x1xf32> to vector<8x32xf32>
    %1154 = arith.mulf %1152, %1153 : vector<8x32xf32>
    %1155 = vector.extract_strided_slice %1136 {offsets = [0, 0], sizes = [1, 32], strides = [1, 1]} : vector<2x32xf32> to vector<1x32xf32>
    %1156 = vector.broadcast %1155 : vector<1x32xf32> to vector<8x32xf32>
    %1157 = arith.mulf %1154, %1156 : vector<8x32xf32>
    %1158 = vector.extract_strided_slice %1136 {offsets = [1, 0], sizes = [1, 32], strides = [1, 1]} : vector<2x32xf32> to vector<1x32xf32>
    %1159 = vector.broadcast %1158 : vector<1x32xf32> to vector<8x32xf32>
    %1160 = arith.addf %1157, %1159 : vector<8x32xf32>
    %cst_707 = arith.constant 0.000000e+00 : f32
    %1161 = vector.broadcast %cst_707 : f32 to vector<8x32xf32>
    %c60 = arith.constant 60 : index
    %c0_708 = arith.constant 0 : index
    %c0_709 = arith.constant 0 : index
    %1162 = vector.load %arg7[%c60, %c0_708, %c0_709] : memref<72x32x8xf32, #tpu.memory_space<vmem>>, vector<1x32x8xf32>
    %1163 = vector.shape_cast %1162 : vector<1x32x8xf32> to vector<32x8xf32>
    %cst_710 = arith.constant dense<0.000000e+00> : vector<8x8xf32>
    %1164 = tpu.matmul %1160, %1163, %cst_710 {dimension_numbers = #tpu.dot_dimension_numbers<[1], [0], [0], [1], [0, 0, 1, 1], [], []>} : vector<8x32xf32>, vector<32x8xf32>, vector<8x8xf32> -> vector<8x8xf32>
    %c60_711 = arith.constant 60 : index
    %c0_712 = arith.constant 0 : index
    %c0_713 = arith.constant 0 : index
    %1165 = vector.load %arg8[%c60_711, %c0_712, %c0_713] : memref<72x1x8xf32, #tpu.memory_space<vmem>>, vector<1x1x8xf32>
    %1166 = vector.shape_cast %1165 : vector<1x1x8xf32> to vector<1x8xf32>
    %1167 = vector.broadcast %1166 : vector<1x8xf32> to vector<8x8xf32>
    %1168 = arith.addf %1164, %1167 : vector<8x8xf32>
    %c64 = arith.constant 64 : index
    %c0_714 = arith.constant 0 : index
    %c0_715 = arith.constant 0 : index
    %1169 = vector.load %arg7[%c64, %c0_714, %c0_715] : memref<72x32x8xf32, #tpu.memory_space<vmem>>, vector<1x32x8xf32>
    %1170 = vector.shape_cast %1169 : vector<1x32x8xf32> to vector<32x8xf32>
    %cst_716 = arith.constant dense<0.000000e+00> : vector<8x8xf32>
    %1171 = tpu.matmul %527, %1170, %cst_716 {dimension_numbers = #tpu.dot_dimension_numbers<[1], [0], [0], [1], [0, 0, 1, 1], [], []>} : vector<8x32xf32>, vector<32x8xf32>, vector<8x8xf32> -> vector<8x8xf32>
    %c64_717 = arith.constant 64 : index
    %c0_718 = arith.constant 0 : index
    %c0_719 = arith.constant 0 : index
    %1172 = vector.load %arg8[%c64_717, %c0_718, %c0_719] : memref<72x1x8xf32, #tpu.memory_space<vmem>>, vector<1x1x8xf32>
    %1173 = vector.shape_cast %1172 : vector<1x1x8xf32> to vector<1x8xf32>
    %1174 = vector.broadcast %1173 : vector<1x8xf32> to vector<8x8xf32>
    %1175 = arith.addf %1171, %1174 : vector<8x8xf32>
    %c68 = arith.constant 68 : index
    %c0_720 = arith.constant 0 : index
    %c0_721 = arith.constant 0 : index
    %1176 = vector.load %arg7[%c68, %c0_720, %c0_721] : memref<72x32x8xf32, #tpu.memory_space<vmem>>, vector<1x32x8xf32>
    %1177 = vector.shape_cast %1176 : vector<1x32x8xf32> to vector<32x8xf32>
    %cst_722 = arith.constant dense<0.000000e+00> : vector<8x8xf32>
    %1178 = tpu.matmul %527, %1177, %cst_722 {dimension_numbers = #tpu.dot_dimension_numbers<[1], [0], [0], [1], [0, 0, 1, 1], [], []>} : vector<8x32xf32>, vector<32x8xf32>, vector<8x8xf32> -> vector<8x8xf32>
    %c68_723 = arith.constant 68 : index
    %c0_724 = arith.constant 0 : index
    %c0_725 = arith.constant 0 : index
    %1179 = vector.load %arg8[%c68_723, %c0_724, %c0_725] : memref<72x1x8xf32, #tpu.memory_space<vmem>>, vector<1x1x8xf32>
    %1180 = vector.shape_cast %1179 : vector<1x1x8xf32> to vector<1x8xf32>
    %1181 = vector.broadcast %1180 : vector<1x8xf32> to vector<8x8xf32>
    %1182 = arith.addf %1178, %1181 : vector<8x8xf32>
    "tpu.trace_start"() <{level = 10 : i32, message = "qd,kd->qk"}> : () -> ()
    %cst_726 = arith.constant dense<0.000000e+00> : vector<8x8xf32>
    %1183 = tpu.matmul %1168, %1175, %cst_726 {dimension_numbers = #tpu.dot_dimension_numbers<[1], [1], [0], [0], [0, 0, 1, 0], [], []>} : vector<8x8xf32>, vector<8x8xf32>, vector<8x8xf32> -> vector<8x8xf32>
    %cst_727 = arith.constant -1.000000e+09 : f32
    "tpu.trace_stop"() : () -> ()
    %1184 = vector.broadcast %cst_727 : f32 to vector<8x8xf32>
    %1185 = arith.select %11, %1183, %1184 : vector<8x8xi1>, vector<8x8xf32>
    %cst_728 = arith.constant dense<0xFF800000> : vector<8xf32>
    %1186 = vector.multi_reduction <maximumf>, %1185, %cst_728 [1] : vector<8x8xf32> to vector<8xf32>
    %1187 = vector.shape_cast %1186 : vector<8xf32> to vector<8x1xf32>
    %1188 = vector.broadcast %1187 : vector<8x1xf32> to vector<8x8xf32>
    %1189 = arith.subf %1185, %1188 : vector<8x8xf32>
    %1190 = math.exp %1189 : vector<8x8xf32>
    %cst_729 = arith.constant dense<0.000000e+00> : vector<8xf32>
    %1191 = vector.multi_reduction <add>, %1190, %cst_729 [1] : vector<8x8xf32> to vector<8xf32>
    %1192 = vector.shape_cast %1191 : vector<8xf32> to vector<8x1xf32>
    %1193 = tpu.reciprocal %1192 {approx = true} : vector<8x1xf32> -> vector<8x1xf32>
    %1194 = vector.broadcast %1193 : vector<8x1xf32> to vector<8x8xf32>
    %1195 = arith.mulf %1190, %1194 : vector<8x8xf32>
    %cst_730 = arith.constant dense<0.000000e+00> : vector<8x8xf32>
    %1196 = tpu.matmul %1195, %1182, %cst_730 {dimension_numbers = #tpu.dot_dimension_numbers<[1], [0], [0], [1], [0, 0, 1, 1], [], []>} : vector<8x8xf32>, vector<8x8xf32>, vector<8x8xf32> -> vector<8x8xf32>
    %c20_731 = arith.constant 20 : index
    %c0_732 = arith.constant 0 : index
    %c0_733 = arith.constant 0 : index
    %1197 = vector.load %arg9[%c20_731, %c0_732, %c0_733] : memref<24x8x32xf32, #tpu.memory_space<vmem>>, vector<1x8x32xf32>
    %1198 = vector.shape_cast %1197 : vector<1x8x32xf32> to vector<8x32xf32>
    %cst_734 = arith.constant dense<0.000000e+00> : vector<8x32xf32>
    %1199 = tpu.matmul %1196, %1198, %cst_734 {dimension_numbers = #tpu.dot_dimension_numbers<[1], [0], [0], [1], [0, 0, 1, 1], [], []>} : vector<8x8xf32>, vector<8x32xf32>, vector<8x32xf32> -> vector<8x32xf32>
    %1200 = arith.addf %1161, %1199 : vector<8x32xf32>
    %c61 = arith.constant 61 : index
    %c0_735 = arith.constant 0 : index
    %c0_736 = arith.constant 0 : index
    %1201 = vector.load %arg7[%c61, %c0_735, %c0_736] : memref<72x32x8xf32, #tpu.memory_space<vmem>>, vector<1x32x8xf32>
    %1202 = vector.shape_cast %1201 : vector<1x32x8xf32> to vector<32x8xf32>
    %cst_737 = arith.constant dense<0.000000e+00> : vector<8x8xf32>
    %1203 = tpu.matmul %1160, %1202, %cst_737 {dimension_numbers = #tpu.dot_dimension_numbers<[1], [0], [0], [1], [0, 0, 1, 1], [], []>} : vector<8x32xf32>, vector<32x8xf32>, vector<8x8xf32> -> vector<8x8xf32>
    %c61_738 = arith.constant 61 : index
    %c0_739 = arith.constant 0 : index
    %c0_740 = arith.constant 0 : index
    %1204 = vector.load %arg8[%c61_738, %c0_739, %c0_740] : memref<72x1x8xf32, #tpu.memory_space<vmem>>, vector<1x1x8xf32>
    %1205 = vector.shape_cast %1204 : vector<1x1x8xf32> to vector<1x8xf32>
    %1206 = vector.broadcast %1205 : vector<1x8xf32> to vector<8x8xf32>
    %1207 = arith.addf %1203, %1206 : vector<8x8xf32>
    %c65 = arith.constant 65 : index
    %c0_741 = arith.constant 0 : index
    %c0_742 = arith.constant 0 : index
    %1208 = vector.load %arg7[%c65, %c0_741, %c0_742] : memref<72x32x8xf32, #tpu.memory_space<vmem>>, vector<1x32x8xf32>
    %1209 = vector.shape_cast %1208 : vector<1x32x8xf32> to vector<32x8xf32>
    %cst_743 = arith.constant dense<0.000000e+00> : vector<8x8xf32>
    %1210 = tpu.matmul %527, %1209, %cst_743 {dimension_numbers = #tpu.dot_dimension_numbers<[1], [0], [0], [1], [0, 0, 1, 1], [], []>} : vector<8x32xf32>, vector<32x8xf32>, vector<8x8xf32> -> vector<8x8xf32>
    %c65_744 = arith.constant 65 : index
    %c0_745 = arith.constant 0 : index
    %c0_746 = arith.constant 0 : index
    %1211 = vector.load %arg8[%c65_744, %c0_745, %c0_746] : memref<72x1x8xf32, #tpu.memory_space<vmem>>, vector<1x1x8xf32>
    %1212 = vector.shape_cast %1211 : vector<1x1x8xf32> to vector<1x8xf32>
    %1213 = vector.broadcast %1212 : vector<1x8xf32> to vector<8x8xf32>
    %1214 = arith.addf %1210, %1213 : vector<8x8xf32>
    %c69 = arith.constant 69 : index
    %c0_747 = arith.constant 0 : index
    %c0_748 = arith.constant 0 : index
    %1215 = vector.load %arg7[%c69, %c0_747, %c0_748] : memref<72x32x8xf32, #tpu.memory_space<vmem>>, vector<1x32x8xf32>
    %1216 = vector.shape_cast %1215 : vector<1x32x8xf32> to vector<32x8xf32>
    %cst_749 = arith.constant dense<0.000000e+00> : vector<8x8xf32>
    %1217 = tpu.matmul %527, %1216, %cst_749 {dimension_numbers = #tpu.dot_dimension_numbers<[1], [0], [0], [1], [0, 0, 1, 1], [], []>} : vector<8x32xf32>, vector<32x8xf32>, vector<8x8xf32> -> vector<8x8xf32>
    %c69_750 = arith.constant 69 : index
    %c0_751 = arith.constant 0 : index
    %c0_752 = arith.constant 0 : index
    %1218 = vector.load %arg8[%c69_750, %c0_751, %c0_752] : memref<72x1x8xf32, #tpu.memory_space<vmem>>, vector<1x1x8xf32>
    %1219 = vector.shape_cast %1218 : vector<1x1x8xf32> to vector<1x8xf32>
    %1220 = vector.broadcast %1219 : vector<1x8xf32> to vector<8x8xf32>
    %1221 = arith.addf %1217, %1220 : vector<8x8xf32>
    "tpu.trace_start"() <{level = 10 : i32, message = "qd,kd->qk"}> : () -> ()
    %cst_753 = arith.constant dense<0.000000e+00> : vector<8x8xf32>
    %1222 = tpu.matmul %1207, %1214, %cst_753 {dimension_numbers = #tpu.dot_dimension_numbers<[1], [1], [0], [0], [0, 0, 1, 0], [], []>} : vector<8x8xf32>, vector<8x8xf32>, vector<8x8xf32> -> vector<8x8xf32>
    %cst_754 = arith.constant -1.000000e+09 : f32
    "tpu.trace_stop"() : () -> ()
    %1223 = vector.broadcast %cst_754 : f32 to vector<8x8xf32>
    %1224 = arith.select %11, %1222, %1223 : vector<8x8xi1>, vector<8x8xf32>
    %cst_755 = arith.constant dense<0xFF800000> : vector<8xf32>
    %1225 = vector.multi_reduction <maximumf>, %1224, %cst_755 [1] : vector<8x8xf32> to vector<8xf32>
    %1226 = vector.shape_cast %1225 : vector<8xf32> to vector<8x1xf32>
    %1227 = vector.broadcast %1226 : vector<8x1xf32> to vector<8x8xf32>
    %1228 = arith.subf %1224, %1227 : vector<8x8xf32>
    %1229 = math.exp %1228 : vector<8x8xf32>
    %cst_756 = arith.constant dense<0.000000e+00> : vector<8xf32>
    %1230 = vector.multi_reduction <add>, %1229, %cst_756 [1] : vector<8x8xf32> to vector<8xf32>
    %1231 = vector.shape_cast %1230 : vector<8xf32> to vector<8x1xf32>
    %1232 = tpu.reciprocal %1231 {approx = true} : vector<8x1xf32> -> vector<8x1xf32>
    %1233 = vector.broadcast %1232 : vector<8x1xf32> to vector<8x8xf32>
    %1234 = arith.mulf %1229, %1233 : vector<8x8xf32>
    %cst_757 = arith.constant dense<0.000000e+00> : vector<8x8xf32>
    %1235 = tpu.matmul %1234, %1221, %cst_757 {dimension_numbers = #tpu.dot_dimension_numbers<[1], [0], [0], [1], [0, 0, 1, 1], [], []>} : vector<8x8xf32>, vector<8x8xf32>, vector<8x8xf32> -> vector<8x8xf32>
    %c21_758 = arith.constant 21 : index
    %c0_759 = arith.constant 0 : index
    %c0_760 = arith.constant 0 : index
    %1236 = vector.load %arg9[%c21_758, %c0_759, %c0_760] : memref<24x8x32xf32, #tpu.memory_space<vmem>>, vector<1x8x32xf32>
    %1237 = vector.shape_cast %1236 : vector<1x8x32xf32> to vector<8x32xf32>
    %cst_761 = arith.constant dense<0.000000e+00> : vector<8x32xf32>
    %1238 = tpu.matmul %1235, %1237, %cst_761 {dimension_numbers = #tpu.dot_dimension_numbers<[1], [0], [0], [1], [0, 0, 1, 1], [], []>} : vector<8x8xf32>, vector<8x32xf32>, vector<8x32xf32> -> vector<8x32xf32>
    %1239 = arith.addf %1200, %1238 : vector<8x32xf32>
    %c62 = arith.constant 62 : index
    %c0_762 = arith.constant 0 : index
    %c0_763 = arith.constant 0 : index
    %1240 = vector.load %arg7[%c62, %c0_762, %c0_763] : memref<72x32x8xf32, #tpu.memory_space<vmem>>, vector<1x32x8xf32>
    %1241 = vector.shape_cast %1240 : vector<1x32x8xf32> to vector<32x8xf32>
    %cst_764 = arith.constant dense<0.000000e+00> : vector<8x8xf32>
    %1242 = tpu.matmul %1160, %1241, %cst_764 {dimension_numbers = #tpu.dot_dimension_numbers<[1], [0], [0], [1], [0, 0, 1, 1], [], []>} : vector<8x32xf32>, vector<32x8xf32>, vector<8x8xf32> -> vector<8x8xf32>
    %c62_765 = arith.constant 62 : index
    %c0_766 = arith.constant 0 : index
    %c0_767 = arith.constant 0 : index
    %1243 = vector.load %arg8[%c62_765, %c0_766, %c0_767] : memref<72x1x8xf32, #tpu.memory_space<vmem>>, vector<1x1x8xf32>
    %1244 = vector.shape_cast %1243 : vector<1x1x8xf32> to vector<1x8xf32>
    %1245 = vector.broadcast %1244 : vector<1x8xf32> to vector<8x8xf32>
    %1246 = arith.addf %1242, %1245 : vector<8x8xf32>
    %c66 = arith.constant 66 : index
    %c0_768 = arith.constant 0 : index
    %c0_769 = arith.constant 0 : index
    %1247 = vector.load %arg7[%c66, %c0_768, %c0_769] : memref<72x32x8xf32, #tpu.memory_space<vmem>>, vector<1x32x8xf32>
    %1248 = vector.shape_cast %1247 : vector<1x32x8xf32> to vector<32x8xf32>
    %cst_770 = arith.constant dense<0.000000e+00> : vector<8x8xf32>
    %1249 = tpu.matmul %527, %1248, %cst_770 {dimension_numbers = #tpu.dot_dimension_numbers<[1], [0], [0], [1], [0, 0, 1, 1], [], []>} : vector<8x32xf32>, vector<32x8xf32>, vector<8x8xf32> -> vector<8x8xf32>
    %c66_771 = arith.constant 66 : index
    %c0_772 = arith.constant 0 : index
    %c0_773 = arith.constant 0 : index
    %1250 = vector.load %arg8[%c66_771, %c0_772, %c0_773] : memref<72x1x8xf32, #tpu.memory_space<vmem>>, vector<1x1x8xf32>
    %1251 = vector.shape_cast %1250 : vector<1x1x8xf32> to vector<1x8xf32>
    %1252 = vector.broadcast %1251 : vector<1x8xf32> to vector<8x8xf32>
    %1253 = arith.addf %1249, %1252 : vector<8x8xf32>
    %c70 = arith.constant 70 : index
    %c0_774 = arith.constant 0 : index
    %c0_775 = arith.constant 0 : index
    %1254 = vector.load %arg7[%c70, %c0_774, %c0_775] : memref<72x32x8xf32, #tpu.memory_space<vmem>>, vector<1x32x8xf32>
    %1255 = vector.shape_cast %1254 : vector<1x32x8xf32> to vector<32x8xf32>
    %cst_776 = arith.constant dense<0.000000e+00> : vector<8x8xf32>
    %1256 = tpu.matmul %527, %1255, %cst_776 {dimension_numbers = #tpu.dot_dimension_numbers<[1], [0], [0], [1], [0, 0, 1, 1], [], []>} : vector<8x32xf32>, vector<32x8xf32>, vector<8x8xf32> -> vector<8x8xf32>
    %c70_777 = arith.constant 70 : index
    %c0_778 = arith.constant 0 : index
    %c0_779 = arith.constant 0 : index
    %1257 = vector.load %arg8[%c70_777, %c0_778, %c0_779] : memref<72x1x8xf32, #tpu.memory_space<vmem>>, vector<1x1x8xf32>
    %1258 = vector.shape_cast %1257 : vector<1x1x8xf32> to vector<1x8xf32>
    %1259 = vector.broadcast %1258 : vector<1x8xf32> to vector<8x8xf32>
    %1260 = arith.addf %1256, %1259 : vector<8x8xf32>
    "tpu.trace_start"() <{level = 10 : i32, message = "qd,kd->qk"}> : () -> ()
    %cst_780 = arith.constant dense<0.000000e+00> : vector<8x8xf32>
    %1261 = tpu.matmul %1246, %1253, %cst_780 {dimension_numbers = #tpu.dot_dimension_numbers<[1], [1], [0], [0], [0, 0, 1, 0], [], []>} : vector<8x8xf32>, vector<8x8xf32>, vector<8x8xf32> -> vector<8x8xf32>
    %cst_781 = arith.constant -1.000000e+09 : f32
    "tpu.trace_stop"() : () -> ()
    %1262 = vector.broadcast %cst_781 : f32 to vector<8x8xf32>
    %1263 = arith.select %11, %1261, %1262 : vector<8x8xi1>, vector<8x8xf32>
    %cst_782 = arith.constant dense<0xFF800000> : vector<8xf32>
    %1264 = vector.multi_reduction <maximumf>, %1263, %cst_782 [1] : vector<8x8xf32> to vector<8xf32>
    %1265 = vector.shape_cast %1264 : vector<8xf32> to vector<8x1xf32>
    %1266 = vector.broadcast %1265 : vector<8x1xf32> to vector<8x8xf32>
    %1267 = arith.subf %1263, %1266 : vector<8x8xf32>
    %1268 = math.exp %1267 : vector<8x8xf32>
    %cst_783 = arith.constant dense<0.000000e+00> : vector<8xf32>
    %1269 = vector.multi_reduction <add>, %1268, %cst_783 [1] : vector<8x8xf32> to vector<8xf32>
    %1270 = vector.shape_cast %1269 : vector<8xf32> to vector<8x1xf32>
    %1271 = tpu.reciprocal %1270 {approx = true} : vector<8x1xf32> -> vector<8x1xf32>
    %1272 = vector.broadcast %1271 : vector<8x1xf32> to vector<8x8xf32>
    %1273 = arith.mulf %1268, %1272 : vector<8x8xf32>
    %cst_784 = arith.constant dense<0.000000e+00> : vector<8x8xf32>
    %1274 = tpu.matmul %1273, %1260, %cst_784 {dimension_numbers = #tpu.dot_dimension_numbers<[1], [0], [0], [1], [0, 0, 1, 1], [], []>} : vector<8x8xf32>, vector<8x8xf32>, vector<8x8xf32> -> vector<8x8xf32>
    %c22_785 = arith.constant 22 : index
    %c0_786 = arith.constant 0 : index
    %c0_787 = arith.constant 0 : index
    %1275 = vector.load %arg9[%c22_785, %c0_786, %c0_787] : memref<24x8x32xf32, #tpu.memory_space<vmem>>, vector<1x8x32xf32>
    %1276 = vector.shape_cast %1275 : vector<1x8x32xf32> to vector<8x32xf32>
    %cst_788 = arith.constant dense<0.000000e+00> : vector<8x32xf32>
    %1277 = tpu.matmul %1274, %1276, %cst_788 {dimension_numbers = #tpu.dot_dimension_numbers<[1], [0], [0], [1], [0, 0, 1, 1], [], []>} : vector<8x8xf32>, vector<8x32xf32>, vector<8x32xf32> -> vector<8x32xf32>
    %1278 = arith.addf %1239, %1277 : vector<8x32xf32>
    %c63 = arith.constant 63 : index
    %c0_789 = arith.constant 0 : index
    %c0_790 = arith.constant 0 : index
    %1279 = vector.load %arg7[%c63, %c0_789, %c0_790] : memref<72x32x8xf32, #tpu.memory_space<vmem>>, vector<1x32x8xf32>
    %1280 = vector.shape_cast %1279 : vector<1x32x8xf32> to vector<32x8xf32>
    %cst_791 = arith.constant dense<0.000000e+00> : vector<8x8xf32>
    %1281 = tpu.matmul %1160, %1280, %cst_791 {dimension_numbers = #tpu.dot_dimension_numbers<[1], [0], [0], [1], [0, 0, 1, 1], [], []>} : vector<8x32xf32>, vector<32x8xf32>, vector<8x8xf32> -> vector<8x8xf32>
    %c63_792 = arith.constant 63 : index
    %c0_793 = arith.constant 0 : index
    %c0_794 = arith.constant 0 : index
    %1282 = vector.load %arg8[%c63_792, %c0_793, %c0_794] : memref<72x1x8xf32, #tpu.memory_space<vmem>>, vector<1x1x8xf32>
    %1283 = vector.shape_cast %1282 : vector<1x1x8xf32> to vector<1x8xf32>
    %1284 = vector.broadcast %1283 : vector<1x8xf32> to vector<8x8xf32>
    %1285 = arith.addf %1281, %1284 : vector<8x8xf32>
    %c67 = arith.constant 67 : index
    %c0_795 = arith.constant 0 : index
    %c0_796 = arith.constant 0 : index
    %1286 = vector.load %arg7[%c67, %c0_795, %c0_796] : memref<72x32x8xf32, #tpu.memory_space<vmem>>, vector<1x32x8xf32>
    %1287 = vector.shape_cast %1286 : vector<1x32x8xf32> to vector<32x8xf32>
    %cst_797 = arith.constant dense<0.000000e+00> : vector<8x8xf32>
    %1288 = tpu.matmul %527, %1287, %cst_797 {dimension_numbers = #tpu.dot_dimension_numbers<[1], [0], [0], [1], [0, 0, 1, 1], [], []>} : vector<8x32xf32>, vector<32x8xf32>, vector<8x8xf32> -> vector<8x8xf32>
    %c67_798 = arith.constant 67 : index
    %c0_799 = arith.constant 0 : index
    %c0_800 = arith.constant 0 : index
    %1289 = vector.load %arg8[%c67_798, %c0_799, %c0_800] : memref<72x1x8xf32, #tpu.memory_space<vmem>>, vector<1x1x8xf32>
    %1290 = vector.shape_cast %1289 : vector<1x1x8xf32> to vector<1x8xf32>
    %1291 = vector.broadcast %1290 : vector<1x8xf32> to vector<8x8xf32>
    %1292 = arith.addf %1288, %1291 : vector<8x8xf32>
    %c71 = arith.constant 71 : index
    %c0_801 = arith.constant 0 : index
    %c0_802 = arith.constant 0 : index
    %1293 = vector.load %arg7[%c71, %c0_801, %c0_802] : memref<72x32x8xf32, #tpu.memory_space<vmem>>, vector<1x32x8xf32>
    %1294 = vector.shape_cast %1293 : vector<1x32x8xf32> to vector<32x8xf32>
    %cst_803 = arith.constant dense<0.000000e+00> : vector<8x8xf32>
    %1295 = tpu.matmul %527, %1294, %cst_803 {dimension_numbers = #tpu.dot_dimension_numbers<[1], [0], [0], [1], [0, 0, 1, 1], [], []>} : vector<8x32xf32>, vector<32x8xf32>, vector<8x8xf32> -> vector<8x8xf32>
    %c71_804 = arith.constant 71 : index
    %c0_805 = arith.constant 0 : index
    %c0_806 = arith.constant 0 : index
    %1296 = vector.load %arg8[%c71_804, %c0_805, %c0_806] : memref<72x1x8xf32, #tpu.memory_space<vmem>>, vector<1x1x8xf32>
    %1297 = vector.shape_cast %1296 : vector<1x1x8xf32> to vector<1x8xf32>
    %1298 = vector.broadcast %1297 : vector<1x8xf32> to vector<8x8xf32>
    %1299 = arith.addf %1295, %1298 : vector<8x8xf32>
    "tpu.trace_start"() <{level = 10 : i32, message = "qd,kd->qk"}> : () -> ()
    %cst_807 = arith.constant dense<0.000000e+00> : vector<8x8xf32>
    %1300 = tpu.matmul %1285, %1292, %cst_807 {dimension_numbers = #tpu.dot_dimension_numbers<[1], [1], [0], [0], [0, 0, 1, 0], [], []>} : vector<8x8xf32>, vector<8x8xf32>, vector<8x8xf32> -> vector<8x8xf32>
    %cst_808 = arith.constant -1.000000e+09 : f32
    "tpu.trace_stop"() : () -> ()
    %1301 = vector.broadcast %cst_808 : f32 to vector<8x8xf32>
    %1302 = arith.select %11, %1300, %1301 : vector<8x8xi1>, vector<8x8xf32>
    %cst_809 = arith.constant dense<0xFF800000> : vector<8xf32>
    %1303 = vector.multi_reduction <maximumf>, %1302, %cst_809 [1] : vector<8x8xf32> to vector<8xf32>
    %1304 = vector.shape_cast %1303 : vector<8xf32> to vector<8x1xf32>
    %1305 = vector.broadcast %1304 : vector<8x1xf32> to vector<8x8xf32>
    %1306 = arith.subf %1302, %1305 : vector<8x8xf32>
    %1307 = math.exp %1306 : vector<8x8xf32>
    %cst_810 = arith.constant dense<0.000000e+00> : vector<8xf32>
    %1308 = vector.multi_reduction <add>, %1307, %cst_810 [1] : vector<8x8xf32> to vector<8xf32>
    %1309 = vector.shape_cast %1308 : vector<8xf32> to vector<8x1xf32>
    %1310 = tpu.reciprocal %1309 {approx = true} : vector<8x1xf32> -> vector<8x1xf32>
    %1311 = vector.broadcast %1310 : vector<8x1xf32> to vector<8x8xf32>
    %1312 = arith.mulf %1307, %1311 : vector<8x8xf32>
    %cst_811 = arith.constant dense<0.000000e+00> : vector<8x8xf32>
    %1313 = tpu.matmul %1312, %1299, %cst_811 {dimension_numbers = #tpu.dot_dimension_numbers<[1], [0], [0], [1], [0, 0, 1, 1], [], []>} : vector<8x8xf32>, vector<8x8xf32>, vector<8x8xf32> -> vector<8x8xf32>
    %c23_812 = arith.constant 23 : index
    %c0_813 = arith.constant 0 : index
    %c0_814 = arith.constant 0 : index
    %1314 = vector.load %arg9[%c23_812, %c0_813, %c0_814] : memref<24x8x32xf32, #tpu.memory_space<vmem>>, vector<1x8x32xf32>
    %1315 = vector.shape_cast %1314 : vector<1x8x32xf32> to vector<8x32xf32>
    %cst_815 = arith.constant dense<0.000000e+00> : vector<8x32xf32>
    %1316 = tpu.matmul %1313, %1315, %cst_815 {dimension_numbers = #tpu.dot_dimension_numbers<[1], [0], [0], [1], [0, 0, 1, 1], [], []>} : vector<8x8xf32>, vector<8x32xf32>, vector<8x32xf32> -> vector<8x32xf32>
    %1317 = arith.addf %1278, %1316 : vector<8x32xf32>
    %c5_816 = arith.constant 5 : index
    %c0_817 = arith.constant 0 : index
    %c0_818 = arith.constant 0 : index
    %1318 = vector.load %arg10[%c5_816, %c0_817, %c0_818] : memref<6x1x32xf32, #tpu.memory_space<vmem>>, vector<1x1x32xf32>
    %1319 = vector.shape_cast %1318 : vector<1x1x32xf32> to vector<1x32xf32>
    %1320 = vector.broadcast %1319 : vector<1x32xf32> to vector<8x32xf32>
    %1321 = arith.addf %1317, %1320 : vector<8x32xf32>
    %1322 = arith.addf %1134, %1321 : vector<8x32xf32>
    %c10_819 = arith.constant 10 : index
    %c0_820 = arith.constant 0 : index
    %c0_821 = arith.constant 0 : index
    %1323 = vector.load %arg15[%c10_819, %c0_820, %c0_821] : memref<12x2x32xf32, #tpu.memory_space<vmem>>, vector<1x2x32xf32>
    %1324 = vector.shape_cast %1323 : vector<1x2x32xf32> to vector<2x32xf32>
    %cst_822 = arith.constant dense<0.000000e+00> : vector<8xf32>
    %1325 = vector.multi_reduction <add>, %1322, %cst_822 [1] : vector<8x32xf32> to vector<8xf32>
    %1326 = vector.shape_cast %1325 : vector<8xf32> to vector<8x1xf32>
    %cst_823 = arith.constant 3.200000e+01 : f32
    %1327 = vector.broadcast %cst_823 : f32 to vector<8x1xf32>
    %1328 = arith.divf %1326, %1327 : vector<8x1xf32>
    %1329 = arith.mulf %1322, %1322 : vector<8x32xf32>
    %cst_824 = arith.constant dense<0.000000e+00> : vector<8xf32>
    %1330 = vector.multi_reduction <add>, %1329, %cst_824 [1] : vector<8x32xf32> to vector<8xf32>
    %1331 = vector.shape_cast %1330 : vector<8xf32> to vector<8x1xf32>
    %cst_825 = arith.constant 3.200000e+01 : f32
    %1332 = vector.broadcast %cst_825 : f32 to vector<8x1xf32>
    %1333 = arith.divf %1331, %1332 : vector<8x1xf32>
    %1334 = arith.mulf %1328, %1328 : vector<8x1xf32>
    %1335 = arith.subf %1333, %1334 : vector<8x1xf32>
    %cst_826 = arith.constant 9.99999997E-7 : f32
    %1336 = vector.broadcast %cst_826 : f32 to vector<8x1xf32>
    %1337 = arith.addf %1335, %1336 : vector<8x1xf32>
    %1338 = math.rsqrt %1337 : vector<8x1xf32>
    %1339 = vector.broadcast %1328 : vector<8x1xf32> to vector<8x32xf32>
    %1340 = arith.subf %1322, %1339 : vector<8x32xf32>
    %1341 = vector.broadcast %1338 : vector<8x1xf32> to vector<8x32xf32>
    %1342 = arith.mulf %1340, %1341 : vector<8x32xf32>
    %1343 = vector.extract_strided_slice %1324 {offsets = [0, 0], sizes = [1, 32], strides = [1, 1]} : vector<2x32xf32> to vector<1x32xf32>
    %1344 = vector.broadcast %1343 : vector<1x32xf32> to vector<8x32xf32>
    %1345 = arith.mulf %1342, %1344 : vector<8x32xf32>
    %1346 = vector.extract_strided_slice %1324 {offsets = [1, 0], sizes = [1, 32], strides = [1, 1]} : vector<2x32xf32> to vector<1x32xf32>
    %1347 = vector.broadcast %1346 : vector<1x32xf32> to vector<8x32xf32>
    %1348 = arith.addf %1345, %1347 : vector<8x32xf32>
    %c3_827 = arith.constant 3 : index
    %c0_828 = arith.constant 0 : index
    %c0_829 = arith.constant 0 : index
    %1349 = vector.load %arg11[%c3_827, %c0_828, %c0_829] : memref<4x32x64xf32, #tpu.memory_space<vmem>>, vector<1x32x64xf32>
    %1350 = vector.shape_cast %1349 : vector<1x32x64xf32> to vector<32x64xf32>
    %cst_830 = arith.constant dense<0.000000e+00> : vector<8x64xf32>
    %1351 = tpu.matmul %1348, %1350, %cst_830 {dimension_numbers = #tpu.dot_dimension_numbers<[1], [0], [0], [1], [0, 0, 1, 1], [], []>} : vector<8x32xf32>, vector<32x64xf32>, vector<8x64xf32> -> vector<8x64xf32>
    %c3_831 = arith.constant 3 : index
    %c0_832 = arith.constant 0 : index
    %c0_833 = arith.constant 0 : index
    %1352 = vector.load %arg12[%c3_831, %c0_832, %c0_833] : memref<4x1x64xf32, #tpu.memory_space<vmem>>, vector<1x1x64xf32>
    %1353 = vector.shape_cast %1352 : vector<1x1x64xf32> to vector<1x64xf32>
    %1354 = vector.broadcast %1353 : vector<1x64xf32> to vector<8x64xf32>
    %1355 = arith.addf %1351, %1354 : vector<8x64xf32>
    %cst_834 = arith.constant 0.000000e+00 : f32
    %1356 = vector.broadcast %cst_834 : f32 to vector<8x64xf32>
    %1357 = arith.maximumf %1355, %1356 : vector<8x64xf32>
    %c3_835 = arith.constant 3 : index
    %c0_836 = arith.constant 0 : index
    %c0_837 = arith.constant 0 : index
    %1358 = vector.load %arg13[%c3_835, %c0_836, %c0_837] : memref<4x64x32xf32, #tpu.memory_space<vmem>>, vector<1x64x32xf32>
    %1359 = vector.shape_cast %1358 : vector<1x64x32xf32> to vector<64x32xf32>
    %cst_838 = arith.constant dense<0.000000e+00> : vector<8x32xf32>
    %1360 = tpu.matmul %1357, %1359, %cst_838 {dimension_numbers = #tpu.dot_dimension_numbers<[1], [0], [0], [1], [0, 0, 1, 1], [], []>} : vector<8x64xf32>, vector<64x32xf32>, vector<8x32xf32> -> vector<8x32xf32>
    %c3_839 = arith.constant 3 : index
    %c0_840 = arith.constant 0 : index
    %c0_841 = arith.constant 0 : index
    %1361 = vector.load %arg14[%c3_839, %c0_840, %c0_841] : memref<4x1x32xf32, #tpu.memory_space<vmem>>, vector<1x1x32xf32>
    %1362 = vector.shape_cast %1361 : vector<1x1x32xf32> to vector<1x32xf32>
    %1363 = vector.broadcast %1362 : vector<1x32xf32> to vector<8x32xf32>
    %1364 = arith.addf %1360, %1363 : vector<8x32xf32>
    %1365 = arith.addf %1322, %1364 : vector<8x32xf32>
    %c11_842 = arith.constant 11 : index
    %c0_843 = arith.constant 0 : index
    %c0_844 = arith.constant 0 : index
    %1366 = vector.load %arg15[%c11_842, %c0_843, %c0_844] : memref<12x2x32xf32, #tpu.memory_space<vmem>>, vector<1x2x32xf32>
    %1367 = vector.shape_cast %1366 : vector<1x2x32xf32> to vector<2x32xf32>
    %cst_845 = arith.constant dense<0.000000e+00> : vector<8xf32>
    %1368 = vector.multi_reduction <add>, %1365, %cst_845 [1] : vector<8x32xf32> to vector<8xf32>
    %1369 = vector.shape_cast %1368 : vector<8xf32> to vector<8x1xf32>
    %cst_846 = arith.constant 3.200000e+01 : f32
    %1370 = vector.broadcast %cst_846 : f32 to vector<8x1xf32>
    %1371 = arith.divf %1369, %1370 : vector<8x1xf32>
    %1372 = arith.mulf %1365, %1365 : vector<8x32xf32>
    %cst_847 = arith.constant dense<0.000000e+00> : vector<8xf32>
    %1373 = vector.multi_reduction <add>, %1372, %cst_847 [1] : vector<8x32xf32> to vector<8xf32>
    %1374 = vector.shape_cast %1373 : vector<8xf32> to vector<8x1xf32>
    %cst_848 = arith.constant 3.200000e+01 : f32
    %1375 = vector.broadcast %cst_848 : f32 to vector<8x1xf32>
    %1376 = arith.divf %1374, %1375 : vector<8x1xf32>
    %1377 = arith.mulf %1371, %1371 : vector<8x1xf32>
    %1378 = arith.subf %1376, %1377 : vector<8x1xf32>
    %cst_849 = arith.constant 9.99999997E-7 : f32
    %1379 = vector.broadcast %cst_849 : f32 to vector<8x1xf32>
    %1380 = arith.addf %1378, %1379 : vector<8x1xf32>
    %1381 = math.rsqrt %1380 : vector<8x1xf32>
    %1382 = vector.broadcast %1371 : vector<8x1xf32> to vector<8x32xf32>
    %1383 = arith.subf %1365, %1382 : vector<8x32xf32>
    %1384 = vector.broadcast %1381 : vector<8x1xf32> to vector<8x32xf32>
    %1385 = arith.mulf %1383, %1384 : vector<8x32xf32>
    %1386 = vector.extract_strided_slice %1367 {offsets = [0, 0], sizes = [1, 32], strides = [1, 1]} : vector<2x32xf32> to vector<1x32xf32>
    %1387 = vector.broadcast %1386 : vector<1x32xf32> to vector<8x32xf32>
    %1388 = arith.mulf %1385, %1387 : vector<8x32xf32>
    %1389 = vector.extract_strided_slice %1367 {offsets = [1, 0], sizes = [1, 32], strides = [1, 1]} : vector<2x32xf32> to vector<1x32xf32>
    %1390 = vector.broadcast %1389 : vector<1x32xf32> to vector<8x32xf32>
    %1391 = arith.addf %1388, %1390 : vector<8x32xf32>
    %c0_850 = arith.constant 0 : index
    %c0_851 = arith.constant 0 : index
    %c0_852 = arith.constant 0 : index
    %1392 = vector.load %arg16[%c0_850, %c0_851, %c0_852] : memref<1x8x32xf32, #tpu.memory_space<vmem>>, vector<1x8x32xf32>
    %1393 = vector.shape_cast %1392 : vector<1x8x32xf32> to vector<8x32xf32>
    %1394 = vector.shape_cast %1391 : vector<8x32xf32> to vector<1x8x32xf32>
    tpu.vector_store %arg16[%c0_850, %c0_851, %c0_852], %1394 {strides = array<i32>} : memref<1x8x32xf32, #tpu.memory_space<vmem>>, vector<1x8x32xf32>,
    return
  }
  func.func @transform_0(%arg0: i32) -> (i32, i32) {
    %c0_i32 = arith.constant 0 : i32
    %c0_i32_0 = arith.constant 0 : i32
    return %arg0, %c0_i32 : i32, i32
  }
  func.func @transform_1(%arg0: i32) -> (i32, i32) {
    %c0_i32 = arith.constant 0 : i32
    %c0_i32_0 = arith.constant 0 : i32
    return %arg0, %c0_i32 : i32, i32
  }
  func.func @transform_2(%arg0: i32) -> (i32, i32, i32) {
    %c0_i32 = arith.constant 0 : i32
    %c0_i32_0 = arith.constant 0 : i32
    %c0_i32_1 = arith.constant 0 : i32
    return %arg0, %c0_i32, %c0_i32_0 : i32, i32, i32
  }
  func.func @transform_3(%arg0: i32) -> (i32, i32, i32) {
    %c0_i32 = arith.constant 0 : i32
    %c0_i32_0 = arith.constant 0 : i32
    %c0_i32_1 = arith.constant 0 : i32
    return %arg0, %c0_i32, %c0_i32_0 : i32, i32, i32
  }
  func.func @transform_4(%arg0: i32) -> (i32, i32, i32) {
    %c0_i32 = arith.constant 0 : i32
    %c0_i32_0 = arith.constant 0 : i32
    %c0_i32_1 = arith.constant 0 : i32
    %c0_i32_2 = arith.constant 0 : i32
    return %c0_i32, %c0_i32_0, %c0_i32_1 : i32, i32, i32
  }
  func.func @transform_5(%arg0: i32) -> (i32, i32) {
    %c0_i32 = arith.constant 0 : i32
    %c0_i32_0 = arith.constant 0 : i32
    %c0_i32_1 = arith.constant 0 : i32
    return %c0_i32, %c0_i32_0 : i32, i32
  }
  func.func @transform_6(%arg0: i32) -> (i32, i32, i32) {
    %c0_i32 = arith.constant 0 : i32
    %c0_i32_0 = arith.constant 0 : i32
    %c0_i32_1 = arith.constant 0 : i32
    %c0_i32_2 = arith.constant 0 : i32
    return %c0_i32, %c0_i32_0, %c0_i32_1 : i32, i32, i32
  }
  func.func @transform_7(%arg0: i32) -> (i32, i32, i32) {
    %c0_i32 = arith.constant 0 : i32
    %c0_i32_0 = arith.constant 0 : i32
    %c0_i32_1 = arith.constant 0 : i32
    %c0_i32_2 = arith.constant 0 : i32
    return %c0_i32, %c0_i32_0, %c0_i32_1 : i32, i32, i32
  }
  func.func @transform_8(%arg0: i32) -> (i32, i32, i32) {
    %c0_i32 = arith.constant 0 : i32
    %c0_i32_0 = arith.constant 0 : i32
    %c0_i32_1 = arith.constant 0 : i32
    %c0_i32_2 = arith.constant 0 : i32
    return %c0_i32, %c0_i32_0, %c0_i32_1 : i32, i32, i32
  }
  func.func @transform_9(%arg0: i32) -> (i32, i32, i32) {
    %c0_i32 = arith.constant 0 : i32
    %c0_i32_0 = arith.constant 0 : i32
    %c0_i32_1 = arith.constant 0 : i32
    %c0_i32_2 = arith.constant 0 : i32
    return %c0_i32, %c0_i32_0, %c0_i32_1 : i32, i32, i32
  }
  func.func @transform_10(%arg0: i32) -> (i32, i32, i32) {
    %c0_i32 = arith.constant 0 : i32
    %c0_i32_0 = arith.constant 0 : i32
    %c0_i32_1 = arith.constant 0 : i32
    %c0_i32_2 = arith.constant 0 : i32
    return %c0_i32, %c0_i32_0, %c0_i32_1 : i32, i32, i32
  }
  func.func @transform_11(%arg0: i32) -> (i32, i32, i32) {
    %c0_i32 = arith.constant 0 : i32
    %c0_i32_0 = arith.constant 0 : i32
    %c0_i32_1 = arith.constant 0 : i32
    %c0_i32_2 = arith.constant 0 : i32
    return %c0_i32, %c0_i32_0, %c0_i32_1 : i32, i32, i32
  }
  func.func @transform_12(%arg0: i32) -> (i32, i32, i32) {
    %c0_i32 = arith.constant 0 : i32
    %c0_i32_0 = arith.constant 0 : i32
    %c0_i32_1 = arith.constant 0 : i32
    %c0_i32_2 = arith.constant 0 : i32
    return %c0_i32, %c0_i32_0, %c0_i32_1 : i32, i32, i32
  }
  func.func @transform_13(%arg0: i32) -> (i32, i32, i32) {
    %c0_i32 = arith.constant 0 : i32
    %c0_i32_0 = arith.constant 0 : i32
    %c0_i32_1 = arith.constant 0 : i32
    %c0_i32_2 = arith.constant 0 : i32
    return %c0_i32, %c0_i32_0, %c0_i32_1 : i32, i32, i32
  }
  func.func @transform_14(%arg0: i32) -> (i32, i32, i32) {
    %c0_i32 = arith.constant 0 : i32
    %c0_i32_0 = arith.constant 0 : i32
    %c0_i32_1 = arith.constant 0 : i32
    %c0_i32_2 = arith.constant 0 : i32
    return %c0_i32, %c0_i32_0, %c0_i32_1 : i32, i32, i32
  }
  func.func @transform_15(%arg0: i32) -> (i32, i32, i32) {
    %c0_i32 = arith.constant 0 : i32
    %c0_i32_0 = arith.constant 0 : i32
    %c0_i32_1 = arith.constant 0 : i32
    return %arg0, %c0_i32, %c0_i32_0 : i32, i32, i32
  }
}

</mosaic_0001>

<bundles_post_ra>
// kernel: transformer_forward.1
= control target key start
LH: loop header
LB: loop body
LE: loop exit
PB: predicated region body
PF: predicated region fallthrough
CT: control target
= control target key end

     0   :  { %s19243_s0 = inlined_call_operand.vmem [shape: s32[16,1], index: 0, kind: input, shape index: {}]   ;;  %s19244_s1 = inlined_call_operand.vmem [shape: s32[16,1], index: 1, kind: input, shape index: {}]   ;;  %s19245_s2 = inlined_call_operand.vmem [shape: s32[2,1,8], index: 2, kind: input, shape index: {}]   ;;  %s19246_s3 = inlined_call_operand.vmem [shape: s32[2,1,8], index: 3, kind: input, shape index: {}]   ;;  %s19247_s4 = inlined_call_operand.vmem [shape: f32[2,16,32], index: 4, kind: input, shape index: {}]   ;;  %s19248_s5 = inlined_call_operand.vmem [shape: f32[16,32], index: 5, kind: input, shape index: {}]   ;;  %s19249_s6 = inlined_call_operand.vmem [shape: f32[72,32,8], index: 6, kind: input, shape index: {}]   ;;  %s19250_s7 = inlined_call_operand.vmem [shape: f32[72,1,8], index: 7, kind: input, shape index: {}]   ;;  %s19251_s8 = inlined_call_operand.vmem [shape: f32[24,8,32], index: 8, kind: input, shape index: {}]   ;;  %s19252_s9 = inlined_call_operand.vmem [shape: f32[6,1,32], index: 9, kind: input, shape index: {}]   ;;  %s19253_s10 = inlined_call_operand.vmem [shape: f32[4,32,64], index: 10, kind: input, shape index: {}]   ;;  %s19254_s11 = inlined_call_operand.vmem [shape: f32[4,1,64], index: 11, kind: input, shape index: {}]   ;;  %s19255_s12 = inlined_call_operand.vmem [shape: f32[4,64,32], index: 12, kind: input, shape index: {}]   ;;  %s19256_s13 = inlined_call_operand.vmem [shape: f32[4,1,32], index: 13, kind: input, shape index: {}]   ;;  %s19257_s14 = inlined_call_operand.vmem [shape: f32[12,2,32], index: 14, kind: input, shape index: {}]   ;;  %s19258_s15 = inlined_call_operand.hbm [shape: f32[2,8,32], index: 15, kind: output, shape index: {}]  }
   0x1   :  { %19264 = sst [smem:[#allocation10_spill]] %s19243_s0 }
   0x2   :  { %20 = vsyncpa [#allocation3], 0 }
   0x3   :  { %22 = vsyncpa [#allocation3 + $0x1], 0  ;;  %s16470_s18 = smov 0   ;;  %s16472_s19 = smov 0  }
   0x4   :  { %s16474_s20 = smov 0   ;;  %s16476_s21 = smov 0  }
   0x5 LB: > { %19265 = sst [smem:[#allocation5_spill]] %s16372_s18  ;;  %s16491_s22 = sadd.s32 4294967295, %s16384_s21   ;;  %s16384_s21 = sphi %s16476_s21, %s19279_s21   ;;  %s16380_s20 = sphi %s16474_s20, %s19281_s20   ;;  %s16376_s19 = sphi %s16472_s19, %s19283_s19   ;;  %s16372_s18 = sphi %s16470_s18, %s19282_s18  }
   0x6   : > { %19266 = sst [smem:[#allocation6_spill]] %s16380_s20  ;;  %s13592_s23 = sadd.s32 4294967294, %s16384_s21  }
   0x7   : > { %s16495_s24 = sadd.s32 1, %s16384_s21   ;;  %s370_s25 = sadd.s32 1, %s16380_s20 }
   0x8   : > { %19267 = sst [smem:[#allocation7_spill]] %s16495_s24  ;;  %s367_s26 = ssub.s32 %s16384_s21, %s16495_s24 }
   0x9   : > { %p380_p0 = scmp.ne.s32.totalorder %s16380_s20, %s16376_s19  ;;  %p368_p1 = scmp.eq.s32.totalorder %s367_s26, 0 }
   0xa   : > { %p381_p2 = scmp.eq.s32.totalorder %s16491_s22, 1  ;;  %p386_p3 = scmp.ne.s32.totalorder %s16376_s19, %s16372_s18 }
   0xb   : > { %p387_p4 = scmp.eq.s32.totalorder %s13592_s23, 1  ;;  %p13595_p7 = scmp.ge.s32.totalorder %s16384_s21, 1 }
   0xc   : > { %s16506_s27 = scalar_select %p368_p1, %s16380_s20, %s370_s25  }
   0xd   : > { %p16508_p5 = por %p381_p2, %p380_p0  ;;  %p16512_p6 = por %p387_p4, %p386_p3 }
   0xe   : > { %19268 = sst [smem:[#allocation8_spill]] %s16506_s27  ;;  %p464_p8 = scmp.lt.s32.totalorder %s16384_s21, 3 }
   0xf   : > { %s19270_s29 = scalar_select %p16512_p6, 1, 0 }
  0x10   : > { %p465_p9 = pnand %p13595_p7, %p464_p8 }
  0x11   : > { %19271 = sst [smem:[#allocation9_spill]] %s19270_s29  ;;  %p521_p10 = scmp.lt.s32.totalorder (!%p465_p9), %s16491_s22, 1 }
  0x12   : > { %468 = sbr.rel (%p465_p9) target bundleno = 24931 (0x6163), region = 80  ;;  %s19272_s0 = sld [smem:[#allocation10_spill]] (!%p465_p9) }
  0x13   : > { %s518_s20 = sand.u32 (!%p465_p9), 1, %s16376_s19   ;;  %s14304_s30 = sshll.u32 (!%p465_p9), %s16491_s22, 7 }
  0x14   : > { %s13596_s24 = sshll.u32 (!%p465_p9), %s518_s20, 3  ;;  %s13501_s18 = scalar_lea.hbm (!%p465_p9), %s19258_s15, %s14304_s30 }
  0x15   : > { %s520_s16 = scalar_lea.vmem (!%p465_p9), [#allocation2], %s13596_s24 }
  0x16   : > { %s13503_s23 = sshll.u32 (!%p465_p9), %s520_s16, 4  ;;  %s13504_s23 = int_to_ptr.vmem [resolvable:$true] %s13503_s23 }
  0x17   : > { %v565_v0 = vld [vmem:[%s19247_s4 + $0x8] sm:$0xff]  ;;  %v16386_v1 = vmov 0   ;;  %v16387_v2 = vmov 0.0   ;;  %s16524_s17 = scalar_select %p521_p10, %s16491_s22, 1  ;;  %v564_v3 = vld [vmem:[%s19247_s4] sm:$0xff]  ;;  %vm16388_vm0 = vmmov 0   ;;  %v540_v9 = vlaneseq }
  0x18   : > { %16201 = vset.pattern.permute.xlu0 %v16386_v1  ;;  %14873 = vmatprep.subr.mxu0 %v16387_v2  ;;  %vm567_vm3 = vcmask 130048   ;;  %v566_v13 = vld [vmem:[%s19248_s5] sm:$0xff]  ;;  %vm725_vm5 = vcmask 261120   ;;  %v13603_v21 = vld [vmem:[%s19247_s4 + $0x18] sm:$0xff]  ;;  %v13602_v22 = vld [vmem:[%s19247_s4 + $0x10] sm:$0xff]  ;;  %vm1002_vm7 = vcmask 64512  }
  0x19   : > { %14874 = vmatpush3.msra.mxu0 %v565_v0  ;;  %16202 = vset.pattern.permute.xlu1 %v16386_v1  ;;  %s13597_s26 = sshll.u32 %s16524_s17, 3  ;;  %s531_s27 = scalar_lea.vmem %s19245_s2, %s16524_s17  ;;  %v16554_v10 = vand.u32 127, %v540_v9  ;;  %v13610_v23 = vld [vmem:[%s19249_s6 + $0x98] sm:$0xff]  ;;  %v13609_v24 = vld [vmem:[%s19249_s6 + $0x90] sm:$0xff]  ;;  %v13608_v25 = vld [vmem:[%s19249_s6 + $0x88] sm:$0xff]  ;;  %v16615_v39 = vshrl.u32 %v540_v9, 7 }
  0x1a   : > { %14875 = vmatprep.subr.mxu0 %v16387_v2  ;;  %14898 = vmatprep.subr.mxu1 %v16387_v2  ;;  %s524_s29 = scalar_lea.vmem %s19272_s0, %s13597_s26  ;;  %s534_s25 = scalar_lea.vmem %s19246_s3, %s16524_s17  ;;  %v535_v4 = vld [vmem:[%s531_s27] sm:$0x1]  ;;  %v755_v35 = vld [vmem:[%s19249_s6 + $0x18] sm:$0xff]  ;;  %v754_v37 = vld [vmem:[%s19249_s6 + $0x10] sm:$0xff]  ;;  %vm2831_vm9 = vcmask 523264  }
  0x1b   : > { %14876 = vmatpush3.msra.mxu0 %v564_v3  ;;  %14877 = vmatprep.mubr.msk.f32.mxu0 %vm16388_vm0, %v16387_v2  ;;  %vm536_vm1 = vcmp.ne.s32.totalorder %v535_v4, 0  ;;  %v537_v5 = vld [vmem:[%s534_s25] sm:$0x1]  ;;  %v753_v38 = vld [vmem:[%s19249_s6 + $0x8] sm:$0xff]  ;;  %v16623_v41 = vsub.s32 0, %v16615_v39  ;;  %v16630_v43 = vsub.s32 1, %v16615_v39  ;;  %vm549_vm10 = vcmp.le.s32.totalorder %v16554_v10, %v16615_v39 }
  0x1c   : > { %14880 = vmatprep.subr.mxu0 %v16387_v2  ;;  %14906 = vmatprep.mubr.msk.f32.mxu1 %vm16388_vm0, %v16387_v2  ;;  %v557_v6 = vld [vmem:[%s524_s29] sm:$0xff]  ;;  %vm538_vm2 = vcmp.ne.s32.totalorder %v537_v5, 0  ;;  %v16550_v7 = vsel %vm536_vm1, 1, %v16386_v1  ;;  %s528_s29 = scalar_lea.vmem %s19244_s1, %s13597_s26  ;;  %v13617_v51 = vld [vmem:[%s19249_s6 + $0x118] sm:$0xff]  ;;  %v13616_v52 = vld [vmem:[%s19249_s6 + $0x110] sm:$0xff]  ;;  %s13490_s26 = scalar_lea.sflag [#allocation3], %s518_s20 }
  0x1d   : > { %559 = vperm.xlu0 %16201, %v557_v6   ;;  %v16552_v8 = vsel %vm538_vm2, 1, %v16386_v1  ;;  %v641_v20 = vld [vmem:[%s528_s29] sm:$0xff]  ;;  %14899 = vmatpush3.msra.mxu1 %v13610_v23  ;;  %v13615_v53 = vld [vmem:[%s19249_s6 + $0x108] sm:$0xff]  ;;  %v13627_v55 = vld [vmem:[%s19249_s6 + $0x38] sm:$0xff]  ;;  %s16324_s27 = scalar_lea.vmem %s13504_s23, 128  ;;  %s16389_s29 = smov [#allocation2]  }
  0x1e   : > { %14900 = vmatprep.subr.mxu1 %v16387_v2  ;;  %v13607_v26 = vld [vmem:[%s19249_s6 + $0x80] sm:$0xff]  ;;  %v13626_v56 = vld [vmem:[%s19249_s6 + $0x30] sm:$0xff]  ;;  %v13625_v57 = vld [vmem:[%s19249_s6 + $0x28] sm:$0xff]  ;;  %p16325_p11 = scmp.ne.s32.totalorder %s13504_s23, %s16324_s27  ;;  %s16328_s0 = sshll.u32 %s16389_s29, 4  ;;  %s16329_s0 = int_to_ptr.vmem [resolvable:$false] %s16328_s0 }
  0x1f   : > { %14901 = vmatpush3.msra.mxu1 %v13609_v24  ;;  %v752_v40 = vld [vmem:[%s19249_s6] sm:$0xff]  ;;  %v13641_v59 = vld [vmem:[%s19249_s6 + $0x138] sm:$0xff]  ;;  %v13640_v60 = vld [vmem:[%s19249_s6 + $0x130] sm:$0xff]  ;;  %s16330_s22 = scalar_lea.vmem %s16329_s0, 256  ;;  %p16331_p0 = scmp.lt.s32.totalorder %s13504_s23, %s16329_s0 }
  0x20   : > { %14902 = vmatprep.subr.mxu1 %v16387_v2  ;;  %v724_v42 = vld [vmem:[%s19257_s14] sm:$0x3]  ;;  %v13639_v61 = vld [vmem:[%s19249_s6 + $0x128] sm:$0xff]  ;;  %v13612_v1 = vld [vmem:[%s19250_s7 + $0x4] ss:$0 sm:$0xff]  ;;  %p16326_p12 = pnand %p16325_p11, %p16508_p5  ;;  %p16332_p1 = scmp.lt.s32.totalorder %s16330_s22, %s16324_s27 }
  0x21   : > { %14903 = vmatpush3.msra.mxu1 %v13608_v25  ;;  %v745_v45 = vrot.slane %v724_v42, %v16623_v41  ;;  %v750_v47 = vrot.slane %v724_v42, %v16630_v43  ;;  %v13614_v54 = vld [vmem:[%s19249_s6 + $0x100] sm:$0xff] }
  0x22   : > { %14904 = vmatprep.subr.mxu1 %v16387_v2  ;;  %v13624_v58 = vld [vmem:[%s19249_s6 + $0x20] sm:$0xff]  ;;  %p16327_p13 = pneg %p16326_p12  ;;  %p16333_p2 = por %p16332_p1, %p16331_p0 }
  0x23   : > { %14905 = vmatpush3.msra.mxu1 %v13607_v26  ;;  %v13638_v62 = vld [vmem:[%s19249_s6 + $0x120] sm:$0xff] }
  0x24   : > { %14920 = vmatprep.subr.mxu1 %v16387_v2  ;;  %v13605_v5 = vld [vmem:[%s19250_s7] ss:$0 sm:$0xff]  ;;  %p16334_p3 = pnand %p16333_p2, %p16327_p13 }
  0x98   : > { %v560_v11 = vpop.permute.xlu0 %559 }
  0x99   : > { %vm561_vm4 = vcmp.eq.s32.totalorder %v560_v11, %v16554_v10 }
  0x9a   : > { %v13599_v12 = vsel %vm561_vm4, 1.0, %v16387_v2 }
  0x9b   : > { %14878 = vmatmul.mubr.msk.f32.vlgmr.msra.gmra.mxu0 %vm567_vm3, %v13599_v12 }
  0x9c   : > { %14884 = vmatprep.mubr.msk.f32.mxu0 %vm16388_vm0, %v16387_v2  ;;  %14881 = vmatpush3.msra.mxu0 %v13603_v21 }
  0x9d   : > { %14882 = vmatprep.subr.mxu0 %v16387_v2 }
  0x9e   : > { %14883 = vmatpush3.msra.mxu0 %v13602_v22  ;;  %v543_v22 = vrot.slane %v16550_v7, %v16623_v41 }
  0x9f   : > { %14887 = vmatprep.subr.mxu0 %v16387_v2 }
  0xa0   : > { %vm16724_vm8 = vcmp.eq.s32.totalorder %v543_v22, 1  ;;  %v13667_v22 = vld [vmem:[%s19249_s6 + $0x150] sm:$0xff] }
 0x15b   : > { %v637_v14 = vpop.f32.mrf.mxu0 }
 0x15c   : > { %v16564_v15 = vadd.f32 %v637_v14, %v566_v13  ;;  %v13619_v13 = vld [vmem:[%s19250_s7 + $0x8] ss:$0 sm:$0xff] }
 0x15d   : > { %v14879_v16 = vpop.f32.mrf.mxu0 }
 0x15e   : > { %v726_v17 = vsel %vm725_vm5, %v16564_v15, 0.0  ;;  %v731_v18 = vmul.f32 %v16564_v15, %v16564_v15 }
 0x15f   : > { %727 = vadd.xlane.f32.xlu0 %v726_v17 }
 0x160   : > { %v732_v19 = vsel %vm725_vm5, %v731_v18, 0.0 }
 0x161   : > { %733 = vadd.xlane.f32.xlu1 %v732_v19 }
 0x172   : > { %643 = vperm.xlu1 %16202, %v641_v20  }
 0x1e8   : > { %v728_v27 = vpop.xlane.xlu0 %727 }
 0x1e9   : > { %v730_v28 = vmul.f32 0.03125, %v728_v27 }
 0x1ea   : > { %v734_v29 = vpop.xlane.xlu1 %733 }
 0x1eb   : > { %v736_v30 = vmul.f32 %v730_v28, %v730_v28  ;;  %v735_v31 = vmul.f32 0.03125, %v734_v29  ;;  %v740_v44 = vsub.f32 %v16564_v15, %v730_v28 }
 0x1ed   : > { %v737_v32 = vsub.f32 %v735_v31, %v736_v30 }
 0x1ee   : > { %v644_v33 = vpop.permute.xlu1 %643 }
 0x1ef   : > { %v738_v34 = vadd.f32 1e-06, %v737_v32  ;;  %vm645_vm6 = vcmp.eq.s32.totalorder %v644_v33, %v16554_v10 }
 0x1f0   : > { %v13601_v36 = vsel %vm645_vm6, 1.0, %v16387_v2 }
 0x1f1   : > { %16203 = vrsqrt.f32 %v738_v34  ;;  %14885 = vmatmul.mubr.msk.f32.vlgmr.msra.gmra.mxu0 %vm567_vm3, %v13601_v36  ;;  %v13633_v36 = vld [vmem:[%s19249_s6 + $0xb0] sm:$0xff] }
 0x1f2   : > { %14888 = vmatpush3.msra.mxu0 %v755_v35  ;;  %14895 = vmatprep.mubr.msk.f32.mxu0 %vm16388_vm0, %v16387_v2  ;;  %v13634_v35 = vld [vmem:[%s19249_s6 + $0xb8] sm:$0xff] }
 0x1f3   : > { %14889 = vmatprep.subr.mxu0 %v16387_v2 }
 0x1f4   : > { %14890 = vmatpush3.msra.mxu0 %v754_v37  ;;  %v13632_v37 = vld [vmem:[%s19249_s6 + $0xa8] sm:$0xff] }
 0x1f5   : > { %14891 = vmatprep.subr.mxu0 %v16387_v2 }
 0x1f6   : > { %14892 = vmatpush3.msra.mxu0 %v753_v38  ;;  %v13631_v38 = vld [vmem:[%s19249_s6 + $0xa0] sm:$0xff] }
 0x1f7   : > { %14893 = vmatprep.subr.mxu0 %v16387_v2 }
 0x1f8   : > { %14894 = vmatpush3.msra.mxu0 %v752_v40 }
 0x1f9   : > { %14909 = vmatprep.subr.mxu0 %v16387_v2 }
 0x1fe   : > { %v16204_v46 = vpop.eup %16203 }
 0x1ff   : > { %v741_v48 = vmul.f32 %v16204_v46, %v740_v44  ;;  %v13636_v44 = vld [vmem:[%s19250_s7 + $0x5] ss:$0 sm:$0xff]  ;;  %v13629_v46 = vld [vmem:[%s19250_s7 + $0x1] ss:$0 sm:$0xff] }
 0x201   : > { %v746_v49 = vmul.f32 %v745_v45, %v741_v48  ;;  %v13643_v48 = vld [vmem:[%s19250_s7 + $0x9] ss:$0 sm:$0xff] }
 0x203   : > { %v16635_v50 = vadd.f32 %v750_v47, %v746_v49 }
 0x205   : > { %14896 = vmatmul.mubr.msk.f32.vlgmr.msra.gmra.mxu0 %vm725_vm5, %v16635_v50  ;;  %14907 = vmatmul.mubr.msk.f32.vlgmr.msra.gmra.mxu1 %vm725_vm5, %v16635_v50 }
 0x206   : > { %14910 = vmatpush3.msra.mxu0 %v13617_v51  ;;  %14917 = vmatprep.mubr.msk.f32.mxu0 %vm16388_vm0, %v16387_v2 }
 0x207   : > { %14911 = vmatprep.subr.mxu0 %v16387_v2  ;;  %14922 = vmatprep.mubr.msk.f32.mxu1 %vm16388_vm0, %v16387_v2 }
 0x208   : > { %14912 = vmatpush3.msra.mxu0 %v13616_v52 }
 0x209   : > { %14913 = vmatprep.subr.mxu0 %v16387_v2 }
 0x20a   : > { %14914 = vmatpush3.msra.mxu0 %v13615_v53 }
 0x20b   : > { %14915 = vmatprep.subr.mxu0 %v16387_v2 }
 0x20c   : > { %14916 = vmatpush3.msra.mxu0 %v13614_v54 }
 0x20d   : > { %14918 = vmatmul.mubr.msk.f32.vlgmr.msra.gmra.mxu0 %vm725_vm5, %v16635_v50  ;;  %14930 = vmatprep.subr.mxu0 %v16387_v2 }
 0x20e   : > { %14931 = vmatpush3.msra.mxu0 %v13627_v55  ;;  %14938 = vmatprep.mubr.msk.f32.mxu0 %vm16388_vm0, %v16387_v2 }
 0x20f   : > { %14932 = vmatprep.subr.mxu0 %v16387_v2 }
 0x210   : > { %14933 = vmatpush3.msra.mxu0 %v13626_v56 }
 0x211   : > { %14934 = vmatprep.subr.mxu0 %v16387_v2 }
 0x212   : > { %14935 = vmatpush3.msra.mxu0 %v13625_v57 }
 0x213   : > { %14936 = vmatprep.subr.mxu0 %v16387_v2 }
 0x214   : > { %14937 = vmatpush3.msra.mxu0 %v13624_v58 }
 0x215   : > { %14939 = vmatmul.mubr.msk.f32.vlgmr.msra.gmra.mxu0 %vm725_vm5, %v16635_v50  ;;  %14952 = vmatprep.subr.mxu0 %v16387_v2 }
 0x216   : > { %14953 = vmatpush3.msra.mxu0 %v13641_v59  ;;  %14960 = vmatprep.mubr.msk.f32.mxu0 %vm16388_vm0, %v16387_v2 }
 0x217   : > { %14954 = vmatprep.subr.mxu0 %v16387_v2 }
 0x218   : > { %14955 = vmatpush3.msra.mxu0 %v13640_v60 }
 0x219   : > { %14956 = vmatprep.subr.mxu0 %v16387_v2 }
 0x21a   : > { %14957 = vmatpush3.msra.mxu0 %v13639_v61 }
 0x21b   : > { %14958 = vmatprep.subr.mxu0 %v16387_v2 }
 0x21c   : > { %14959 = vmatpush3.msra.mxu0 %v13638_v62  ;;  %v13648_v62 = vld [vmem:[%s19251_s8 + $0x8] sm:$0xff] }
 0x21d   : > { %14961 = vmatmul.mubr.msk.f32.vlgmr.msra.gmra.mxu0 %vm725_vm5, %v16635_v50  ;;  %14973 = vmatprep.subr.mxu0 %v16387_v2 }
 0x21e   : > { %14975 = vmatprep.mubr.msk.f32.mxu0 %vm16388_vm0, %v16387_v2  ;;  %14974 = vmatpush3.msra.mxu0 %v13648_v62  ;;  %v13692_v62 = vld [vmem:[%s19249_s6 + $0x168] sm:$0xff] }
 0x21f   : > { %14983 = vmatprep.subr.mxu0 %v16387_v2 }
 0x2b1   : > { %v16705_v63 = vpop.f32.mrf.mxu0 }
 0x2b3   : > { %v14886_v0 = vpop.f32.mrf.mxu0 }
 0x2c5   : > { %v832_v3 = vpop.f32.mrf.mxu0  ;;  %v915_v4 = vpop.f32.mrf.mxu1 }
 0x2c6   : > { %v916_v6 = vadd.f32 %v13612_v1, %v915_v4  ;;  %v833_v12 = vadd.f32 %v13605_v5, %v832_v3  ;;  %v1164_v4 = vld [vmem:[%s19251_s8] sm:$0xff]  ;;  %v13661_v5 = vld [vmem:[%s19249_s6 + $0xd8] sm:$0xff] }
 0x2c7   : > { %v14897_v9 = vpop.f32.mrf.mxu0  ;;  %v14908_v11 = vpop.f32.mrf.mxu1 }
 0x2c8   : > { %14921 = vmatpush3.xpose.msk.msra.mxu1 %vm1002_vm7, %v916_v6  ;;  %v13660_v6 = vld [vmem:[%s19249_s6 + $0xd0] sm:$0xff]  ;;  %v13659_v9 = vld [vmem:[%s19249_s6 + $0xc8] sm:$0xff]  ;;  %v13658_v11 = vld [vmem:[%s19249_s6 + $0xc0] sm:$0xff] }
 0x2c9   : > { %14925 = vmatprep.subr.mxu1 %v16387_v2 }
 0x2cb   : > { %14923 = vmatmul.mubr.msk.f32.vlgmr.msra.gmra.mxu1 %vm1002_vm7, %v833_v12  ;;  %v13654_v12 = vld [vmem:[%s19249_s6 + $0x58] sm:$0xff] }
 0x2cc   : > { %14927 = vmatprep.mubr.msk.f32.mxu1 %vm16388_vm0, %v16387_v2 }
 0x2cd   : > { %v998_v14 = vpop.f32.mrf.mxu0 }
 0x2ce   : > { %v999_v16 = vadd.f32 %v13619_v13, %v998_v14  ;;  %v13653_v14 = vld [vmem:[%s19249_s6 + $0x50] sm:$0xff] }
 0x2cf   : > { %v14919_v17 = vpop.f32.mrf.mxu0 }
 0x2d0   : > { %14926 = vmatpush3.msra.mxu1 %v999_v16  ;;  %v13652_v17 = vld [vmem:[%s19249_s6 + $0x48] sm:$0xff] }
 0x2d1   : > { %14941 = vmatprep.subr.mxu1 %v16387_v2 }
 0x2d5   : > { %v1244_v18 = vpop.f32.mrf.mxu0 }
 0x2d6   : > { %v1245_v51 = vadd.f32 %v13629_v46, %v1244_v18 }
 0x2d7   : > { %v14940_v19 = vpop.f32.mrf.mxu0 }
 0x2d8   : > { %v13651_v19 = vld [vmem:[%s19249_s6 + $0x40] sm:$0xff] }
 0x2dd   : > { %v1410_v20 = vpop.f32.mrf.mxu0 }
 0x2de   : > { %v1411_v52 = vadd.f32 %v13643_v48, %v1410_v20 }
 0x2df   : > { %v14962_v21 = vpop.f32.mrf.mxu0 }
 0x2e0   : > { %v13668_v21 = vld [vmem:[%s19249_s6 + $0x158] sm:$0xff] }
 0x38b   : > { %v1075_v24 = vpop.f32.mrf.mxu1 }
 0x38c   : > { %v1079_v25 = vsel %vm16724_vm8, %v1075_v24, -1e+09  ;;  %v13663_v24 = vld [vmem:[%s19250_s7 + $0x6] ss:$0 sm:$0xff] }
 0x38d   : > { %v14924_v26 = vpop.f32.mrf.mxu1  ;;  %v1080_v27 = vsel %vm1002_vm7, %v1079_v25, -inf }
 0x38e   : > { %1081 = vmax.xlane.f32.xlu1 %v1080_v27 }
 0x417   : > { %v1082_v28 = vpop.xlane.xlu1 %1081 }
 0x418   : > { %v1083_v29 = vsub.f32 %v1079_v25, %v1082_v28  ;;  %v13666_v25 = vld [vmem:[%s19249_s6 + $0x148] sm:$0xff]  ;;  %v13665_v28 = vld [vmem:[%s19249_s6 + $0x140] sm:$0xff] }
 0x41a   : > { %v1084_v30 = vmul.f32 1.442695, %v1083_v29 }
 0x41c   : > { %16205 = vpow2.f32 %v1084_v30 }
 0x429   : > { %v16206_v31 = vpop.eup %16205 }
 0x42a   : > { %v1086_v32 = vsel %vm1002_vm7, %v16206_v31, 0.0 }
 0x42b   : > { %1087 = vadd.xlane.f32.xlu0 %v1086_v32  ;;  %v13656_v32 = vld [vmem:[%s19250_s7 + $0x2] ss:$0 sm:$0xff] }
 0x4b4   : > { %v1088_v7 = vpop.xlane.xlu0 %1087 }
 0x4b5   : > { %16207 = vrcp.f32 %v1088_v7 }
 0x4c2   : > { %v16208_v33 = vpop.eup %16207 }
 0x4c3   : > { %v1090_v34 = vmul.f32 %v16208_v33, %v16206_v31 }
 0x4c5   : > { %14928 = vmatmul.mubr.msk.f32.vlgmr.msra.gmra.mxu1 %vm1002_vm7, %v1090_v34 }
 0x4c6   : > { %14942 = vmatpush3.msra.mxu1 %v13634_v35  ;;  %14949 = vmatprep.mubr.msk.f32.mxu1 %vm16388_vm0, %v16387_v2  ;;  %v13670_v35 = vld [vmem:[%s19250_s7 + $0xa] ss:$0 sm:$0xff] }
 0x4c7   : > { %14943 = vmatprep.subr.mxu1 %v16387_v2 }
 0x4c8   : > { %14944 = vmatpush3.msra.mxu1 %v13633_v36 }
 0x4c9   : > { %14945 = vmatprep.subr.mxu1 %v16387_v2 }
 0x4ca   : > { %14946 = vmatpush3.msra.mxu1 %v13632_v37 }
 0x4cb   : > { %14947 = vmatprep.subr.mxu1 %v16387_v2 }
 0x4cc   : > { %14948 = vmatpush3.msra.mxu1 %v13631_v38 }
 0x4cd   : > { %14950 = vmatmul.mubr.msk.f32.vlgmr.msra.gmra.mxu1 %vm725_vm5, %v16635_v50  ;;  %14963 = vmatprep.subr.mxu1 %v16387_v2 }
 0x4ce   : > { %14965 = vmatprep.mubr.msk.f32.mxu1 %vm16388_vm0, %v16387_v2 }
 0x585   : > { %v1160_v40 = vpop.f32.mrf.mxu1 }
 0x587   : > { %v14929_v42 = vpop.f32.mrf.mxu1 }
 0x58d   : > { %v1327_v45 = vpop.f32.mrf.mxu1 }
 0x58e   : > { %v1328_v47 = vadd.f32 %v13636_v44, %v1327_v45 }
 0x58f   : > { %v14951_v49 = vpop.f32.mrf.mxu1 }
 0x590   : > { %14964 = vmatpush3.xpose.msk.msra.mxu1 %vm1002_vm7, %v1328_v47 }
 0x591   : > { %14968 = vmatprep.subr.mxu1 %v16387_v2 }
 0x593   : > { %14966 = vmatmul.mubr.msk.f32.vlgmr.msra.gmra.mxu1 %vm1002_vm7, %v1245_v51 }
 0x594   : > { %14969 = vmatpush3.msra.mxu1 %v1411_v52  ;;  %14970 = vmatprep.mubr.msk.f32.mxu1 %vm16388_vm0, %v16387_v2  ;;  %v13675_v52 = vld [vmem:[%s19251_s8 + $0x10] sm:$0xff] }
 0x595   : > { %14978 = vmatprep.subr.mxu1 %v16387_v2 }
 0x653   : > { %v1486_v53 = vpop.f32.mrf.mxu1 }
 0x654   : > { %v1490_v54 = vsel %vm16724_vm8, %v1486_v53, -1e+09 }
 0x655   : > { %v14967_v55 = vpop.f32.mrf.mxu1  ;;  %v1491_v56 = vsel %vm1002_vm7, %v1490_v54, -inf }
 0x656   : > { %1492 = vmax.xlane.f32.xlu0 %v1491_v56  ;;  %v13680_v56 = vld [vmem:[%s19249_s6 + $0x78] sm:$0xff] }
 0x6df   : > { %v1493_v57 = vpop.xlane.xlu0 %1492 }
 0x6e0   : > { %v1494_v58 = vsub.f32 %v1490_v54, %v1493_v57  ;;  %v13679_v57 = vld [vmem:[%s19249_s6 + $0x70] sm:$0xff] }
 0x6e2   : > { %v1495_v59 = vmul.f32 1.442695, %v1494_v58  ;;  %v13678_v58 = vld [vmem:[%s19249_s6 + $0x68] sm:$0xff] }
 0x6e4   : > { %16209 = vpow2.f32 %v1495_v59  ;;  %v13677_v59 = vld [vmem:[%s19249_s6 + $0x60] sm:$0xff] }
 0x6f1   : > { %v16210_v60 = vpop.eup %16209 }
 0x6f2   : > { %v1497_v61 = vsel %vm1002_vm7, %v16210_v60, 0.0 }
 0x6f3   : > { %1498 = vadd.xlane.f32.xlu0 %v1497_v61  ;;  %v13693_v61 = vld [vmem:[%s19249_s6 + $0x170] sm:$0xff] }
 0x77c   : > { %v1499_v0 = vpop.xlane.xlu0 %1498 }
 0x77d   : > { %16211 = vrcp.f32 %v1499_v0  ;;  %v13691_v0 = vld [vmem:[%s19249_s6 + $0x160] sm:$0xff] }
 0x78a   : > { %v16212_v1 = vpop.eup %16211 }
 0x78b   : > { %v1501_v3 = vmul.f32 %v16212_v1, %v16210_v60  ;;  %v13694_v60 = vld [vmem:[%s19249_s6 + $0x178] sm:$0xff] }
 0x78c   : > { %v13687_v1 = vld [vmem:[%s19249_s6 + $0xf8] sm:$0xff] }
 0x78d   : > { %14971 = vmatmul.mubr.msk.f32.vlgmr.msra.gmra.mxu1 %vm1002_vm7, %v1501_v3 }
 0x78e   : > { %14979 = vmatpush3.msra.mxu1 %v1164_v4  ;;  %14980 = vmatprep.mubr.msk.f32.mxu1 %vm16388_vm0, %v16387_v2  ;;  %v13686_v4 = vld [vmem:[%s19249_s6 + $0xf0] sm:$0xff] }
 0x78f   : > { %14994 = vmatprep.subr.mxu1 %v16387_v2 }
 0x791   : > { %14981 = vmatmul.mubr.msk.f32.vlgmr.msra.gmra.mxu1 %vm1002_vm7, %v1160_v40 }
 0x792   : > { %14995 = vmatpush3.msra.mxu1 %v13661_v5  ;;  %15002 = vmatprep.mubr.msk.f32.mxu1 %vm16388_vm0, %v16387_v2 }
 0x793   : > { %14996 = vmatprep.subr.mxu1 %v16387_v2 }
 0x794   : > { %14997 = vmatpush3.msra.mxu1 %v13660_v6  ;;  %v13685_v6 = vld [vmem:[%s19249_s6 + $0xe8] sm:$0xff] }
 0x795   : > { %14998 = vmatprep.subr.mxu1 %v16387_v2 }
 0x796   : > { %14999 = vmatpush3.msra.mxu1 %v13659_v9  ;;  %v13684_v9 = vld [vmem:[%s19249_s6 + $0xe0] sm:$0xff] }
 0x797   : > { %15000 = vmatprep.subr.mxu1 %v16387_v2 }
 0x798   : > { %15001 = vmatpush3.msra.mxu1 %v13658_v11 }
 0x799   : > { %15003 = vmatmul.mubr.msk.f32.vlgmr.msra.gmra.mxu1 %vm725_vm5, %v16635_v50  ;;  %15016 = vmatprep.subr.mxu1 %v16387_v2 }
 0x79a   : > { %15018 = vmatprep.mubr.msk.f32.mxu1 %vm16388_vm0, %v16387_v2 }
 0x84d   : > { %v1571_v13 = vpop.f32.mrf.mxu1 }
 0x84e   : > { %14976 = vmatmul.mubr.msk.f32.vlgmr.msra.gmra.mxu0 %vm1002_vm7, %v1571_v13 }
 0x84f   : > { %14984 = vmatpush3.msra.mxu0 %v13654_v12  ;;  %v14972_v16 = vpop.f32.mrf.mxu1  ;;  %14991 = vmatprep.mubr.msk.f32.mxu0 %vm16388_vm0, %v16387_v2 }
 0x850   : > { %14985 = vmatprep.subr.mxu0 %v16387_v2 }
 0x851   : > { %14986 = vmatpush3.msra.mxu0 %v13653_v14  ;;  %v16821_v18 = vpop.f32.mrf.mxu1 }
 0x852   : > { %14987 = vmatprep.subr.mxu0 %v16387_v2 }
 0x853   : > { %14988 = vmatpush3.msra.mxu0 %v13652_v17  ;;  %v14982_v20 = vpop.f32.mrf.mxu1 }
 0x854   : > { %14989 = vmatprep.subr.mxu0 %v16387_v2 }
 0x855   : > { %14990 = vmatpush3.msra.mxu0 %v13651_v19 }
 0x856   : > { %14992 = vmatmul.mubr.msk.f32.vlgmr.msra.gmra.mxu0 %vm725_vm5, %v16635_v50  ;;  %15005 = vmatprep.subr.mxu0 %v16387_v2 }
 0x857   : > { %15006 = vmatpush3.msra.mxu0 %v13668_v21  ;;  %15013 = vmatprep.mubr.msk.f32.mxu0 %vm16388_vm0, %v16387_v2  ;;  %v13689_v21 = vld [vmem:[%s19250_s7 + $0x7] ss:$0 sm:$0xff] }
 0x858   : > { %15007 = vmatprep.subr.mxu0 %v16387_v2 }
 0x859   : > { %v1885_v26 = vpop.f32.mrf.mxu1  ;;  %15008 = vmatpush3.msra.mxu0 %v13667_v22 }
 0x85a   : > { %v1886_v27 = vadd.f32 %v13663_v24, %v1885_v26  ;;  %15009 = vmatprep.subr.mxu0 %v16387_v2 }
 0x85b   : > { %v15004_v29 = vpop.f32.mrf.mxu1  ;;  %15010 = vmatpush3.msra.mxu0 %v13666_v25  ;;  %v13696_v25 = vld [vmem:[%s19250_s7 + $0xb] ss:$0 sm:$0xff] }
 0x85c   : > { %15011 = vmatprep.subr.mxu0 %v16387_v2  ;;  %15017 = vmatpush3.xpose.msk.msra.mxu1 %vm1002_vm7, %v1886_v27 }
 0x85d   : > { %15012 = vmatpush3.msra.mxu0 %v13665_v28  ;;  %15021 = vmatprep.subr.mxu1 %v16387_v2 }
 0x85e   : > { %15014 = vmatmul.mubr.msk.f32.vlgmr.msra.gmra.mxu0 %vm725_vm5, %v16635_v50  ;;  %15026 = vmatprep.subr.mxu0 %v16387_v2 }
 0x85f   : > { %15028 = vmatprep.mubr.msk.f32.mxu0 %vm16388_vm0, %v16387_v2  ;;  %15027 = vmatpush3.msra.mxu0 %v13675_v52 }
 0x860   : > { %15042 = vmatprep.subr.mxu0 %v16387_v2 }
 0x90e   : > { %v16858_v30 = vpop.f32.mrf.mxu0 }
 0x90f   : > { %v1720_v16 = vadd.f32 %v16821_v18, %v16858_v30 }
 0x910   : > { %v14977_v31 = vpop.f32.mrf.mxu0 }
 0x916   : > { %v1802_v7 = vpop.f32.mrf.mxu0 }
 0x917   : > { %v1803_v33 = vadd.f32 %v13656_v32, %v1802_v7 }
 0x918   : > { %v14993_v34 = vpop.f32.mrf.mxu0 }
 0x919   : > { %15019 = vmatmul.mubr.msk.f32.vlgmr.msra.gmra.mxu1 %vm1002_vm7, %v1803_v33 }
 0x91a   : > { %15023 = vmatprep.mubr.msk.f32.mxu1 %vm16388_vm0, %v16387_v2 }
 0x91e   : > { %v1968_v36 = vpop.f32.mrf.mxu0 }
 0x91f   : > { %v1969_v37 = vadd.f32 %v13670_v35, %v1968_v36  ;;  %v13701_v36 = vld [vmem:[%s19251_s8 + $0x18] sm:$0xff] }
 0x920   : > { %v15015_v38 = vpop.f32.mrf.mxu0 }
 0x921   : > { %15022 = vmatpush3.msra.mxu1 %v1969_v37 }
 0x922   : > { %15031 = vmatprep.subr.mxu1 %v16387_v2 }
 0x9d9   : > { %v2044_v40 = vpop.f32.mrf.mxu1 }
 0x9da   : > { %v2048_v42 = vsel %vm16724_vm8, %v2044_v40, -1e+09 }
 0x9db   : > { %v15020_v44 = vpop.f32.mrf.mxu1  ;;  %v2049_v45 = vsel %vm1002_vm7, %v2048_v42, -inf }
 0x9dc   : > { %2050 = vmax.xlane.f32.xlu0 %v2049_v45 }
 0xa65   : > { %v2051_v46 = vpop.xlane.xlu0 %2050 }
 0xa66   : > { %v2052_v47 = vsub.f32 %v2048_v42, %v2051_v46  ;;  %v13703_v46 = vld [vmem:[%s19252_s9] ss:$0 sm:$0xff] }
 0xa68   : > { %v2053_v48 = vmul.f32 1.442695, %v2052_v47 }
 0xa6a   : > { %16213 = vpow2.f32 %v2053_v48 }
 0xa77   : > { %v16214_v49 = vpop.eup %16213 }
 0xa78   : > { %v2055_v51 = vsel %vm1002_vm7, %v16214_v49, 0.0 }
 0xa79   : > { %2056 = vadd.xlane.f32.xlu0 %v2055_v51 }
 0xb02   : > { %v2057_v53 = vpop.xlane.xlu0 %2056 }
 0xb03   : > { %16215 = vrcp.f32 %v2057_v53 }
 0xb10   : > { %v16216_v54 = vpop.eup %16215 }
 0xb11   : > { %v2059_v55 = vmul.f32 %v16216_v54, %v16214_v49 }
 0xb13   : > { %15024 = vmatmul.mubr.msk.f32.vlgmr.msra.gmra.mxu1 %vm1002_vm7, %v2059_v55  ;;  %v2734_v55 = vld [vmem:[%s19253_s10 + $0x18] sm:$0xff] }
 0xb14   : > { %15032 = vmatpush3.msra.mxu1 %v13680_v56  ;;  %15039 = vmatprep.mubr.msk.f32.mxu1 %vm16388_vm0, %v16387_v2  ;;  %v2733_v56 = vld [vmem:[%s19253_s10 + $0x10] sm:$0xff] }
 0xb15   : > { %15033 = vmatprep.subr.mxu1 %v16387_v2 }
 0xb16   : > { %15034 = vmatpush3.msra.mxu1 %v13679_v57  ;;  %v2731_v57 = vld [vmem:[%s19253_s10] sm:$0xff] }
 0xb17   : > { %15035 = vmatprep.subr.mxu1 %v16387_v2 }
 0xb18   : > { %15036 = vmatpush3.msra.mxu1 %v13678_v58  ;;  %v2823_v58 = vld [vmem:[%s19255_s12 + $0x38] sm:$0xff] }
 0xb19   : > { %15037 = vmatprep.subr.mxu1 %v16387_v2 }
 0xb1a   : > { %15038 = vmatpush3.msra.mxu1 %v13677_v59  ;;  %v2822_v59 = vld [vmem:[%s19255_s12 + $0x30] sm:$0xff] }
 0xb1b   : > { %15040 = vmatmul.mubr.msk.f32.vlgmr.msra.gmra.mxu1 %vm725_vm5, %v16635_v50  ;;  %15053 = vmatprep.subr.mxu1 %v16387_v2 }
 0xb1c   : > { %15054 = vmatpush3.msra.mxu1 %v13694_v60  ;;  %15061 = vmatprep.mubr.msk.f32.mxu1 %vm16388_vm0, %v16387_v2  ;;  %v2821_v60 = vld [vmem:[%s19255_s12 + $0x28] sm:$0xff] }
 0xb1d   : > { %15055 = vmatprep.subr.mxu1 %v16387_v2 }
 0xb1e   : > { %15056 = vmatpush3.msra.mxu1 %v13693_v61  ;;  %v2820_v61 = vld [vmem:[%s19255_s12 + $0x20] sm:$0xff] }
 0xb1f   : > { %15057 = vmatprep.subr.mxu1 %v16387_v2 }
 0xb20   : > { %15058 = vmatpush3.msra.mxu1 %v13692_v62  ;;  %v2819_v62 = vld [vmem:[%s19255_s12 + $0x18] sm:$0xff] }
 0xb21   : > { %15059 = vmatprep.subr.mxu1 %v16387_v2 }
 0xb22   : > { %15060 = vmatpush3.msra.mxu1 %v13691_v0 }
 0xb23   : > { %15062 = vmatmul.mubr.msk.f32.vlgmr.msra.gmra.mxu1 %vm725_vm5, %v16635_v50  ;;  %15074 = vmatprep.subr.mxu1 %v16387_v2 }
 0xb24   : > { %15076 = vmatprep.mubr.msk.f32.mxu1 %vm16388_vm0, %v16387_v2  ;;  %15075 = vmatpush3.msra.mxu1 %v13701_v36  ;;  %v13727_v36 = vld [vmem:[%s19249_s6 + $0x298] sm:$0xff] }
 0xb25   : > { %15090 = vmatprep.subr.mxu1 %v16387_v2 }
 0xbd3   : > { %v2129_v3 = vpop.f32.mrf.mxu1 }
 0xbd4   : > { %15029 = vmatmul.mubr.msk.f32.vlgmr.msra.gmra.mxu0 %vm1002_vm7, %v2129_v3 }
 0xbd5   : > { %15043 = vmatpush3.msra.mxu0 %v13687_v1  ;;  %v15025_v5 = vpop.f32.mrf.mxu1  ;;  %15050 = vmatprep.mubr.msk.f32.mxu0 %vm16388_vm0, %v16387_v2 }
 0xbd6   : > { %15044 = vmatprep.subr.mxu0 %v16387_v2 }
 0xbd7   : > { %15045 = vmatpush3.msra.mxu0 %v13686_v4 }
 0xbd8   : > { %15046 = vmatprep.subr.mxu0 %v16387_v2 }
 0xbd9   : > { %15047 = vmatpush3.msra.mxu0 %v13685_v6 }
 0xbda   : > { %15048 = vmatprep.subr.mxu0 %v16387_v2 }
 0xbdb   : > { %v2288_v11 = vpop.f32.mrf.mxu1  ;;  %15049 = vmatpush3.msra.mxu0 %v13684_v9 }
 0xbdc   : > { %15051 = vmatmul.mubr.msk.f32.vlgmr.msra.gmra.mxu0 %vm725_vm5, %v16635_v50  ;;  %15064 = vmatprep.subr.mxu0 %v16387_v2  ;;  %v13682_v50 = vld [vmem:[%s19250_s7 + $0x3] ss:$0 sm:$0xff] }
 0xbdd   : > { %v15041_v12 = vpop.f32.mrf.mxu1  ;;  %15066 = vmatprep.mubr.msk.f32.mxu0 %vm16388_vm0, %v16387_v2  ;;  %v2289_v18 = vadd.f32 %v13682_v50, %v2288_v11  ;;  %v13704_v11 = vld [vmem:[%s19257_s14 + $0x2] sm:$0x3] }
 0xbde   : > { %v2816_v50 = vld [vmem:[%s19255_s12] sm:$0xff] }
 0xbe3   : > { %v2454_v13 = vpop.f32.mrf.mxu1 }
 0xbe4   : > { %v2455_v27 = vadd.f32 %v13696_v25, %v2454_v13  ;;  %v2724_v13 = vrot.slane %v13704_v11, %v16623_v41 }
 0xbe5   : > { %v15063_v14 = vpop.f32.mrf.mxu1 }
 0xc94   : > { %v2204_v17 = vpop.f32.mrf.mxu0 }
 0xc95   : > { %v2208_v19 = vadd.f32 %v2204_v17, %v1720_v16  ;;  %v2729_v17 = vrot.slane %v13704_v11, %v16630_v43 }
 0xc96   : > { %v15030_v20 = vpop.f32.mrf.mxu0 }
 0xc9c   : > { %v2371_v22 = vpop.f32.mrf.mxu0 }
 0xc9d   : > { %v2372_v24 = vadd.f32 %v13689_v21, %v2371_v22  ;;  %v2818_v21 = vld [vmem:[%s19255_s12 + $0x10] sm:$0xff]  ;;  %v2817_v22 = vld [vmem:[%s19255_s12 + $0x8] sm:$0xff] }
 0xc9e   : > { %v15052_v26 = vpop.f32.mrf.mxu0 }
 0xc9f   : > { %15065 = vmatpush3.xpose.msk.msra.mxu0 %vm1002_vm7, %v2372_v24  ;;  %v13705_v24 = vld [vmem:[%s19254_s11] ss:$0 sm:$0xff] }
 0xca0   : > { %15069 = vmatprep.subr.mxu0 %v16387_v2 }
 0xca2   : > { %15067 = vmatmul.mubr.msk.f32.vlgmr.msra.gmra.mxu0 %vm1002_vm7, %v2289_v18 }
 0xca3   : > { %15070 = vmatpush3.msra.mxu0 %v2455_v27  ;;  %15071 = vmatprep.mubr.msk.f32.mxu0 %vm16388_vm0, %v16387_v2 }
 0xca4   : > { %15079 = vmatprep.subr.mxu0 %v16387_v2 }
 0xd62   : > { %v2530_v28 = vpop.f32.mrf.mxu0 }
 0xd63   : > { %v2534_v29 = vsel %vm16724_vm8, %v2530_v28, -1e+09  ;;  %v13707_v28 = vld [vmem:[%s19256_s13] ss:$0 sm:$0xff] }
 0xd64   : > { %v15068_v30 = vpop.f32.mrf.mxu0  ;;  %v2535_v31 = vsel %vm1002_vm7, %v2534_v29, -inf }
 0xd65   : > { %2536 = vmax.xlane.f32.xlu0 %v2535_v31 }
 0xdee   : > { %v2537_v32 = vpop.xlane.xlu0 %2536 }
 0xdef   : > { %v2538_v7 = vsub.f32 %v2534_v29, %v2537_v32 }
 0xdf1   : > { %v2539_v33 = vmul.f32 1.442695, %v2538_v7 }
 0xdf3   : > { %16217 = vpow2.f32 %v2539_v33 }
 0xe00   : > { %v16218_v34 = vpop.eup %16217 }
 0xe01   : > { %v2541_v35 = vsel %vm1002_vm7, %v16218_v34, 0.0 }
 0xe02   : > { %2542 = vadd.xlane.f32.xlu1 %v2541_v35  ;;  %v13713_v35 = vld [vmem:[%s19249_s6 + $0x198] sm:$0xff] }
 0xe8b   : > { %v2543_v37 = vpop.xlane.xlu1 %2542 }
 0xe8c   : > { %16219 = vrcp.f32 %v2543_v37  ;;  %v13712_v37 = vld [vmem:[%s19249_s6 + $0x190] sm:$0xff] }
 0xe99   : > { %v16220_v38 = vpop.eup %16219 }
 0xe9a   : > { %v2545_v40 = vmul.f32 %v16220_v38, %v16218_v34  ;;  %v13726_v38 = vld [vmem:[%s19249_s6 + $0x290] sm:$0xff] }
 0xe9c   : > { %15072 = vmatmul.mubr.msk.f32.vlgmr.msra.gmra.mxu0 %vm1002_vm7, %v2545_v40  ;;  %v13711_v40 = vld [vmem:[%s19249_s6 + $0x188] sm:$0xff] }
 0xe9d   : > { %15087 = vmatprep.mubr.msk.f32.mxu0 %vm16388_vm0, %v16387_v2  ;;  %15080 = vmatpush3.msra.mxu0 %v2734_v55 }
 0xe9e   : > { %15081 = vmatprep.subr.mxu0 %v16387_v2 }
 0xe9f   : > { %15082 = vmatpush3.msra.mxu0 %v2733_v56 }
 0xea0   : > { %15083 = vmatprep.subr.mxu0 %v16387_v2 }
 0xf5c   : > { %v2615_v42 = vpop.f32.mrf.mxu0 }
 0xf5d   : > { %15077 = vmatmul.mubr.msk.f32.vlgmr.msra.gmra.mxu1 %vm1002_vm7, %v2615_v42  ;;  %v13725_v42 = vld [vmem:[%s19249_s6 + $0x288] sm:$0xff] }
 0xf5e   : > { %v15073_v44 = vpop.f32.mrf.mxu0  ;;  %15106 = vmatprep.mubr.msk.f32.mxu1 %vm16388_vm0, %v16387_v2  ;;  %15091 = vmatpush3.msra.mxu1 %v2823_v58 }
 0xf5f   : > { %15092 = vmatprep.subr.mxu1 %v16387_v2  ;;  %v13710_v44 = vld [vmem:[%s19249_s6 + $0x180] sm:$0xff] }
 0xf60   : > { %15093 = vmatpush3.msra.mxu1 %v2822_v59 }
 0xf61   : > { %15094 = vmatprep.subr.mxu1 %v16387_v2 }
 0xf62   : > { %15095 = vmatpush3.msra.mxu1 %v2821_v60 }
 0xf63   : > { %15096 = vmatprep.subr.mxu1 %v16387_v2 }
 0xf64   : > { %15097 = vmatpush3.msra.mxu1 %v2820_v61  ;;  %v13720_v61 = vld [vmem:[%s19249_s6 + $0x218] sm:$0xff] }
 0xf65   : > { %15098 = vmatprep.subr.mxu1 %v16387_v2 }
 0xf66   : > { %15099 = vmatpush3.msra.mxu1 %v2819_v62  ;;  %v13719_v62 = vld [vmem:[%s19249_s6 + $0x210] sm:$0xff] }
 0xf67   : > { %15100 = vmatprep.subr.mxu1 %v16387_v2 }
 0xf68   : > { %15101 = vmatpush3.msra.mxu1 %v2818_v21  ;;  %v13737_v21 = vld [vmem:[%s19249_s6 + $0x1b0] sm:$0xff] }
 0xf69   : > { %15102 = vmatprep.subr.mxu1 %v16387_v2 }
 0xf6a   : > { %15103 = vmatpush3.msra.mxu1 %v2817_v22  ;;  %v13736_v22 = vld [vmem:[%s19249_s6 + $0x1a8] sm:$0xff] }
 0xf6b   : > { %15104 = vmatprep.subr.mxu1 %v16387_v2 }
 0xf6c   : > { %15105 = vmatpush3.msra.mxu1 %v2816_v50  ;;  %v13735_v50 = vld [vmem:[%s19249_s6 + $0x1a0] sm:$0xff] }
 0xf6d   : > { %15131 = vmatprep.subr.mxu1 %v16387_v2 }
0x101d   : > { %v2690_v45 = vpop.f32.mrf.mxu1 }
0x101e   : > { %v2694_v47 = vadd.f32 %v2690_v45, %v2208_v19  ;;  %v13724_v45 = vld [vmem:[%s19249_s6 + $0x280] sm:$0xff] }
0x101f   : > { %v15078_v48 = vpop.f32.mrf.mxu1 }
0x1020   : > { %v2702_v49 = vadd.f32 %v13703_v46, %v2694_v47 }
0x1022   : > { %v16979_v51 = vadd.f32 %v2702_v49, %v16564_v15  ;;  %v2732_v15 = vld [vmem:[%s19253_s10 + $0x8] sm:$0xff] }
0x1023   : > { %15084 = vmatpush3.msra.mxu0 %v2732_v15 }
0x1024   : > { %v2706_v52 = vsel %vm725_vm5, %v16979_v51, 0.0  ;;  %v2710_v53 = vmul.f32 %v16979_v51, %v16979_v51  ;;  %15085 = vmatprep.subr.mxu0 %v16387_v2 }
0x1025   : > { %2707 = vadd.xlane.f32.xlu0 %v2706_v52  ;;  %15086 = vmatpush3.msra.mxu0 %v2731_v57 }
0x1026   : > { %v2711_v54 = vsel %vm725_vm5, %v2710_v53, 0.0  ;;  %15109 = vmatprep.subr.mxu0 %v16387_v2 }
0x1027   : > { %2712 = vadd.xlane.f32.xlu1 %v2711_v54  ;;  %v13709_v54 = vld [vmem:[%s19257_s14 + $0x4] sm:$0x3] }
0x1028   : > { %v2926_v56 = vrot.slane %v13709_v54, %v16623_v41  ;;  %v2931_v57 = vrot.slane %v13709_v54, %v16630_v43 }
0x10ae   : > { %v2708_v0 = vpop.xlane.xlu0 %2707 }
0x10af   : > { %v2709_v1 = vmul.f32 0.03125, %v2708_v0  ;;  %v13718_v0 = vld [vmem:[%s19249_s6 + $0x208] sm:$0xff] }
0x10b0   : > { %v2713_v3 = vpop.xlane.xlu1 %2712 }
0x10b1   : > { %v2715_v4 = vmul.f32 %v2709_v1, %v2709_v1  ;;  %v2714_v5 = vmul.f32 0.03125, %v2713_v3  ;;  %v2719_v12 = vsub.f32 %v16979_v51, %v2709_v1  ;;  %v13717_v1 = vld [vmem:[%s19249_s6 + $0x200] sm:$0xff]  ;;  %v13729_v3 = vld [vmem:[%s19250_s7 + $0x14] ss:$0 sm:$0xff] }
0x10b3   : > { %v2716_v6 = vsub.f32 %v2714_v5, %v2715_v4 }
0x10b5   : > { %v2717_v9 = vadd.f32 1e-06, %v2716_v6 }
0x10b7   : > { %16221 = vrsqrt.f32 %v2717_v9 }
0x10c4   : > { %v16222_v14 = vpop.eup %16221 }
0x10c5   : > { %v2720_v16 = vmul.f32 %v16222_v14, %v2719_v12  ;;  %v13722_v12 = vld [vmem:[%s19250_s7 + $0x10] ss:$0 sm:$0xff]  ;;  %v13715_v14 = vld [vmem:[%s19250_s7 + $0xc] ss:$0 sm:$0xff] }
0x10c7   : > { %v2725_v19 = vmul.f32 %v2724_v13, %v2720_v16 }
0x10c9   : > { %v2730_v20 = vadd.f32 %v2729_v17, %v2725_v19 }
0x10cb   : > { %15088 = vmatmul.mubr.msk.f32.vlgmr.msra.gmra.mxu0 %vm725_vm5, %v2730_v20  ;;  %v13738_v20 = vld [vmem:[%s19249_s6 + $0x1b8] sm:$0xff] }
0x10cc   : > { %15117 = vmatprep.mubr.msk.f32.mxu0 %vm16388_vm0, %v16387_v2  ;;  %15110 = vmatpush3.msra.mxu0 %v13713_v35 }
0x10cd   : > { %15111 = vmatprep.subr.mxu0 %v16387_v2 }
0x10ce   : > { %15112 = vmatpush3.msra.mxu0 %v13712_v37 }
0x10cf   : > { %15113 = vmatprep.subr.mxu0 %v16387_v2 }
0x10d0   : > { %15114 = vmatpush3.msra.mxu0 %v13711_v40 }
0x10d1   : > { %15115 = vmatprep.subr.mxu0 %v16387_v2 }
0x10d2   : > { %15116 = vmatpush3.msra.mxu0 %v13710_v44 }
0x10d3   : > { %15120 = vmatprep.subr.mxu0 %v16387_v2 }
0x118b   : > { %v2811_v25 = vpop.f32.mrf.mxu0 }
0x118c   : > { %v2812_v26 = vadd.f32 %v13705_v24, %v2811_v25  ;;  %v13752_v24 = vld [vmem:[%s19249_s6 + $0x2b8] sm:$0xff]  ;;  %v13751_v25 = vld [vmem:[%s19249_s6 + $0x2b0] sm:$0xff] }
0x118d   : > { %v15089_v18 = vpop.f32.mrf.mxu0 }
0x118e   : > { %v2815_v27 = vmax.f32 %v2812_v26, 0.0  ;;  %v13750_v26 = vld [vmem:[%s19249_s6 + $0x2a8] sm:$0xff]  ;;  %v13749_v18 = vld [vmem:[%s19249_s6 + $0x2a0] sm:$0xff] }
0x1190   : > { %15107 = vmatmul.mubr.msk.f32.vlgmr.msra.gmra.mxu1 %vm2831_vm9, %v2815_v27 }
0x1191   : > { %15139 = vmatprep.mubr.msk.f32.mxu1 %vm16388_vm0, %v16387_v2  ;;  %15132 = vmatpush3.msra.mxu1 %v13727_v36 }
0x1192   : > { %15133 = vmatprep.subr.mxu1 %v16387_v2 }
0x1193   : > { %15134 = vmatpush3.msra.mxu1 %v13726_v38 }
0x1194   : > { %15135 = vmatprep.subr.mxu1 %v16387_v2 }
0x1195   : > { %15136 = vmatpush3.msra.mxu1 %v13725_v42 }
0x1196   : > { %15137 = vmatprep.subr.mxu1 %v16387_v2 }
0x1197   : > { %15138 = vmatpush3.msra.mxu1 %v13724_v45 }
0x1198   : > { %15147 = vmatprep.subr.mxu1 %v16387_v2 }
0x1250   : > { %v2901_v29 = vpop.f32.mrf.mxu1 }
0x1251   : > { %v2902_v30 = vadd.f32 %v13707_v28, %v2901_v29 }
0x1252   : > { %v15108_v31 = vpop.f32.mrf.mxu1 }
0x1253   : > { %v17053_v32 = vadd.f32 %v2902_v30, %v16979_v51 }
0x1255   : > { %v2908_v7 = vsel %vm725_vm5, %v17053_v32, 0.0  ;;  %v2912_v33 = vmul.f32 %v17053_v32, %v17053_v32 }
0x1256   : > { %2909 = vadd.xlane.f32.xlu0 %v2908_v7 }
0x1257   : > { %v2913_v34 = vsel %vm725_vm5, %v2912_v33, 0.0 }
0x1258   : > { %2914 = vadd.xlane.f32.xlu1 %v2913_v34 }
0x12df   : > { %v2910_v46 = vpop.xlane.xlu0 %2909 }
0x12e0   : > { %v2911_v47 = vmul.f32 0.03125, %v2910_v46  ;;  %v13745_v46 = vld [vmem:[%s19249_s6 + $0x238] sm:$0xff] }
0x12e1   : > { %v2915_v48 = vpop.xlane.xlu1 %2914 }
0x12e2   : > { %v2917_v49 = vmul.f32 %v2911_v47, %v2911_v47  ;;  %v2916_v51 = vmul.f32 0.03125, %v2915_v48  ;;  %v2921_v55 = vsub.f32 %v17053_v32, %v2911_v47  ;;  %v13744_v47 = vld [vmem:[%s19249_s6 + $0x230] sm:$0xff]  ;;  %v13743_v48 = vld [vmem:[%s19249_s6 + $0x228] sm:$0xff] }
0x12e4   : > { %v2918_v52 = vsub.f32 %v2916_v51, %v2917_v49  ;;  %v13742_v49 = vld [vmem:[%s19249_s6 + $0x220] sm:$0xff] }
0x12e6   : > { %v2919_v53 = vadd.f32 1e-06, %v2918_v52 }
0x12e8   : > { %16223 = vrsqrt.f32 %v2919_v53  ;;  %v13747_v53 = vld [vmem:[%s19250_s7 + $0x11] ss:$0 sm:$0xff] }
0x12f5   : > { %v16224_v15 = vpop.eup %16223 }
0x12f6   : > { %v2922_v58 = vmul.f32 %v16224_v15, %v2921_v55  ;;  %v13740_v55 = vld [vmem:[%s19250_s7 + $0xd] ss:$0 sm:$0xff]  ;;  %v13754_v15 = vld [vmem:[%s19250_s7 + $0x15] ss:$0 sm:$0xff] }
0x12f8   : > { %v2927_v59 = vmul.f32 %v2926_v56, %v2922_v58 }
0x12fa   : > { %v17098_v60 = vadd.f32 %v2931_v57, %v2927_v59 }
0x12fc   : > { %15118 = vmatmul.mubr.msk.f32.vlgmr.msra.gmra.mxu0 %vm725_vm5, %v17098_v60  ;;  %15140 = vmatmul.mubr.msk.f32.vlgmr.msra.gmra.mxu1 %vm725_vm5, %v17098_v60 }
0x12fd   : > { %15121 = vmatpush3.msra.mxu0 %v13720_v61  ;;  %15128 = vmatprep.mubr.msk.f32.mxu0 %vm16388_vm0, %v16387_v2 }
0x12fe   : > { %15122 = vmatprep.subr.mxu0 %v16387_v2  ;;  %15149 = vmatprep.mubr.msk.f32.mxu1 %vm16388_vm0, %v16387_v2 }
0x12ff   : > { %15123 = vmatpush3.msra.mxu0 %v13719_v62 }
0x1300   : > { %15124 = vmatprep.subr.mxu0 %v16387_v2 }
0x1301   : > { %15125 = vmatpush3.msra.mxu0 %v13718_v0 }
0x1302   : > { %15126 = vmatprep.subr.mxu0 %v16387_v2 }
0x1303   : > { %15127 = vmatpush3.msra.mxu0 %v13717_v1 }
0x1304   : > { %15129 = vmatmul.mubr.msk.f32.vlgmr.msra.gmra.mxu0 %vm725_vm5, %v17098_v60  ;;  %15142 = vmatprep.subr.mxu0 %v16387_v2 }
0x1305   : > { %15144 = vmatprep.mubr.msk.f32.mxu0 %vm16388_vm0, %v16387_v2 }
0x13bc   : > { %v3015_v4 = vpop.f32.mrf.mxu0  ;;  %v3181_v5 = vpop.f32.mrf.mxu1 }
0x13bd   : > { %v3182_v6 = vadd.f32 %v13729_v3, %v3181_v5  ;;  %v3016_v19 = vadd.f32 %v13715_v14, %v3015_v4 }
0x13be   : > { %v15119_v9 = vpop.f32.mrf.mxu0  ;;  %v15141_v11 = vpop.f32.mrf.mxu1 }
0x13bf   : > { %15148 = vmatpush3.msra.mxu1 %v3182_v6  ;;  %v13759_v11 = vld [vmem:[%s19251_s8 + $0x28] sm:$0xff] }
0x13c0   : > { %15163 = vmatprep.subr.mxu1 %v16387_v2 }
0x13c4   : > { %v3098_v13 = vpop.f32.mrf.mxu0 }
0x13c5   : > { %v3099_v16 = vadd.f32 %v13722_v12, %v3098_v13 }
0x13c6   : > { %v15130_v17 = vpop.f32.mrf.mxu0 }
0x13c7   : > { %15143 = vmatpush3.xpose.msk.msra.mxu0 %vm1002_vm7, %v3099_v16  ;;  %v13734_v16 = vld [vmem:[%s19251_s8 + $0x20] sm:$0xff]  ;;  %v13772_v17 = vld [vmem:[%s19249_s6 + $0x258] sm:$0xff] }
0x13c8   : > { %15152 = vmatprep.subr.mxu0 %v16387_v2 }
0x13ca   : > { %15145 = vmatmul.mubr.msk.f32.vlgmr.msra.gmra.mxu0 %vm1002_vm7, %v3016_v19  ;;  %v13771_v19 = vld [vmem:[%s19249_s6 + $0x250] sm:$0xff] }
0x13cb   : > { %15153 = vmatpush3.msra.mxu0 %v13738_v20  ;;  %15160 = vmatprep.mubr.msk.f32.mxu0 %vm16388_vm0, %v16387_v2  ;;  %v13770_v20 = vld [vmem:[%s19249_s6 + $0x248] sm:$0xff] }
0x13cc   : > { %15154 = vmatprep.subr.mxu0 %v16387_v2 }
0x13cd   : > { %15155 = vmatpush3.msra.mxu0 %v13737_v21  ;;  %v13769_v21 = vld [vmem:[%s19249_s6 + $0x240] sm:$0xff] }
0x13ce   : > { %15156 = vmatprep.subr.mxu0 %v16387_v2 }
0x13cf   : > { %15157 = vmatpush3.msra.mxu0 %v13736_v22  ;;  %v13765_v22 = vld [vmem:[%s19249_s6 + $0x1d8] sm:$0xff] }
0x13d0   : > { %15158 = vmatprep.subr.mxu0 %v16387_v2 }
0x13d1   : > { %15159 = vmatpush3.msra.mxu0 %v13735_v50 }
0x13d2   : > { %15161 = vmatmul.mubr.msk.f32.vlgmr.msra.gmra.mxu0 %vm725_vm5, %v17098_v60  ;;  %15174 = vmatprep.subr.mxu0 %v16387_v2 }
0x13d3   : > { %15175 = vmatpush3.msra.mxu0 %v13752_v24  ;;  %15182 = vmatprep.mubr.msk.f32.mxu0 %vm16388_vm0, %v16387_v2  ;;  %v13764_v24 = vld [vmem:[%s19249_s6 + $0x1d0] sm:$0xff] }
0x13d4   : > { %15176 = vmatprep.subr.mxu0 %v16387_v2 }
0x13d5   : > { %15177 = vmatpush3.msra.mxu0 %v13751_v25 }
0x13d6   : > { %15178 = vmatprep.subr.mxu0 %v16387_v2 }
0x13d7   : > { %15179 = vmatpush3.msra.mxu0 %v13750_v26  ;;  %v13763_v26 = vld [vmem:[%s19249_s6 + $0x1c8] sm:$0xff] }
0x13d8   : > { %15180 = vmatprep.subr.mxu0 %v16387_v2 }
0x13d9   : > { %15181 = vmatpush3.msra.mxu0 %v13749_v18 }
0x13da   : > { %15183 = vmatmul.mubr.msk.f32.vlgmr.msra.gmra.mxu0 %vm725_vm5, %v17098_v60  ;;  %15195 = vmatprep.subr.mxu0 %v16387_v2 }
0x13db   : > { %15197 = vmatprep.mubr.msk.f32.mxu0 %vm16388_vm0, %v16387_v2  ;;  %15196 = vmatpush3.msra.mxu0 %v13759_v11  ;;  %v13803_v11 = vld [vmem:[%s19249_s6 + $0x2e8] sm:$0xff] }
0x13dc   : > { %15205 = vmatprep.subr.mxu0 %v16387_v2 }
0x148a   : > { %v3257_v27 = vpop.f32.mrf.mxu0 }
0x148b   : > { %v3261_v28 = vsel %vm16724_vm8, %v3257_v27, -1e+09  ;;  %v13762_v27 = vld [vmem:[%s19249_s6 + $0x1c0] sm:$0xff] }
0x148c   : > { %v15146_v29 = vpop.f32.mrf.mxu0  ;;  %v3262_v30 = vsel %vm1002_vm7, %v3261_v28, -inf }
0x148d   : > { %3263 = vmax.xlane.f32.xlu0 %v3262_v30  ;;  %v13779_v29 = vld [vmem:[%s19249_s6 + $0x2d8] sm:$0xff]  ;;  %v13778_v30 = vld [vmem:[%s19249_s6 + $0x2d0] sm:$0xff] }
0x1492   : > { %v3427_v31 = vpop.f32.mrf.mxu0 }
0x1493   : > { %v3428_v58 = vadd.f32 %v13740_v55, %v3427_v31  ;;  %v13774_v31 = vld [vmem:[%s19250_s7 + $0x12] ss:$0 sm:$0xff] }
0x1494   : > { %v15162_v7 = vpop.f32.mrf.mxu0 }
0x1495   : > { %v13777_v7 = vld [vmem:[%s19249_s6 + $0x2c8] sm:$0xff] }
0x149a   : > { %v3593_v33 = vpop.f32.mrf.mxu0 }
0x149b   : > { %v3594_v59 = vadd.f32 %v13754_v15, %v3593_v33 }
0x149c   : > { %v15184_v34 = vpop.f32.mrf.mxu0 }
0x1516   : > { %v3264_v35 = vpop.xlane.xlu0 %3263 }
0x1517   : > { %v3265_v36 = vsub.f32 %v3261_v28, %v3264_v35  ;;  %v13776_v35 = vld [vmem:[%s19249_s6 + $0x2c0] sm:$0xff] }
0x1519   : > { %v3266_v37 = vmul.f32 1.442695, %v3265_v36 }
0x151b   : > { %16225 = vpow2.f32 %v3266_v37 }
0x1528   : > { %v16226_v38 = vpop.eup %16225 }
0x1529   : > { %v3268_v40 = vsel %vm1002_vm7, %v16226_v38, 0.0 }
0x152a   : > { %3269 = vadd.xlane.f32.xlu1 %v3268_v40  ;;  %v13767_v40 = vld [vmem:[%s19250_s7 + $0xe] ss:$0 sm:$0xff] }
0x15b3   : > { %v3270_v42 = vpop.xlane.xlu1 %3269 }
0x15b4   : > { %16227 = vrcp.f32 %v3270_v42 }
0x15c1   : > { %v16228_v44 = vpop.eup %16227 }
0x15c2   : > { %v3272_v45 = vmul.f32 %v16228_v44, %v16226_v38 }
0x15c4   : > { %15150 = vmatmul.mubr.msk.f32.vlgmr.msra.gmra.mxu1 %vm1002_vm7, %v3272_v45 }
0x15c5   : > { %15164 = vmatpush3.msra.mxu1 %v13745_v46  ;;  %15171 = vmatprep.mubr.msk.f32.mxu1 %vm16388_vm0, %v16387_v2  ;;  %v13781_v46 = vld [vmem:[%s19250_s7 + $0x16] ss:$0 sm:$0xff] }
0x15c6   : > { %15165 = vmatprep.subr.mxu1 %v16387_v2 }
0x15c7   : > { %15166 = vmatpush3.msra.mxu1 %v13744_v47 }
0x15c8   : > { %15167 = vmatprep.subr.mxu1 %v16387_v2 }
0x15c9   : > { %15168 = vmatpush3.msra.mxu1 %v13743_v48 }
0x15ca   : > { %15169 = vmatprep.subr.mxu1 %v16387_v2 }
0x15cb   : > { %15170 = vmatpush3.msra.mxu1 %v13742_v49 }
0x15cc   : > { %15172 = vmatmul.mubr.msk.f32.vlgmr.msra.gmra.mxu1 %vm725_vm5, %v17098_v60  ;;  %15185 = vmatprep.subr.mxu1 %v16387_v2 }
0x15cd   : > { %15187 = vmatprep.mubr.msk.f32.mxu1 %vm16388_vm0, %v16387_v2 }
0x1684   : > { %v3342_v51 = vpop.f32.mrf.mxu1 }
0x1686   : > { %v15151_v52 = vpop.f32.mrf.mxu1 }
0x168c   : > { %v3510_v54 = vpop.f32.mrf.mxu1 }
0x168d   : > { %v3511_v56 = vadd.f32 %v13747_v53, %v3510_v54 }
0x168e   : > { %v15173_v57 = vpop.f32.mrf.mxu1 }
0x168f   : > { %15186 = vmatpush3.xpose.msk.msra.mxu1 %vm1002_vm7, %v3511_v56 }
0x1690   : > { %15190 = vmatprep.subr.mxu1 %v16387_v2 }
0x1692   : > { %15188 = vmatmul.mubr.msk.f32.vlgmr.msra.gmra.mxu1 %vm1002_vm7, %v3428_v58 }
0x1693   : > { %15191 = vmatpush3.msra.mxu1 %v3594_v59  ;;  %15192 = vmatprep.mubr.msk.f32.mxu1 %vm16388_vm0, %v16387_v2  ;;  %v13786_v59 = vld [vmem:[%s19251_s8 + $0x30] sm:$0xff] }
0x1694   : > { %15200 = vmatprep.subr.mxu1 %v16387_v2 }
0x1752   : > { %v3669_v61 = vpop.f32.mrf.mxu1 }
0x1753   : > { %v3673_v62 = vsel %vm16724_vm8, %v3669_v61, -1e+09 }
0x1754   : > { %v15189_v0 = vpop.f32.mrf.mxu1  ;;  %v3674_v1 = vsel %vm1002_vm7, %v3673_v62, -inf }
0x1755   : > { %3675 = vmax.xlane.f32.xlu0 %v3674_v1  ;;  %v13791_v1 = vld [vmem:[%s19249_s6 + $0x1f8] sm:$0xff] }
0x17de   : > { %v3676_v3 = vpop.xlane.xlu0 %3675 }
0x17df   : > { %v3677_v4 = vsub.f32 %v3673_v62, %v3676_v3  ;;  %v13790_v3 = vld [vmem:[%s19249_s6 + $0x1f0] sm:$0xff] }
0x17e1   : > { %v3678_v5 = vmul.f32 1.442695, %v3677_v4  ;;  %v13789_v4 = vld [vmem:[%s19249_s6 + $0x1e8] sm:$0xff] }
0x17e3   : > { %16229 = vpow2.f32 %v3678_v5  ;;  %v13788_v5 = vld [vmem:[%s19249_s6 + $0x1e0] sm:$0xff] }
0x17f0   : > { %v16230_v6 = vpop.eup %16229 }
0x17f1   : > { %v3680_v9 = vsel %vm1002_vm7, %v16230_v6, 0.0 }
0x17f2   : > { %3681 = vadd.xlane.f32.xlu1 %v3680_v9  ;;  %v13804_v9 = vld [vmem:[%s19249_s6 + $0x2f0] sm:$0xff] }
0x187b   : > { %v3682_v12 = vpop.xlane.xlu1 %3681 }
0x187c   : > { %16231 = vrcp.f32 %v3682_v12  ;;  %v13802_v12 = vld [vmem:[%s19249_s6 + $0x2e0] sm:$0xff] }
0x1889   : > { %v16232_v13 = vpop.eup %16231 }
0x188a   : > { %v3684_v14 = vmul.f32 %v16232_v13, %v16230_v6  ;;  %v13805_v6 = vld [vmem:[%s19249_s6 + $0x2f8] sm:$0xff] }
0x188b   : > { %v13798_v13 = vld [vmem:[%s19249_s6 + $0x278] sm:$0xff] }
0x188c   : > { %15193 = vmatmul.mubr.msk.f32.vlgmr.msra.gmra.mxu1 %vm1002_vm7, %v3684_v14 }
0x188d   : > { %15201 = vmatpush3.msra.mxu1 %v13734_v16  ;;  %15202 = vmatprep.mubr.msk.f32.mxu1 %vm16388_vm0, %v16387_v2  ;;  %v13797_v16 = vld [vmem:[%s19249_s6 + $0x270] sm:$0xff] }
0x188e   : > { %15216 = vmatprep.subr.mxu1 %v16387_v2 }
0x1890   : > { %15203 = vmatmul.mubr.msk.f32.vlgmr.msra.gmra.mxu1 %vm1002_vm7, %v3342_v51 }
0x1891   : > { %15217 = vmatpush3.msra.mxu1 %v13772_v17  ;;  %15224 = vmatprep.mubr.msk.f32.mxu1 %vm16388_vm0, %v16387_v2 }
0x1892   : > { %15218 = vmatprep.subr.mxu1 %v16387_v2 }
0x1893   : > { %15219 = vmatpush3.msra.mxu1 %v13771_v19  ;;  %v13796_v19 = vld [vmem:[%s19249_s6 + $0x268] sm:$0xff] }
0x1894   : > { %15220 = vmatprep.subr.mxu1 %v16387_v2 }
0x1895   : > { %15221 = vmatpush3.msra.mxu1 %v13770_v20  ;;  %v13795_v20 = vld [vmem:[%s19249_s6 + $0x260] sm:$0xff] }
0x1896   : > { %15222 = vmatprep.subr.mxu1 %v16387_v2 }
0x1897   : > { %15223 = vmatpush3.msra.mxu1 %v13769_v21 }
0x1898   : > { %15225 = vmatmul.mubr.msk.f32.vlgmr.msra.gmra.mxu1 %vm725_vm5, %v17098_v60  ;;  %15238 = vmatprep.subr.mxu1 %v16387_v2 }
0x1899   : > { %15240 = vmatprep.mubr.msk.f32.mxu1 %vm16388_vm0, %v16387_v2 }
0x194c   : > { %v3754_v50 = vpop.f32.mrf.mxu1 }
0x194d   : > { %15198 = vmatmul.mubr.msk.f32.vlgmr.msra.gmra.mxu0 %vm1002_vm7, %v3754_v50 }
0x194e   : > { %15206 = vmatpush3.msra.mxu0 %v13765_v22  ;;  %v15194_v25 = vpop.f32.mrf.mxu1  ;;  %15213 = vmatprep.mubr.msk.f32.mxu0 %vm16388_vm0, %v16387_v2 }
0x194f   : > { %15207 = vmatprep.subr.mxu0 %v16387_v2 }
0x1950   : > { %15208 = vmatpush3.msra.mxu0 %v13764_v24  ;;  %v17276_v18 = vpop.f32.mrf.mxu1 }
0x1951   : > { %15209 = vmatprep.subr.mxu0 %v16387_v2 }
0x1952   : > { %15210 = vmatpush3.msra.mxu0 %v13763_v26  ;;  %v15204_v28 = vpop.f32.mrf.mxu1 }
0x1953   : > { %15211 = vmatprep.subr.mxu0 %v16387_v2 }
0x1954   : > { %15212 = vmatpush3.msra.mxu0 %v13762_v27 }
0x1955   : > { %15214 = vmatmul.mubr.msk.f32.vlgmr.msra.gmra.mxu0 %vm725_vm5, %v17098_v60  ;;  %15227 = vmatprep.subr.mxu0 %v16387_v2 }
0x1956   : > { %15228 = vmatpush3.msra.mxu0 %v13779_v29  ;;  %15235 = vmatprep.mubr.msk.f32.mxu0 %vm16388_vm0, %v16387_v2  ;;  %v13800_v29 = vld [vmem:[%s19250_s7 + $0x13] ss:$0 sm:$0xff] }
0x1957   : > { %15229 = vmatprep.subr.mxu0 %v16387_v2 }
0x1958   : > { %v4068_v33 = vpop.f32.mrf.mxu1  ;;  %15230 = vmatpush3.msra.mxu0 %v13778_v30 }
0x1959   : > { %v4069_v34 = vadd.f32 %v13774_v31, %v4068_v33  ;;  %15231 = vmatprep.subr.mxu0 %v16387_v2 }
0x195a   : > { %v15226_v36 = vpop.f32.mrf.mxu1  ;;  %15232 = vmatpush3.msra.mxu0 %v13777_v7  ;;  %v13807_v7 = vld [vmem:[%s19250_s7 + $0x17] ss:$0 sm:$0xff] }
0x195b   : > { %15233 = vmatprep.subr.mxu0 %v16387_v2  ;;  %15239 = vmatpush3.xpose.msk.msra.mxu1 %vm1002_vm7, %v4069_v34 }
0x195c   : > { %15234 = vmatpush3.msra.mxu0 %v13776_v35  ;;  %15243 = vmatprep.subr.mxu1 %v16387_v2 }
0x195d   : > { %15236 = vmatmul.mubr.msk.f32.vlgmr.msra.gmra.mxu0 %vm725_vm5, %v17098_v60  ;;  %15248 = vmatprep.subr.mxu0 %v16387_v2 }
0x195e   : > { %15250 = vmatprep.mubr.msk.f32.mxu0 %vm16388_vm0, %v16387_v2  ;;  %15249 = vmatpush3.msra.mxu0 %v13786_v59 }
0x195f   : > { %15264 = vmatprep.subr.mxu0 %v16387_v2 }
0x1a0d   : > { %v17313_v37 = vpop.f32.mrf.mxu0 }
0x1a0e   : > { %v3903_v25 = vadd.f32 %v17276_v18, %v17313_v37 }
0x1a0f   : > { %v15199_v38 = vpop.f32.mrf.mxu0 }
0x1a15   : > { %v3985_v42 = vpop.f32.mrf.mxu0 }
0x1a16   : > { %v3986_v44 = vadd.f32 %v13767_v40, %v3985_v42 }
0x1a17   : > { %v15215_v45 = vpop.f32.mrf.mxu0 }
0x1a18   : > { %15241 = vmatmul.mubr.msk.f32.vlgmr.msra.gmra.mxu1 %vm1002_vm7, %v3986_v44 }
0x1a19   : > { %15245 = vmatprep.mubr.msk.f32.mxu1 %vm16388_vm0, %v16387_v2 }
0x1a1d   : > { %v4151_v47 = vpop.f32.mrf.mxu0 }
0x1a1e   : > { %v4152_v48 = vadd.f32 %v13781_v46, %v4151_v47  ;;  %v13812_v47 = vld [vmem:[%s19251_s8 + $0x38] sm:$0xff] }
0x1a1f   : > { %v15237_v49 = vpop.f32.mrf.mxu0 }
0x1a20   : > { %15244 = vmatpush3.msra.mxu1 %v4152_v48 }
0x1a21   : > { %15253 = vmatprep.subr.mxu1 %v16387_v2 }
0x1ad8   : > { %v4227_v51 = vpop.f32.mrf.mxu1 }
0x1ad9   : > { %v4231_v52 = vsel %vm16724_vm8, %v4227_v51, -1e+09 }
0x1ada   : > { %v15242_v53 = vpop.f32.mrf.mxu1  ;;  %v4232_v54 = vsel %vm1002_vm7, %v4231_v52, -inf }
0x1adb   : > { %4233 = vmax.xlane.f32.xlu0 %v4232_v54 }
0x1b64   : > { %v4234_v55 = vpop.xlane.xlu0 %4233 }
0x1b65   : > { %v4235_v56 = vsub.f32 %v4231_v52, %v4234_v55  ;;  %v13815_v55 = vld [vmem:[%s19252_s9 + $0x1] ss:$0 sm:$0xff] }
0x1b67   : > { %v4236_v15 = vmul.f32 1.442695, %v4235_v56 }
0x1b69   : > { %16233 = vpow2.f32 %v4236_v15 }
0x1b76   : > { %v16234_v57 = vpop.eup %16233 }
0x1b77   : > { %v4238_v58 = vsel %vm1002_vm7, %v16234_v57, 0.0 }
0x1b78   : > { %4239 = vadd.xlane.f32.xlu1 %v4238_v58  ;;  %v16323_v58 = vld [vmem:[%s19248_s5] sm:$0xff] }
0x1b79   : > { %v17437_v59 = vadd.f32 %v16323_v58, %v16705_v63  ;;  %v13825_v58 = vld [vmem:[%s19255_s12 + $0x48] sm:$0xff] }
0x1b7b   : > { %v5122_v63 = vsel %vm725_vm5, %v17437_v59, 0.0 }
0x1c01   : > { %v4240_v61 = vpop.xlane.xlu1 %4239 }
0x1c02   : > { %16235 = vrcp.f32 %v4240_v61 }
0x1c0f   : > { %v16236_v62 = vpop.eup %16235 }
0x1c10   : > { %v4242_v0 = vmul.f32 %v16236_v62, %v16234_v57 }
0x1c12   : > { %15246 = vmatmul.mubr.msk.f32.vlgmr.msra.gmra.mxu1 %vm1002_vm7, %v4242_v0 }
0x1c13   : > { %15254 = vmatpush3.msra.mxu1 %v13791_v1  ;;  %15261 = vmatprep.mubr.msk.f32.mxu1 %vm16388_vm0, %v16387_v2 }
0x1c14   : > { %15255 = vmatprep.subr.mxu1 %v16387_v2 }
0x1c15   : > { %15256 = vmatpush3.msra.mxu1 %v13790_v3  ;;  %v5126_v3 = vmul.f32 %v17437_v59, %v17437_v59 }
0x1c16   : > { %15257 = vmatprep.subr.mxu1 %v16387_v2 }
0x1c17   : > { %15258 = vmatpush3.msra.mxu1 %v13789_v4  ;;  %v13820_v4 = vld [vmem:[%s19253_s10 + $0x38] sm:$0xff] }
0x1c18   : > { %15259 = vmatprep.subr.mxu1 %v16387_v2 }
0x1c19   : > { %15260 = vmatpush3.msra.mxu1 %v13788_v5  ;;  %v13819_v5 = vld [vmem:[%s19253_s10 + $0x30] sm:$0xff] }
0x1c1a   : > { %15262 = vmatmul.mubr.msk.f32.vlgmr.msra.gmra.mxu1 %vm725_vm5, %v17098_v60  ;;  %15275 = vmatprep.subr.mxu1 %v16387_v2 }
0x1c1b   : > { %15276 = vmatpush3.msra.mxu1 %v13805_v6  ;;  %15283 = vmatprep.mubr.msk.f32.mxu1 %vm16388_vm0, %v16387_v2  ;;  %v13818_v6 = vld [vmem:[%s19253_s10 + $0x28] sm:$0xff] }
0x1c1c   : > { %15277 = vmatprep.subr.mxu1 %v16387_v2 }
0x1c1d   : > { %15278 = vmatpush3.msra.mxu1 %v13804_v9  ;;  %v13817_v9 = vld [vmem:[%s19253_s10 + $0x20] sm:$0xff] }
0x1c1e   : > { %15279 = vmatprep.subr.mxu1 %v16387_v2 }
0x1c1f   : > { %15280 = vmatpush3.msra.mxu1 %v13803_v11  ;;  %v13831_v11 = vld [vmem:[%s19255_s12 + $0x78] sm:$0xff] }
0x1c20   : > { %15281 = vmatprep.subr.mxu1 %v16387_v2 }
0x1c21   : > { %15282 = vmatpush3.msra.mxu1 %v13802_v12  ;;  %v13830_v12 = vld [vmem:[%s19255_s12 + $0x70] sm:$0xff] }
0x1c22   : > { %15284 = vmatmul.mubr.msk.f32.vlgmr.msra.gmra.mxu1 %vm725_vm5, %v17098_v60  ;;  %15296 = vmatprep.subr.mxu1 %v16387_v2 }
0x1c23   : > { %15298 = vmatprep.mubr.msk.f32.mxu1 %vm16388_vm0, %v16387_v2  ;;  %15297 = vmatpush3.msra.mxu1 %v13812_v47  ;;  %v13840_v47 = vld [vmem:[%s19249_s6 + $0x318] sm:$0xff] }
0x1c24   : > { %15312 = vmatprep.subr.mxu1 %v16387_v2 }
0x1cd2   : > { %v4312_v14 = vpop.f32.mrf.mxu1 }
0x1cd3   : > { %15251 = vmatmul.mubr.msk.f32.vlgmr.msra.gmra.mxu0 %vm1002_vm7, %v4312_v14  ;;  %v13828_v14 = vld [vmem:[%s19255_s12 + $0x60] sm:$0xff] }
0x1cd4   : > { %15265 = vmatpush3.msra.mxu0 %v13798_v13  ;;  %v15247_v17 = vpop.f32.mrf.mxu1  ;;  %15272 = vmatprep.mubr.msk.f32.mxu0 %vm16388_vm0, %v16387_v2  ;;  %v13829_v13 = vld [vmem:[%s19255_s12 + $0x68] sm:$0xff] }
0x1cd5   : > { %15266 = vmatprep.subr.mxu0 %v16387_v2  ;;  %v13826_v17 = vld [vmem:[%s19255_s12 + $0x50] sm:$0xff] }
0x1cd6   : > { %15267 = vmatpush3.msra.mxu0 %v13797_v16  ;;  %v13827_v16 = vld [vmem:[%s19255_s12 + $0x58] sm:$0xff] }
0x1cd7   : > { %15268 = vmatprep.subr.mxu0 %v16387_v2 }
0x1cd8   : > { %15269 = vmatpush3.msra.mxu0 %v13796_v19 }
0x1cd9   : > { %15270 = vmatprep.subr.mxu0 %v16387_v2 }
0x1cda   : > { %v4471_v21 = vpop.f32.mrf.mxu1  ;;  %15271 = vmatpush3.msra.mxu0 %v13795_v20 }
0x1cdb   : > { %15273 = vmatmul.mubr.msk.f32.vlgmr.msra.gmra.mxu0 %vm725_vm5, %v17098_v60  ;;  %15286 = vmatprep.subr.mxu0 %v16387_v2  ;;  %v13793_v60 = vld [vmem:[%s19250_s7 + $0xf] ss:$0 sm:$0xff] }
0x1cdc   : > { %v15263_v22 = vpop.f32.mrf.mxu1  ;;  %15288 = vmatprep.mubr.msk.f32.mxu0 %vm16388_vm0, %v16387_v2  ;;  %v4472_v18 = vadd.f32 %v13793_v60, %v4471_v21 }
0x1ce2   : > { %v4637_v50 = vpop.f32.mrf.mxu1 }
0x1ce3   : > { %v4638_v34 = vadd.f32 %v13807_v7, %v4637_v50  ;;  %v13816_v7 = vld [vmem:[%s19257_s14 + $0x6] sm:$0x3] }
0x1ce4   : > { %v15285_v24 = vpop.f32.mrf.mxu1 }
0x1d93   : > { %v4387_v26 = vpop.f32.mrf.mxu0 }
0x1d94   : > { %v4391_v27 = vadd.f32 %v4387_v26, %v3903_v25 }
0x1d95   : > { %v15252_v28 = vpop.f32.mrf.mxu0 }
0x1d9b   : > { %v4554_v30 = vpop.f32.mrf.mxu0 }
0x1d9c   : > { %v4555_v31 = vadd.f32 %v13800_v29, %v4554_v30 }
0x1d9d   : > { %v15274_v33 = vpop.f32.mrf.mxu0 }
0x1d9e   : > { %15287 = vmatpush3.xpose.msk.msra.mxu0 %vm1002_vm7, %v4555_v31 }
0x1d9f   : > { %15291 = vmatprep.subr.mxu0 %v16387_v2 }
0x1da1   : > { %15289 = vmatmul.mubr.msk.f32.vlgmr.msra.gmra.mxu0 %vm1002_vm7, %v4472_v18  ;;  %v4908_v18 = vrot.slane %v13816_v7, %v16623_v41 }
0x1da2   : > { %15292 = vmatpush3.msra.mxu0 %v4638_v34  ;;  %15293 = vmatprep.mubr.msk.f32.mxu0 %vm16388_vm0, %v16387_v2 }
0x1da3   : > { %15301 = vmatprep.subr.mxu0 %v16387_v2 }
0x1e61   : > { %v4713_v35 = vpop.f32.mrf.mxu0 }
0x1e62   : > { %v4717_v36 = vsel %vm16724_vm8, %v4713_v35, -1e+09 }
0x1e63   : > { %v15290_v37 = vpop.f32.mrf.mxu0  ;;  %v4718_v38 = vsel %vm1002_vm7, %v4717_v36, -inf }
0x1e64   : > { %4719 = vmax.xlane.f32.xlu0 %v4718_v38  ;;  %v13836_v37 = vld [vmem:[%s19257_s14 + $0xa] sm:$0x3] }
0x1eed   : > { %v4720_v40 = vpop.xlane.xlu0 %4719 }
0x1eee   : > { %v4721_v42 = vsub.f32 %v4717_v36, %v4720_v40  ;;  %v4913_v36 = vrot.slane %v13816_v7, %v16630_v43  ;;  %v13856_v7 = vld [vmem:[%s19250_s7 + $0x20] ss:$0 sm:$0xff] }
0x1ef0   : > { %v4722_v44 = vmul.f32 1.442695, %v4721_v42 }
0x1ef2   : > { %16237 = vpow2.f32 %v4722_v44  ;;  %v5140_v44 = vrot.slane %v13836_v37, %v16623_v41 }
0x1eff   : > { %v16238_v45 = vpop.eup %16237 }
0x1f00   : > { %v4724_v46 = vsel %vm1002_vm7, %v16238_v45, 0.0 }
0x1f01   : > { %4725 = vadd.xlane.f32.xlu1 %v4724_v46 }
0x1f8a   : > { %v4726_v48 = vpop.xlane.xlu1 %4725 }
0x1f8b   : > { %16239 = vrcp.f32 %v4726_v48  ;;  %v13839_v48 = vld [vmem:[%s19249_s6 + $0x310] sm:$0xff] }
0x1f98   : > { %v16240_v49 = vpop.eup %16239 }
0x1f99   : > { %v4728_v51 = vmul.f32 %v16240_v49, %v16238_v45  ;;  %v5145_v49 = vrot.slane %v13836_v37, %v16630_v43 }
0x1f9b   : > { %15294 = vmatmul.mubr.msk.f32.vlgmr.msra.gmra.mxu0 %vm1002_vm7, %v4728_v51 }
0x1f9c   : > { %15309 = vmatprep.mubr.msk.f32.mxu0 %vm16388_vm0, %v16387_v2  ;;  %15302 = vmatpush3.msra.mxu0 %v13820_v4  ;;  %v13854_v4 = vld [vmem:[%s19249_s6 + $0x418] sm:$0xff] }
0x1f9d   : > { %15303 = vmatprep.subr.mxu0 %v16387_v2 }
0x1f9e   : > { %15304 = vmatpush3.msra.mxu0 %v13819_v5  ;;  %v13853_v5 = vld [vmem:[%s19249_s6 + $0x410] sm:$0xff] }
0x1f9f   : > { %15305 = vmatprep.subr.mxu0 %v16387_v2 }
0x1fa0   : > { %15306 = vmatpush3.msra.mxu0 %v13818_v6  ;;  %v13852_v6 = vld [vmem:[%s19249_s6 + $0x408] sm:$0xff] }
0x1fa1   : > { %15307 = vmatprep.subr.mxu0 %v16387_v2 }
0x1fa2   : > { %15308 = vmatpush3.msra.mxu0 %v13817_v9 }
0x1fa3   : > { %15331 = vmatprep.subr.mxu0 %v16387_v2 }
0x205b   : > { %v4798_v52 = vpop.f32.mrf.mxu0 }
0x205c   : > { %15299 = vmatmul.mubr.msk.f32.vlgmr.msra.gmra.mxu1 %vm1002_vm7, %v4798_v52  ;;  %v13838_v52 = vld [vmem:[%s19249_s6 + $0x308] sm:$0xff] }
0x205d   : > { %v15295_v53 = vpop.f32.mrf.mxu0  ;;  %15328 = vmatprep.mubr.msk.f32.mxu1 %vm16388_vm0, %v16387_v2  ;;  %15313 = vmatpush3.msra.mxu1 %v13831_v11  ;;  %v13851_v11 = vld [vmem:[%s19249_s6 + $0x400] sm:$0xff] }
0x205e   : > { %15314 = vmatprep.subr.mxu1 %v16387_v2  ;;  %v13837_v53 = vld [vmem:[%s19249_s6 + $0x300] sm:$0xff] }
0x205f   : > { %15315 = vmatpush3.msra.mxu1 %v13830_v12 }
0x2060   : > { %15316 = vmatprep.subr.mxu1 %v16387_v2 }
0x2061   : > { %15317 = vmatpush3.msra.mxu1 %v13829_v13  ;;  %v13849_v13 = vld [vmem:[%s19250_s7 + $0x1c] ss:$0 sm:$0xff] }
0x2062   : > { %15318 = vmatprep.subr.mxu1 %v16387_v2 }
0x2063   : > { %15319 = vmatpush3.msra.mxu1 %v13828_v14 }
0x2064   : > { %15320 = vmatprep.subr.mxu1 %v16387_v2 }
0x2065   : > { %15321 = vmatpush3.msra.mxu1 %v13827_v16  ;;  %v13842_v16 = vld [vmem:[%s19250_s7 + $0x18] ss:$0 sm:$0xff] }
0x2066   : > { %15322 = vmatprep.subr.mxu1 %v16387_v2 }
0x2067   : > { %15323 = vmatpush3.msra.mxu1 %v13826_v17 }
0x2068   : > { %15324 = vmatprep.subr.mxu1 %v16387_v2 }
0x2069   : > { %15325 = vmatpush3.msra.mxu1 %v13825_v58  ;;  %v13874_v58 = vld [vmem:[%s19250_s7 + $0x1d] ss:$0 sm:$0xff] }
0x206a   : > { %15326 = vmatprep.subr.mxu1 %v16387_v2 }
0x211c   : > { %v4873_v54 = vpop.f32.mrf.mxu1 }
0x211d   : > { %v4877_v56 = vadd.f32 %v4873_v54, %v4391_v27 }
0x211e   : > { %v15300_v15 = vpop.f32.mrf.mxu1 }
0x211f   : > { %v4886_v57 = vadd.f32 %v13815_v55, %v4877_v56  ;;  %v13847_v55 = vld [vmem:[%s19249_s6 + $0x398] sm:$0xff]  ;;  %v13846_v56 = vld [vmem:[%s19249_s6 + $0x390] sm:$0xff]  ;;  %v13845_v15 = vld [vmem:[%s19249_s6 + $0x388] sm:$0xff] }
0x2121   : > { %v17440_v61 = vadd.f32 %v4886_v57, %v17053_v32  ;;  %v5127_v32 = vsel %vm725_vm5, %v5126_v3, 0.0  ;;  %v13844_v57 = vld [vmem:[%s19249_s6 + $0x380] sm:$0xff] }
0x2123   : > { %v4890_v62 = vsel %vm725_vm5, %v17440_v61, 0.0  ;;  %v4894_v0 = vmul.f32 %v17440_v61, %v17440_v61 }
0x2124   : > { %4891 = vadd.xlane.f32.xlu0 %v4890_v62  ;;  %v13824_v62 = vld [vmem:[%s19255_s12 + $0x40] sm:$0xff] }
0x2125   : > { %v4895_v1 = vsel %vm725_vm5, %v4894_v0, 0.0  ;;  %15327 = vmatpush3.msra.mxu1 %v13824_v62  ;;  %v13822_v0 = vld [vmem:[%s19254_s11 + $0x1] ss:$0 sm:$0xff] }
0x2126   : > { %4896 = vadd.xlane.f32.xlu1 %v4895_v1  ;;  %15353 = vmatprep.subr.mxu1 %v16387_v2 }
0x2128   : > { %5123 = vadd.xlane.f32.xlu0 %v5122_v63 }
0x212a   : > { %5128 = vadd.xlane.f32.xlu1 %v5127_v32 }
0x21ad   : > { %v4892_v19 = vpop.xlane.xlu0 %4891 }
0x21ae   : > { %v4893_v20 = vmul.f32 0.03125, %v4892_v19 }
0x21af   : > { %v4897_v21 = vpop.xlane.xlu1 %4896 }
0x21b0   : > { %v4899_v22 = vmul.f32 %v4893_v20, %v4893_v20  ;;  %v4898_v50 = vmul.f32 0.03125, %v4897_v21  ;;  %v4903_v33 = vsub.f32 %v17440_v61, %v4893_v20  ;;  %v13865_v21 = vld [vmem:[%s19249_s6 + $0x338] sm:$0xff] }
0x21b1   : > { %v5124_v24 = vpop.xlane.xlu0 %5123 }
0x21b2   : > { %v4900_v25 = vsub.f32 %v4898_v50, %v4899_v22  ;;  %v5125_v26 = vmul.f32 0.03125, %v5124_v24  ;;  %v13864_v22 = vld [vmem:[%s19249_s6 + $0x330] sm:$0xff]  ;;  %v13863_v50 = vld [vmem:[%s19249_s6 + $0x328] sm:$0xff]  ;;  %v13862_v24 = vld [vmem:[%s19249_s6 + $0x320] sm:$0xff] }
0x21b3   : > { %v5129_v27 = vpop.xlane.xlu1 %5128 }
0x21b4   : > { %v4901_v28 = vadd.f32 1e-06, %v4900_v25  ;;  %v5131_v29 = vmul.f32 %v5125_v26, %v5125_v26  ;;  %v5130_v30 = vmul.f32 0.03125, %v5129_v27  ;;  %v5135_v38 = vsub.f32 %v17437_v59, %v5125_v26  ;;  %v13879_v25 = vld [vmem:[%s19249_s6 + $0x438] sm:$0xff]  ;;  %v13878_v26 = vld [vmem:[%s19249_s6 + $0x430] sm:$0xff]  ;;  %v13877_v27 = vld [vmem:[%s19249_s6 + $0x428] sm:$0xff] }
0x21b6   : > { %16241 = vrsqrt.f32 %v4901_v28  ;;  %v5132_v60 = vsub.f32 %v5130_v30, %v5131_v29  ;;  %v13876_v28 = vld [vmem:[%s19249_s6 + $0x420] sm:$0xff]  ;;  %v554_v29 = vrot.slane %v16552_v8, %v16623_v41 }
0x21b8   : > { %v5133_v31 = vadd.f32 1e-06, %v5132_v60  ;;  %vm555_vm11 = vcmp.eq.s32.totalorder %v554_v29, 1 }
0x21b9   : > { %vm17638_vm12 = vmand %vm549_vm10, %vm555_vm11 }
0x21ba   : > { %16243 = vrsqrt.f32 %v5133_v31 }
0x21c3   : > { %v16242_v34 = vpop.eup %16241 }
0x21c4   : > { %v4904_v35 = vmul.f32 %v16242_v34, %v4903_v33 }
0x21c6   : > { %v4909_v40 = vmul.f32 %v4908_v18, %v4904_v35 }
0x21c7   : > { %v16244_v42 = vpop.eup %16243 }
0x21c8   : > { %v5136_v45 = vmul.f32 %v16244_v42, %v5135_v38  ;;  %v4914_v46 = vadd.f32 %v4913_v36, %v4909_v40 }
0x21ca   : > { %15310 = vmatmul.mubr.msk.f32.vlgmr.msra.gmra.mxu0 %vm725_vm5, %v4914_v46  ;;  %v5141_v51 = vmul.f32 %v5140_v44, %v5136_v45 }
0x21cb   : > { %15332 = vmatpush3.msra.mxu0 %v13840_v47  ;;  %15339 = vmatprep.mubr.msk.f32.mxu0 %vm16388_vm0, %v16387_v2 }
0x21cc   : > { %15333 = vmatprep.subr.mxu0 %v16387_v2  ;;  %v17521_v54 = vadd.f32 %v5145_v49, %v5141_v51 }
0x21cd   : > { %15334 = vmatpush3.msra.mxu0 %v13839_v48 }
0x21ce   : > { %15335 = vmatprep.subr.mxu0 %v16387_v2 }
0x21cf   : > { %15336 = vmatpush3.msra.mxu0 %v13838_v52  ;;  %v13872_v52 = vld [vmem:[%s19249_s6 + $0x3b8] sm:$0xff] }
0x21d0   : > { %15337 = vmatprep.subr.mxu0 %v16387_v2 }
0x21d1   : > { %15338 = vmatpush3.msra.mxu0 %v13837_v53  ;;  %v13871_v53 = vld [vmem:[%s19249_s6 + $0x3b0] sm:$0xff] }
0x21d2   : > { %15340 = vmatmul.mubr.msk.f32.vlgmr.msra.gmra.mxu0 %vm725_vm5, %v17521_v54  ;;  %15342 = vmatprep.subr.mxu0 %v16387_v2 }
0x21d3   : > { %15343 = vmatpush3.msra.mxu0 %v13847_v55  ;;  %15350 = vmatprep.mubr.msk.f32.mxu0 %vm16388_vm0, %v16387_v2  ;;  %v13870_v55 = vld [vmem:[%s19249_s6 + $0x3a8] sm:$0xff] }
0x21d4   : > { %15344 = vmatprep.subr.mxu0 %v16387_v2 }
0x21d5   : > { %15345 = vmatpush3.msra.mxu0 %v13846_v56  ;;  %v13869_v56 = vld [vmem:[%s19249_s6 + $0x3a0] sm:$0xff] }
0x21d6   : > { %15346 = vmatprep.subr.mxu0 %v16387_v2 }
0x21d7   : > { %15347 = vmatpush3.msra.mxu0 %v13845_v15 }
0x21d8   : > { %15348 = vmatprep.subr.mxu0 %v16387_v2 }
0x21d9   : > { %15349 = vmatpush3.msra.mxu0 %v13844_v57 }
0x21da   : > { %15351 = vmatmul.mubr.msk.f32.vlgmr.msra.gmra.mxu0 %vm725_vm5, %v17521_v54  ;;  %15364 = vmatprep.subr.mxu0 %v16387_v2 }
0x21db   : > { %15366 = vmatprep.mubr.msk.f32.mxu0 %vm16388_vm0, %v16387_v2 }
0x228a   : > { %v4997_v1 = vpop.f32.mrf.mxu0 }
0x228b   : > { %v4998_v3 = vadd.f32 %v13822_v0, %v4997_v1  ;;  %v13867_v0 = vld [vmem:[%s19250_s7 + $0x19] ss:$0 sm:$0xff] }
0x228c   : > { %v15311_v63 = vpop.f32.mrf.mxu0 }
0x228d   : > { %v5001_v32 = vmax.f32 %v4998_v3, 0.0  ;;  %v13881_v3 = vld [vmem:[%s19250_s7 + $0x21] ss:$0 sm:$0xff] }
0x228f   : > { %15329 = vmatmul.mubr.msk.f32.vlgmr.msra.gmra.mxu1 %vm2831_vm9, %v5001_v32 }
0x2290   : > { %15354 = vmatpush3.msra.mxu1 %v13854_v4  ;;  %15361 = vmatprep.mubr.msk.f32.mxu1 %vm16388_vm0, %v16387_v2 }
0x2291   : > { %15355 = vmatprep.subr.mxu1 %v16387_v2 }
0x2292   : > { %v5229_v9 = vpop.f32.mrf.mxu0  ;;  %15356 = vmatpush3.msra.mxu1 %v13853_v5 }
0x2293   : > { %15357 = vmatprep.subr.mxu1 %v16387_v2  ;;  %v5230_v20 = vadd.f32 %v13842_v16, %v5229_v9 }
0x2294   : > { %v15341_v12 = vpop.f32.mrf.mxu0  ;;  %15358 = vmatpush3.msra.mxu1 %v13852_v6 }
0x2295   : > { %15359 = vmatprep.subr.mxu1 %v16387_v2 }
0x2296   : > { %15360 = vmatpush3.msra.mxu1 %v13851_v11 }
0x2297   : > { %15362 = vmatmul.mubr.msk.f32.vlgmr.msra.gmra.mxu1 %vm725_vm5, %v17521_v54  ;;  %15369 = vmatprep.subr.mxu1 %v16387_v2 }
0x2298   : > { %15371 = vmatprep.mubr.msk.f32.mxu1 %vm16388_vm0, %v16387_v2 }
0x229a   : > { %v5312_v14 = vpop.f32.mrf.mxu0 }
0x229b   : > { %v5313_v17 = vadd.f32 %v13849_v13, %v5312_v14 }
0x229c   : > { %v15352_v19 = vpop.f32.mrf.mxu0 }
0x229d   : > { %15365 = vmatpush3.xpose.msk.msra.mxu0 %vm1002_vm7, %v5313_v17  ;;  %v13886_v19 = vld [vmem:[%s19251_s8 + $0x48] sm:$0xff] }
0x229e   : > { %15374 = vmatprep.subr.mxu0 %v16387_v2 }
0x22a0   : > { %15367 = vmatmul.mubr.msk.f32.vlgmr.msra.gmra.mxu0 %vm1002_vm7, %v5230_v20 }
0x22a1   : > { %15375 = vmatpush3.msra.mxu0 %v13865_v21  ;;  %15382 = vmatprep.mubr.msk.f32.mxu0 %vm16388_vm0, %v16387_v2 }
0x22a2   : > { %15376 = vmatprep.subr.mxu0 %v16387_v2 }
0x22a3   : > { %15377 = vmatpush3.msra.mxu0 %v13864_v22 }
0x22a4   : > { %15378 = vmatprep.subr.mxu0 %v16387_v2 }
0x22a5   : > { %15379 = vmatpush3.msra.mxu0 %v13863_v50  ;;  %v13861_v50 = vld [vmem:[%s19251_s8 + $0x40] sm:$0xff] }
0x22a6   : > { %15380 = vmatprep.subr.mxu0 %v16387_v2 }
0x22a7   : > { %15381 = vmatpush3.msra.mxu0 %v13862_v24  ;;  %v13899_v24 = vld [vmem:[%s19249_s6 + $0x3d8] sm:$0xff] }
0x22a8   : > { %15383 = vmatmul.mubr.msk.f32.vlgmr.msra.gmra.mxu0 %vm725_vm5, %v17521_v54  ;;  %15396 = vmatprep.subr.mxu0 %v16387_v2 }
0x22a9   : > { %15397 = vmatpush3.msra.mxu0 %v13879_v25  ;;  %15404 = vmatprep.mubr.msk.f32.mxu0 %vm16388_vm0, %v16387_v2  ;;  %v13898_v25 = vld [vmem:[%s19249_s6 + $0x3d0] sm:$0xff] }
0x22aa   : > { %15398 = vmatprep.subr.mxu0 %v16387_v2 }
0x22ab   : > { %15399 = vmatpush3.msra.mxu0 %v13878_v26  ;;  %v13897_v26 = vld [vmem:[%s19249_s6 + $0x3c8] sm:$0xff] }
0x22ac   : > { %15400 = vmatprep.subr.mxu0 %v16387_v2 }
0x22ad   : > { %15401 = vmatpush3.msra.mxu0 %v13877_v27  ;;  %v13896_v27 = vld [vmem:[%s19249_s6 + $0x3c0] sm:$0xff] }
0x22ae   : > { %15402 = vmatprep.subr.mxu0 %v16387_v2 }
0x22af   : > { %15403 = vmatpush3.msra.mxu0 %v13876_v28  ;;  %v13892_v28 = vld [vmem:[%s19249_s6 + $0x358] sm:$0xff] }
0x22b0   : > { %15405 = vmatmul.mubr.msk.f32.vlgmr.msra.gmra.mxu0 %vm725_vm5, %v17521_v54  ;;  %15417 = vmatprep.subr.mxu0 %v16387_v2 }
0x22b1   : > { %15419 = vmatprep.mubr.msk.f32.mxu0 %vm16388_vm0, %v16387_v2  ;;  %15418 = vmatpush3.msra.mxu0 %v13886_v19  ;;  %v13929_v19 = vld [vmem:[%s19249_s6 + $0x460] sm:$0xff] }
0x22b2   : > { %15427 = vmatprep.subr.mxu0 %v16387_v2 }
0x234f   : > { %v17642_v60 = vpop.f32.mrf.mxu1 }
0x2351   : > { %v15330_v31 = vpop.f32.mrf.mxu1 }
0x2352   : > { %v13891_v31 = vld [vmem:[%s19249_s6 + $0x350] sm:$0xff] }
0x2357   : > { %v5395_v33 = vpop.f32.mrf.mxu1 }
0x2358   : > { %v5396_v18 = vadd.f32 %v13856_v7, %v5395_v33  ;;  %v13890_v33 = vld [vmem:[%s19249_s6 + $0x348] sm:$0xff] }
0x2359   : > { %v15363_v34 = vpop.f32.mrf.mxu1 }
0x235a   : > { %15370 = vmatpush3.msra.mxu1 %v5396_v18  ;;  %v13889_v34 = vld [vmem:[%s19249_s6 + $0x340] sm:$0xff] }
0x235b   : > { %15385 = vmatprep.subr.mxu1 %v16387_v2 }
0x2360   : > { %v5471_v10 = vpop.f32.mrf.mxu0 }
0x2361   : > { %v5475_v8 = vsel %vm17638_vm12, %v5471_v10, -1e+09 }
0x2362   : > { %v15368_v39 = vpop.f32.mrf.mxu0  ;;  %v5476_v35 = vsel %vm1002_vm7, %v5475_v8, -inf }
0x2363   : > { %5477 = vmax.xlane.f32.xlu0 %v5476_v35  ;;  %v13905_v39 = vld [vmem:[%s19249_s6 + $0x450] sm:$0xff]  ;;  %v13901_v35 = vld [vmem:[%s19250_s7 + $0x1e] ss:$0 sm:$0xff] }
0x2368   : > { %v5641_v36 = vpop.f32.mrf.mxu0 }
0x2369   : > { %v5642_v32 = vadd.f32 %v13867_v0, %v5641_v36  ;;  %v13904_v36 = vld [vmem:[%s19249_s6 + $0x448] sm:$0xff] }
0x236a   : > { %v15384_v37 = vpop.f32.mrf.mxu0 }
0x2370   : > { %v5807_v38 = vpop.f32.mrf.mxu0 }
0x2371   : > { %v5808_v4 = vadd.f32 %v13881_v3, %v5807_v38 }
0x2372   : > { %v15406_v40 = vpop.f32.mrf.mxu0 }
0x2373   : > { %v13903_v40 = vld [vmem:[%s19249_s6 + $0x440] sm:$0xff] }
0x23ec   : > { %v5478_v42 = vpop.xlane.xlu0 %5477 }
0x23ed   : > { %v5479_v44 = vsub.f32 %v5475_v8, %v5478_v42  ;;  %v13906_v8 = vld [vmem:[%s19249_s6 + $0x458] sm:$0xff] }
0x23ef   : > { %v5480_v45 = vmul.f32 1.442695, %v5479_v44 }
0x23f1   : > { %16245 = vpow2.f32 %v5480_v45 }
0x23fe   : > { %v16246_v46 = vpop.eup %16245 }
0x23ff   : > { %v5482_v47 = vsel %vm1002_vm7, %v16246_v46, 0.0 }
0x2400   : > { %5483 = vadd.xlane.f32.xlu1 %v5482_v47 }
0x2489   : > { %v5484_v48 = vpop.xlane.xlu1 %5483 }
0x248a   : > { %16247 = vrcp.f32 %v5484_v48 }
0x2497   : > { %v16248_v49 = vpop.eup %16247 }
0x2498   : > { %v5486_v51 = vmul.f32 %v16248_v49, %v16246_v46  ;;  %v13894_v46 = vld [vmem:[%s19250_s7 + $0x1a] ss:$0 sm:$0xff] }
0x249a   : > { %15372 = vmatmul.mubr.msk.f32.vlgmr.msra.gmra.mxu1 %vm1002_vm7, %v5486_v51  ;;  %v13908_v51 = vld [vmem:[%s19250_s7 + $0x22] ss:$0 sm:$0xff] }
0x249b   : > { %15386 = vmatpush3.msra.mxu1 %v13872_v52  ;;  %15393 = vmatprep.mubr.msk.f32.mxu1 %vm16388_vm0, %v16387_v2 }
0x249c   : > { %15387 = vmatprep.subr.mxu1 %v16387_v2 }
0x249d   : > { %15388 = vmatpush3.msra.mxu1 %v13871_v53 }
0x249e   : > { %15389 = vmatprep.subr.mxu1 %v16387_v2 }
0x249f   : > { %15390 = vmatpush3.msra.mxu1 %v13870_v55 }
0x24a0   : > { %15391 = vmatprep.subr.mxu1 %v16387_v2 }
0x24a1   : > { %15392 = vmatpush3.msra.mxu1 %v13869_v56 }
0x24a2   : > { %15394 = vmatmul.mubr.msk.f32.vlgmr.msra.gmra.mxu1 %vm725_vm5, %v17521_v54  ;;  %15407 = vmatprep.subr.mxu1 %v16387_v2 }
0x24a3   : > { %15409 = vmatprep.mubr.msk.f32.mxu1 %vm16388_vm0, %v16387_v2 }
0x255a   : > { %v5556_v15 = vpop.f32.mrf.mxu1 }
0x255c   : > { %v15373_v57 = vpop.f32.mrf.mxu1 }
0x2562   : > { %v5724_v62 = vpop.f32.mrf.mxu1 }
0x2563   : > { %v5725_v1 = vadd.f32 %v13874_v58, %v5724_v62 }
0x2564   : > { %v15395_v63 = vpop.f32.mrf.mxu1 }
0x2565   : > { %15408 = vmatpush3.xpose.msk.msra.mxu1 %vm1002_vm7, %v5725_v1 }
0x2566   : > { %15412 = vmatprep.subr.mxu1 %v16387_v2 }
0x2568   : > { %15410 = vmatmul.mubr.msk.f32.vlgmr.msra.gmra.mxu1 %vm1002_vm7, %v5642_v32  ;;  %v13913_v32 = vld [vmem:[%s19251_s8 + $0x50] sm:$0xff] }
0x2569   : > { %15413 = vmatpush3.msra.mxu1 %v5808_v4  ;;  %15414 = vmatprep.mubr.msk.f32.mxu1 %vm16388_vm0, %v16387_v2 }
0x256a   : > { %15422 = vmatprep.subr.mxu1 %v16387_v2 }
0x2628   : > { %v5883_v5 = vpop.f32.mrf.mxu1 }
0x2629   : > { %v5887_v6 = vsel %vm17638_vm12, %v5883_v5, -1e+09 }
0x262a   : > { %v15411_v9 = vpop.f32.mrf.mxu1  ;;  %v5888_v11 = vsel %vm1002_vm7, %v5887_v6, -inf }
0x262b   : > { %5889 = vmax.xlane.f32.xlu0 %v5888_v11  ;;  %v13918_v9 = vld [vmem:[%s19249_s6 + $0x378] sm:$0xff]  ;;  %v13917_v11 = vld [vmem:[%s19249_s6 + $0x370] sm:$0xff] }
0x26b4   : > { %v5890_v12 = vpop.xlane.xlu0 %5889 }
0x26b5   : > { %v5891_v13 = vsub.f32 %v5887_v6, %v5890_v12  ;;  %v13916_v12 = vld [vmem:[%s19249_s6 + $0x368] sm:$0xff] }
0x26b7   : > { %v5892_v14 = vmul.f32 1.442695, %v5891_v13  ;;  %v13915_v13 = vld [vmem:[%s19249_s6 + $0x360] sm:$0xff] }
0x26b9   : > { %16249 = vpow2.f32 %v5892_v14  ;;  %v13932_v14 = vld [vmem:[%s19249_s6 + $0x478] sm:$0xff] }
0x26c6   : > { %v16250_v16 = vpop.eup %16249 }
0x26c7   : > { %v5894_v17 = vsel %vm1002_vm7, %v16250_v16, 0.0 }
0x26c8   : > { %5895 = vadd.xlane.f32.xlu1 %v5894_v17  ;;  %v13930_v17 = vld [vmem:[%s19249_s6 + $0x468] sm:$0xff] }
0x2751   : > { %v5896_v20 = vpop.xlane.xlu1 %5895 }
0x2752   : > { %16251 = vrcp.f32 %v5896_v20  ;;  %v13925_v20 = vld [vmem:[%s19249_s6 + $0x3f8] sm:$0xff] }
0x275f   : > { %v16252_v21 = vpop.eup %16251 }
0x2760   : > { %v5898_v22 = vmul.f32 %v16252_v21, %v16250_v16  ;;  %v13931_v16 = vld [vmem:[%s19249_s6 + $0x470] sm:$0xff] }
0x2762   : > { %15415 = vmatmul.mubr.msk.f32.vlgmr.msra.gmra.mxu1 %vm1002_vm7, %v5898_v22  ;;  %v13924_v22 = vld [vmem:[%s19249_s6 + $0x3f0] sm:$0xff] }
0x2763   : > { %15423 = vmatpush3.msra.mxu1 %v13861_v50  ;;  %15424 = vmatprep.mubr.msk.f32.mxu1 %vm16388_vm0, %v16387_v2 }
0x2764   : > { %15438 = vmatprep.subr.mxu1 %v16387_v2 }
0x2766   : > { %15425 = vmatmul.mubr.msk.f32.vlgmr.msra.gmra.mxu1 %vm1002_vm7, %v5556_v15 }
0x2767   : > { %15439 = vmatpush3.msra.mxu1 %v13899_v24  ;;  %15446 = vmatprep.mubr.msk.f32.mxu1 %vm16388_vm0, %v16387_v2  ;;  %v13923_v24 = vld [vmem:[%s19249_s6 + $0x3e8] sm:$0xff] }
0x2768   : > { %15440 = vmatprep.subr.mxu1 %v16387_v2 }
0x2769   : > { %15441 = vmatpush3.msra.mxu1 %v13898_v25  ;;  %v13922_v25 = vld [vmem:[%s19249_s6 + $0x3e0] sm:$0xff] }
0x276a   : > { %15442 = vmatprep.subr.mxu1 %v16387_v2 }
0x276b   : > { %15443 = vmatpush3.msra.mxu1 %v13897_v26 }
0x276c   : > { %15444 = vmatprep.subr.mxu1 %v16387_v2 }
0x276d   : > { %15445 = vmatpush3.msra.mxu1 %v13896_v27 }
0x276e   : > { %15447 = vmatmul.mubr.msk.f32.vlgmr.msra.gmra.mxu1 %vm725_vm5, %v17521_v54  ;;  %15460 = vmatprep.subr.mxu1 %v16387_v2 }
0x276f   : > { %15462 = vmatprep.mubr.msk.f32.mxu1 %vm16388_vm0, %v16387_v2 }
0x2822   : > { %v5968_v29 = vpop.f32.mrf.mxu1 }
0x2823   : > { %15420 = vmatmul.mubr.msk.f32.vlgmr.msra.gmra.mxu0 %vm1002_vm7, %v5968_v29 }
0x2824   : > { %15428 = vmatpush3.msra.mxu0 %v13892_v28  ;;  %v15416_v7 = vpop.f32.mrf.mxu1  ;;  %15435 = vmatprep.mubr.msk.f32.mxu0 %vm16388_vm0, %v16387_v2 }
0x2825   : > { %15429 = vmatprep.subr.mxu0 %v16387_v2 }
0x2826   : > { %15430 = vmatpush3.msra.mxu0 %v13891_v31  ;;  %v17741_v18 = vpop.f32.mrf.mxu1 }
0x2827   : > { %15431 = vmatprep.subr.mxu0 %v16387_v2 }
0x2828   : > { %15432 = vmatpush3.msra.mxu0 %v13890_v33  ;;  %v15426_v10 = vpop.f32.mrf.mxu1 }
0x2829   : > { %15433 = vmatprep.subr.mxu0 %v16387_v2  ;;  %v13927_v10 = vld [vmem:[%s19250_s7 + $0x1f] ss:$0 sm:$0xff] }
0x282a   : > { %15434 = vmatpush3.msra.mxu0 %v13889_v34 }
0x282b   : > { %15436 = vmatmul.mubr.msk.f32.vlgmr.msra.gmra.mxu0 %vm725_vm5, %v17521_v54  ;;  %15449 = vmatprep.subr.mxu0 %v16387_v2 }
0x282c   : > { %15450 = vmatpush3.msra.mxu0 %v13906_v8  ;;  %15457 = vmatprep.mubr.msk.f32.mxu0 %vm16388_vm0, %v16387_v2  ;;  %v13920_v8 = vld [vmem:[%s19250_s7 + $0x1b] ss:$0 sm:$0xff] }
0x282d   : > { %15451 = vmatprep.subr.mxu0 %v16387_v2 }
0x282e   : > { %v6282_v37 = vpop.f32.mrf.mxu1  ;;  %15452 = vmatpush3.msra.mxu0 %v13905_v39 }
0x282f   : > { %v6283_v38 = vadd.f32 %v13901_v35, %v6282_v37  ;;  %15453 = vmatprep.subr.mxu0 %v16387_v2  ;;  %v13934_v35 = vld [vmem:[%s19250_s7 + $0x23] ss:$0 sm:$0xff] }
0x2830   : > { %v15448_v42 = vpop.f32.mrf.mxu1  ;;  %15454 = vmatpush3.msra.mxu0 %v13904_v36 }
0x2831   : > { %15455 = vmatprep.subr.mxu0 %v16387_v2  ;;  %15461 = vmatpush3.xpose.msk.msra.mxu1 %vm1002_vm7, %v6283_v38  ;;  %v13833_v38 = vld [vmem:[%s19256_s13 + $0x1] ss:$0 sm:$0xff] }
0x2832   : > { %15456 = vmatpush3.msra.mxu0 %v13903_v40  ;;  %15465 = vmatprep.subr.mxu1 %v16387_v2  ;;  %v5089_v40 = vadd.f32 %v13833_v38, %v17642_v60 }
0x2833   : > { %15458 = vmatmul.mubr.msk.f32.vlgmr.msra.gmra.mxu0 %vm725_vm5, %v17521_v54  ;;  %15470 = vmatprep.subr.mxu0 %v16387_v2 }
0x2834   : > { %15472 = vmatprep.mubr.msk.f32.mxu0 %vm16388_vm0, %v16387_v2  ;;  %15471 = vmatpush3.msra.mxu0 %v13913_v32 }
0x2835   : > { %15486 = vmatprep.subr.mxu0 %v16387_v2 }
0x28e3   : > { %v17778_v44 = vpop.f32.mrf.mxu0 }
0x28e4   : > { %v6117_v31 = vadd.f32 %v17741_v18, %v17778_v44 }
0x28e5   : > { %v15421_v45 = vpop.f32.mrf.mxu0 }
0x28e6   : > { %v5092_v45 = vadd.f32 %v5089_v40, %v17440_v61  ;;  %v13939_v61 = vld [vmem:[%s19251_s8 + $0x58] sm:$0xff] }
0x28eb   : > { %v6199_v47 = vpop.f32.mrf.mxu0 }
0x28ec   : > { %v6200_v48 = vadd.f32 %v13894_v46, %v6199_v47 }
0x28ed   : > { %v15437_v49 = vpop.f32.mrf.mxu0 }
0x28ee   : > { %15463 = vmatmul.mubr.msk.f32.vlgmr.msra.gmra.mxu1 %vm1002_vm7, %v6200_v48  ;;  %v5095_v48 = vsel %vm725_vm5, %v5092_v45, 0.0 }
0x28ef   : > { %15467 = vmatprep.mubr.msk.f32.mxu1 %vm16388_vm0, %v16387_v2 }
0x28f3   : > { %v6365_v52 = vpop.f32.mrf.mxu0 }
0x28f4   : > { %v6366_v53 = vadd.f32 %v13908_v51, %v6365_v52 }
0x28f5   : > { %v15459_v55 = vpop.f32.mrf.mxu0 }
0x28f6   : > { %15466 = vmatpush3.msra.mxu1 %v6366_v53  ;;  %v5099_v55 = vmul.f32 %v5092_v45, %v5092_v45 }
0x28f7   : > { %15475 = vmatprep.subr.mxu1 %v16387_v2 }
0x29ae   : > { %v6441_v56 = vpop.f32.mrf.mxu1 }
0x29af   : > { %v6445_v15 = vsel %vm17638_vm12, %v6441_v56, -1e+09  ;;  %v5100_v56 = vsel %vm725_vm5, %v5099_v55, 0.0  ;;  %v13961_v55 = vld [vmem:[%s19249_s6 + $0x598] sm:$0xff] }
0x29b0   : > { %v15464_v57 = vpop.f32.mrf.mxu1  ;;  %v6446_v58 = vsel %vm1002_vm7, %v6445_v15, -inf }
0x29b1   : > { %6447 = vmax.xlane.f32.xlu0 %v6446_v58 }
0x2a3a   : > { %v6448_v62 = vpop.xlane.xlu0 %6447 }
0x2a3b   : > { %v6449_v0 = vsub.f32 %v6445_v15, %v6448_v62 }
0x2a3d   : > { %v6450_v1 = vmul.f32 1.442695, %v6449_v0 }
0x2a3f   : > { %16253 = vpow2.f32 %v6450_v1 }
0x2a4c   : > { %v16254_v3 = vpop.eup %16253 }
0x2a4d   : > { %v6452_v63 = vsel %vm1002_vm7, %v16254_v3, 0.0 }
0x2a4e   : > { %6453 = vadd.xlane.f32.xlu1 %v6452_v63 }
0x2ad7   : > { %v6454_v4 = vpop.xlane.xlu1 %6453 }
0x2ad8   : > { %16255 = vrcp.f32 %v6454_v4 }
0x2ae5   : > { %v16256_v5 = vpop.eup %16255 }
0x2ae6   : > { %v6456_v6 = vmul.f32 %v16256_v5, %v16254_v3 }
0x2ae8   : > { %15468 = vmatmul.mubr.msk.f32.vlgmr.msra.gmra.mxu1 %vm1002_vm7, %v6456_v6  ;;  %v13835_v6 = vld [vmem:[%s19257_s14 + $0x8] sm:$0x3] }
0x2ae9   : > { %15476 = vmatpush3.msra.mxu1 %v13918_v9  ;;  %15483 = vmatprep.mubr.msk.f32.mxu1 %vm16388_vm0, %v16387_v2 }
0x2aea   : > { %15477 = vmatprep.subr.mxu1 %v16387_v2 }
0x2aeb   : > { %15478 = vmatpush3.msra.mxu1 %v13917_v11  ;;  %v5113_v11 = vrot.slane %v13835_v6, %v16623_v41 }
0x2aec   : > { %15479 = vmatprep.subr.mxu1 %v16387_v2 }
0x2aed   : > { %15480 = vmatpush3.msra.mxu1 %v13916_v12 }
0x2aee   : > { %15481 = vmatprep.subr.mxu1 %v16387_v2 }
0x2aef   : > { %15482 = vmatpush3.msra.mxu1 %v13915_v13  ;;  %v13954_v13 = vld [vmem:[%s19249_s6 + $0x518] sm:$0xff] }
0x2af0   : > { %15484 = vmatmul.mubr.msk.f32.vlgmr.msra.gmra.mxu1 %vm725_vm5, %v17521_v54  ;;  %15497 = vmatprep.subr.mxu1 %v16387_v2 }
0x2af1   : > { %15498 = vmatpush3.msra.mxu1 %v13932_v14  ;;  %15505 = vmatprep.mubr.msk.f32.mxu1 %vm16388_vm0, %v16387_v2 }
0x2af2   : > { %15499 = vmatprep.subr.mxu1 %v16387_v2 }
0x2af3   : > { %15500 = vmatpush3.msra.mxu1 %v13931_v16  ;;  %v13953_v16 = vld [vmem:[%s19249_s6 + $0x510] sm:$0xff] }
0x2af4   : > { %15501 = vmatprep.subr.mxu1 %v16387_v2 }
0x2af5   : > { %15502 = vmatpush3.msra.mxu1 %v13930_v17 }
0x2af6   : > { %15503 = vmatprep.subr.mxu1 %v16387_v2 }
0x2af7   : > { %15504 = vmatpush3.msra.mxu1 %v13929_v19  ;;  %v5118_v19 = vrot.slane %v13835_v6, %v16630_v43 }
0x2af8   : > { %15506 = vmatmul.mubr.msk.f32.vlgmr.msra.gmra.mxu1 %vm725_vm5, %v17521_v54  ;;  %15518 = vmatprep.subr.mxu1 %v16387_v2 }
0x2af9   : > { %15520 = vmatprep.mubr.msk.f32.mxu1 %vm16388_vm0, %v16387_v2  ;;  %15519 = vmatpush3.msra.mxu1 %v13939_v61  ;;  %v13959_v61 = vld [vmem:[%s19249_s6 + $0x588] sm:$0xff] }
0x2afa   : > { %15534 = vmatprep.subr.mxu1 %v16387_v2 }
0x2ba8   : > { %v6526_v21 = vpop.f32.mrf.mxu1 }
0x2ba9   : > { %15473 = vmatmul.mubr.msk.f32.vlgmr.msra.gmra.mxu0 %vm1002_vm7, %v6526_v21  ;;  %v13952_v21 = vld [vmem:[%s19249_s6 + $0x508] sm:$0xff] }
0x2baa   : > { %15487 = vmatpush3.msra.mxu0 %v13925_v20  ;;  %v15469_v50 = vpop.f32.mrf.mxu1  ;;  %15494 = vmatprep.mubr.msk.f32.mxu0 %vm16388_vm0, %v16387_v2 }
0x2bab   : > { %15488 = vmatprep.subr.mxu0 %v16387_v2 }
0x2bac   : > { %15489 = vmatpush3.msra.mxu0 %v13924_v22  ;;  %v13951_v22 = vld [vmem:[%s19249_s6 + $0x500] sm:$0xff] }
0x2bad   : > { %15490 = vmatprep.subr.mxu0 %v16387_v2 }
0x2bae   : > { %15491 = vmatpush3.msra.mxu0 %v13923_v24 }
0x2baf   : > { %15492 = vmatprep.subr.mxu0 %v16387_v2 }
0x2bb0   : > { %v6685_v26 = vpop.f32.mrf.mxu1  ;;  %15493 = vmatpush3.msra.mxu0 %v13922_v25  ;;  %v13942_v25 = vld [vmem:[%s19252_s9 + $0x2] ss:$0 sm:$0xff] }
0x2bb1   : > { %15495 = vmatmul.mubr.msk.f32.vlgmr.msra.gmra.mxu0 %vm725_vm5, %v17521_v54  ;;  %15508 = vmatprep.subr.mxu0 %v16387_v2  ;;  %v6686_v18 = vadd.f32 %v13920_v8, %v6685_v26 }
0x2bb2   : > { %v15485_v27 = vpop.f32.mrf.mxu1  ;;  %15510 = vmatprep.mubr.msk.f32.mxu0 %vm16388_vm0, %v16387_v2 }
0x2bb8   : > { %v6851_v28 = vpop.f32.mrf.mxu1 }
0x2bb9   : > { %v6852_v37 = vadd.f32 %v13934_v35, %v6851_v28  ;;  %v13945_v35 = vld [vmem:[%s19249_s6 + $0x488] sm:$0xff] }
0x2bba   : > { %v15507_v29 = vpop.f32.mrf.mxu1 }
0x2c69   : > { %v6601_v7 = vpop.f32.mrf.mxu0 }
0x2c6a   : > { %v17866_v33 = vadd.f32 %v6601_v7, %v6117_v31  ;;  %v13956_v31 = vld [vmem:[%s19250_s7 + $0x28] ss:$0 sm:$0xff] }
0x2c6b   : > { %v15474_v34 = vpop.f32.mrf.mxu0 }
0x2c71   : > { %v6768_v54 = vpop.f32.mrf.mxu0 }
0x2c72   : > { %v6769_v39 = vadd.f32 %v13927_v10, %v6768_v54 }
0x2c73   : > { %v15496_v36 = vpop.f32.mrf.mxu0 }
0x2c74   : > { %15509 = vmatpush3.xpose.msk.msra.mxu0 %vm1002_vm7, %v6769_v39  ;;  %v13946_v39 = vld [vmem:[%s19249_s6 + $0x490] sm:$0xff]  ;;  %v13944_v36 = vld [vmem:[%s19249_s6 + $0x480] sm:$0xff] }
0x2c75   : > { %15513 = vmatprep.subr.mxu0 %v16387_v2 }
0x2c77   : > { %15511 = vmatmul.mubr.msk.f32.vlgmr.msra.gmra.mxu0 %vm1002_vm7, %v6686_v18 }
0x2c78   : > { %15514 = vmatpush3.msra.mxu0 %v6852_v37  ;;  %15515 = vmatprep.mubr.msk.f32.mxu0 %vm16388_vm0, %v16387_v2 }
0x2c79   : > { %15523 = vmatprep.subr.mxu0 %v16387_v2 }
0x2d37   : > { %v6927_v42 = vpop.f32.mrf.mxu0 }
0x2d38   : > { %v6931_v44 = vsel %vm17638_vm12, %v6927_v42, -1e+09 }
0x2d39   : > { %v15512_v46 = vpop.f32.mrf.mxu0  ;;  %v6932_v47 = vsel %vm1002_vm7, %v6931_v44, -inf }
0x2d3a   : > { %6933 = vmax.xlane.f32.xlu0 %v6932_v47  ;;  %v13943_v46 = vld [vmem:[%s19257_s14 + $0xc] sm:$0x3] }
0x2d3e   : > { %5096 = vadd.xlane.f32.xlu0 %v5095_v48  ;;  %v7122_v48 = vrot.slane %v13943_v46, %v16623_v41 }
0x2dc3   : > { %v6934_v49 = vpop.xlane.xlu0 %6933 }
0x2dc4   : > { %v6935_v51 = vsub.f32 %v6931_v44, %v6934_v49 }
0x2dc6   : > { %v6936_v52 = vmul.f32 1.442695, %v6935_v51 }
0x2dc7   : > { %v5097_v62 = vpop.xlane.xlu0 %5096 }
0x2dc8   : > { %16257 = vpow2.f32 %v6936_v52  ;;  %v5098_v1 = vmul.f32 0.03125, %v5097_v62  ;;  %v7127_v52 = vrot.slane %v13943_v46, %v16630_v43  ;;  %v13970_v62 = vld [vmem:[%s19249_s6 + $0x4a8] sm:$0xff] }
0x2dca   : > { %v5104_v63 = vmul.f32 %v5098_v1, %v5098_v1  ;;  %v5108_v9 = vsub.f32 %v5092_v45, %v5098_v1  ;;  %v13986_v1 = vld [vmem:[%s19249_s6 + $0x5b8] sm:$0xff] }
0x2dd5   : > { %v16258_v53 = vpop.eup %16257 }
0x2dd6   : > { %v6938_v60 = vsel %vm1002_vm7, %v16258_v53, 0.0 }
0x2dd7   : > { %6939 = vadd.xlane.f32.xlu1 %v6938_v60 }
0x2ddb   : > { %5101 = vadd.xlane.f32.xlu1 %v5100_v56  ;;  %v13960_v56 = vld [vmem:[%s19249_s6 + $0x590] sm:$0xff] }
0x2e60   : > { %v6940_v15 = vpop.xlane.xlu1 %6939 }
0x2e61   : > { %16259 = vrcp.f32 %v6940_v15  ;;  %v13958_v15 = vld [vmem:[%s19249_s6 + $0x580] sm:$0xff] }
0x2e64   : > { %v5102_v0 = vpop.xlane.xlu1 %5101 }
0x2e65   : > { %v5103_v3 = vmul.f32 0.03125, %v5102_v0  ;;  %v13969_v0 = vld [vmem:[%s19249_s6 + $0x4a0] sm:$0xff] }
0x2e67   : > { %v5105_v32 = vsub.f32 %v5103_v3, %v5104_v63  ;;  %v13985_v3 = vld [vmem:[%s19249_s6 + $0x5b0] sm:$0xff]  ;;  %v13984_v63 = vld [vmem:[%s19249_s6 + $0x5a8] sm:$0xff] }
0x2e69   : > { %v5106_v4 = vadd.f32 1e-06, %v5105_v32  ;;  %v13983_v32 = vld [vmem:[%s19249_s6 + $0x5a0] sm:$0xff] }
0x2e6b   : > { %16261 = vrsqrt.f32 %v5106_v4  ;;  %v13949_v4 = vld [vmem:[%s19250_s7 + $0x24] ss:$0 sm:$0xff] }
0x2e6e   : > { %v16260_v57 = vpop.eup %16259 }
0x2e6f   : > { %v6942_v58 = vmul.f32 %v16260_v57, %v16258_v53  ;;  %v13972_v57 = vld [vmem:[%s19249_s6 + $0x4b8] sm:$0xff] }
0x2e71   : > { %15516 = vmatmul.mubr.msk.f32.vlgmr.msra.gmra.mxu0 %vm1002_vm7, %v6942_v58  ;;  %v13971_v58 = vld [vmem:[%s19249_s6 + $0x4b0] sm:$0xff] }
0x2e72   : > { %15531 = vmatprep.mubr.msk.f32.mxu0 %vm16388_vm0, %v16387_v2 }
0x2e78   : > { %v16262_v5 = vpop.eup %16261 }
0x2e79   : > { %v5109_v12 = vmul.f32 %v16262_v5, %v5108_v9 }
0x2e7b   : > { %v5114_v20 = vmul.f32 %v5113_v11, %v5109_v12  ;;  %v13963_v11 = vld [vmem:[%s19250_s7 + $0x2c] ss:$0 sm:$0xff] }
0x2e7d   : > { %v17923_v50 = vadd.f32 %v5118_v19, %v5114_v20 }
0x2f31   : > { %v7012_v14 = vpop.f32.mrf.mxu0 }
0x2f32   : > { %15521 = vmatmul.mubr.msk.f32.vlgmr.msra.gmra.mxu1 %vm1002_vm7, %v7012_v14 }
0x2f33   : > { %15535 = vmatpush3.msra.mxu1 %v13954_v13  ;;  %v15517_v17 = vpop.f32.mrf.mxu0  ;;  %15542 = vmatprep.mubr.msk.f32.mxu1 %vm16388_vm0, %v16387_v2 }
0x2f34   : > { %15536 = vmatprep.subr.mxu1 %v16387_v2 }
0x2f35   : > { %15537 = vmatpush3.msra.mxu1 %v13953_v16 }
0x2f36   : > { %15538 = vmatprep.subr.mxu1 %v16387_v2 }
0x2f37   : > { %15539 = vmatpush3.msra.mxu1 %v13952_v21 }
0x2f38   : > { %15540 = vmatprep.subr.mxu1 %v16387_v2 }
0x2f39   : > { %15541 = vmatpush3.msra.mxu1 %v13951_v22 }
0x2f3a   : > { %15543 = vmatmul.mubr.msk.f32.vlgmr.msra.gmra.mxu1 %vm725_vm5, %v17923_v50  ;;  %15556 = vmatprep.subr.mxu1 %v16387_v2 }
0x2f3b   : > { %15558 = vmatprep.mubr.msk.f32.mxu1 %vm16388_vm0, %v16387_v2 }
0x2ff2   : > { %v7087_v24 = vpop.f32.mrf.mxu1 }
0x2ff3   : > { %v7091_v26 = vadd.f32 %v7087_v24, %v17866_v33 }
0x2ff4   : > { %v15522_v27 = vpop.f32.mrf.mxu1 }
0x2ff5   : > { %v7100_v28 = vadd.f32 %v13942_v25, %v7091_v26 }
0x2ff7   : > { %v17936_v29 = vadd.f32 %v7100_v28, %v17437_v59  ;;  %v13947_v59 = vld [vmem:[%s19249_s6 + $0x498] sm:$0xff] }
0x2ff8   : > { %15524 = vmatpush3.msra.mxu0 %v13947_v59  ;;  %v13977_v59 = vld [vmem:[%s19249_s6 + $0x528] sm:$0xff] }
0x2ff9   : > { %v7104_v7 = vsel %vm725_vm5, %v17936_v29, 0.0  ;;  %v7108_v34 = vmul.f32 %v17936_v29, %v17936_v29  ;;  %15525 = vmatprep.subr.mxu0 %v16387_v2 }
0x2ffa   : > { %v7297_v10 = vpop.f32.mrf.mxu1  ;;  %7105 = vadd.xlane.f32.xlu0 %v7104_v7  ;;  %15526 = vmatpush3.msra.mxu0 %v13946_v39  ;;  %v13976_v39 = vld [vmem:[%s19249_s6 + $0x520] sm:$0xff] }
0x2ffb   : > { %v7298_v54 = vadd.f32 %v13956_v31, %v7297_v10  ;;  %v7109_v33 = vsel %vm725_vm5, %v7108_v34, 0.0  ;;  %15527 = vmatprep.subr.mxu0 %v16387_v2 }
0x2ffc   : > { %v15544_v8 = vpop.f32.mrf.mxu1  ;;  %7110 = vadd.xlane.f32.xlu1 %v7109_v33  ;;  %15528 = vmatpush3.msra.mxu0 %v13945_v35  ;;  %v13979_v33 = vld [vmem:[%s19249_s6 + $0x538] sm:$0xff] }
0x2ffd   : > { %15557 = vmatpush3.xpose.msk.msra.mxu1 %vm1002_vm7, %v7298_v54  ;;  %15529 = vmatprep.subr.mxu0 %v16387_v2  ;;  %v13978_v8 = vld [vmem:[%s19249_s6 + $0x530] sm:$0xff] }
0x2ffe   : > { %15561 = vmatprep.subr.mxu1 %v16387_v2  ;;  %15530 = vmatpush3.msra.mxu0 %v13944_v36 }
0x2fff   : > { %15545 = vmatprep.subr.mxu0 %v16387_v2 }
0x3083   : > { %v7106_v18 = vpop.xlane.xlu0 %7105 }
0x3084   : > { %v7107_v37 = vmul.f32 0.03125, %v7106_v18  ;;  %v13981_v18 = vld [vmem:[%s19250_s7 + $0x29] ss:$0 sm:$0xff] }
0x3085   : > { %v7111_v38 = vpop.xlane.xlu1 %7110 }
0x3086   : > { %v7113_v40 = vmul.f32 %v7107_v37, %v7107_v37  ;;  %v7112_v42 = vmul.f32 0.03125, %v7111_v38  ;;  %v7117_v47 = vsub.f32 %v17936_v29, %v7107_v37  ;;  %v13974_v38 = vld [vmem:[%s19250_s7 + $0x25] ss:$0 sm:$0xff] }
0x3088   : > { %v7114_v44 = vsub.f32 %v7112_v42, %v7113_v40  ;;  %v13988_v42 = vld [vmem:[%s19250_s7 + $0x2d] ss:$0 sm:$0xff] }
0x308a   : > { %v7115_v45 = vadd.f32 1e-06, %v7114_v44 }
0x308c   : > { %16263 = vrsqrt.f32 %v7115_v45 }
0x3099   : > { %v16264_v49 = vpop.eup %16263 }
0x309a   : > { %v7118_v51 = vmul.f32 %v16264_v49, %v7117_v47 }
0x309c   : > { %v7123_v53 = vmul.f32 %v7122_v48, %v7118_v51 }
0x309e   : > { %v17970_v60 = vadd.f32 %v7127_v52, %v7123_v53 }
0x30a0   : > { %15532 = vmatmul.mubr.msk.f32.vlgmr.msra.gmra.mxu0 %vm725_vm5, %v17970_v60 }
0x30a1   : > { %15546 = vmatpush3.msra.mxu0 %v13961_v55  ;;  %15553 = vmatprep.mubr.msk.f32.mxu0 %vm16388_vm0, %v16387_v2 }
0x30a2   : > { %15547 = vmatprep.subr.mxu0 %v16387_v2 }
0x30a3   : > { %15548 = vmatpush3.msra.mxu0 %v13960_v56 }
0x30a4   : > { %15549 = vmatprep.subr.mxu0 %v16387_v2 }
0x30a5   : > { %15550 = vmatpush3.msra.mxu0 %v13959_v61 }
0x30a6   : > { %15551 = vmatprep.subr.mxu0 %v16387_v2 }
0x30a7   : > { %15552 = vmatpush3.msra.mxu0 %v13958_v15  ;;  %v13993_v15 = vld [vmem:[%s19251_s8 + $0x68] sm:$0xff] }
0x30a8   : > { %15554 = vmatmul.mubr.msk.f32.vlgmr.msra.gmra.mxu0 %vm725_vm5, %v17923_v50  ;;  %15566 = vmatprep.subr.mxu0 %v16387_v2 }
0x30a9   : > { %15567 = vmatpush3.msra.mxu0 %v13972_v57  ;;  %15574 = vmatprep.mubr.msk.f32.mxu0 %vm16388_vm0, %v16387_v2 }
0x30aa   : > { %15568 = vmatprep.subr.mxu0 %v16387_v2 }
0x30ab   : > { %15569 = vmatpush3.msra.mxu0 %v13971_v58 }
0x30ac   : > { %15570 = vmatprep.subr.mxu0 %v16387_v2 }
0x30ad   : > { %15571 = vmatpush3.msra.mxu0 %v13970_v62 }
0x30ae   : > { %15572 = vmatprep.subr.mxu0 %v16387_v2 }
0x30af   : > { %15573 = vmatpush3.msra.mxu0 %v13969_v0  ;;  %v13968_v0 = vld [vmem:[%s19251_s8 + $0x60] sm:$0xff] }
0x30b0   : > { %15575 = vmatmul.mubr.msk.f32.vlgmr.msra.gmra.mxu0 %vm725_vm5, %v17970_v60  ;;  %15588 = vmatprep.subr.mxu0 %v16387_v2 }
0x30b1   : > { %15589 = vmatpush3.msra.mxu0 %v13986_v1  ;;  %15596 = vmatprep.mubr.msk.f32.mxu0 %vm16388_vm0, %v16387_v2  ;;  %v14006_v1 = vld [vmem:[%s19249_s6 + $0x558] sm:$0xff] }
0x30b2   : > { %15590 = vmatprep.subr.mxu0 %v16387_v2 }
0x30b3   : > { %15591 = vmatpush3.msra.mxu0 %v13985_v3  ;;  %v14005_v3 = vld [vmem:[%s19249_s6 + $0x550] sm:$0xff] }
0x30b4   : > { %15592 = vmatprep.subr.mxu0 %v16387_v2 }
0x30b5   : > { %15593 = vmatpush3.msra.mxu0 %v13984_v63  ;;  %v14004_v63 = vld [vmem:[%s19249_s6 + $0x548] sm:$0xff] }
0x30b6   : > { %15594 = vmatprep.subr.mxu0 %v16387_v2 }
0x30b7   : > { %15595 = vmatpush3.msra.mxu0 %v13983_v32  ;;  %v14003_v32 = vld [vmem:[%s19249_s6 + $0x540] sm:$0xff] }
0x30b8   : > { %15597 = vmatmul.mubr.msk.f32.vlgmr.msra.gmra.mxu0 %vm725_vm5, %v17923_v50  ;;  %15609 = vmatprep.subr.mxu0 %v16387_v2 }
0x30b9   : > { %15611 = vmatprep.mubr.msk.f32.mxu0 %vm16388_vm0, %v16387_v2  ;;  %15610 = vmatpush3.msra.mxu0 %v13993_v15 }
0x30ba   : > { %15619 = vmatprep.subr.mxu0 %v16387_v2 }
0x3160   : > { %v7211_v5 = vpop.f32.mrf.mxu0 }
0x3161   : > { %v7212_v6 = vadd.f32 %v13949_v4, %v7211_v5  ;;  %v13999_v4 = vld [vmem:[%s19249_s6 + $0x4d8] sm:$0xff] }
0x3162   : > { %v15533_v9 = vpop.f32.mrf.mxu0 }
0x3163   : > { %15559 = vmatmul.mubr.msk.f32.vlgmr.msra.gmra.mxu1 %vm1002_vm7, %v7212_v6  ;;  %v13998_v6 = vld [vmem:[%s19249_s6 + $0x4d0] sm:$0xff] }
0x3164   : > { %15563 = vmatprep.mubr.msk.f32.mxu1 %vm16388_vm0, %v16387_v2 }
0x3168   : > { %v7380_v12 = vpop.f32.mrf.mxu0 }
0x3169   : > { %v7381_v13 = vadd.f32 %v13963_v11, %v7380_v12  ;;  %v13997_v11 = vld [vmem:[%s19249_s6 + $0x4c8] sm:$0xff] }
0x316a   : > { %v15555_v14 = vpop.f32.mrf.mxu0 }
0x316b   : > { %15562 = vmatpush3.msra.mxu1 %v7381_v13  ;;  %v13996_v13 = vld [vmem:[%s19249_s6 + $0x4c0] sm:$0xff] }
0x316c   : > { %15577 = vmatprep.subr.mxu1 %v16387_v2 }
0x3170   : > { %v7626_v16 = vpop.f32.mrf.mxu0 }
0x3171   : > { %v7627_v45 = vadd.f32 %v13974_v38, %v7626_v16  ;;  %v14013_v16 = vld [vmem:[%s19249_s6 + $0x5d8] sm:$0xff] }
0x3172   : > { %v15576_v17 = vpop.f32.mrf.mxu0 }
0x3173   : > { %v14012_v17 = vld [vmem:[%s19249_s6 + $0x5d0] sm:$0xff] }
0x3178   : > { %v7792_v19 = vpop.f32.mrf.mxu0 }
0x3179   : > { %v7793_v46 = vadd.f32 %v13988_v42, %v7792_v19  ;;  %v14008_v19 = vld [vmem:[%s19250_s7 + $0x2a] ss:$0 sm:$0xff] }
0x317a   : > { %v15598_v20 = vpop.f32.mrf.mxu0 }
0x317b   : > { %v14011_v20 = vld [vmem:[%s19249_s6 + $0x5c8] sm:$0xff] }
0x3223   : > { %v7456_v21 = vpop.f32.mrf.mxu1 }
0x3224   : > { %v7460_v22 = vsel %vm16724_vm8, %v7456_v21, -1e+09 }
0x3225   : > { %v15560_v24 = vpop.f32.mrf.mxu1  ;;  %v7461_v25 = vsel %vm1002_vm7, %v7460_v22, -inf }
0x3226   : > { %7462 = vmax.xlane.f32.xlu0 %v7461_v25  ;;  %v14010_v24 = vld [vmem:[%s19249_s6 + $0x5c0] sm:$0xff] }
0x32af   : > { %v7463_v26 = vpop.xlane.xlu0 %7462 }
0x32b0   : > { %v7464_v27 = vsub.f32 %v7460_v22, %v7463_v26 }
0x32b2   : > { %v7465_v28 = vmul.f32 1.442695, %v7464_v27 }
0x32b4   : > { %16265 = vpow2.f32 %v7465_v28  ;;  %v14001_v28 = vld [vmem:[%s19250_s7 + $0x26] ss:$0 sm:$0xff] }
0x32c1   : > { %v16266_v31 = vpop.eup %16265 }
0x32c2   : > { %v7467_v7 = vsel %vm1002_vm7, %v16266_v31, 0.0 }
0x32c3   : > { %7468 = vadd.xlane.f32.xlu1 %v7467_v7 }
0x334c   : > { %v7469_v34 = vpop.xlane.xlu1 %7468 }
0x334d   : > { %16267 = vrcp.f32 %v7469_v34 }
0x335a   : > { %v16268_v10 = vpop.eup %16267 }
0x335b   : > { %v7471_v54 = vmul.f32 %v16268_v10, %v16266_v31  ;;  %v14015_v10 = vld [vmem:[%s19250_s7 + $0x2e] ss:$0 sm:$0xff] }
0x335d   : > { %15564 = vmatmul.mubr.msk.f32.vlgmr.msra.gmra.mxu1 %vm1002_vm7, %v7471_v54 }
0x335e   : > { %15578 = vmatpush3.msra.mxu1 %v13979_v33  ;;  %15585 = vmatprep.mubr.msk.f32.mxu1 %vm16388_vm0, %v16387_v2 }
0x335f   : > { %15579 = vmatprep.subr.mxu1 %v16387_v2 }
0x3360   : > { %15580 = vmatpush3.msra.mxu1 %v13978_v8 }
0x3361   : > { %15581 = vmatprep.subr.mxu1 %v16387_v2 }
0x3362   : > { %15582 = vmatpush3.msra.mxu1 %v13977_v59 }
0x3363   : > { %15583 = vmatprep.subr.mxu1 %v16387_v2 }
0x3364   : > { %15584 = vmatpush3.msra.mxu1 %v13976_v39 }
0x3365   : > { %15586 = vmatmul.mubr.msk.f32.vlgmr.msra.gmra.mxu1 %vm725_vm5, %v17923_v50  ;;  %15599 = vmatprep.subr.mxu1 %v16387_v2 }
0x3366   : > { %15601 = vmatprep.mubr.msk.f32.mxu1 %vm16388_vm0, %v16387_v2 }
0x341d   : > { %v7541_v35 = vpop.f32.mrf.mxu1 }
0x341f   : > { %v15565_v36 = vpop.f32.mrf.mxu1 }
0x3425   : > { %v7709_v37 = vpop.f32.mrf.mxu1 }
0x3426   : > { %v7710_v40 = vadd.f32 %v13981_v18, %v7709_v37 }
0x3427   : > { %v15587_v44 = vpop.f32.mrf.mxu1 }
0x3428   : > { %15600 = vmatpush3.xpose.msk.msra.mxu1 %vm1002_vm7, %v7710_v40  ;;  %v14020_v44 = vld [vmem:[%s19251_s8 + $0x70] sm:$0xff] }
0x3429   : > { %15604 = vmatprep.subr.mxu1 %v16387_v2 }
0x342b   : > { %15602 = vmatmul.mubr.msk.f32.vlgmr.msra.gmra.mxu1 %vm1002_vm7, %v7627_v45 }
0x342c   : > { %15605 = vmatpush3.msra.mxu1 %v7793_v46  ;;  %15606 = vmatprep.mubr.msk.f32.mxu1 %vm16388_vm0, %v16387_v2 }
0x342d   : > { %15614 = vmatprep.subr.mxu1 %v16387_v2 }
0x34eb   : > { %v7868_v47 = vpop.f32.mrf.mxu1 }
0x34ec   : > { %v7872_v48 = vsel %vm16724_vm8, %v7868_v47, -1e+09 }
0x34ed   : > { %v15603_v49 = vpop.f32.mrf.mxu1  ;;  %v7873_v51 = vsel %vm1002_vm7, %v7872_v48, -inf }
0x34ee   : > { %7874 = vmax.xlane.f32.xlu0 %v7873_v51  ;;  %v14024_v49 = vld [vmem:[%s19249_s6 + $0x4f0] sm:$0xff]  ;;  %v14023_v51 = vld [vmem:[%s19249_s6 + $0x4e8] sm:$0xff] }
0x3577   : > { %v7875_v52 = vpop.xlane.xlu0 %7874 }
0x3578   : > { %v7876_v53 = vsub.f32 %v7872_v48, %v7875_v52  ;;  %v14025_v48 = vld [vmem:[%s19249_s6 + $0x4f8] sm:$0xff]  ;;  %v14022_v52 = vld [vmem:[%s19249_s6 + $0x4e0] sm:$0xff] }
0x357a   : > { %v7877_v55 = vmul.f32 1.442695, %v7876_v53  ;;  %v14039_v53 = vld [vmem:[%s19249_s6 + $0x5f8] sm:$0xff] }
0x357c   : > { %16269 = vpow2.f32 %v7877_v55  ;;  %v14038_v55 = vld [vmem:[%s19249_s6 + $0x5f0] sm:$0xff] }
0x3589   : > { %v16270_v56 = vpop.eup %16269 }
0x358a   : > { %v7879_v61 = vsel %vm1002_vm7, %v16270_v56, 0.0 }
0x358b   : > { %7880 = vadd.xlane.f32.xlu1 %v7879_v61  ;;  %v14032_v61 = vld [vmem:[%s19249_s6 + $0x578] sm:$0xff] }
0x3614   : > { %v7881_v57 = vpop.xlane.xlu1 %7880 }
0x3615   : > { %16271 = vrcp.f32 %v7881_v57  ;;  %v14031_v57 = vld [vmem:[%s19249_s6 + $0x570] sm:$0xff] }
0x3622   : > { %v16272_v58 = vpop.eup %16271 }
0x3623   : > { %v7883_v62 = vmul.f32 %v16272_v58, %v16270_v56  ;;  %v14037_v56 = vld [vmem:[%s19249_s6 + $0x5e8] sm:$0xff] }
0x3625   : > { %15607 = vmatmul.mubr.msk.f32.vlgmr.msra.gmra.mxu1 %vm1002_vm7, %v7883_v62  ;;  %v14030_v62 = vld [vmem:[%s19249_s6 + $0x568] sm:$0xff] }
0x3626   : > { %15615 = vmatpush3.msra.mxu1 %v13968_v0  ;;  %15616 = vmatprep.mubr.msk.f32.mxu1 %vm16388_vm0, %v16387_v2  ;;  %v14029_v0 = vld [vmem:[%s19249_s6 + $0x560] sm:$0xff] }
0x3627   : > { %15630 = vmatprep.subr.mxu1 %v16387_v2 }
0x3629   : > { %15617 = vmatmul.mubr.msk.f32.vlgmr.msra.gmra.mxu1 %vm1002_vm7, %v7541_v35 }
0x362a   : > { %15631 = vmatpush3.msra.mxu1 %v14006_v1  ;;  %15638 = vmatprep.mubr.msk.f32.mxu1 %vm16388_vm0, %v16387_v2 }
0x362b   : > { %15632 = vmatprep.subr.mxu1 %v16387_v2 }
0x362c   : > { %15633 = vmatpush3.msra.mxu1 %v14005_v3 }
0x362d   : > { %15634 = vmatprep.subr.mxu1 %v16387_v2 }
0x362e   : > { %15635 = vmatpush3.msra.mxu1 %v14004_v63 }
0x362f   : > { %15636 = vmatprep.subr.mxu1 %v16387_v2 }
0x3630   : > { %15637 = vmatpush3.msra.mxu1 %v14003_v32 }
0x3631   : > { %15639 = vmatmul.mubr.msk.f32.vlgmr.msra.gmra.mxu1 %vm725_vm5, %v17923_v50  ;;  %15652 = vmatprep.subr.mxu1 %v16387_v2 }
0x3632   : > { %15654 = vmatprep.mubr.msk.f32.mxu1 %vm16388_vm0, %v16387_v2 }
0x36e5   : > { %v7953_v5 = vpop.f32.mrf.mxu1 }
0x36e6   : > { %15612 = vmatmul.mubr.msk.f32.vlgmr.msra.gmra.mxu0 %vm1002_vm7, %v7953_v5 }
0x36e7   : > { %15620 = vmatpush3.msra.mxu0 %v13999_v4  ;;  %v15608_v9 = vpop.f32.mrf.mxu1  ;;  %15627 = vmatprep.mubr.msk.f32.mxu0 %vm16388_vm0, %v16387_v2 }
0x36e8   : > { %15621 = vmatprep.subr.mxu0 %v16387_v2 }
0x36e9   : > { %15622 = vmatpush3.msra.mxu0 %v13998_v6  ;;  %v18139_v12 = vpop.f32.mrf.mxu1 }
0x36ea   : > { %15623 = vmatprep.subr.mxu0 %v16387_v2 }
0x36eb   : > { %15624 = vmatpush3.msra.mxu0 %v13997_v11  ;;  %v15618_v14 = vpop.f32.mrf.mxu1  ;;  %v14034_v11 = vld [vmem:[%s19250_s7 + $0x2b] ss:$0 sm:$0xff] }
0x36ec   : > { %15625 = vmatprep.subr.mxu0 %v16387_v2  ;;  %v14027_v14 = vld [vmem:[%s19250_s7 + $0x27] ss:$0 sm:$0xff] }
0x36ed   : > { %15626 = vmatpush3.msra.mxu0 %v13996_v13 }
0x36ee   : > { %15628 = vmatmul.mubr.msk.f32.vlgmr.msra.gmra.mxu0 %vm725_vm5, %v17970_v60  ;;  %15641 = vmatprep.subr.mxu0 %v16387_v2 }
0x36ef   : > { %15642 = vmatpush3.msra.mxu0 %v14013_v16  ;;  %15649 = vmatprep.mubr.msk.f32.mxu0 %vm16388_vm0, %v16387_v2 }
0x36f0   : > { %15643 = vmatprep.subr.mxu0 %v16387_v2 }
0x36f1   : > { %v8267_v21 = vpop.f32.mrf.mxu1  ;;  %15644 = vmatpush3.msra.mxu0 %v14012_v17  ;;  %v14041_v17 = vld [vmem:[%s19250_s7 + $0x2f] ss:$0 sm:$0xff] }
0x36f2   : > { %v8268_v22 = vadd.f32 %v14008_v19, %v8267_v21  ;;  %15645 = vmatprep.subr.mxu0 %v16387_v2 }
0x36f3   : > { %v15640_v25 = vpop.f32.mrf.mxu1  ;;  %15646 = vmatpush3.msra.mxu0 %v14011_v20 }
0x36f4   : > { %15647 = vmatprep.subr.mxu0 %v16387_v2  ;;  %15653 = vmatpush3.xpose.msk.msra.mxu1 %vm1002_vm7, %v8268_v22 }
0x36f5   : > { %15648 = vmatpush3.msra.mxu0 %v14010_v24  ;;  %15657 = vmatprep.subr.mxu1 %v16387_v2 }
0x36f6   : > { %15650 = vmatmul.mubr.msk.f32.vlgmr.msra.gmra.mxu0 %vm725_vm5, %v17923_v50  ;;  %15662 = vmatprep.subr.mxu0 %v16387_v2 }
0x36f7   : > { %15664 = vmatprep.mubr.msk.f32.mxu0 %vm16388_vm0, %v16387_v2  ;;  %15663 = vmatpush3.msra.mxu0 %v14020_v44 }
0x36f8   : > { %15678 = vmatprep.subr.mxu0 %v16387_v2 }
0x37a6   : > { %v18176_v26 = vpop.f32.mrf.mxu0 }
0x37a7   : > { %v8102_v4 = vadd.f32 %v18139_v12, %v18176_v26 }
0x37a8   : > { %v15613_v27 = vpop.f32.mrf.mxu0 }
0x37ae   : > { %v8184_v31 = vpop.f32.mrf.mxu0 }
0x37af   : > { %v8185_v7 = vadd.f32 %v14001_v28, %v8184_v31 }
0x37b0   : > { %v15629_v34 = vpop.f32.mrf.mxu0 }
0x37b1   : > { %15655 = vmatmul.mubr.msk.f32.vlgmr.msra.gmra.mxu1 %vm1002_vm7, %v8185_v7  ;;  %v14046_v34 = vld [vmem:[%s19251_s8 + $0x78] sm:$0xff] }
0x37b2   : > { %15659 = vmatprep.mubr.msk.f32.mxu1 %vm16388_vm0, %v16387_v2 }
0x37b6   : > { %v8350_v54 = vpop.f32.mrf.mxu0 }
0x37b7   : > { %v8351_v33 = vadd.f32 %v14015_v10, %v8350_v54 }
0x37b8   : > { %v15651_v8 = vpop.f32.mrf.mxu0 }
0x37b9   : > { %15658 = vmatpush3.msra.mxu1 %v8351_v33 }
0x37ba   : > { %15667 = vmatprep.subr.mxu1 %v16387_v2 }
0x3871   : > { %v8426_v59 = vpop.f32.mrf.mxu1 }
0x3872   : > { %v8430_v39 = vsel %vm16724_vm8, %v8426_v59, -1e+09 }
0x3873   : > { %v15656_v35 = vpop.f32.mrf.mxu1  ;;  %v8431_v36 = vsel %vm1002_vm7, %v8430_v39, -inf }
0x3874   : > { %8432 = vmax.xlane.f32.xlu0 %v8431_v36  ;;  %v14049_v35 = vld [vmem:[%s19252_s9 + $0x3] ss:$0 sm:$0xff] }
0x38fd   : > { %v8433_v18 = vpop.xlane.xlu0 %8432 }
0x38fe   : > { %v8434_v37 = vsub.f32 %v8430_v39, %v8433_v18 }
0x3900   : > { %v8435_v38 = vmul.f32 1.442695, %v8434_v37 }
0x3902   : > { %16273 = vpow2.f32 %v8435_v38 }
0x390f   : > { %v16274_v40 = vpop.eup %16273 }
0x3910   : > { %v8437_v42 = vsel %vm1002_vm7, %v16274_v40, 0.0 }
0x3911   : > { %8438 = vadd.xlane.f32.xlu1 %v8437_v42 }
0x399a   : > { %v8439_v45 = vpop.xlane.xlu1 %8438 }
0x399b   : > { %16275 = vrcp.f32 %v8439_v45  ;;  %v14054_v45 = vld [vmem:[%s19253_s10 + $0x58] sm:$0xff] }
0x39a8   : > { %v16276_v46 = vpop.eup %16275 }
0x39a9   : > { %v8441_v47 = vmul.f32 %v16276_v46, %v16274_v40  ;;  %v14053_v46 = vld [vmem:[%s19253_s10 + $0x50] sm:$0xff] }
0x39ab   : > { %15660 = vmatmul.mubr.msk.f32.vlgmr.msra.gmra.mxu1 %vm1002_vm7, %v8441_v47  ;;  %v14051_v47 = vld [vmem:[%s19253_s10 + $0x40] sm:$0xff] }
0x39ac   : > { %15668 = vmatpush3.msra.mxu1 %v14025_v48  ;;  %15675 = vmatprep.mubr.msk.f32.mxu1 %vm16388_vm0, %v16387_v2  ;;  %v14065_v48 = vld [vmem:[%s19255_s12 + $0xb8] sm:$0xff] }
0x39ad   : > { %15669 = vmatprep.subr.mxu1 %v16387_v2 }
0x39ae   : > { %15670 = vmatpush3.msra.mxu1 %v14024_v49  ;;  %v14064_v49 = vld [vmem:[%s19255_s12 + $0xb0] sm:$0xff] }
0x39af   : > { %15671 = vmatprep.subr.mxu1 %v16387_v2 }
0x39b0   : > { %15672 = vmatpush3.msra.mxu1 %v14023_v51  ;;  %v14063_v51 = vld [vmem:[%s19255_s12 + $0xa8] sm:$0xff] }
0x39b1   : > { %15673 = vmatprep.subr.mxu1 %v16387_v2 }
0x39b2   : > { %15674 = vmatpush3.msra.mxu1 %v14022_v52  ;;  %v14062_v52 = vld [vmem:[%s19255_s12 + $0xa0] sm:$0xff] }
0x39b3   : > { %15676 = vmatmul.mubr.msk.f32.vlgmr.msra.gmra.mxu1 %vm725_vm5, %v17970_v60  ;;  %15689 = vmatprep.subr.mxu1 %v16387_v2  ;;  %v14036_v60 = vld [vmem:[%s19249_s6 + $0x5e0] sm:$0xff] }
0x39b4   : > { %15690 = vmatpush3.msra.mxu1 %v14039_v53  ;;  %15697 = vmatprep.mubr.msk.f32.mxu1 %vm16388_vm0, %v16387_v2  ;;  %v14061_v53 = vld [vmem:[%s19255_s12 + $0x98] sm:$0xff] }
0x39b5   : > { %15691 = vmatprep.subr.mxu1 %v16387_v2 }
0x39b6   : > { %15692 = vmatpush3.msra.mxu1 %v14038_v55 }
0x39b7   : > { %15693 = vmatprep.subr.mxu1 %v16387_v2 }
0x39b8   : > { %15694 = vmatpush3.msra.mxu1 %v14037_v56 }
0x39b9   : > { %15695 = vmatprep.subr.mxu1 %v16387_v2 }
0x39ba   : > { %15696 = vmatpush3.msra.mxu1 %v14036_v60 }
0x39bb   : > { %15698 = vmatmul.mubr.msk.f32.vlgmr.msra.gmra.mxu1 %vm725_vm5, %v17923_v50  ;;  %15710 = vmatprep.subr.mxu1 %v16387_v2 }
0x39bc   : > { %15712 = vmatprep.mubr.msk.f32.mxu1 %vm16388_vm0, %v16387_v2  ;;  %15711 = vmatpush3.msra.mxu1 %v14046_v34  ;;  %v14086_v34 = vld [vmem:[%s19249_s6 + $0x710] sm:$0xff] }
0x39bd   : > { %15726 = vmatprep.subr.mxu1 %v16387_v2 }
0x3a6b   : > { %v8511_v15 = vpop.f32.mrf.mxu1 }
0x3a6c   : > { %15665 = vmatmul.mubr.msk.f32.vlgmr.msra.gmra.mxu0 %vm1002_vm7, %v8511_v15 }
0x3a6d   : > { %15679 = vmatpush3.msra.mxu0 %v14032_v61  ;;  %v15661_v58 = vpop.f32.mrf.mxu1  ;;  %15686 = vmatprep.mubr.msk.f32.mxu0 %vm16388_vm0, %v16387_v2 }
0x3a6e   : > { %15680 = vmatprep.subr.mxu0 %v16387_v2 }
0x3a6f   : > { %15681 = vmatpush3.msra.mxu0 %v14031_v57 }
0x3a70   : > { %15682 = vmatprep.subr.mxu0 %v16387_v2 }
0x3a71   : > { %15683 = vmatpush3.msra.mxu0 %v14030_v62  ;;  %v14050_v62 = vld [vmem:[%s19257_s14 + $0xe] sm:$0x3] }
0x3a72   : > { %15684 = vmatprep.subr.mxu0 %v16387_v2 }
0x3a73   : > { %v8670_v1 = vpop.f32.mrf.mxu1  ;;  %15685 = vmatpush3.msra.mxu0 %v14029_v0 }
0x3a74   : > { %15687 = vmatmul.mubr.msk.f32.vlgmr.msra.gmra.mxu0 %vm725_vm5, %v17923_v50  ;;  %15700 = vmatprep.subr.mxu0 %v16387_v2  ;;  %v8671_v12 = vadd.f32 %v14027_v14, %v8670_v1  ;;  %v9107_v1 = vrot.slane %v14050_v62, %v16623_v41 }
0x3a75   : > { %v15677_v3 = vpop.f32.mrf.mxu1  ;;  %15702 = vmatprep.mubr.msk.f32.mxu0 %vm16388_vm0, %v16387_v2 }
0x3a7b   : > { %v8836_v63 = vpop.f32.mrf.mxu1 }
0x3a7c   : > { %v8837_v20 = vadd.f32 %v14041_v17, %v8836_v63 }
0x3a7d   : > { %v15699_v32 = vpop.f32.mrf.mxu1 }
0x3a7e   : > { %v9112_v32 = vrot.slane %v14050_v62, %v16630_v43 }
0x3b2c   : > { %v8586_v5 = vpop.f32.mrf.mxu0 }
0x3b2d   : > { %v8590_v6 = vadd.f32 %v8586_v5, %v8102_v4 }
0x3b2e   : > { %v15666_v9 = vpop.f32.mrf.mxu0 }
0x3b2f   : > { %v14059_v9 = vld [vmem:[%s19255_s12 + $0x88] sm:$0xff] }
0x3b34   : > { %v8753_v13 = vpop.f32.mrf.mxu0 }
0x3b35   : > { %v8754_v16 = vadd.f32 %v14034_v11, %v8753_v13  ;;  %v14058_v11 = vld [vmem:[%s19255_s12 + $0x80] sm:$0xff] }
0x3b36   : > { %v15688_v19 = vpop.f32.mrf.mxu0  ;;  %v14056_v13 = vld [vmem:[%s19254_s11 + $0x2] ss:$0 sm:$0xff] }
0x3b37   : > { %15701 = vmatpush3.xpose.msk.msra.mxu0 %vm1002_vm7, %v8754_v16 }
0x3b38   : > { %15705 = vmatprep.subr.mxu0 %v16387_v2 }
0x3b3a   : > { %15703 = vmatmul.mubr.msk.f32.vlgmr.msra.gmra.mxu0 %vm1002_vm7, %v8671_v12  ;;  %v14067_v12 = vld [vmem:[%s19256_s13 + $0x2] ss:$0 sm:$0xff] }
0x3b3b   : > { %15706 = vmatpush3.msra.mxu0 %v8837_v20  ;;  %15707 = vmatprep.mubr.msk.f32.mxu0 %vm16388_vm0, %v16387_v2 }
0x3b3c   : > { %15715 = vmatprep.subr.mxu0 %v16387_v2 }
0x3bfa   : > { %v8912_v21 = vpop.f32.mrf.mxu0 }
0x3bfb   : > { %v8916_v22 = vsel %vm16724_vm8, %v8912_v21, -1e+09 }
0x3bfc   : > { %v15704_v24 = vpop.f32.mrf.mxu0  ;;  %v8917_v25 = vsel %vm1002_vm7, %v8916_v22, -inf }
0x3bfd   : > { %8918 = vmax.xlane.f32.xlu0 %v8917_v25 }
0x3c86   : > { %v8919_v26 = vpop.xlane.xlu0 %8918 }
0x3c87   : > { %v8920_v27 = vsub.f32 %v8916_v22, %v8919_v26 }
0x3c89   : > { %v8921_v28 = vmul.f32 1.442695, %v8920_v27 }
0x3c8b   : > { %16277 = vpow2.f32 %v8921_v28  ;;  %v14073_v28 = vld [vmem:[%s19249_s6 + $0x618] sm:$0xff] }
0x3c98   : > { %v16278_v31 = vpop.eup %16277 }
0x3c99   : > { %v8923_v7 = vsel %vm1002_vm7, %v16278_v31, 0.0 }
0x3c9a   : > { %8924 = vadd.xlane.f32.xlu1 %v8923_v7  ;;  %v14072_v7 = vld [vmem:[%s19249_s6 + $0x610] sm:$0xff] }
0x3d23   : > { %v8925_v10 = vpop.xlane.xlu1 %8924 }
0x3d24   : > { %16279 = vrcp.f32 %v8925_v10  ;;  %v14071_v10 = vld [vmem:[%s19249_s6 + $0x608] sm:$0xff] }
0x3d31   : > { %v16280_v54 = vpop.eup %16279 }
0x3d32   : > { %v8927_v33 = vmul.f32 %v16280_v54, %v16278_v31  ;;  %v14087_v31 = vld [vmem:[%s19249_s6 + $0x718] sm:$0xff]  ;;  %v14085_v54 = vld [vmem:[%s19249_s6 + $0x708] sm:$0xff] }
0x3d34   : > { %15708 = vmatmul.mubr.msk.f32.vlgmr.msra.gmra.mxu0 %vm1002_vm7, %v8927_v33  ;;  %v14070_v33 = vld [vmem:[%s19249_s6 + $0x600] sm:$0xff] }
0x3d35   : > { %15723 = vmatprep.mubr.msk.f32.mxu0 %vm16388_vm0, %v16387_v2  ;;  %15716 = vmatpush3.msra.mxu0 %v14054_v45 }
0x3d36   : > { %15717 = vmatprep.subr.mxu0 %v16387_v2 }
0x3d37   : > { %15718 = vmatpush3.msra.mxu0 %v14053_v46 }
0x3d38   : > { %15719 = vmatprep.subr.mxu0 %v16387_v2 }
0x3df4   : > { %v8997_v8 = vpop.f32.mrf.mxu0 }
0x3df5   : > { %15713 = vmatmul.mubr.msk.f32.vlgmr.msra.gmra.mxu1 %vm1002_vm7, %v8997_v8  ;;  %v14084_v8 = vld [vmem:[%s19249_s6 + $0x700] sm:$0xff] }
0x3df6   : > { %v15709_v59 = vpop.f32.mrf.mxu0  ;;  %15742 = vmatprep.mubr.msk.f32.mxu1 %vm16388_vm0, %v16387_v2  ;;  %15727 = vmatpush3.msra.mxu1 %v14065_v48 }
0x3df7   : > { %15728 = vmatprep.subr.mxu1 %v16387_v2 }
0x3df8   : > { %15729 = vmatpush3.msra.mxu1 %v14064_v49  ;;  %v14080_v49 = vld [vmem:[%s19249_s6 + $0x698] sm:$0xff] }
0x3df9   : > { %15730 = vmatprep.subr.mxu1 %v16387_v2 }
0x3dfa   : > { %15731 = vmatpush3.msra.mxu1 %v14063_v51  ;;  %v14079_v51 = vld [vmem:[%s19249_s6 + $0x690] sm:$0xff] }
0x3dfb   : > { %15732 = vmatprep.subr.mxu1 %v16387_v2 }
0x3dfc   : > { %15733 = vmatpush3.msra.mxu1 %v14062_v52  ;;  %v14078_v52 = vld [vmem:[%s19249_s6 + $0x688] sm:$0xff] }
0x3dfd   : > { %15734 = vmatprep.subr.mxu1 %v16387_v2 }
0x3dfe   : > { %15735 = vmatpush3.msra.mxu1 %v14061_v53  ;;  %v14077_v53 = vld [vmem:[%s19249_s6 + $0x680] sm:$0xff] }
0x3dff   : > { %15736 = vmatprep.subr.mxu1 %v16387_v2 }
0x3eb5   : > { %v9072_v39 = vpop.f32.mrf.mxu1 }
0x3eb6   : > { %v9076_v36 = vadd.f32 %v9072_v39, %v8590_v6  ;;  %v14060_v6 = vld [vmem:[%s19255_s12 + $0x90] sm:$0xff] }
0x3eb7   : > { %v15714_v18 = vpop.f32.mrf.mxu1  ;;  %15737 = vmatpush3.msra.mxu1 %v14060_v6  ;;  %v14095_v6 = vld [vmem:[%s19249_s6 + $0x620] sm:$0xff] }
0x3eb8   : > { %v9085_v37 = vadd.f32 %v14049_v35, %v9076_v36  ;;  %15738 = vmatprep.subr.mxu1 %v16387_v2 }
0x3eb9   : > { %15739 = vmatpush3.msra.mxu1 %v14059_v9  ;;  %v14112_v9 = vld [vmem:[%s19249_s6 + $0x738] sm:$0xff] }
0x3eba   : > { %v18297_v38 = vadd.f32 %v9085_v37, %v17936_v29  ;;  %v14052_v29 = vld [vmem:[%s19253_s10 + $0x48] sm:$0xff]  ;;  %15740 = vmatprep.subr.mxu1 %v16387_v2 }
0x3ebb   : > { %15720 = vmatpush3.msra.mxu0 %v14052_v29  ;;  %15741 = vmatpush3.msra.mxu1 %v14058_v11  ;;  %v14111_v11 = vld [vmem:[%s19249_s6 + $0x730] sm:$0xff] }
0x3ebc   : > { %v9089_v40 = vsel %vm725_vm5, %v18297_v38, 0.0  ;;  %v9093_v42 = vmul.f32 %v18297_v38, %v18297_v38  ;;  %15721 = vmatprep.subr.mxu0 %v16387_v2  ;;  %15767 = vmatprep.subr.mxu1 %v16387_v2 }
0x3ebd   : > { %9090 = vadd.xlane.f32.xlu0 %v9089_v40  ;;  %15722 = vmatpush3.msra.mxu0 %v14051_v47  ;;  %v14069_v40 = vld [vmem:[%s19257_s14 + $0x10] sm:$0x3] }
0x3ebe   : > { %v9094_v44 = vsel %vm725_vm5, %v9093_v42, 0.0  ;;  %15745 = vmatprep.subr.mxu0 %v16387_v2  ;;  %v9317_v46 = vrot.slane %v14069_v40, %v16630_v43 }
0x3ebf   : > { %9095 = vadd.xlane.f32.xlu1 %v9094_v44  ;;  %v9312_v44 = vrot.slane %v14069_v40, %v16623_v41 }
0x3f46   : > { %v9091_v55 = vpop.xlane.xlu0 %9090 }
0x3f47   : > { %v9092_v56 = vmul.f32 0.03125, %v9091_v55  ;;  %v14089_v55 = vld [vmem:[%s19250_s7 + $0x38] ss:$0 sm:$0xff] }
0x3f48   : > { %v9096_v60 = vpop.xlane.xlu1 %9095 }
0x3f49   : > { %v9098_v61 = vmul.f32 %v9092_v56, %v9092_v56  ;;  %v9097_v15 = vmul.f32 0.03125, %v9096_v60  ;;  %v9102_v0 = vsub.f32 %v18297_v38, %v9092_v56 }
0x3f4b   : > { %v9099_v57 = vsub.f32 %v9097_v15, %v9098_v61 }
0x3f4d   : > { %v9100_v58 = vadd.f32 1e-06, %v9099_v57 }
0x3f4f   : > { %16281 = vrsqrt.f32 %v9100_v58  ;;  %v14082_v58 = vld [vmem:[%s19250_s7 + $0x34] ss:$0 sm:$0xff] }
0x3f5c   : > { %v16282_v3 = vpop.eup %16281 }
0x3f5d   : > { %v9103_v63 = vmul.f32 %v16282_v3, %v9102_v0  ;;  %v14075_v0 = vld [vmem:[%s19250_s7 + $0x30] ss:$0 sm:$0xff] }
0x3f5f   : > { %v9108_v4 = vmul.f32 %v9107_v1, %v9103_v63 }
0x3f61   : > { %v9113_v5 = vadd.f32 %v9112_v32, %v9108_v4  ;;  %v14098_v32 = vld [vmem:[%s19249_s6 + $0x638] sm:$0xff]  ;;  %v14097_v4 = vld [vmem:[%s19249_s6 + $0x630] sm:$0xff] }
0x3f63   : > { %15724 = vmatmul.mubr.msk.f32.vlgmr.msra.gmra.mxu0 %vm725_vm5, %v9113_v5  ;;  %v14096_v5 = vld [vmem:[%s19249_s6 + $0x628] sm:$0xff] }
0x3f64   : > { %15753 = vmatprep.mubr.msk.f32.mxu0 %vm16388_vm0, %v16387_v2  ;;  %15746 = vmatpush3.msra.mxu0 %v14073_v28 }
0x3f65   : > { %15747 = vmatprep.subr.mxu0 %v16387_v2 }
0x3f66   : > { %15748 = vmatpush3.msra.mxu0 %v14072_v7 }
0x3f67   : > { %15749 = vmatprep.subr.mxu0 %v16387_v2 }
0x3f68   : > { %15750 = vmatpush3.msra.mxu0 %v14071_v10 }
0x3f69   : > { %15751 = vmatprep.subr.mxu0 %v16387_v2 }
0x3f6a   : > { %15752 = vmatpush3.msra.mxu0 %v14070_v33  ;;  %v14105_v33 = vld [vmem:[%s19249_s6 + $0x6b8] sm:$0xff] }
0x3f6b   : > { %15756 = vmatprep.subr.mxu0 %v16387_v2 }
0x4023   : > { %v9196_v14 = vpop.f32.mrf.mxu0 }
0x4024   : > { %v9197_v16 = vadd.f32 %v14056_v13, %v9196_v14  ;;  %v14110_v13 = vld [vmem:[%s19249_s6 + $0x728] sm:$0xff]  ;;  %v14109_v14 = vld [vmem:[%s19249_s6 + $0x720] sm:$0xff] }
0x4025   : > { %v15725_v17 = vpop.f32.mrf.mxu0 }
0x4026   : > { %v9200_v19 = vmax.f32 %v9197_v16, 0.0 }
0x4028   : > { %15743 = vmatmul.mubr.msk.f32.vlgmr.msra.gmra.mxu1 %vm2831_vm9, %v9200_v19 }
0x4029   : > { %15775 = vmatprep.mubr.msk.f32.mxu1 %vm16388_vm0, %v16387_v2  ;;  %15768 = vmatpush3.msra.mxu1 %v14087_v31 }
0x402a   : > { %15769 = vmatprep.subr.mxu1 %v16387_v2 }
0x402b   : > { %15770 = vmatpush3.msra.mxu1 %v14086_v34 }
0x402c   : > { %15771 = vmatprep.subr.mxu1 %v16387_v2 }
0x402d   : > { %15772 = vmatpush3.msra.mxu1 %v14085_v54 }
0x402e   : > { %15773 = vmatprep.subr.mxu1 %v16387_v2 }
0x402f   : > { %15774 = vmatpush3.msra.mxu1 %v14084_v8  ;;  %v14104_v8 = vld [vmem:[%s19249_s6 + $0x6b0] sm:$0xff] }
0x4030   : > { %15783 = vmatprep.subr.mxu1 %v16387_v2 }
0x40e8   : > { %v9287_v20 = vpop.f32.mrf.mxu1 }
0x40e9   : > { %v9288_v21 = vadd.f32 %v14067_v12, %v9287_v20 }
0x40ea   : > { %v15744_v22 = vpop.f32.mrf.mxu1 }
0x40eb   : > { %v18371_v24 = vadd.f32 %v9288_v21, %v18297_v38 }
0x40ed   : > { %v9294_v25 = vsel %vm725_vm5, %v18371_v24, 0.0  ;;  %v9298_v26 = vmul.f32 %v18371_v24, %v18371_v24 }
0x40ee   : > { %9295 = vadd.xlane.f32.xlu0 %v9294_v25 }
0x40ef   : > { %v9299_v27 = vsel %vm725_vm5, %v9298_v26, 0.0 }
0x40f0   : > { %9300 = vadd.xlane.f32.xlu1 %v9299_v27 }
0x4177   : > { %v9296_v59 = vpop.xlane.xlu0 %9295 }
0x4178   : > { %v9297_v39 = vmul.f32 0.03125, %v9296_v59  ;;  %v14103_v59 = vld [vmem:[%s19249_s6 + $0x6a8] sm:$0xff] }
0x4179   : > { %v9301_v35 = vpop.xlane.xlu1 %9300 }
0x417a   : > { %v9303_v36 = vmul.f32 %v9297_v39, %v9297_v39  ;;  %v9302_v18 = vmul.f32 0.03125, %v9301_v35  ;;  %v9307_v42 = vsub.f32 %v18371_v24, %v9297_v39  ;;  %v14102_v39 = vld [vmem:[%s19249_s6 + $0x6a0] sm:$0xff] }
0x417c   : > { %v9304_v37 = vsub.f32 %v9302_v18, %v9303_v36  ;;  %v14107_v18 = vld [vmem:[%s19250_s7 + $0x35] ss:$0 sm:$0xff] }
0x417e   : > { %v9305_v38 = vadd.f32 1e-06, %v9304_v37 }
0x4180   : > { %16283 = vrsqrt.f32 %v9305_v38  ;;  %v14100_v38 = vld [vmem:[%s19250_s7 + $0x31] ss:$0 sm:$0xff] }
0x418d   : > { %v16284_v45 = vpop.eup %16283 }
0x418e   : > { %v9308_v29 = vmul.f32 %v16284_v45, %v9307_v42  ;;  %v14114_v42 = vld [vmem:[%s19250_s7 + $0x39] ss:$0 sm:$0xff] }
0x4190   : > { %v9313_v47 = vmul.f32 %v9312_v44, %v9308_v29 }
0x4192   : > { %v18416_v48 = vadd.f32 %v9317_v46, %v9313_v47 }
0x4194   : > { %15754 = vmatmul.mubr.msk.f32.vlgmr.msra.gmra.mxu0 %vm725_vm5, %v18416_v48  ;;  %15776 = vmatmul.mubr.msk.f32.vlgmr.msra.gmra.mxu1 %vm725_vm5, %v18416_v48 }
0x4195   : > { %15757 = vmatpush3.msra.mxu0 %v14080_v49  ;;  %15764 = vmatprep.mubr.msk.f32.mxu0 %vm16388_vm0, %v16387_v2 }
0x4196   : > { %15758 = vmatprep.subr.mxu0 %v16387_v2  ;;  %15785 = vmatprep.mubr.msk.f32.mxu1 %vm16388_vm0, %v16387_v2 }
0x4197   : > { %15759 = vmatpush3.msra.mxu0 %v14079_v51 }
0x4198   : > { %15760 = vmatprep.subr.mxu0 %v16387_v2 }
0x4199   : > { %15761 = vmatpush3.msra.mxu0 %v14078_v52 }
0x419a   : > { %15762 = vmatprep.subr.mxu0 %v16387_v2 }
0x419b   : > { %15763 = vmatpush3.msra.mxu0 %v14077_v53 }
0x419c   : > { %15765 = vmatmul.mubr.msk.f32.vlgmr.msra.gmra.mxu0 %vm725_vm5, %v18416_v48  ;;  %15778 = vmatprep.subr.mxu0 %v16387_v2 }
0x419d   : > { %15780 = vmatprep.mubr.msk.f32.mxu0 %vm16388_vm0, %v16387_v2 }
0x4254   : > { %v9401_v56 = vpop.f32.mrf.mxu0  ;;  %v9567_v60 = vpop.f32.mrf.mxu1 }
0x4255   : > { %v9568_v61 = vadd.f32 %v14089_v55, %v9567_v60  ;;  %v9402_v63 = vadd.f32 %v14075_v0, %v9401_v56  ;;  %v14132_v0 = vld [vmem:[%s19249_s6 + $0x6d8] sm:$0xff] }
0x4256   : > { %v15755_v15 = vpop.f32.mrf.mxu0  ;;  %v15777_v57 = vpop.f32.mrf.mxu1 }
0x4257   : > { %15784 = vmatpush3.msra.mxu1 %v9568_v61  ;;  %v14119_v61 = vld [vmem:[%s19251_s8 + $0x88] sm:$0xff] }
0x4258   : > { %15799 = vmatprep.subr.mxu1 %v16387_v2 }
0x425c   : > { %v9484_v62 = vpop.f32.mrf.mxu0 }
0x425d   : > { %v9485_v1 = vadd.f32 %v14082_v58, %v9484_v62  ;;  %v14094_v62 = vld [vmem:[%s19251_s8 + $0x80] sm:$0xff] }
0x425e   : > { %v15766_v3 = vpop.f32.mrf.mxu0 }
0x425f   : > { %15779 = vmatpush3.xpose.msk.msra.mxu0 %vm1002_vm7, %v9485_v1  ;;  %v14131_v1 = vld [vmem:[%s19249_s6 + $0x6d0] sm:$0xff]  ;;  %v14130_v3 = vld [vmem:[%s19249_s6 + $0x6c8] sm:$0xff] }
0x4260   : > { %15788 = vmatprep.subr.mxu0 %v16387_v2 }
0x4262   : > { %15781 = vmatmul.mubr.msk.f32.vlgmr.msra.gmra.mxu0 %vm1002_vm7, %v9402_v63  ;;  %v14129_v63 = vld [vmem:[%s19249_s6 + $0x6c0] sm:$0xff] }
0x4263   : > { %15789 = vmatpush3.msra.mxu0 %v14098_v32  ;;  %15796 = vmatprep.mubr.msk.f32.mxu0 %vm16388_vm0, %v16387_v2  ;;  %v14125_v32 = vld [vmem:[%s19249_s6 + $0x658] sm:$0xff] }
0x4264   : > { %15790 = vmatprep.subr.mxu0 %v16387_v2 }
0x4265   : > { %15791 = vmatpush3.msra.mxu0 %v14097_v4 }
0x4266   : > { %15792 = vmatprep.subr.mxu0 %v16387_v2 }
0x4267   : > { %15793 = vmatpush3.msra.mxu0 %v14096_v5  ;;  %v14124_v5 = vld [vmem:[%s19249_s6 + $0x650] sm:$0xff] }
0x4268   : > { %15794 = vmatprep.subr.mxu0 %v16387_v2 }
0x4269   : > { %15795 = vmatpush3.msra.mxu0 %v14095_v6 }
0x426a   : > { %15797 = vmatmul.mubr.msk.f32.vlgmr.msra.gmra.mxu0 %vm725_vm5, %v18416_v48  ;;  %15810 = vmatprep.subr.mxu0 %v16387_v2 }
0x426b   : > { %15811 = vmatpush3.msra.mxu0 %v14112_v9  ;;  %15818 = vmatprep.mubr.msk.f32.mxu0 %vm16388_vm0, %v16387_v2  ;;  %v14123_v9 = vld [vmem:[%s19249_s6 + $0x648] sm:$0xff] }
0x426c   : > { %15812 = vmatprep.subr.mxu0 %v16387_v2 }
0x426d   : > { %15813 = vmatpush3.msra.mxu0 %v14111_v11 }
0x426e   : > { %15814 = vmatprep.subr.mxu0 %v16387_v2 }
0x426f   : > { %15815 = vmatpush3.msra.mxu0 %v14110_v13  ;;  %v14122_v13 = vld [vmem:[%s19249_s6 + $0x640] sm:$0xff] }
0x4270   : > { %15816 = vmatprep.subr.mxu0 %v16387_v2 }
0x4271   : > { %15817 = vmatpush3.msra.mxu0 %v14109_v14 }
0x4272   : > { %15819 = vmatmul.mubr.msk.f32.vlgmr.msra.gmra.mxu0 %vm725_vm5, %v18416_v48  ;;  %15831 = vmatprep.subr.mxu0 %v16387_v2 }
0x4273   : > { %15833 = vmatprep.mubr.msk.f32.mxu0 %vm16388_vm0, %v16387_v2  ;;  %15832 = vmatpush3.msra.mxu0 %v14119_v61  ;;  %v14158_v61 = vld [vmem:[%s19249_s6 + $0x6f8] sm:$0xff] }
0x4274   : > { %15841 = vmatprep.subr.mxu0 %v16387_v2 }
0x4322   : > { %v9643_v16 = vpop.f32.mrf.mxu0 }
0x4323   : > { %v9647_v17 = vsel %vm17638_vm12, %v9643_v16, -1e+09  ;;  %v14139_v16 = vld [vmem:[%s19249_s6 + $0x758] sm:$0xff] }
0x4324   : > { %v15782_v19 = vpop.f32.mrf.mxu0  ;;  %v9648_v12 = vsel %vm1002_vm7, %v9647_v17, -inf }
0x4325   : > { %9649 = vmax.xlane.f32.xlu0 %v9648_v12  ;;  %v14134_v19 = vld [vmem:[%s19250_s7 + $0x36] ss:$0 sm:$0xff]  ;;  %v14137_v12 = vld [vmem:[%s19249_s6 + $0x748] sm:$0xff] }
0x432a   : > { %v9813_v20 = vpop.f32.mrf.mxu0 }
0x432b   : > { %v9814_v45 = vadd.f32 %v14100_v38, %v9813_v20 }
0x432c   : > { %v15798_v21 = vpop.f32.mrf.mxu0 }
0x4332   : > { %v9979_v22 = vpop.f32.mrf.mxu0 }
0x4333   : > { %v9980_v46 = vadd.f32 %v14114_v42, %v9979_v22  ;;  %v14136_v22 = vld [vmem:[%s19249_s6 + $0x740] sm:$0xff] }
0x4334   : > { %v15820_v25 = vpop.f32.mrf.mxu0 }
0x43ae   : > { %v9650_v26 = vpop.xlane.xlu0 %9649 }
0x43af   : > { %v9651_v27 = vsub.f32 %v9647_v17, %v9650_v26  ;;  %v14138_v17 = vld [vmem:[%s19249_s6 + $0x750] sm:$0xff] }
0x43b1   : > { %v9652_v28 = vmul.f32 1.442695, %v9651_v27 }
0x43b3   : > { %16285 = vpow2.f32 %v9652_v28  ;;  %v14127_v28 = vld [vmem:[%s19250_s7 + $0x32] ss:$0 sm:$0xff] }
0x43c0   : > { %v16286_v31 = vpop.eup %16285 }
0x43c1   : > { %v9654_v7 = vsel %vm1002_vm7, %v16286_v31, 0.0 }
0x43c2   : > { %9655 = vadd.xlane.f32.xlu1 %v9654_v7 }
0x444b   : > { %v9656_v34 = vpop.xlane.xlu1 %9655 }
0x444c   : > { %16287 = vrcp.f32 %v9656_v34 }
0x4459   : > { %v16288_v10 = vpop.eup %16287 }
0x445a   : > { %v9658_v54 = vmul.f32 %v16288_v10, %v16286_v31  ;;  %v14141_v10 = vld [vmem:[%s19250_s7 + $0x3a] ss:$0 sm:$0xff] }
0x445c   : > { %15786 = vmatmul.mubr.msk.f32.vlgmr.msra.gmra.mxu1 %vm1002_vm7, %v9658_v54 }
0x445d   : > { %15800 = vmatpush3.msra.mxu1 %v14105_v33  ;;  %15807 = vmatprep.mubr.msk.f32.mxu1 %vm16388_vm0, %v16387_v2 }
0x445e   : > { %15801 = vmatprep.subr.mxu1 %v16387_v2 }
0x445f   : > { %15802 = vmatpush3.msra.mxu1 %v14104_v8 }
0x4460   : > { %15803 = vmatprep.subr.mxu1 %v16387_v2 }
0x4461   : > { %15804 = vmatpush3.msra.mxu1 %v14103_v59 }
0x4462   : > { %15805 = vmatprep.subr.mxu1 %v16387_v2 }
0x4463   : > { %15806 = vmatpush3.msra.mxu1 %v14102_v39 }
0x4464   : > { %15808 = vmatmul.mubr.msk.f32.vlgmr.msra.gmra.mxu1 %vm725_vm5, %v18416_v48  ;;  %15821 = vmatprep.subr.mxu1 %v16387_v2 }
0x4465   : > { %15823 = vmatprep.mubr.msk.f32.mxu1 %vm16388_vm0, %v16387_v2 }
0x451c   : > { %v9728_v35 = vpop.f32.mrf.mxu1 }
0x451e   : > { %v15787_v36 = vpop.f32.mrf.mxu1 }
0x4524   : > { %v9896_v37 = vpop.f32.mrf.mxu1 }
0x4525   : > { %v9897_v40 = vadd.f32 %v14107_v18, %v9896_v37 }
0x4526   : > { %v15809_v44 = vpop.f32.mrf.mxu1 }
0x4527   : > { %15822 = vmatpush3.xpose.msk.msra.mxu1 %vm1002_vm7, %v9897_v40  ;;  %v14146_v44 = vld [vmem:[%s19251_s8 + $0x90] sm:$0xff] }
0x4528   : > { %15826 = vmatprep.subr.mxu1 %v16387_v2 }
0x452a   : > { %15824 = vmatmul.mubr.msk.f32.vlgmr.msra.gmra.mxu1 %vm1002_vm7, %v9814_v45 }
0x452b   : > { %15827 = vmatpush3.msra.mxu1 %v9980_v46  ;;  %15828 = vmatprep.mubr.msk.f32.mxu1 %vm16388_vm0, %v16387_v2 }
0x452c   : > { %15836 = vmatprep.subr.mxu1 %v16387_v2 }
0x45ea   : > { %v10055_v29 = vpop.f32.mrf.mxu1 }
0x45eb   : > { %v10059_v47 = vsel %vm17638_vm12, %v10055_v29, -1e+09 }
0x45ec   : > { %v15825_v49 = vpop.f32.mrf.mxu1  ;;  %v10060_v51 = vsel %vm1002_vm7, %v10059_v47, -inf }
0x45ed   : > { %10061 = vmax.xlane.f32.xlu0 %v10060_v51  ;;  %v14150_v49 = vld [vmem:[%s19249_s6 + $0x670] sm:$0xff]  ;;  %v14149_v51 = vld [vmem:[%s19249_s6 + $0x668] sm:$0xff] }
0x4676   : > { %v10062_v52 = vpop.xlane.xlu0 %10061 }
0x4677   : > { %v10063_v53 = vsub.f32 %v10059_v47, %v10062_v52  ;;  %v14151_v47 = vld [vmem:[%s19249_s6 + $0x678] sm:$0xff]  ;;  %v14148_v52 = vld [vmem:[%s19249_s6 + $0x660] sm:$0xff] }
0x4679   : > { %v10064_v55 = vmul.f32 1.442695, %v10063_v53  ;;  %v14165_v53 = vld [vmem:[%s19249_s6 + $0x778] sm:$0xff] }
0x467b   : > { %16289 = vpow2.f32 %v10064_v55  ;;  %v14164_v55 = vld [vmem:[%s19249_s6 + $0x770] sm:$0xff] }
0x4688   : > { %v16290_v56 = vpop.eup %16289 }
0x4689   : > { %v10066_v60 = vsel %vm1002_vm7, %v16290_v56, 0.0 }
0x468a   : > { %10067 = vadd.xlane.f32.xlu1 %v10066_v60  ;;  %v14162_v60 = vld [vmem:[%s19249_s6 + $0x760] sm:$0xff] }
0x4713   : > { %v10068_v15 = vpop.xlane.xlu1 %10067 }
0x4714   : > { %16291 = vrcp.f32 %v10068_v15 }
0x4721   : > { %v16292_v57 = vpop.eup %16291 }
0x4722   : > { %v10070_v58 = vmul.f32 %v16292_v57, %v16290_v56  ;;  %v14163_v56 = vld [vmem:[%s19249_s6 + $0x768] sm:$0xff]  ;;  %v14157_v57 = vld [vmem:[%s19249_s6 + $0x6f0] sm:$0xff] }
0x4724   : > { %15829 = vmatmul.mubr.msk.f32.vlgmr.msra.gmra.mxu1 %vm1002_vm7, %v10070_v58 }
0x4725   : > { %15837 = vmatpush3.msra.mxu1 %v14094_v62  ;;  %15838 = vmatprep.mubr.msk.f32.mxu1 %vm16388_vm0, %v16387_v2  ;;  %v14156_v62 = vld [vmem:[%s19249_s6 + $0x6e8] sm:$0xff] }
0x4726   : > { %15852 = vmatprep.subr.mxu1 %v16387_v2 }
0x4728   : > { %15839 = vmatmul.mubr.msk.f32.vlgmr.msra.gmra.mxu1 %vm1002_vm7, %v9728_v35 }
0x4729   : > { %15853 = vmatpush3.msra.mxu1 %v14132_v0  ;;  %15860 = vmatprep.mubr.msk.f32.mxu1 %vm16388_vm0, %v16387_v2  ;;  %v14155_v0 = vld [vmem:[%s19249_s6 + $0x6e0] sm:$0xff] }
0x472a   : > { %15854 = vmatprep.subr.mxu1 %v16387_v2 }
0x472b   : > { %15855 = vmatpush3.msra.mxu1 %v14131_v1 }
0x472c   : > { %15856 = vmatprep.subr.mxu1 %v16387_v2 }
0x472d   : > { %15857 = vmatpush3.msra.mxu1 %v14130_v3 }
0x472e   : > { %15858 = vmatprep.subr.mxu1 %v16387_v2 }
0x472f   : > { %15859 = vmatpush3.msra.mxu1 %v14129_v63 }
0x4730   : > { %15861 = vmatmul.mubr.msk.f32.vlgmr.msra.gmra.mxu1 %vm725_vm5, %v18416_v48  ;;  %15874 = vmatprep.subr.mxu1 %v16387_v2 }
0x4731   : > { %15876 = vmatprep.mubr.msk.f32.mxu1 %vm16388_vm0, %v16387_v2 }
0x47e4   : > { %v10140_v4 = vpop.f32.mrf.mxu1 }
0x47e5   : > { %15834 = vmatmul.mubr.msk.f32.vlgmr.msra.gmra.mxu0 %vm1002_vm7, %v10140_v4 }
0x47e6   : > { %15842 = vmatpush3.msra.mxu0 %v14125_v32  ;;  %v15830_v6 = vpop.f32.mrf.mxu1  ;;  %15849 = vmatprep.mubr.msk.f32.mxu0 %vm16388_vm0, %v16387_v2 }
0x47e7   : > { %15843 = vmatprep.subr.mxu0 %v16387_v2 }
0x47e8   : > { %15844 = vmatpush3.msra.mxu0 %v14124_v5  ;;  %v18594_v11 = vpop.f32.mrf.mxu1 }
0x47e9   : > { %15845 = vmatprep.subr.mxu0 %v16387_v2 }
0x47ea   : > { %15846 = vmatpush3.msra.mxu0 %v14123_v9  ;;  %v15840_v14 = vpop.f32.mrf.mxu1 }
0x47eb   : > { %15847 = vmatprep.subr.mxu0 %v16387_v2 }
0x47ec   : > { %15848 = vmatpush3.msra.mxu0 %v14122_v13  ;;  %v14160_v13 = vld [vmem:[%s19250_s7 + $0x37] ss:$0 sm:$0xff] }
0x47ed   : > { %15850 = vmatmul.mubr.msk.f32.vlgmr.msra.gmra.mxu0 %vm725_vm5, %v18416_v48  ;;  %15863 = vmatprep.subr.mxu0 %v16387_v2 }
0x47ee   : > { %15864 = vmatpush3.msra.mxu0 %v14139_v16  ;;  %15871 = vmatprep.mubr.msk.f32.mxu0 %vm16388_vm0, %v16387_v2 }
0x47ef   : > { %15865 = vmatprep.subr.mxu0 %v16387_v2 }
0x47f0   : > { %v10454_v20 = vpop.f32.mrf.mxu1  ;;  %15866 = vmatpush3.msra.mxu0 %v14138_v17  ;;  %v14167_v17 = vld [vmem:[%s19250_s7 + $0x3b] ss:$0 sm:$0xff] }
0x47f1   : > { %v10455_v21 = vadd.f32 %v14134_v19, %v10454_v20  ;;  %15867 = vmatprep.subr.mxu0 %v16387_v2 }
0x47f2   : > { %v15862_v25 = vpop.f32.mrf.mxu1  ;;  %15868 = vmatpush3.msra.mxu0 %v14137_v12 }
0x47f3   : > { %15869 = vmatprep.subr.mxu0 %v16387_v2  ;;  %15875 = vmatpush3.xpose.msk.msra.mxu1 %vm1002_vm7, %v10455_v21 }
0x47f4   : > { %15870 = vmatpush3.msra.mxu0 %v14136_v22  ;;  %15879 = vmatprep.subr.mxu1 %v16387_v2 }
0x47f5   : > { %15872 = vmatmul.mubr.msk.f32.vlgmr.msra.gmra.mxu0 %vm725_vm5, %v18416_v48  ;;  %15884 = vmatprep.subr.mxu0 %v16387_v2 }
0x47f6   : > { %15886 = vmatprep.mubr.msk.f32.mxu0 %vm16388_vm0, %v16387_v2  ;;  %15885 = vmatpush3.msra.mxu0 %v14146_v44 }
0x47f7   : > { %15900 = vmatprep.subr.mxu0 %v16387_v2 }
0x48a5   : > { %v18631_v26 = vpop.f32.mrf.mxu0 }
0x48a6   : > { %v10289_v4 = vadd.f32 %v18594_v11, %v18631_v26 }
0x48a7   : > { %v15835_v27 = vpop.f32.mrf.mxu0 }
0x48ad   : > { %v10371_v31 = vpop.f32.mrf.mxu0 }
0x48ae   : > { %v10372_v7 = vadd.f32 %v14127_v28, %v10371_v31 }
0x48af   : > { %v15851_v34 = vpop.f32.mrf.mxu0 }
0x48b0   : > { %15877 = vmatmul.mubr.msk.f32.vlgmr.msra.gmra.mxu1 %vm1002_vm7, %v10372_v7  ;;  %v14172_v34 = vld [vmem:[%s19251_s8 + $0x98] sm:$0xff] }
0x48b1   : > { %15881 = vmatprep.mubr.msk.f32.mxu1 %vm16388_vm0, %v16387_v2 }
0x48b5   : > { %v10537_v54 = vpop.f32.mrf.mxu0 }
0x48b6   : > { %v10538_v33 = vadd.f32 %v14141_v10, %v10537_v54 }
0x48b7   : > { %v15873_v8 = vpop.f32.mrf.mxu0 }
0x48b8   : > { %15880 = vmatpush3.msra.mxu1 %v10538_v33  ;;  %v14187_v33 = vld [vmem:[%s19249_s6 + $0x818] sm:$0xff] }
0x48b9   : > { %15889 = vmatprep.subr.mxu1 %v16387_v2 }
0x4970   : > { %v10613_v59 = vpop.f32.mrf.mxu1 }
0x4971   : > { %v10617_v39 = vsel %vm17638_vm12, %v10613_v59, -1e+09  ;;  %v14186_v59 = vld [vmem:[%s19249_s6 + $0x810] sm:$0xff] }
0x4972   : > { %v15878_v35 = vpop.f32.mrf.mxu1  ;;  %v10618_v36 = vsel %vm1002_vm7, %v10617_v39, -inf }
0x4973   : > { %10619 = vmax.xlane.f32.xlu0 %v10618_v36  ;;  %v14185_v35 = vld [vmem:[%s19249_s6 + $0x808] sm:$0xff]  ;;  %v14184_v36 = vld [vmem:[%s19249_s6 + $0x800] sm:$0xff] }
0x49fc   : > { %v10620_v18 = vpop.xlane.xlu0 %10619 }
0x49fd   : > { %v10621_v37 = vsub.f32 %v10617_v39, %v10620_v18 }
0x49ff   : > { %v10622_v38 = vmul.f32 1.442695, %v10621_v37  ;;  %v14175_v37 = vld [vmem:[%s19252_s9 + $0x4] ss:$0 sm:$0xff] }
0x4a01   : > { %16293 = vpow2.f32 %v10622_v38 }
0x4a0e   : > { %v16294_v40 = vpop.eup %16293 }
0x4a0f   : > { %v10624_v42 = vsel %vm1002_vm7, %v16294_v40, 0.0 }
0x4a10   : > { %10625 = vadd.xlane.f32.xlu1 %v10624_v42 }
0x4a99   : > { %v10626_v45 = vpop.xlane.xlu1 %10625 }
0x4a9a   : > { %16295 = vrcp.f32 %v10626_v45  ;;  %v14189_v45 = vld [vmem:[%s19250_s7 + $0x40] ss:$0 sm:$0xff] }
0x4aa7   : > { %v16296_v46 = vpop.eup %16295 }
0x4aa8   : > { %v10628_v29 = vmul.f32 %v16296_v46, %v16294_v40 }
0x4aaa   : > { %15882 = vmatmul.mubr.msk.f32.vlgmr.msra.gmra.mxu1 %vm1002_vm7, %v10628_v29 }
0x4aab   : > { %15890 = vmatpush3.msra.mxu1 %v14151_v47  ;;  %15897 = vmatprep.mubr.msk.f32.mxu1 %vm16388_vm0, %v16387_v2 }
0x4aac   : > { %15891 = vmatprep.subr.mxu1 %v16387_v2 }
0x4aad   : > { %15892 = vmatpush3.msra.mxu1 %v14150_v49 }
0x4aae   : > { %15893 = vmatprep.subr.mxu1 %v16387_v2 }
0x4aaf   : > { %15894 = vmatpush3.msra.mxu1 %v14149_v51 }
0x4ab0   : > { %15895 = vmatprep.subr.mxu1 %v16387_v2 }
0x4ab1   : > { %15896 = vmatpush3.msra.mxu1 %v14148_v52 }
0x4ab2   : > { %15898 = vmatmul.mubr.msk.f32.vlgmr.msra.gmra.mxu1 %vm725_vm5, %v18416_v48  ;;  %15911 = vmatprep.subr.mxu1 %v16387_v2 }
0x4ab3   : > { %15912 = vmatpush3.msra.mxu1 %v14165_v53  ;;  %15919 = vmatprep.mubr.msk.f32.mxu1 %vm16388_vm0, %v16387_v2  ;;  %v14179_v53 = vld [vmem:[%s19249_s6 + $0x790] sm:$0xff] }
0x4ab4   : > { %15913 = vmatprep.subr.mxu1 %v16387_v2 }
0x4ab5   : > { %15914 = vmatpush3.msra.mxu1 %v14164_v55  ;;  %v14178_v55 = vld [vmem:[%s19249_s6 + $0x788] sm:$0xff] }
0x4ab6   : > { %15915 = vmatprep.subr.mxu1 %v16387_v2 }
0x4ab7   : > { %15916 = vmatpush3.msra.mxu1 %v14163_v56  ;;  %v14177_v56 = vld [vmem:[%s19249_s6 + $0x780] sm:$0xff] }
0x4ab8   : > { %15917 = vmatprep.subr.mxu1 %v16387_v2 }
0x4ab9   : > { %15918 = vmatpush3.msra.mxu1 %v14162_v60 }
0x4aba   : > { %15920 = vmatmul.mubr.msk.f32.vlgmr.msra.gmra.mxu1 %vm725_vm5, %v18416_v48  ;;  %15932 = vmatprep.subr.mxu1 %v16387_v2 }
0x4abb   : > { %15934 = vmatprep.mubr.msk.f32.mxu1 %vm16388_vm0, %v16387_v2  ;;  %15933 = vmatpush3.msra.mxu1 %v14172_v34 }
0x4abc   : > { %15948 = vmatprep.subr.mxu1 %v16387_v2 }
0x4b6a   : > { %v10698_v15 = vpop.f32.mrf.mxu1 }
0x4b6b   : > { %15887 = vmatmul.mubr.msk.f32.vlgmr.msra.gmra.mxu0 %vm1002_vm7, %v10698_v15 }
0x4b6c   : > { %15901 = vmatpush3.msra.mxu0 %v14158_v61  ;;  %v15883_v58 = vpop.f32.mrf.mxu1  ;;  %15908 = vmatprep.mubr.msk.f32.mxu0 %vm16388_vm0, %v16387_v2 }
0x4b6d   : > { %15902 = vmatprep.subr.mxu0 %v16387_v2 }
0x4b6e   : > { %15903 = vmatpush3.msra.mxu0 %v14157_v57 }
0x4b6f   : > { %15904 = vmatprep.subr.mxu0 %v16387_v2 }
0x4b70   : > { %15905 = vmatpush3.msra.mxu0 %v14156_v62 }
0x4b71   : > { %15906 = vmatprep.subr.mxu0 %v16387_v2 }
0x4b72   : > { %v10857_v1 = vpop.f32.mrf.mxu1  ;;  %15907 = vmatpush3.msra.mxu0 %v14155_v0 }
0x4b73   : > { %15909 = vmatmul.mubr.msk.f32.vlgmr.msra.gmra.mxu0 %vm725_vm5, %v18416_v48  ;;  %15922 = vmatprep.subr.mxu0 %v16387_v2  ;;  %v14153_v48 = vld [vmem:[%s19250_s7 + $0x33] ss:$0 sm:$0xff] }
0x4b74   : > { %v15899_v3 = vpop.f32.mrf.mxu1  ;;  %15924 = vmatprep.mubr.msk.f32.mxu0 %vm16388_vm0, %v16387_v2  ;;  %v10858_v11 = vadd.f32 %v14153_v48, %v10857_v1  ;;  %v14176_v1 = vld [vmem:[%s19257_s14 + $0x12] sm:$0x3]  ;;  %v14192_v48 = vld [vmem:[%s19249_s6 + $0x888] sm:$0xff] }
0x4b7a   : > { %v11023_v63 = vpop.f32.mrf.mxu1 }
0x4b7b   : > { %v11024_v12 = vadd.f32 %v14167_v17, %v11023_v63  ;;  %v11294_v63 = vrot.slane %v14176_v1, %v16623_v41  ;;  %v14205_v17 = vld [vmem:[%s19249_s6 + $0x7b8] sm:$0xff] }
0x4b7c   : > { %v15921_v32 = vpop.f32.mrf.mxu1 }
0x4c2b   : > { %v10773_v5 = vpop.f32.mrf.mxu0 }
0x4c2c   : > { %v10777_v6 = vadd.f32 %v10773_v5, %v10289_v4  ;;  %v11299_v5 = vrot.slane %v14176_v1, %v16630_v43 }
0x4c2d   : > { %v15888_v9 = vpop.f32.mrf.mxu0 }
0x4c33   : > { %v10940_v14 = vpop.f32.mrf.mxu0 }
0x4c34   : > { %v10941_v16 = vadd.f32 %v14160_v13, %v10940_v14  ;;  %v14194_v13 = vld [vmem:[%s19249_s6 + $0x898] sm:$0xff]  ;;  %v14193_v14 = vld [vmem:[%s19249_s6 + $0x890] sm:$0xff] }
0x4c35   : > { %v15910_v19 = vpop.f32.mrf.mxu0 }
0x4c36   : > { %15923 = vmatpush3.xpose.msk.msra.mxu0 %vm1002_vm7, %v10941_v16  ;;  %v14191_v16 = vld [vmem:[%s19249_s6 + $0x880] sm:$0xff]  ;;  %v14204_v19 = vld [vmem:[%s19249_s6 + $0x7b0] sm:$0xff] }
0x4c37   : > { %15927 = vmatprep.subr.mxu0 %v16387_v2 }
0x4c39   : > { %15925 = vmatmul.mubr.msk.f32.vlgmr.msra.gmra.mxu0 %vm1002_vm7, %v10858_v11  ;;  %v14203_v11 = vld [vmem:[%s19249_s6 + $0x7a8] sm:$0xff] }
0x4c3a   : > { %15928 = vmatpush3.msra.mxu0 %v11024_v12  ;;  %15929 = vmatprep.mubr.msk.f32.mxu0 %vm16388_vm0, %v16387_v2  ;;  %v14202_v12 = vld [vmem:[%s19249_s6 + $0x7a0] sm:$0xff] }
0x4c3b   : > { %15937 = vmatprep.subr.mxu0 %v16387_v2 }
0x4cf9   : > { %v11099_v20 = vpop.f32.mrf.mxu0 }
0x4cfa   : > { %v11103_v21 = vsel %vm17638_vm12, %v11099_v20, -1e+09  ;;  %v14219_v20 = vld [vmem:[%s19249_s6 + $0x8b8] sm:$0xff] }
0x4cfb   : > { %v15926_v22 = vpop.f32.mrf.mxu0  ;;  %v11104_v25 = vsel %vm1002_vm7, %v11103_v21, -inf }
0x4cfc   : > { %11105 = vmax.xlane.f32.xlu0 %v11104_v25  ;;  %v14217_v22 = vld [vmem:[%s19249_s6 + $0x8a8] sm:$0xff]  ;;  %v14216_v25 = vld [vmem:[%s19249_s6 + $0x8a0] sm:$0xff] }
0x4d85   : > { %v11106_v26 = vpop.xlane.xlu0 %11105 }
0x4d86   : > { %v11107_v27 = vsub.f32 %v11103_v21, %v11106_v26  ;;  %v14218_v21 = vld [vmem:[%s19249_s6 + $0x8b0] sm:$0xff]  ;;  %v14182_v26 = vld [vmem:[%s19250_s7 + $0x3c] ss:$0 sm:$0xff] }
0x4d88   : > { %v11108_v28 = vmul.f32 1.442695, %v11107_v27 }
0x4d8a   : > { %16297 = vpow2.f32 %v11108_v28 }
0x4d97   : > { %v16298_v31 = vpop.eup %16297 }
0x4d98   : > { %v11110_v7 = vsel %vm1002_vm7, %v16298_v31, 0.0 }
0x4d99   : > { %11111 = vadd.xlane.f32.xlu1 %v11110_v7  ;;  %v14196_v7 = vld [vmem:[%s19250_s7 + $0x44] ss:$0 sm:$0xff] }
0x4e22   : > { %v11112_v30 = vpop.xlane.xlu1 %11111 }
0x4e23   : > { %16299 = vrcp.f32 %v11112_v30 }
0x4e30   : > { %v16300_v10 = vpop.eup %16299 }
0x4e31   : > { %v11114_v54 = vmul.f32 %v16300_v10, %v16298_v31 }
0x4e33   : > { %15930 = vmatmul.mubr.msk.f32.vlgmr.msra.gmra.mxu0 %vm1002_vm7, %v11114_v54 }
0x4e34   : > { %15945 = vmatprep.mubr.msk.f32.mxu0 %vm16388_vm0, %v16387_v2 }
0x4ef3   : > { %v11184_v8 = vpop.f32.mrf.mxu0 }
0x4ef4   : > { %15935 = vmatmul.mubr.msk.f32.vlgmr.msra.gmra.mxu1 %vm1002_vm7, %v11184_v8 }
0x4ef5   : > { %15949 = vmatpush3.msra.mxu1 %v14187_v33  ;;  %v15931_v39 = vpop.f32.mrf.mxu0  ;;  %15956 = vmatprep.mubr.msk.f32.mxu1 %vm16388_vm0, %v16387_v2 }
0x4ef6   : > { %15950 = vmatprep.subr.mxu1 %v16387_v2 }
0x4ef7   : > { %15951 = vmatpush3.msra.mxu1 %v14186_v59 }
0x4ef8   : > { %15952 = vmatprep.subr.mxu1 %v16387_v2 }
0x4ef9   : > { %15953 = vmatpush3.msra.mxu1 %v14185_v35 }
0x4efa   : > { %15954 = vmatprep.subr.mxu1 %v16387_v2 }
0x4efb   : > { %15955 = vmatpush3.msra.mxu1 %v14184_v36 }
0x4efc   : > { %15957 = vmatmul.mubr.msk.f32.vlgmr.msra.gmra.mxu1 %vm725_vm5, %v17923_v50  ;;  %15970 = vmatprep.subr.mxu1 %v16387_v2 }
0x4efd   : > { %15972 = vmatprep.mubr.msk.f32.mxu1 %vm16388_vm0, %v16387_v2 }
0x4fb4   : > { %v11259_v18 = vpop.f32.mrf.mxu1 }
0x4fb5   : > { %v11263_v38 = vadd.f32 %v11259_v18, %v10777_v6 }
0x4fb6   : > { %v15936_v40 = vpop.f32.mrf.mxu1 }
0x4fb7   : > { %v11272_v42 = vadd.f32 %v14175_v37, %v11263_v38 }
0x4fb9   : > { %v18772_v44 = vadd.f32 %v11272_v42, %v18371_v24  ;;  %v14180_v24 = vld [vmem:[%s19249_s6 + $0x798] sm:$0xff] }
0x4fba   : > { %15938 = vmatpush3.msra.mxu0 %v14180_v24  ;;  %v14209_v24 = vld [vmem:[%s19249_s6 + $0x820] sm:$0xff] }
0x4fbb   : > { %v11276_v46 = vsel %vm725_vm5, %v18772_v44, 0.0  ;;  %v11280_v29 = vmul.f32 %v18772_v44, %v18772_v44  ;;  %15939 = vmatprep.subr.mxu0 %v16387_v2 }
0x4fbc   : > { %v11466_v47 = vpop.f32.mrf.mxu1  ;;  %11277 = vadd.xlane.f32.xlu0 %v11276_v46  ;;  %15940 = vmatpush3.msra.mxu0 %v14179_v53 }
0x4fbd   : > { %v11467_v49 = vadd.f32 %v14189_v45, %v11466_v47  ;;  %v11281_v51 = vsel %vm725_vm5, %v11280_v29, 0.0  ;;  %15941 = vmatprep.subr.mxu0 %v16387_v2 }
0x4fbe   : > { %v15958_v52 = vpop.f32.mrf.mxu1  ;;  %11282 = vadd.xlane.f32.xlu1 %v11281_v51  ;;  %15942 = vmatpush3.msra.mxu0 %v14178_v55  ;;  %v14211_v51 = vld [vmem:[%s19249_s6 + $0x830] sm:$0xff] }
0x4fbf   : > { %15971 = vmatpush3.xpose.msk.msra.mxu1 %vm1002_vm7, %v11467_v49  ;;  %15943 = vmatprep.subr.mxu0 %v16387_v2  ;;  %v14212_v49 = vld [vmem:[%s19249_s6 + $0x838] sm:$0xff]  ;;  %v14210_v52 = vld [vmem:[%s19249_s6 + $0x828] sm:$0xff] }
0x4fc0   : > { %15975 = vmatprep.subr.mxu1 %v16387_v2  ;;  %15944 = vmatpush3.msra.mxu0 %v14177_v56  ;;  %v14214_v56 = vld [vmem:[%s19250_s7 + $0x41] ss:$0 sm:$0xff] }
0x4fc1   : > { %15959 = vmatprep.subr.mxu0 %v16387_v2 }
0x5045   : > { %v11278_v60 = vpop.xlane.xlu0 %11277 }
0x5046   : > { %v11279_v61 = vmul.f32 0.03125, %v11278_v60 }
0x5047   : > { %v11283_v15 = vpop.xlane.xlu1 %11282 }
0x5048   : > { %v11285_v57 = vmul.f32 %v11279_v61, %v11279_v61  ;;  %v11284_v58 = vmul.f32 0.03125, %v11283_v15  ;;  %v11289_v3 = vsub.f32 %v18772_v44, %v11279_v61  ;;  %v14207_v61 = vld [vmem:[%s19250_s7 + $0x3d] ss:$0 sm:$0xff] }
0x504a   : > { %v11286_v62 = vsub.f32 %v11284_v58, %v11285_v57  ;;  %v14221_v57 = vld [vmem:[%s19250_s7 + $0x45] ss:$0 sm:$0xff] }
0x504c   : > { %v11287_v0 = vadd.f32 1e-06, %v11286_v62 }
0x504e   : > { %16301 = vrsqrt.f32 %v11287_v0 }
0x505b   : > { %v16302_v32 = vpop.eup %16301 }
0x505c   : > { %v11290_v4 = vmul.f32 %v16302_v32, %v11289_v3 }
0x505e   : > { %v11295_v6 = vmul.f32 %v11294_v63, %v11290_v4 }
0x5060   : > { %v18806_v9 = vadd.f32 %v11299_v5, %v11295_v6 }
0x5062   : > { %15946 = vmatmul.mubr.msk.f32.vlgmr.msra.gmra.mxu0 %vm725_vm5, %v18806_v9 }
0x5063   : > { %15960 = vmatpush3.msra.mxu0 %v14194_v13  ;;  %15967 = vmatprep.mubr.msk.f32.mxu0 %vm16388_vm0, %v16387_v2 }
0x5064   : > { %15961 = vmatprep.subr.mxu0 %v16387_v2 }
0x5065   : > { %15962 = vmatpush3.msra.mxu0 %v14193_v14 }
0x5066   : > { %15963 = vmatprep.subr.mxu0 %v16387_v2 }
0x5067   : > { %15964 = vmatpush3.msra.mxu0 %v14192_v48  ;;  %v14226_v48 = vld [vmem:[%s19251_s8 + $0xa8] sm:$0xff] }
0x5068   : > { %15965 = vmatprep.subr.mxu0 %v16387_v2 }
0x5069   : > { %15966 = vmatpush3.msra.mxu0 %v14191_v16 }
0x506a   : > { %15968 = vmatmul.mubr.msk.f32.vlgmr.msra.gmra.mxu0 %vm725_vm5, %v17923_v50  ;;  %15980 = vmatprep.subr.mxu0 %v16387_v2 }
0x506b   : > { %15981 = vmatpush3.msra.mxu0 %v14205_v17  ;;  %15988 = vmatprep.mubr.msk.f32.mxu0 %vm16388_vm0, %v16387_v2 }
0x506c   : > { %15982 = vmatprep.subr.mxu0 %v16387_v2 }
0x506d   : > { %15983 = vmatpush3.msra.mxu0 %v14204_v19 }
0x506e   : > { %15984 = vmatprep.subr.mxu0 %v16387_v2 }
0x506f   : > { %15985 = vmatpush3.msra.mxu0 %v14203_v11  ;;  %v14201_v11 = vld [vmem:[%s19251_s8 + $0xa0] sm:$0xff] }
0x5070   : > { %15986 = vmatprep.subr.mxu0 %v16387_v2 }
0x5071   : > { %15987 = vmatpush3.msra.mxu0 %v14202_v12  ;;  %v14239_v12 = vld [vmem:[%s19249_s6 + $0x858] sm:$0xff] }
0x5072   : > { %15989 = vmatmul.mubr.msk.f32.vlgmr.msra.gmra.mxu0 %vm725_vm5, %v18806_v9  ;;  %16002 = vmatprep.subr.mxu0 %v16387_v2 }
0x5073   : > { %16003 = vmatpush3.msra.mxu0 %v14219_v20  ;;  %16010 = vmatprep.mubr.msk.f32.mxu0 %vm16388_vm0, %v16387_v2  ;;  %v14238_v20 = vld [vmem:[%s19249_s6 + $0x850] sm:$0xff] }
0x5074   : > { %16004 = vmatprep.subr.mxu0 %v16387_v2 }
0x5075   : > { %16005 = vmatpush3.msra.mxu0 %v14218_v21  ;;  %v14237_v21 = vld [vmem:[%s19249_s6 + $0x848] sm:$0xff] }
0x5076   : > { %16006 = vmatprep.subr.mxu0 %v16387_v2 }
0x5077   : > { %16007 = vmatpush3.msra.mxu0 %v14217_v22  ;;  %v14236_v22 = vld [vmem:[%s19249_s6 + $0x840] sm:$0xff] }
0x5078   : > { %16008 = vmatprep.subr.mxu0 %v16387_v2 }
0x5079   : > { %16009 = vmatpush3.msra.mxu0 %v14216_v25  ;;  %v14232_v25 = vld [vmem:[%s19249_s6 + $0x7d8] sm:$0xff] }
0x507a   : > { %16011 = vmatmul.mubr.msk.f32.vlgmr.msra.gmra.mxu0 %vm725_vm5, %v17923_v50  ;;  %16023 = vmatprep.subr.mxu0 %v16387_v2 }
0x507b   : > { %16025 = vmatprep.mubr.msk.f32.mxu0 %vm16388_vm0, %v16387_v2  ;;  %16024 = vmatpush3.msra.mxu0 %v14226_v48  ;;  %v14264_v48 = vld [vmem:[%s19249_s6 + $0x870] sm:$0xff] }
0x507c   : > { %16033 = vmatprep.subr.mxu0 %v16387_v2 }
0x5122   : > { %v11383_v27 = vpop.f32.mrf.mxu0 }
0x5123   : > { %v11384_v28 = vadd.f32 %v14182_v26, %v11383_v27  ;;  %v14231_v27 = vld [vmem:[%s19249_s6 + $0x7d0] sm:$0xff] }
0x5124   : > { %v15947_v31 = vpop.f32.mrf.mxu0 }
0x5125   : > { %15973 = vmatmul.mubr.msk.f32.vlgmr.msra.gmra.mxu1 %vm1002_vm7, %v11384_v28  ;;  %v14230_v31 = vld [vmem:[%s19249_s6 + $0x7c8] sm:$0xff] }
0x5126   : > { %15977 = vmatprep.mubr.msk.f32.mxu1 %vm16388_vm0, %v16387_v2 }
0x512a   : > { %v11549_v34 = vpop.f32.mrf.mxu0 }
0x512b   : > { %v11550_v30 = vadd.f32 %v14196_v7, %v11549_v34  ;;  %v14229_v34 = vld [vmem:[%s19249_s6 + $0x7c0] sm:$0xff] }
0x512c   : > { %v15969_v10 = vpop.f32.mrf.mxu0 }
0x512d   : > { %15976 = vmatpush3.msra.mxu1 %v11550_v30  ;;  %v14246_v10 = vld [vmem:[%s19249_s6 + $0x8d8] sm:$0xff] }
0x512e   : > { %15991 = vmatprep.subr.mxu1 %v16387_v2 }
0x5132   : > { %v11795_v54 = vpop.f32.mrf.mxu0 }
0x5133   : > { %v11796_v62 = vadd.f32 %v14207_v61, %v11795_v54  ;;  %v14245_v54 = vld [vmem:[%s19249_s6 + $0x8d0] sm:$0xff] }
0x5134   : > { %v15990_v33 = vpop.f32.mrf.mxu0 }
0x5135   : > { %v14241_v33 = vld [vmem:[%s19250_s7 + $0x42] ss:$0 sm:$0xff] }
0x513a   : > { %v11961_v8 = vpop.f32.mrf.mxu0 }
0x513b   : > { %v11962_v0 = vadd.f32 %v14221_v57, %v11961_v8  ;;  %v14244_v8 = vld [vmem:[%s19249_s6 + $0x8c8] sm:$0xff]  ;;  %v14253_v57 = vld [vmem:[%s19251_s8 + $0xb0] sm:$0xff] }
0x513c   : > { %v16012_v59 = vpop.f32.mrf.mxu0 }
0x51e5   : > { %v11625_v39 = vpop.f32.mrf.mxu1 }
0x51e6   : > { %v11629_v35 = vsel %vm16724_vm8, %v11625_v39, -1e+09 }
0x51e7   : > { %v15974_v36 = vpop.f32.mrf.mxu1  ;;  %v11630_v18 = vsel %vm1002_vm7, %v11629_v35, -inf }
0x51e8   : > { %11631 = vmax.xlane.f32.xlu0 %v11630_v18 }
0x5271   : > { %v11632_v37 = vpop.xlane.xlu0 %11631 }
0x5272   : > { %v11633_v38 = vsub.f32 %v11629_v35, %v11632_v37  ;;  %v14243_v35 = vld [vmem:[%s19249_s6 + $0x8c0] sm:$0xff] }
0x5274   : > { %v11634_v40 = vmul.f32 1.442695, %v11633_v38  ;;  %v14234_v38 = vld [vmem:[%s19250_s7 + $0x3e] ss:$0 sm:$0xff] }
0x5276   : > { %16303 = vpow2.f32 %v11634_v40 }
0x5283   : > { %v16304_v42 = vpop.eup %16303 }
0x5284   : > { %v11636_v45 = vsel %vm1002_vm7, %v16304_v42, 0.0 }
0x5285   : > { %11637 = vadd.xlane.f32.xlu1 %v11636_v45 }
0x530e   : > { %v11638_v46 = vpop.xlane.xlu1 %11637 }
0x530f   : > { %16305 = vrcp.f32 %v11638_v46  ;;  %v14248_v46 = vld [vmem:[%s19250_s7 + $0x46] ss:$0 sm:$0xff] }
0x531c   : > { %v16306_v29 = vpop.eup %16305 }
0x531d   : > { %v11640_v47 = vmul.f32 %v16306_v29, %v16304_v42 }
0x531f   : > { %15978 = vmatmul.mubr.msk.f32.vlgmr.msra.gmra.mxu1 %vm1002_vm7, %v11640_v47 }
0x5320   : > { %15992 = vmatpush3.msra.mxu1 %v14212_v49  ;;  %15999 = vmatprep.mubr.msk.f32.mxu1 %vm16388_vm0, %v16387_v2 }
0x5321   : > { %15993 = vmatprep.subr.mxu1 %v16387_v2 }
0x5322   : > { %15994 = vmatpush3.msra.mxu1 %v14211_v51 }
0x5323   : > { %15995 = vmatprep.subr.mxu1 %v16387_v2 }
0x5324   : > { %15996 = vmatpush3.msra.mxu1 %v14210_v52 }
0x5325   : > { %15997 = vmatprep.subr.mxu1 %v16387_v2 }
0x5326   : > { %15998 = vmatpush3.msra.mxu1 %v14209_v24 }
0x5327   : > { %16000 = vmatmul.mubr.msk.f32.vlgmr.msra.gmra.mxu1 %vm725_vm5, %v17923_v50  ;;  %16013 = vmatprep.subr.mxu1 %v16387_v2 }
0x5328   : > { %16015 = vmatprep.mubr.msk.f32.mxu1 %vm16388_vm0, %v16387_v2 }
0x53df   : > { %v11710_v53 = vpop.f32.mrf.mxu1 }
0x53e1   : > { %v15979_v55 = vpop.f32.mrf.mxu1 }
0x53e7   : > { %v11878_v60 = vpop.f32.mrf.mxu1 }
0x53e8   : > { %v11879_v15 = vadd.f32 %v14214_v56, %v11878_v60 }
0x53e9   : > { %v16001_v58 = vpop.f32.mrf.mxu1 }
0x53ea   : > { %16014 = vmatpush3.xpose.msk.msra.mxu1 %vm1002_vm7, %v11879_v15 }
0x53eb   : > { %16018 = vmatprep.subr.mxu1 %v16387_v2 }
0x53ed   : > { %16016 = vmatmul.mubr.msk.f32.vlgmr.msra.gmra.mxu1 %vm1002_vm7, %v11796_v62 }
0x53ee   : > { %16019 = vmatpush3.msra.mxu1 %v11962_v0  ;;  %16020 = vmatprep.mubr.msk.f32.mxu1 %vm16388_vm0, %v16387_v2 }
0x53ef   : > { %16028 = vmatprep.subr.mxu1 %v16387_v2 }
0x54ad   : > { %v12037_v1 = vpop.f32.mrf.mxu1 }
0x54ae   : > { %v12041_v3 = vsel %vm16724_vm8, %v12037_v1, -1e+09  ;;  %v14258_v1 = vld [vmem:[%s19249_s6 + $0x7f8] sm:$0xff] }
0x54af   : > { %v16017_v63 = vpop.f32.mrf.mxu1  ;;  %v12042_v32 = vsel %vm1002_vm7, %v12041_v3, -inf }
0x54b0   : > { %12043 = vmax.xlane.f32.xlu0 %v12042_v32  ;;  %v14256_v63 = vld [vmem:[%s19249_s6 + $0x7e8] sm:$0xff]  ;;  %v14255_v32 = vld [vmem:[%s19249_s6 + $0x7e0] sm:$0xff] }
0x5539   : > { %v12044_v4 = vpop.xlane.xlu0 %12043 }
0x553a   : > { %v12045_v5 = vsub.f32 %v12041_v3, %v12044_v4  ;;  %v14257_v3 = vld [vmem:[%s19249_s6 + $0x7f0] sm:$0xff]  ;;  %v14272_v4 = vld [vmem:[%s19249_s6 + $0x8f8] sm:$0xff] }
0x553c   : > { %v12046_v6 = vmul.f32 1.442695, %v12045_v5  ;;  %v14271_v5 = vld [vmem:[%s19249_s6 + $0x8f0] sm:$0xff] }
0x553e   : > { %16307 = vpow2.f32 %v12046_v6  ;;  %v14270_v6 = vld [vmem:[%s19249_s6 + $0x8e8] sm:$0xff] }
0x554b   : > { %v16308_v13 = vpop.eup %16307 }
0x554c   : > { %v12048_v14 = vsel %vm1002_vm7, %v16308_v13, 0.0 }
0x554d   : > { %12049 = vadd.xlane.f32.xlu1 %v12048_v14 }
0x55d6   : > { %v12050_v16 = vpop.xlane.xlu1 %12049 }
0x55d7   : > { %16309 = vrcp.f32 %v12050_v16 }
0x55e4   : > { %v16310_v17 = vpop.eup %16309 }
0x55e5   : > { %v12052_v19 = vmul.f32 %v16310_v17, %v16308_v13  ;;  %v14265_v13 = vld [vmem:[%s19249_s6 + $0x878] sm:$0xff]  ;;  %v14263_v17 = vld [vmem:[%s19249_s6 + $0x868] sm:$0xff] }
0x55e7   : > { %16021 = vmatmul.mubr.msk.f32.vlgmr.msra.gmra.mxu1 %vm1002_vm7, %v12052_v19  ;;  %v14262_v19 = vld [vmem:[%s19249_s6 + $0x860] sm:$0xff] }
0x55e8   : > { %16029 = vmatpush3.msra.mxu1 %v14201_v11  ;;  %16030 = vmatprep.mubr.msk.f32.mxu1 %vm16388_vm0, %v16387_v2 }
0x55e9   : > { %16044 = vmatprep.subr.mxu1 %v16387_v2 }
0x55eb   : > { %16031 = vmatmul.mubr.msk.f32.vlgmr.msra.gmra.mxu1 %vm1002_vm7, %v11710_v53 }
0x55ec   : > { %16045 = vmatpush3.msra.mxu1 %v14239_v12  ;;  %16052 = vmatprep.mubr.msk.f32.mxu1 %vm16388_vm0, %v16387_v2 }
0x55ed   : > { %16046 = vmatprep.subr.mxu1 %v16387_v2 }
0x55ee   : > { %16047 = vmatpush3.msra.mxu1 %v14238_v20 }
0x55ef   : > { %16048 = vmatprep.subr.mxu1 %v16387_v2 }
0x55f0   : > { %16049 = vmatpush3.msra.mxu1 %v14237_v21 }
0x55f1   : > { %16050 = vmatprep.subr.mxu1 %v16387_v2 }
0x55f2   : > { %16051 = vmatpush3.msra.mxu1 %v14236_v22 }
0x55f3   : > { %16053 = vmatmul.mubr.msk.f32.vlgmr.msra.gmra.mxu1 %vm725_vm5, %v17923_v50  ;;  %16066 = vmatprep.subr.mxu1 %v16387_v2 }
0x55f4   : > { %16068 = vmatprep.mubr.msk.f32.mxu1 %vm16388_vm0, %v16387_v2 }
0x56a7   : > { %v12122_v26 = vpop.f32.mrf.mxu1 }
0x56a8   : > { %16026 = vmatmul.mubr.msk.f32.vlgmr.msra.gmra.mxu0 %vm1002_vm7, %v12122_v26 }
0x56a9   : > { %16034 = vmatpush3.msra.mxu0 %v14232_v25  ;;  %v16022_v28 = vpop.f32.mrf.mxu1  ;;  %16041 = vmatprep.mubr.msk.f32.mxu0 %vm16388_vm0, %v16387_v2 }
0x56aa   : > { %16035 = vmatprep.subr.mxu0 %v16387_v2  ;;  %v14267_v28 = vld [vmem:[%s19250_s7 + $0x43] ss:$0 sm:$0xff] }
0x56ab   : > { %16036 = vmatpush3.msra.mxu0 %v14231_v27  ;;  %v18975_v7 = vpop.f32.mrf.mxu1 }
0x56ac   : > { %16037 = vmatprep.subr.mxu0 %v16387_v2 }
0x56ad   : > { %16038 = vmatpush3.msra.mxu0 %v14230_v31  ;;  %v16032_v30 = vpop.f32.mrf.mxu1 }
0x56ae   : > { %16039 = vmatprep.subr.mxu0 %v16387_v2  ;;  %v14274_v30 = vld [vmem:[%s19250_s7 + $0x47] ss:$0 sm:$0xff] }
0x56af   : > { %16040 = vmatpush3.msra.mxu0 %v14229_v34 }
0x56b0   : > { %16042 = vmatmul.mubr.msk.f32.vlgmr.msra.gmra.mxu0 %vm725_vm5, %v18806_v9  ;;  %16055 = vmatprep.subr.mxu0 %v16387_v2 }
0x56b1   : > { %16056 = vmatpush3.msra.mxu0 %v14246_v10  ;;  %16063 = vmatprep.mubr.msk.f32.mxu0 %vm16388_vm0, %v16387_v2 }
0x56b2   : > { %16057 = vmatprep.subr.mxu0 %v16387_v2 }
0x56b3   : > { %v12436_v59 = vpop.f32.mrf.mxu1  ;;  %16058 = vmatpush3.msra.mxu0 %v14245_v54 }
0x56b4   : > { %v12437_v39 = vadd.f32 %v14241_v33, %v12436_v59  ;;  %16059 = vmatprep.subr.mxu0 %v16387_v2 }
0x56b5   : > { %v16054_v36 = vpop.f32.mrf.mxu1  ;;  %16060 = vmatpush3.msra.mxu0 %v14244_v8 }
0x56b6   : > { %16061 = vmatprep.subr.mxu0 %v16387_v2  ;;  %16067 = vmatpush3.xpose.msk.msra.mxu1 %vm1002_vm7, %v12437_v39 }
0x56b7   : > { %16062 = vmatpush3.msra.mxu0 %v14243_v35  ;;  %16071 = vmatprep.subr.mxu1 %v16387_v2 }
0x56b8   : > { %16064 = vmatmul.mubr.msk.f32.vlgmr.msra.gmra.mxu0 %vm725_vm5, %v17923_v50  ;;  %16076 = vmatprep.subr.mxu0 %v16387_v2 }
0x56b9   : > { %16078 = vmatprep.mubr.msk.f32.mxu0 %vm16388_vm0, %v16387_v2  ;;  %16077 = vmatpush3.msra.mxu0 %v14253_v57  ;;  %v14284_v57 = vld [vmem:[%s19253_s10 + $0x60] sm:$0xff] }
0x56ba   : > { %16092 = vmatprep.subr.mxu0 %v16387_v2 }
0x5768   : > { %v19012_v18 = vpop.f32.mrf.mxu0 }
0x5769   : > { %v12271_v22 = vadd.f32 %v18975_v7, %v19012_v18 }
0x576a   : > { %v16027_v37 = vpop.f32.mrf.mxu0 }
0x5770   : > { %v12353_v40 = vpop.f32.mrf.mxu0 }
0x5771   : > { %v12354_v42 = vadd.f32 %v14234_v38, %v12353_v40  ;;  %v14279_v40 = vld [vmem:[%s19251_s8 + $0xb8] sm:$0xff] }
0x5772   : > { %v16043_v45 = vpop.f32.mrf.mxu0 }
0x5773   : > { %16069 = vmatmul.mubr.msk.f32.vlgmr.msra.gmra.mxu1 %vm1002_vm7, %v12354_v42 }
0x5774   : > { %16073 = vmatprep.mubr.msk.f32.mxu1 %vm16388_vm0, %v16387_v2 }
0x5778   : > { %v12519_v29 = vpop.f32.mrf.mxu0 }
0x5779   : > { %v12520_v47 = vadd.f32 %v14248_v46, %v12519_v29 }
0x577a   : > { %v16065_v49 = vpop.f32.mrf.mxu0 }
0x577b   : > { %16072 = vmatpush3.msra.mxu1 %v12520_v47  ;;  %v14282_v49 = vld [vmem:[%s19252_s9 + $0x5] ss:$0 sm:$0xff] }
0x577c   : > { %16081 = vmatprep.subr.mxu1 %v16387_v2 }
0x5833   : > { %v12595_v51 = vpop.f32.mrf.mxu1 }
0x5834   : > { %v12599_v52 = vsel %vm16724_vm8, %v12595_v51, -1e+09 }
0x5835   : > { %v16070_v24 = vpop.f32.mrf.mxu1  ;;  %v12600_v53 = vsel %vm1002_vm7, %v12599_v52, -inf }
0x5836   : > { %12601 = vmax.xlane.f32.xlu0 %v12600_v53 }
0x58bf   : > { %v12602_v55 = vpop.xlane.xlu0 %12601 }
0x58c0   : > { %v12603_v56 = vsub.f32 %v12599_v52, %v12602_v55 }
0x58c2   : > { %v12604_v60 = vmul.f32 1.442695, %v12603_v56 }
0x58c4   : > { %16311 = vpow2.f32 %v12604_v60 }
0x58d1   : > { %v16312_v61 = vpop.eup %16311 }
0x58d2   : > { %v12606_v15 = vsel %vm1002_vm7, %v16312_v61, 0.0 }
0x58d3   : > { %12607 = vadd.xlane.f32.xlu1 %v12606_v15  ;;  %v14285_v15 = vld [vmem:[%s19253_s10 + $0x68] sm:$0xff] }
0x595c   : > { %v12608_v58 = vpop.xlane.xlu1 %12607 }
0x595d   : > { %16313 = vrcp.f32 %v12608_v58  ;;  %v14298_v58 = vld [vmem:[%s19255_s12 + $0xf8] sm:$0xff] }
0x596a   : > { %v16314_v62 = vpop.eup %16313 }
0x596b   : > { %v12610_v0 = vmul.f32 %v16314_v62, %v16312_v61  ;;  %v14287_v61 = vld [vmem:[%s19253_s10 + $0x78] sm:$0xff]  ;;  %v14297_v62 = vld [vmem:[%s19255_s12 + $0xf0] sm:$0xff] }
0x596d   : > { %16074 = vmatmul.mubr.msk.f32.vlgmr.msra.gmra.mxu1 %vm1002_vm7, %v12610_v0  ;;  %v14296_v0 = vld [vmem:[%s19255_s12 + $0xe8] sm:$0xff] }
0x596e   : > { %16082 = vmatpush3.msra.mxu1 %v14258_v1  ;;  %16089 = vmatprep.mubr.msk.f32.mxu1 %vm16388_vm0, %v16387_v2  ;;  %v14295_v1 = vld [vmem:[%s19255_s12 + $0xe0] sm:$0xff] }
0x596f   : > { %16083 = vmatprep.subr.mxu1 %v16387_v2 }
0x5970   : > { %16084 = vmatpush3.msra.mxu1 %v14257_v3  ;;  %v14294_v3 = vld [vmem:[%s19255_s12 + $0xd8] sm:$0xff] }
0x5971   : > { %16085 = vmatprep.subr.mxu1 %v16387_v2 }
0x5972   : > { %16086 = vmatpush3.msra.mxu1 %v14256_v63 }
0x5973   : > { %16087 = vmatprep.subr.mxu1 %v16387_v2 }
0x5974   : > { %16088 = vmatpush3.msra.mxu1 %v14255_v32 }
0x5975   : > { %16090 = vmatmul.mubr.msk.f32.vlgmr.msra.gmra.mxu1 %vm725_vm5, %v18806_v9  ;;  %16103 = vmatprep.subr.mxu1 %v16387_v2  ;;  %v14269_v9 = vld [vmem:[%s19249_s6 + $0x8e0] sm:$0xff] }
0x5976   : > { %16104 = vmatpush3.msra.mxu1 %v14272_v4  ;;  %16111 = vmatprep.mubr.msk.f32.mxu1 %vm16388_vm0, %v16387_v2 }
0x5977   : > { %16105 = vmatprep.subr.mxu1 %v16387_v2 }
0x5978   : > { %16106 = vmatpush3.msra.mxu1 %v14271_v5 }
0x5979   : > { %16107 = vmatprep.subr.mxu1 %v16387_v2 }
0x597a   : > { %16108 = vmatpush3.msra.mxu1 %v14270_v6 }
0x597b   : > { %16109 = vmatprep.subr.mxu1 %v16387_v2 }
0x597c   : > { %16110 = vmatpush3.msra.mxu1 %v14269_v9 }
0x597d   : > { %16112 = vmatmul.mubr.msk.f32.vlgmr.msra.gmra.mxu1 %vm725_vm5, %v17923_v50  ;;  %16124 = vmatprep.subr.mxu1 %v16387_v2 }
0x597e   : > { %16126 = vmatprep.mubr.msk.f32.mxu1 %vm16388_vm0, %v16387_v2  ;;  %16125 = vmatpush3.msra.mxu1 %v14279_v40  ;;  %v14302_v40 = vld [vmem:[%s19257_s14 + $0x16] sm:$0x3] }
0x597f   : > { %16140 = vmatprep.subr.mxu1 %v16387_v2 }
0x5a2d   : > { %v12680_v14 = vpop.f32.mrf.mxu1 }
0x5a2e   : > { %16079 = vmatmul.mubr.msk.f32.vlgmr.msra.gmra.mxu0 %vm1002_vm7, %v12680_v14  ;;  %v14283_v14 = vld [vmem:[%s19257_s14 + $0x14] sm:$0x3] }
0x5a2f   : > { %16093 = vmatpush3.msra.mxu0 %v14265_v13  ;;  %v16075_v16 = vpop.f32.mrf.mxu1  ;;  %16100 = vmatprep.mubr.msk.f32.mxu0 %vm16388_vm0, %v16387_v2 }
0x5a30   : > { %16094 = vmatprep.subr.mxu0 %v16387_v2  ;;  %v13276_v16 = vrot.slane %v14283_v14, %v16623_v41 }
0x5a31   : > { %16095 = vmatpush3.msra.mxu0 %v14264_v48 }
0x5a32   : > { %16096 = vmatprep.subr.mxu0 %v16387_v2 }
0x5a33   : > { %16097 = vmatpush3.msra.mxu0 %v14263_v17 }
0x5a34   : > { %16098 = vmatprep.subr.mxu0 %v16387_v2 }
0x5a35   : > { %v12839_v11 = vpop.f32.mrf.mxu1  ;;  %16099 = vmatpush3.msra.mxu0 %v14262_v19 }
0x5a36   : > { %16101 = vmatmul.mubr.msk.f32.vlgmr.msra.gmra.mxu0 %vm725_vm5, %v17923_v50  ;;  %16114 = vmatprep.subr.mxu0 %v16387_v2  ;;  %v14260_v50 = vld [vmem:[%s19250_s7 + $0x3f] ss:$0 sm:$0xff] }
0x5a37   : > { %v16091_v12 = vpop.f32.mrf.mxu1  ;;  %16116 = vmatprep.mubr.msk.f32.mxu0 %vm16388_vm0, %v16387_v2  ;;  %v12840_v7 = vadd.f32 %v14260_v50, %v12839_v11  ;;  %v13281_v11 = vrot.slane %v14283_v14, %v16630_v43 }
0x5a3d   : > { %v13005_v20 = vpop.f32.mrf.mxu1 }
0x5a3e   : > { %v13006_v54 = vadd.f32 %v14274_v30, %v13005_v20 }
0x5a3f   : > { %v16113_v21 = vpop.f32.mrf.mxu1 }
0x5a40   : > { %v14293_v21 = vld [vmem:[%s19255_s12 + $0xd0] sm:$0xff] }
0x5aee   : > { %v12755_v25 = vpop.f32.mrf.mxu0 }
0x5aef   : > { %v12759_v26 = vadd.f32 %v12755_v25, %v12271_v22  ;;  %v14292_v22 = vld [vmem:[%s19255_s12 + $0xc8] sm:$0xff]  ;;  %v14291_v25 = vld [vmem:[%s19255_s12 + $0xc0] sm:$0xff] }
0x5af0   : > { %v16080_v27 = vpop.f32.mrf.mxu0 }
0x5af6   : > { %v12922_v31 = vpop.f32.mrf.mxu0 }
0x5af7   : > { %v12923_v34 = vadd.f32 %v14267_v28, %v12922_v31 }
0x5af8   : > { %v16102_v10 = vpop.f32.mrf.mxu0 }
0x5af9   : > { %16115 = vmatpush3.xpose.msk.msra.mxu0 %vm1002_vm7, %v12923_v34  ;;  %v14300_v34 = vld [vmem:[%s19256_s13 + $0x3] ss:$0 sm:$0xff] }
0x5afa   : > { %16119 = vmatprep.subr.mxu0 %v16387_v2 }
0x5afc   : > { %16117 = vmatmul.mubr.msk.f32.vlgmr.msra.gmra.mxu0 %vm1002_vm7, %v12840_v7 }
0x5afd   : > { %16120 = vmatpush3.msra.mxu0 %v13006_v54  ;;  %16121 = vmatprep.mubr.msk.f32.mxu0 %vm16388_vm0, %v16387_v2 }
0x5afe   : > { %16129 = vmatprep.subr.mxu0 %v16387_v2 }
0x5bbc   : > { %v13081_v33 = vpop.f32.mrf.mxu0 }
0x5bbd   : > { %v13085_v8 = vsel %vm16724_vm8, %v13081_v33, -1e+09 }
0x5bbe   : > { %v16118_v59 = vpop.f32.mrf.mxu0  ;;  %v13086_v39 = vsel %vm1002_vm7, %v13085_v8, -inf }
0x5bbf   : > { %13087 = vmax.xlane.f32.xlu0 %v13086_v39 }
0x5c48   : > { %v13088_v35 = vpop.xlane.xlu0 %13087 }
0x5c49   : > { %v13089_v36 = vsub.f32 %v13085_v8, %v13088_v35 }
0x5c4b   : > { %v13090_v18 = vmul.f32 1.442695, %v13089_v36 }
0x5c4d   : > { %16315 = vpow2.f32 %v13090_v18 }
0x5c5a   : > { %v16316_v37 = vpop.eup %16315 }
0x5c5b   : > { %v13092_v38 = vsel %vm1002_vm7, %v16316_v37, 0.0 }
0x5c5c   : > { %13093 = vadd.xlane.f32.xlu1 %v13092_v38 }
0x5ce5   : > { %v13094_v23 = vpop.xlane.xlu1 %13093 }
0x5ce6   : > { %16317 = vrcp.f32 %v13094_v23 }
0x5cf3   : > { %v16318_v42 = vpop.eup %16317 }
0x5cf4   : > { %v13096_v45 = vmul.f32 %v16318_v42, %v16316_v37  ;;  %v13481_v42 = vrot.slane %v14302_v40, %v16623_v41 }
0x5cf6   : > { %16122 = vmatmul.mubr.msk.f32.vlgmr.msra.gmra.mxu0 %vm1002_vm7, %v13096_v45 }
0x5cf7   : > { %16137 = vmatprep.mubr.msk.f32.mxu0 %vm16388_vm0, %v16387_v2  ;;  %16130 = vmatpush3.msra.mxu0 %v14287_v61 }
0x5cf8   : > { %16131 = vmatprep.subr.mxu0 %v16387_v2 }
0x5db6   : > { %v13166_v46 = vpop.f32.mrf.mxu0 }
0x5db7   : > { %16127 = vmatmul.mubr.msk.f32.vlgmr.msra.gmra.mxu1 %vm1002_vm7, %v13166_v46 }
0x5db8   : > { %v16123_v29 = vpop.f32.mrf.mxu0  ;;  %16156 = vmatprep.mubr.msk.f32.mxu1 %vm16388_vm0, %v16387_v2  ;;  %16141 = vmatpush3.msra.mxu1 %v14298_v58 }
0x5db9   : > { %16142 = vmatprep.subr.mxu1 %v16387_v2  ;;  %v13486_v29 = vrot.slane %v14302_v40, %v16630_v43 }
0x5dba   : > { %16143 = vmatpush3.msra.mxu1 %v14297_v62 }
0x5dbb   : > { %16144 = vmatprep.subr.mxu1 %v16387_v2 }
0x5dbc   : > { %16145 = vmatpush3.msra.mxu1 %v14296_v0 }
0x5dbd   : > { %16146 = vmatprep.subr.mxu1 %v16387_v2 }
0x5dbe   : > { %16147 = vmatpush3.msra.mxu1 %v14295_v1 }
0x5dbf   : > { %16148 = vmatprep.subr.mxu1 %v16387_v2 }
0x5dc0   : > { %16149 = vmatpush3.msra.mxu1 %v14294_v3 }
0x5dc1   : > { %16150 = vmatprep.subr.mxu1 %v16387_v2 }
0x5dc2   : > { %16151 = vmatpush3.msra.mxu1 %v14293_v21 }
0x5dc3   : > { %16152 = vmatprep.subr.mxu1 %v16387_v2 }
0x5dc4   : > { %16153 = vmatpush3.msra.mxu1 %v14292_v22 }
0x5dc5   : > { %16154 = vmatprep.subr.mxu1 %v16387_v2 }
0x5dc6   : > { %16155 = vmatpush3.msra.mxu1 %v14291_v25 }
0x5e77   : > { %v13241_v47 = vpop.f32.mrf.mxu1 }
0x5e78   : > { %v13245_v51 = vadd.f32 %v13241_v47, %v12759_v26  ;;  %v14289_v26 = vld [vmem:[%s19254_s11 + $0x3] ss:$0 sm:$0xff] }
0x5e79   : > { %v16128_v52 = vpop.f32.mrf.mxu1 }
0x5e7a   : > { %v13254_v24 = vadd.f32 %v14282_v49, %v13245_v51 }
0x5e7c   : > { %v19133_v53 = vadd.f32 %v13254_v24, %v18772_v44  ;;  %v14286_v44 = vld [vmem:[%s19253_s10 + $0x70] sm:$0xff] }
0x5e7d   : > { %16132 = vmatpush3.msra.mxu0 %v14286_v44 }
0x5e7e   : > { %v13258_v55 = vsel %vm725_vm5, %v19133_v53, 0.0  ;;  %v13262_v56 = vmul.f32 %v19133_v53, %v19133_v53  ;;  %16133 = vmatprep.subr.mxu0 %v16387_v2 }
0x5e7f   : > { %13259 = vadd.xlane.f32.xlu0 %v13258_v55  ;;  %16134 = vmatpush3.msra.mxu0 %v14285_v15 }
0x5e80   : > { %v13263_v60 = vsel %vm725_vm5, %v13262_v56, 0.0  ;;  %16135 = vmatprep.subr.mxu0 %v16387_v2 }
0x5e81   : > { %13264 = vadd.xlane.f32.xlu1 %v13263_v60  ;;  %16136 = vmatpush3.msra.mxu0 %v14284_v57 }
0x5f08   : > { %v13260_v63 = vpop.xlane.xlu0 %13259 }
0x5f09   : > { %v13261_v32 = vmul.f32 0.03125, %v13260_v63 }
0x5f0a   : > { %v13265_v4 = vpop.xlane.xlu1 %13264 }
0x5f0b   : > { %v13267_v5 = vmul.f32 %v13261_v32, %v13261_v32  ;;  %v13266_v6 = vmul.f32 0.03125, %v13265_v4  ;;  %v13271_v48 = vsub.f32 %v19133_v53, %v13261_v32 }
0x5f0d   : > { %v13268_v9 = vsub.f32 %v13266_v6, %v13267_v5 }
0x5f0f   : > { %v13269_v13 = vadd.f32 1e-06, %v13268_v9 }
0x5f11   : > { %16319 = vrsqrt.f32 %v13269_v13 }
0x5f1e   : > { %v16320_v17 = vpop.eup %16319 }
0x5f1f   : > { %v13272_v19 = vmul.f32 %v16320_v17, %v13271_v48 }
0x5f21   : > { %v13277_v12 = vmul.f32 %v13276_v16, %v13272_v19 }
0x5f23   : > { %v13282_v20 = vadd.f32 %v13281_v11, %v13277_v12 }
0x5f25   : > { %16138 = vmatmul.mubr.msk.f32.vlgmr.msra.gmra.mxu0 %vm725_vm5, %v13282_v20 }
0x5fe5   : > { %v13365_v27 = vpop.f32.mrf.mxu0 }
0x5fe6   : > { %v13366_v28 = vadd.f32 %v14289_v26, %v13365_v27 }
0x5fe7   : > { %v16139_v31 = vpop.f32.mrf.mxu0 }
0x5fe8   : > { %v13369_v50 = vmax.f32 %v13366_v28, 0.0 }
0x5fea   : > { %16157 = vmatmul.mubr.msk.f32.vlgmr.msra.gmra.mxu1 %vm2831_vm9, %v13369_v50 }
0x60aa   : > { %v13456_v2 = vpop.f32.mrf.mxu1 }
0x60ab   : > { %v13457_v30 = vadd.f32 %v14300_v34, %v13456_v2 }
0x60ac   : > { %v16158_v10 = vpop.f32.mrf.mxu1 }
0x60ad   : > { %v13460_v7 = vadd.f32 %v13457_v30, %v19133_v53 }
0x60af   : > { %v13463_v54 = vsel %vm725_vm5, %v13460_v7, 0.0  ;;  %v13467_v33 = vmul.f32 %v13460_v7, %v13460_v7 }
0x60b0   : > { %13464 = vadd.xlane.f32.xlu0 %v13463_v54 }
0x60b1   : > { %v13468_v8 = vsel %vm725_vm5, %v13467_v33, 0.0 }
0x60b2   : > { %13469 = vadd.xlane.f32.xlu1 %v13468_v8 }
0x6139   : > { %v13465_v59 = vpop.xlane.xlu0 %13464 }
0x613a   : > { %v13466_v39 = vmul.f32 0.03125, %v13465_v59 }
0x613b   : > { %v13470_v35 = vpop.xlane.xlu1 %13469 }
0x613c   : > { %v13472_v36 = vmul.f32 %v13466_v39, %v13466_v39  ;;  %v13471_v18 = vmul.f32 0.03125, %v13470_v35  ;;  %v13476_v23 = vsub.f32 %v13460_v7, %v13466_v39 }
0x613e   : > { %v13473_v37 = vsub.f32 %v13471_v18, %v13472_v36 }
0x6140   : > { %v13474_v38 = vadd.f32 1e-06, %v13473_v37 }
0x6142   : > { %16321 = vrsqrt.f32 %v13474_v38 }
0x614f   : > { %v16322_v45 = vpop.eup %16321 }
0x6150   : > { %v13477_v46 = vmul.f32 %v16322_v45, %v13476_v23 }
0x6152   : > { %v13482_v47 = vmul.f32 %v13481_v42, %v13477_v46 }
0x6154   : > { %v13487_v49 = vadd.f32 %v13486_v29, %v13482_v47 }
0x6156   : > { %13488 = vst.msk [vmem:[%s520_s16] sm:$0xff] %vm725_vm5, %v13487_v49 }
0x6157   : > { %16337 = shalt.err (!%p16334_p3)
}
0x6158   : > { %s16338_s24 = scalar_lea.hbm %s13501_s18, 128  ;;  %s16342_s16 = scalar_lea.hbm %s19258_s15, 256 }
0x6159   : > { %p16339_p4 = scmp.ne.s32.totalorder %s13501_s18, %s16338_s24  ;;  %p16343_p9 = scmp.lt.s32.totalorder %s13501_s18, %s19258_s15 }
0x615a   : > { %p16344_p10 = scmp.lt.s32.totalorder %s16342_s16, %s16338_s24 }
0x615b   : > { %p16340_p7 = pnand %p16339_p4, %p16508_p5 }
0x615c   : > { %p16345_p11 = por %p16344_p10, %p16343_p9 }
0x615d   : > { %p16341_p8 = pneg %p16340_p7 }
0x615f   : > { %p16346_p12 = pnand %p16345_p11, %p16341_p8 }
0x6161   : > { %16349 = shalt.err (!%p16346_p12)
}
0x6162   : > { %16159 = dma.vmem_to_hbm [thread:$0]  (%p16508_p5), %s13504_s23, 128, %s13501_s18, %s13490_s26  }
0x6163 PF: > { %s19277_s0 = sld [smem:[#allocation5_spill]]  ;;  %p16165_p13 = scmp.ge.s32.totalorder %s16384_s21, 2 }
0x6165   : > { %p16162_p0 = pnand %p16165_p13, %p16512_p6 }
0x6167   : > { %p16163_p1 = pneg %p16162_p0 }
0x6169   : > { %s13515_s29 = sand.u32 1, %s19277_s0  }
0x616a   : > { %s13516_s22 = scalar_lea.sflag [#allocation3], %s13515_s29 }
0x616b   : > { %16367 = dma.done.wait (%p16163_p1), %s13516_s22, 128  }
0x616c   : > { %16369 = vsyncadd (%p16163_p1), %s13516_s22, 4294967168  ;;  %s19279_s21 = sld [smem:[#allocation7_spill]]  ;;  %s19282_s18 = smov %s16376_s19 }
0x616d   : > { %s19280_s24 = sld [smem:[#allocation6_spill]] }
0x616e   : > { %s19281_s20 = sld [smem:[#allocation8_spill]] }
0x6172   : > { %p25_p2 = scmp.ge.s32.totalorder %s19279_s21, 4  }
0x6173   : > { %s19283_s19 = smov %s19280_s24 }
0x6174   :  { %27 = sbr.rel (!%p25_p2) target bundleno = 5 (0x5), region = 318 }
0x6179   :  { %13521 = vsyncpa [#allocation3], 1 }
0x617a   :  { %13523 = vsyncpa [#allocation3 + $0x1], 1 }

</bundles_post_ra>
